<compile_context>
chip_gen: v7x
topology: tpu7x:2x2x1
jax: 0.10.0
libtpu: 0.0.40
codegen_flags: <defaults>
</compile_context>

<pallas_src>
import functools
import math

import jax
import jax.numpy as jnp
from jax.experimental import pallas as pl
from jax.experimental.pallas import tpu as pltpu


# ------------------------------ chip / tiling helpers ------------------------

def _round_up(x, m):
    return ((x + m - 1) // m) * m


@functools.lru_cache(maxsize=None)
def _chip_cfg():
    """Generation-aware tile sizes / VMEM budget (v5e,v6e: 128 MiB VMEM; v7x: 64 MiB)."""
    vmem = 64 * 1024 * 1024
    try:
        vmem = int(pltpu.get_tpu_info().vmem_capacity_bytes)
    except Exception:
        pass
    if vmem >= 100 * 1024 * 1024:                      # v5e / v6e
        return {"vmem": 80 * 1024 * 1024, "tm": 512, "tn": 512, "tk": 512, "bufs": 3}
    return {"vmem": 40 * 1024 * 1024, "tm": 256, "tn": 256, "tk": 512, "bufs": 2}


def _tile_and_pad(d, pref, align):
    """Return (tile, padded_dim): tile <= pref, multiple of align, divides padded_dim."""
    dp = _round_up(d, align)
    if dp <= pref:
        return dp, dp
    for t in range(pref, align - 1, -align):
        if dp % t == 0:
            return t, dp
    return pref, _round_up(dp, pref)


def _maybe_pad2(a, rows, cols):
    r, c = a.shape
    if r == rows and c == cols:
        return a                                    # no per-call HBM pad when aligned
    return jnp.pad(a, ((0, rows - r), (0, cols - c)))


def _spec(shape, index_map, bufs=2):
    """BlockSpec with optional deeper input pipelining (guarded fallback)."""
    if bufs > 2:
        try:
            return pl.BlockSpec(shape, index_map, pipeline_mode=pl.Buffered(bufs))
        except Exception:
            pass
    return pl.BlockSpec(shape, index_map)


def _pick_time_chunk(T, cap=64):
    if T <= cap:
        return T
    for c in range(cap, 7, -8):
        if T % c == 0:
            return c
    return T


def _identity(v):
    return v


# ----------------------------- Pallas kernels --------------------------------

def _matmul_kernel(x_ref, w_ref, b_ref, o_ref, acc_ref, *, act):
    @pl.when(pl.program_id(2) == 0)
    def _():
        acc_ref[...] = jnp.zeros_like(acc_ref)

    acc_ref[...] += jnp.dot(x_ref[...].astype(jnp.bfloat16),
                            w_ref[...].astype(jnp.bfloat16),
                            preferred_element_type=jnp.float32)

    @pl.when(pl.program_id(2) == pl.num_programs(2) - 1)
    def _():
        y = acc_ref[...] + b_ref[...]
        o_ref[...] = act(y).astype(o_ref.dtype)


def dense(x, w, b, act=_identity, out_dtype=jnp.bfloat16):
    """y = act(x @ w + b); x: (M, K) bf16/f32, w: (K, N) bf16, b: (1, N) f32."""
    M, K = x.shape
    N = w.shape[1]
    cc = _chip_cfg()
    tm, Mp = _tile_and_pad(M, cc["tm"], 8)
    tn, Np = _tile_and_pad(N, cc["tn"], 128)
    tk, Kp = _tile_and_pad(K, cc["tk"], 128)
    xp = _maybe_pad2(x, Mp, Kp)
    wp = _maybe_pad2(w, Kp, Np)
    bp = _maybe_pad2(b, 1, Np)

    out = pl.pallas_call(
        functools.partial(_matmul_kernel, act=act),
        out_shape=jax.ShapeDtypeStruct((Mp, Np), out_dtype),
        grid=(Mp // tm, Np // tn, Kp // tk),
        in_specs=[_spec((tm, tk), lambda i, j, k: (i, k), cc["bufs"]),
                  _spec((tk, tn), lambda i, j, k: (k, j), cc["bufs"]),
                  pl.BlockSpec((1, tn), lambda i, j, k: (0, j))],
        out_specs=pl.BlockSpec((tm, tn), lambda i, j, k: (i, j)),
        scratch_shapes=[pltpu.VMEM((tm, tn), jnp.float32)],
        compiler_params=pltpu.CompilerParams(
            dimension_semantics=("parallel", "parallel", "arbitrary"),
            vmem_limit_bytes=cc["vmem"]),
        cost_estimate=pl.CostEstimate(
            flops=2 * Mp * Np * Kp, transcendentals=0,
            bytes_accessed=2 * (Mp * Kp + Kp * Np + Mp * Np)),
    )(xp, wp, bp)
    if Mp != M or Np != N:
        out = out[:M, :N]
    return out


def _matmul_res_ln_kernel(x_ref, w_ref, b_ref, r_ref, g_ref, bb_ref, o_ref, acc_ref):
    @pl.when(pl.program_id(1) == 0)
    def _():
        acc_ref[...] = jnp.zeros_like(acc_ref)

    acc_ref[...] += jnp.dot(x_ref[...].astype(jnp.bfloat16),
                            w_ref[...].astype(jnp.bfloat16),
                            preferred_element_type=jnp.float32)

    @pl.when(pl.program_id(1) == pl.num_programs(1) - 1)
    def _():
        y = acc_ref[...] + b_ref[...] + r_ref[...].astype(jnp.float32)
        mean = jnp.mean(y, axis=-1, keepdims=True)
        var = jnp.mean(jnp.square(y - mean), axis=-1, keepdims=True)
        inv = jax.lax.rsqrt(var + 1e-12)
        o_ref[...] = ((y - mean) * inv * g_ref[...] + bb_ref[...]).astype(o_ref.dtype)


def dense_res_ln(x, w, b, res, g, beta, out_dtype=jnp.bfloat16):
    """LayerNorm(x @ w + b + res); LN over the full N, tiled over M and K."""
    M, K = x.shape
    N = w.shape[1]
    cc = _chip_cfg()
    tm, Mp = _tile_and_pad(M, cc["tm"], 8)
    tk, Kp = _tile_and_pad(K, cc["tk"], 128)
    xp = _maybe_pad2(x, Mp, Kp)
    wp = _maybe_pad2(w, Kp, N)
    rp = _maybe_pad2(res, Mp, N)

    out = pl.pallas_call(
        _matmul_res_ln_kernel,
        out_shape=jax.ShapeDtypeStruct((Mp, N), out_dtype),
        grid=(Mp // tm, Kp // tk),
        in_specs=[_spec((tm, tk), lambda i, k: (i, k), cc["bufs"]),
                  _spec((tk, N), lambda i, k: (k, 0), cc["bufs"]),
                  pl.BlockSpec((1, N), lambda i, k: (0, 0)),
                  pl.BlockSpec((tm, N), lambda i, k: (i, 0)),
                  pl.BlockSpec((1, N), lambda i, k: (0, 0)),
                  pl.BlockSpec((1, N), lambda i, k: (0, 0))],
        out_specs=pl.BlockSpec((tm, N), lambda i, k: (i, 0)),
        scratch_shapes=[pltpu.VMEM((tm, N), jnp.float32)],
        compiler_params=pltpu.CompilerParams(
            dimension_semantics=("parallel", "arbitrary"),
            vmem_limit_bytes=cc["vmem"]),
        cost_estimate=pl.CostEstimate(
            flops=2 * Mp * N * Kp, transcendentals=Mp,
            bytes_accessed=2 * (Mp * Kp + Kp * N + 3 * Mp * N)),
    )(xp, wp, b, rp, g, beta)
    return out[:M] if Mp != M else out


def _ln_kernel(x_ref, g_ref, b_ref, o_ref):
    x = x_ref[...].astype(jnp.float32)
    mean = jnp.mean(x, axis=-1, keepdims=True)
    var = jnp.mean(jnp.square(x - mean), axis=-1, keepdims=True)
    inv = jax.lax.rsqrt(var + 1e-12)
    o_ref[...] = ((x - mean) * inv * g_ref[...] + b_ref[...]).astype(o_ref.dtype)


def layernorm(x, g, b, out_dtype=jnp.bfloat16):
    M, H = x.shape
    cc = _chip_cfg()
    tm, Mp = _tile_and_pad(M, cc["tm"], 8)
    xp = _maybe_pad2(x, Mp, H)
    out = pl.pallas_call(
        _ln_kernel,
        out_shape=jax.ShapeDtypeStruct((Mp, H), out_dtype),
        grid=(Mp // tm,),
        in_specs=[pl.BlockSpec((tm, H), lambda i: (i, 0)),
                  pl.BlockSpec((1, H), lambda i: (0, 0)),
                  pl.BlockSpec((1, H), lambda i: (0, 0))],
        out_specs=pl.BlockSpec((tm, H), lambda i: (i, 0)),
        compiler_params=pltpu.CompilerParams(
            dimension_semantics=("parallel",),
            vmem_limit_bytes=cc["vmem"]),
    )(xp, g, b)
    return out[:M] if Mp != M else out


def _attn_kernel(qkv_ref, m_ref, o_ref, *, nh, dh, scale):
    """One batch element per program; heads handled by a static lane-slice loop.

    The output is assembled head-concatenated and stored once as a lane-dense
    (S, H) block; only one (S, S) score tile is live at a time.
    """
    H = nh * dh
    mask = m_ref[...]                                   # (1, S) additive key mask, f32
    outs = []
    for h in range(nh):                                 # static loop (nh small)
        q = qkv_ref[:, h * dh:(h + 1) * dh].astype(jnp.bfloat16)            # (S, dh)
        k = qkv_ref[:, H + h * dh:H + (h + 1) * dh].astype(jnp.bfloat16)
        v = qkv_ref[:, 2 * H + h * dh:2 * H + (h + 1) * dh].astype(jnp.bfloat16)
        s = jax.lax.dot_general(q, k, (((1,), (1,)), ((), ())),
                                preferred_element_type=jnp.float32) * scale  # (S, S)
        s = s + mask
        s = s - jnp.max(s, axis=-1, keepdims=True)
        p = jnp.exp(s)
        p = p * pl.reciprocal(jnp.sum(p, axis=-1, keepdims=True), approx=True)
        outs.append(jnp.dot(p.astype(jnp.bfloat16), v,
                            preferred_element_type=jnp.float32))             # (S, dh)
    o_ref[...] = jnp.concatenate(outs, axis=-1).astype(o_ref.dtype)          # (S, H)


def attention(qkv, add_mask, nh, dh, scale):
    """qkv: (B, S, 3H) bf16 (fused Q||K||V); add_mask: (B, 1, S) f32 -> (B, S, H) bf16."""
    # TODO(synk): for long S, add a query-tile grid axis + KV-tiled online softmax
    # (flash) to further bound VMEM on v7x; the per-head loop already keeps only one
    # (S, S) f32 score tile live at BERT-scale S.
    B, S, H3 = qkv.shape
    H = nh * dh
    return pl.pallas_call(
        functools.partial(_attn_kernel, nh=nh, dh=dh, scale=scale),
        out_shape=jax.ShapeDtypeStruct((B, S, H), jnp.bfloat16),
        grid=(B,),
        in_specs=[pl.BlockSpec((None, S, H3), lambda b: (b, 0, 0)),
                  pl.BlockSpec((None, 1, S), lambda b: (b, 0, 0))],
        out_specs=pl.BlockSpec((None, S, H), lambda b: (b, 0, 0)),
        compiler_params=pltpu.CompilerParams(
            dimension_semantics=("parallel",),
            vmem_limit_bytes=_chip_cfg()["vmem"]),
        cost_estimate=pl.CostEstimate(
            flops=4 * B * nh * S * S * dh,
            transcendentals=B * nh * S * S,
            bytes_accessed=2 * B * S * (H3 + H) + 4 * B * S),
    )(qkv, add_mask)


def _lstm_kernel(xp_ref, whh_ref, o_ref, h_sc, c_sc, *, hid, t_chunk, reverse):
    @pl.when(pl.program_id(0) == 0)
    def _():
        h_sc[...] = jnp.zeros_like(h_sc)
        c_sc[...] = jnp.zeros_like(c_sc)

    whh = whh_ref[...].astype(jnp.bfloat16)             # recurrent weight stays resident

    def step(s, carry):
        t = (t_chunk - 1 - s) if reverse else s
        # gates = (x_t @ W_ih^T + b_ih + b_hh) + h_{t-1} @ W_hh^T   (precomputed x-proj)
        x_t = xp_ref[:, pl.ds(t, 1), :][:, 0, :].astype(jnp.float32)        # (B, 4*hid)
        gates = x_t + jnp.dot(h_sc[...].astype(jnp.bfloat16), whh,
                              preferred_element_type=jnp.float32)
        i_g = jax.nn.sigmoid(gates[:, 0 * hid:1 * hid])
        f_g = jax.nn.sigmoid(gates[:, 1 * hid:2 * hid])
        g_g = jnp.tanh(gates[:, 2 * hid:3 * hid])
        o_g = jax.nn.sigmoid(gates[:, 3 * hid:4 * hid])
        c = f_g * c_sc[...] + i_g * g_g
        h = o_g * jnp.tanh(c)
        c_sc[...] = c
        h_sc[...] = h
        o_ref[:, pl.ds(t, 1), :] = h.astype(o_ref.dtype)[:, None, :]
        return carry

    # Partial unroll so LLO can overlap the small recurrent matmul with the EUP chain.
    jax.lax.fori_loop(0, t_chunk, step, 0, unroll=min(8, t_chunk))


def lstm_direction(x_proj, w_hh, hid, reverse):
    """x_proj: (B, T, 8*hid) fused fwd||bwd input projection; selects its lane half
    and (for reverse) the time flip purely via the BlockSpec index_map."""
    B, T, _ = x_proj.shape
    t_chunk = _pick_time_chunk(T)
    nc = max(T // t_chunk, 1)
    x_idx = (lambda c: (0, nc - 1 - c, 1)) if reverse else (lambda c: (0, c, 0))
    o_idx = (lambda c: (0, nc - 1 - c, 0)) if reverse else (lambda c: (0, c, 0))
    return pl.pallas_call(
        functools.partial(_lstm_kernel, hid=hid, t_chunk=t_chunk, reverse=reverse),
        out_shape=jax.ShapeDtypeStruct((B, T, hid), jnp.bfloat16),
        grid=(nc,),
        in_specs=[pl.BlockSpec((B, t_chunk, 4 * hid), x_idx),
                  pl.BlockSpec((hid, 4 * hid), lambda c: (0, 0))],
        out_specs=pl.BlockSpec((B, t_chunk, hid), o_idx),
        scratch_shapes=[pltpu.VMEM((B, hid), jnp.float32),   # h state
                        pltpu.VMEM((B, hid), jnp.float32)],  # c state
        compiler_params=pltpu.CompilerParams(
            dimension_semantics=("arbitrary",),
            vmem_limit_bytes=_chip_cfg()["vmem"]),
    )(x_proj, w_hh)


# ------------------------------ model (glue) ---------------------------------

def bert_layer(x, p, add_mask, nh):
    B, S, H = x.shape
    dh = H // nh
    xf = x.reshape(B * S, H)

    # Fused QKV projection; heads are split/merged inside the attention kernel.
    qkv = dense(xf, p["w_qkv"], p["b_qkv"])                       # (B*S, 3H) bf16
    ctx = attention(qkv.reshape(B, S, 3 * H), add_mask, nh, dh, 1.0 / math.sqrt(dh))

    # wo-proj with fused residual-add + LayerNorm epilogue.
    x1 = dense_res_ln(ctx.reshape(B * S, H), p["wo"], p["bo"], xf,
                      p["ln1_g"], p["ln1_b"])

    # TODO(synk): HF BERT default is exact erf GELU; tanh approximation used here.
    ff = dense(x1, p["w1"], p["b1"], act=lambda v: jax.nn.gelu(v, approximate=True))
    x2 = dense_res_ln(ff, p["w2"], p["b2"], x1, p["ln2_g"], p["ln2_b"])
    return x2.reshape(B, S, H)


def bilstm_layer(x, p, hid):
    """Bidirectional LSTM layer; x: (B, T, D) -> (B, T, 2*hid), all batch-major."""
    B, T, D = x.shape
    # Fused forward/backward input projection: one (D, 8*hid) matmul.
    proj = dense(x.reshape(B * T, D), p["w_ih"], p["b_ih"])       # (B*T, 8*hid) bf16
    proj = proj.reshape(B, T, 8 * hid)                            # free reshape

    # TODO(synk): on v7x run the two directions concurrently on the 2 TensorCores
    # (leading size-2 "parallel" direction grid axis / core_map) instead of two
    # sequential pallas_calls.
    h_f = lstm_direction(proj, p["w_hh_f"], hid, reverse=False)   # (B, T, hid)
    h_b = lstm_direction(proj, p["w_hh_b"], hid, reverse=True)
    return jnp.concatenate([h_f, h_b], axis=-1)                   # (B, T, 2*hid)


def bert_lstm_forward(params, input_ids, attention_mask, cfg):
    B, S = input_ids.shape
    H = cfg["hidden"]

    emb = (jnp.take(params["word_emb"], input_ids, axis=0)
           + params["pos_emb"][:S][None, :, :]
           + params["type_emb"][0][None, None, :])
    x = layernorm(emb.reshape(B * S, H),
                  params["emb_ln_g"], params["emb_ln_b"]).reshape(B, S, H)

    add_mask = ((1.0 - attention_mask.astype(jnp.float32)) * -1e9)[:, None, :]  # (B,1,S)
    for lp in params["layers"]:
        x = bert_layer(x, lp, add_mask, cfg["heads"])

    # nn.Dropout(p=0.1) is identity at inference (eval) time.
    out = x
    for lp in params["lstm"]:
        out = bilstm_layer(out, lp, cfg["lstm_hid"] // 2)

    # Classifier weight is pre-padded to a 128-wide lane-dense N at init; slice once.
    logits = dense(out.reshape(B * S, -1), params["cls_w"], params["cls_b"],
                   out_dtype=jnp.float32)[:, :cfg["num_labels"]]
    logits = logits.reshape(B, S, cfg["num_labels"])

    # TODO(synk): CRF loss / Viterbi decode (labels is not None branch) not
    # implemented; this matches forward(labels=None) which returns loss=None.
    return {"loss": None, "logits": logits,
            "hidden_states": None, "attentions": None}


# ---------------------------- parameter init ----------------------------------

def init_params(key, cfg):
    H, I = cfg["hidden"], cfg["intermediate"]
    nlab, lh = cfg["num_labels"], cfg["lstm_hid"]
    ks = iter(jax.random.split(key, 512))

    def n(shape, std=0.02):
        return jax.random.normal(next(ks), shape, jnp.float32) * std

    def u(shape, b):
        return jax.random.uniform(next(ks), shape, jnp.float32, -b, b)

    def bf(a):
        return a.astype(jnp.bfloat16)   # matmul weights stored bf16 (MXU operands)

    nlab_p = _round_up(nlab, 128)       # pre-pad classifier once (lane-dense out_spec)
    cls_w = jnp.pad(n((lh, nlab)), ((0, 0), (0, nlab_p - nlab)))   # normal_(0, 0.02)

    params = {
        "word_emb": n((cfg["vocab"], H)),
        "pos_emb": n((cfg["max_pos"], H)),
        "type_emb": n((cfg["type_vocab"], H)),
        "emb_ln_g": jnp.ones((1, H), jnp.float32),
        "emb_ln_b": jnp.zeros((1, H), jnp.float32),
        "layers": [],
        "lstm": [],
        "cls_w": bf(cls_w),
        "cls_b": jnp.zeros((1, nlab_p), jnp.float32),              # bias zeroed
    }
    for _ in range(cfg["num_layers"]):
        params["layers"].append({
            "w_qkv": bf(n((H, 3 * H))),
            "b_qkv": jnp.zeros((1, 3 * H), jnp.float32),
            "wo": bf(n((H, H))), "bo": jnp.zeros((1, H), jnp.float32),
            "ln1_g": jnp.ones((1, H), jnp.float32),
            "ln1_b": jnp.zeros((1, H), jnp.float32),
            "w1": bf(n((H, I))), "b1": jnp.zeros((1, I), jnp.float32),
            "w2": bf(n((I, H))), "b2": jnp.zeros((1, H), jnp.float32),
            "ln2_g": jnp.ones((1, H), jnp.float32),
            "ln2_b": jnp.zeros((1, H), jnp.float32),
        })
    hid = lh // 2
    in_dim = H
    bound = 1.0 / math.sqrt(hid)
    for _ in range(cfg["lstm_layers"]):
        params["lstm"].append({
            # forward || backward input projections fused along N: (D, 8*hid)
            "w_ih": bf(jnp.concatenate([u((in_dim, 4 * hid), bound),
                                        u((in_dim, 4 * hid), bound)], axis=1)),
            # b_ih + b_hh for each direction, concatenated
            "b_ih": jnp.concatenate(
                [u((1, 4 * hid), bound) + u((1, 4 * hid), bound),
                 u((1, 4 * hid), bound) + u((1, 4 * hid), bound)], axis=1),
            "w_hh_f": bf(u((hid, 4 * hid), bound)),
            "w_hh_b": bf(u((hid, 4 * hid), bound)),
        })
        in_dim = lh
    return params


# --------------------------------- main ----------------------------------------

if __name__ == "__main__":
    # Small, alignment-friendly synthetic config (hidden multiple of 128 so the hot
    # path needs no runtime padding).
    cfg = dict(vocab=100, hidden=128, heads=2, num_layers=2, intermediate=256,
               max_pos=64, type_vocab=2, lstm_hid=128, lstm_layers=2, num_labels=9)
    key = jax.random.PRNGKey(0)
    pkey, ikey = jax.random.split(key)
    params = init_params(pkey, cfg)

    B, S = 2, 8
    input_ids = jax.random.randint(ikey, (B, S), 0, cfg["vocab"], dtype=jnp.int32)
    attention_mask = jnp.array([[1, 1, 1, 1, 1, 1, 1, 1],
                                [1, 1, 1, 1, 1, 0, 0, 0]], dtype=jnp.int32)

    forward = jax.jit(lambda p, ids, m: bert_lstm_forward(p, ids, m, cfg))
    out = forward(params, input_ids, attention_mask)
    logits = jax.block_until_ready(out["logits"])
    assert logits.shape == (B, S, cfg["num_labels"])
    assert bool(jnp.all(jnp.isfinite(logits)))
    print("KERNEL_OK")
</pallas_src>

<mosaic_0001>
module attributes {stable_mosaic.version = 11 : i64} {
  func.func @_attn_kernel(%arg0: i32, %arg1: memref<1x8x384xbf16, #tpu.memory_space<vmem>>, %arg2: memref<1x1x8xf32, #tpu.memory_space<vmem>>, %arg3: memref<1x8x128xbf16, #tpu.memory_space<vmem>>) attributes {dimension_semantics = [#tpu.dimension_semantics<parallel>], iteration_bounds = array<i64: 2>, scalar_prefetch = 0 : i64, scratch_operands = 0 : i64, tpu.core_type = #tpu.core_type<tc>, window_params = [{transform_indices = @transform_0, window_bounds = array<i64: 1, 8, 384>}, {transform_indices = @transform_1, window_bounds = array<i64: 1, 1, 8>}, {transform_indices = @transform_2, window_bounds = array<i64: 1, 8, 128>}]} {
    %c0 = arith.constant 0 : index
    %c0_0 = arith.constant 0 : index
    %c0_1 = arith.constant 0 : index
    %0 = vector.load %arg2[%c0, %c0_0, %c0_1] : memref<1x1x8xf32, #tpu.memory_space<vmem>>, vector<1x1x8xf32>
    %1 = vector.shape_cast %0 : vector<1x1x8xf32> to vector<1x8xf32>
    %c0_2 = arith.constant 0 : index
    %c0_3 = arith.constant 0 : index
    %c0_4 = arith.constant 0 : index
    %2 = vector.load %arg1[%c0_2, %c0_3, %c0_4] : memref<1x8x384xbf16, #tpu.memory_space<vmem>>, vector<1x8x64xbf16>
    %3 = vector.shape_cast %2 : vector<1x8x64xbf16> to vector<8x64xbf16>
    %c0_5 = arith.constant 0 : index
    %c0_6 = arith.constant 0 : index
    %c128 = arith.constant 128 : index
    %4 = vector.load %arg1[%c0_5, %c0_6, %c128] : memref<1x8x384xbf16, #tpu.memory_space<vmem>>, vector<1x8x64xbf16>
    %5 = vector.shape_cast %4 : vector<1x8x64xbf16> to vector<8x64xbf16>
    %c0_7 = arith.constant 0 : index
    %c0_8 = arith.constant 0 : index
    %c256 = arith.constant 256 : index
    %6 = vector.load %arg1[%c0_7, %c0_8, %c256] : memref<1x8x384xbf16, #tpu.memory_space<vmem>>, vector<1x8x64xbf16>
    %7 = vector.shape_cast %6 : vector<1x8x64xbf16> to vector<8x64xbf16>
    %cst = arith.constant dense<0.000000e+00> : vector<8x8xf32>
    %8 = tpu.matmul %3, %5, %cst {dimension_numbers = #tpu.dot_dimension_numbers<[1], [1], [0], [0], [0, 0, 1, 0], [], []>} : vector<8x64xbf16>, vector<8x64xbf16>, vector<8x8xf32> -> vector<8x8xf32>
    %cst_9 = arith.constant 1.250000e-01 : f32
    %9 = vector.broadcast %cst_9 : f32 to vector<8x8xf32>
    %10 = arith.mulf %8, %9 : vector<8x8xf32>
    %11 = vector.broadcast %1 : vector<1x8xf32> to vector<8x8xf32>
    %12 = arith.addf %10, %11 : vector<8x8xf32>
    %cst_10 = arith.constant dense<0xFF800000> : vector<8xf32>
    %13 = vector.multi_reduction <maximumf>, %12, %cst_10 [1] : vector<8x8xf32> to vector<8xf32>
    %14 = vector.shape_cast %13 : vector<8xf32> to vector<8x1xf32>
    %15 = vector.broadcast %14 : vector<8x1xf32> to vector<8x8xf32>
    %16 = arith.subf %12, %15 : vector<8x8xf32>
    %17 = math.exp %16 : vector<8x8xf32>
    %cst_11 = arith.constant dense<0.000000e+00> : vector<8xf32>
    %18 = vector.multi_reduction <add>, %17, %cst_11 [1] : vector<8x8xf32> to vector<8xf32>
    %19 = vector.shape_cast %18 : vector<8xf32> to vector<8x1xf32>
    %20 = tpu.reciprocal %19 {approx = true} : vector<8x1xf32> -> vector<8x1xf32>
    %21 = vector.broadcast %20 : vector<8x1xf32> to vector<8x8xf32>
    %22 = arith.mulf %17, %21 : vector<8x8xf32>
    %23 = arith.truncf %22 : vector<8x8xf32> to vector<8x8xbf16>
    %cst_12 = arith.constant dense<0.000000e+00> : vector<8x64xf32>
    %24 = tpu.matmul %23, %7, %cst_12 {dimension_numbers = #tpu.dot_dimension_numbers<[1], [0], [0], [1], [0, 0, 1, 1], [], []>} : vector<8x8xbf16>, vector<8x64xbf16>, vector<8x64xf32> -> vector<8x64xf32>
    %c0_13 = arith.constant 0 : index
    %c0_14 = arith.constant 0 : index
    %c64 = arith.constant 64 : index
    %25 = vector.load %arg1[%c0_13, %c0_14, %c64] : memref<1x8x384xbf16, #tpu.memory_space<vmem>>, vector<1x8x64xbf16>
    %26 = vector.shape_cast %25 : vector<1x8x64xbf16> to vector<8x64xbf16>
    %c0_15 = arith.constant 0 : index
    %c0_16 = arith.constant 0 : index
    %c192 = arith.constant 192 : index
    %27 = vector.load %arg1[%c0_15, %c0_16, %c192] : memref<1x8x384xbf16, #tpu.memory_space<vmem>>, vector<1x8x64xbf16>
    %28 = vector.shape_cast %27 : vector<1x8x64xbf16> to vector<8x64xbf16>
    %c0_17 = arith.constant 0 : index
    %c0_18 = arith.constant 0 : index
    %c320 = arith.constant 320 : index
    %29 = vector.load %arg1[%c0_17, %c0_18, %c320] : memref<1x8x384xbf16, #tpu.memory_space<vmem>>, vector<1x8x64xbf16>
    %30 = vector.shape_cast %29 : vector<1x8x64xbf16> to vector<8x64xbf16>
    %cst_19 = arith.constant dense<0.000000e+00> : vector<8x8xf32>
    %31 = tpu.matmul %26, %28, %cst_19 {dimension_numbers = #tpu.dot_dimension_numbers<[1], [1], [0], [0], [0, 0, 1, 0], [], []>} : vector<8x64xbf16>, vector<8x64xbf16>, vector<8x8xf32> -> vector<8x8xf32>
    %cst_20 = arith.constant 1.250000e-01 : f32
    %32 = vector.broadcast %cst_20 : f32 to vector<8x8xf32>
    %33 = arith.mulf %31, %32 : vector<8x8xf32>
    %34 = vector.broadcast %1 : vector<1x8xf32> to vector<8x8xf32>
    %35 = arith.addf %33, %34 : vector<8x8xf32>
    %cst_21 = arith.constant dense<0xFF800000> : vector<8xf32>
    %36 = vector.multi_reduction <maximumf>, %35, %cst_21 [1] : vector<8x8xf32> to vector<8xf32>
    %37 = vector.shape_cast %36 : vector<8xf32> to vector<8x1xf32>
    %38 = vector.broadcast %37 : vector<8x1xf32> to vector<8x8xf32>
    %39 = arith.subf %35, %38 : vector<8x8xf32>
    %40 = math.exp %39 : vector<8x8xf32>
    %cst_22 = arith.constant dense<0.000000e+00> : vector<8xf32>
    %41 = vector.multi_reduction <add>, %40, %cst_22 [1] : vector<8x8xf32> to vector<8xf32>
    %42 = vector.shape_cast %41 : vector<8xf32> to vector<8x1xf32>
    %43 = tpu.reciprocal %42 {approx = true} : vector<8x1xf32> -> vector<8x1xf32>
    %44 = vector.broadcast %43 : vector<8x1xf32> to vector<8x8xf32>
    %45 = arith.mulf %40, %44 : vector<8x8xf32>
    %46 = arith.truncf %45 : vector<8x8xf32> to vector<8x8xbf16>
    %cst_23 = arith.constant dense<0.000000e+00> : vector<8x64xf32>
    %47 = tpu.matmul %46, %30, %cst_23 {dimension_numbers = #tpu.dot_dimension_numbers<[1], [0], [0], [1], [0, 0, 1, 1], [], []>} : vector<8x8xbf16>, vector<8x64xbf16>, vector<8x64xf32> -> vector<8x64xf32>
    %48 = tpu.concatenate %24, %47 in 1 : vector<8x64xf32>, vector<8x64xf32> -> vector<8x128xf32>
    %49 = arith.truncf %48 : vector<8x128xf32> to vector<8x128xbf16>
    %c0_24 = arith.constant 0 : index
    %c0_25 = arith.constant 0 : index
    %c0_26 = arith.constant 0 : index
    %50 = vector.load %arg3[%c0_24, %c0_25, %c0_26] : memref<1x8x128xbf16, #tpu.memory_space<vmem>>, vector<1x8x128xbf16>
    %51 = vector.shape_cast %50 : vector<1x8x128xbf16> to vector<8x128xbf16>
    %52 = vector.shape_cast %49 : vector<8x128xbf16> to vector<1x8x128xbf16>
    tpu.vector_store %arg3[%c0_24, %c0_25, %c0_26], %52 {strides = array<i32>} : memref<1x8x128xbf16, #tpu.memory_space<vmem>>, vector<1x8x128xbf16>,
    return
  }
  func.func @transform_0(%arg0: i32) -> (i32, i32, i32) {
    %c0_i32 = arith.constant 0 : i32
    %c0_i32_0 = arith.constant 0 : i32
    %c0_i32_1 = arith.constant 0 : i32
    return %arg0, %c0_i32, %c0_i32_0 : i32, i32, i32
  }
  func.func @transform_1(%arg0: i32) -> (i32, i32, i32) {
    %c0_i32 = arith.constant 0 : i32
    %c0_i32_0 = arith.constant 0 : i32
    %c0_i32_1 = arith.constant 0 : i32
    return %arg0, %c0_i32, %c0_i32_0 : i32, i32, i32
  }
  func.func @transform_2(%arg0: i32) -> (i32, i32, i32) {
    %c0_i32 = arith.constant 0 : i32
    %c0_i32_0 = arith.constant 0 : i32
    %c0_i32_1 = arith.constant 0 : i32
    return %arg0, %c0_i32, %c0_i32_0 : i32, i32, i32
  }
}

module attributes {stable_mosaic.version = 11 : i64} {
  func.func @_ln_kernel(%arg0: i32, %arg1: memref<16x128xf32, #tpu.memory_space<vmem>>, %arg2: memref<1x128xf32, #tpu.memory_space<vmem>>, %arg3: memref<1x128xf32, #tpu.memory_space<vmem>>, %arg4: memref<16x128xbf16, #tpu.memory_space<vmem>>) attributes {dimension_semantics = [#tpu.dimension_semantics<parallel>], iteration_bounds = array<i64: 1>, scalar_prefetch = 0 : i64, scratch_operands = 0 : i64, tpu.core_type = #tpu.core_type<tc>, window_params = [{transform_indices = @transform_0, window_bounds = array<i64: 16, 128>}, {pipeline_mode = #tpu.pipeline_mode<synchronous>, transform_indices = @transform_1, window_bounds = array<i64: 1, 128>}, {pipeline_mode = #tpu.pipeline_mode<synchronous>, transform_indices = @transform_2, window_bounds = array<i64: 1, 128>}, {transform_indices = @transform_3, window_bounds = array<i64: 16, 128>}]} {
    %c0 = arith.constant 0 : index
    %c0_0 = arith.constant 0 : index
    %0 = vector.load %arg1[%c0, %c0_0] : memref<16x128xf32, #tpu.memory_space<vmem>>, vector<16x128xf32>
    %cst = arith.constant dense<0.000000e+00> : vector<16xf32>
    %1 = vector.multi_reduction <add>, %0, %cst [1] : vector<16x128xf32> to vector<16xf32>
    %2 = vector.shape_cast %1 : vector<16xf32> to vector<16x1xf32>
    %cst_1 = arith.constant 1.280000e+02 : f32
    %3 = vector.broadcast %cst_1 : f32 to vector<16x1xf32>
    %4 = arith.divf %2, %3 : vector<16x1xf32>
    %5 = vector.broadcast %4 : vector<16x1xf32> to vector<16x128xf32>
    %6 = arith.subf %0, %5 : vector<16x128xf32>
    %7 = arith.mulf %6, %6 : vector<16x128xf32>
    %cst_2 = arith.constant dense<0.000000e+00> : vector<16xf32>
    %8 = vector.multi_reduction <add>, %7, %cst_2 [1] : vector<16x128xf32> to vector<16xf32>
    %9 = vector.shape_cast %8 : vector<16xf32> to vector<16x1xf32>
    %cst_3 = arith.constant 1.280000e+02 : f32
    %10 = vector.broadcast %cst_3 : f32 to vector<16x1xf32>
    %11 = arith.divf %9, %10 : vector<16x1xf32>
    %cst_4 = arith.constant 9.99999996E-13 : f32
    %12 = vector.broadcast %cst_4 : f32 to vector<16x1xf32>
    %13 = arith.addf %11, %12 : vector<16x1xf32>
    %14 = math.rsqrt %13 : vector<16x1xf32>
    %15 = vector.broadcast %4 : vector<16x1xf32> to vector<16x128xf32>
    %16 = arith.subf %0, %15 : vector<16x128xf32>
    %17 = vector.broadcast %14 : vector<16x1xf32> to vector<16x128xf32>
    %18 = arith.mulf %16, %17 : vector<16x128xf32>
    %c0_5 = arith.constant 0 : index
    %c0_6 = arith.constant 0 : index
    %19 = vector.load %arg2[%c0_5, %c0_6] : memref<1x128xf32, #tpu.memory_space<vmem>>, vector<1x128xf32>
    %20 = vector.broadcast %19 : vector<1x128xf32> to vector<16x128xf32>
    %21 = arith.mulf %18, %20 : vector<16x128xf32>
    %c0_7 = arith.constant 0 : index
    %c0_8 = arith.constant 0 : index
    %22 = vector.load %arg3[%c0_7, %c0_8] : memref<1x128xf32, #tpu.memory_space<vmem>>, vector<1x128xf32>
    %23 = vector.broadcast %22 : vector<1x128xf32> to vector<16x128xf32>
    %24 = arith.addf %21, %23 : vector<16x128xf32>
    %25 = arith.truncf %24 : vector<16x128xf32> to vector<16x128xbf16>
    %c0_9 = arith.constant 0 : index
    %c0_10 = arith.constant 0 : index
    %26 = vector.load %arg4[%c0_9, %c0_10] : memref<16x128xbf16, #tpu.memory_space<vmem>>, vector<16x128xbf16>
    tpu.vector_store %arg4[%c0_9, %c0_10], %25 {strides = array<i32>} : memref<16x128xbf16, #tpu.memory_space<vmem>>, vector<16x128xbf16>,
    return
  }
  func.func @transform_0(%arg0: i32) -> (i32, i32) {
    %c0_i32 = arith.constant 0 : i32
    %c0_i32_0 = arith.constant 0 : i32
    return %arg0, %c0_i32 : i32, i32
  }
  func.func @transform_1(%arg0: i32) -> (i32, i32) {
    %c0_i32 = arith.constant 0 : i32
    %c0_i32_0 = arith.constant 0 : i32
    %c0_i32_1 = arith.constant 0 : i32
    return %c0_i32, %c0_i32_0 : i32, i32
  }
  func.func @transform_2(%arg0: i32) -> (i32, i32) {
    %c0_i32 = arith.constant 0 : i32
    %c0_i32_0 = arith.constant 0 : i32
    %c0_i32_1 = arith.constant 0 : i32
    return %c0_i32, %c0_i32_0 : i32, i32
  }
  func.func @transform_3(%arg0: i32) -> (i32, i32) {
    %c0_i32 = arith.constant 0 : i32
    %c0_i32_0 = arith.constant 0 : i32
    return %arg0, %c0_i32 : i32, i32
  }
}

module attributes {stable_mosaic.version = 11 : i64} {
  func.func @_matmul_kernel(%arg0: i32, %arg1: i32, %arg2: i32, %arg3: memref<16x128xbf16, #tpu.memory_space<vmem>>, %arg4: memref<128x128xbf16, #tpu.memory_space<vmem>>, %arg5: memref<1x128xf32, #tpu.memory_space<vmem>>, %arg6: memref<16x128xbf16, #tpu.memory_space<vmem>>, %arg7: memref<16x128xf32, #tpu.memory_space<vmem>>) attributes {dimension_semantics = [#tpu.dimension_semantics<parallel>, #tpu.dimension_semantics<parallel>, #tpu.dimension_semantics<arbitrary>], iteration_bounds = array<i64: 1, 3, 1>, scalar_prefetch = 0 : i64, scratch_operands = 1 : i64, tpu.core_type = #tpu.core_type<tc>, window_params = [{transform_indices = @transform_0, window_bounds = array<i64: 16, 128>}, {transform_indices = @transform_1, window_bounds = array<i64: 128, 128>}, {transform_indices = @transform_2, window_bounds = array<i64: 1, 128>}, {transform_indices = @transform_3, window_bounds = array<i64: 16, 128>}]} {
    %c0_i32 = arith.constant 0 : i32
    %0 = arith.cmpi eq, %arg2, %c0_i32 : i32
    %1 = arith.extui %0 : i1 to i32
    %c0_i32_0 = arith.constant 0 : i32
    %2 = arith.cmpi ne, %1, %c0_i32_0 : i32
    scf.if %2 {
      %cst_10 = arith.constant 0.000000e+00 : f32
      %12 = vector.broadcast %cst_10 : f32 to vector<16x128xf32>
      %c0_11 = arith.constant 0 : index
      %c0_12 = arith.constant 0 : index
      %13 = vector.load %arg7[%c0_11, %c0_12] : memref<16x128xf32, #tpu.memory_space<vmem>>, vector<16x128xf32>
      tpu.vector_store %arg7[%c0_11, %c0_12], %12 {strides = array<i32>} : memref<16x128xf32, #tpu.memory_space<vmem>>, vector<16x128xf32>,
    } else {
    }
    %c0 = arith.constant 0 : index
    %c0_1 = arith.constant 0 : index
    %3 = vector.load %arg7[%c0, %c0_1] : memref<16x128xf32, #tpu.memory_space<vmem>>, vector<16x128xf32>
    %c0_2 = arith.constant 0 : index
    %c0_3 = arith.constant 0 : index
    %4 = vector.load %arg3[%c0_2, %c0_3] : memref<16x128xbf16, #tpu.memory_space<vmem>>, vector<16x128xbf16>
    %c0_4 = arith.constant 0 : index
    %c0_5 = arith.constant 0 : index
    %5 = vector.load %arg4[%c0_4, %c0_5] : memref<128x128xbf16, #tpu.memory_space<vmem>>, vector<128x128xbf16>
    %cst = arith.constant dense<0.000000e+00> : vector<16x128xf32>
    %6 = tpu.matmul %4, %5, %cst {dimension_numbers = #tpu.dot_dimension_numbers<[1], [0], [0], [1], [0, 0, 1, 1], [], []>} : vector<16x128xbf16>, vector<128x128xbf16>, vector<16x128xf32> -> vector<16x128xf32>
    %7 = arith.addf %3, %6 : vector<16x128xf32>
    %c0_6 = arith.constant 0 : index
    %c0_7 = arith.constant 0 : index
    %8 = vector.load %arg7[%c0_6, %c0_7] : memref<16x128xf32, #tpu.memory_space<vmem>>, vector<16x128xf32>
    tpu.vector_store %arg7[%c0_6, %c0_7], %7 {strides = array<i32>} : memref<16x128xf32, #tpu.memory_space<vmem>>, vector<16x128xf32>,
    %c0_i32_8 = arith.constant 0 : i32
    %9 = arith.cmpi eq, %arg2, %c0_i32_8 : i32
    %10 = arith.extui %9 : i1 to i32
    %c0_i32_9 = arith.constant 0 : i32
    %11 = arith.cmpi ne, %10, %c0_i32_9 : i32
    scf.if %11 {
      %c0_10 = arith.constant 0 : index
      %c0_11 = arith.constant 0 : index
      %12 = vector.load %arg7[%c0_10, %c0_11] : memref<16x128xf32, #tpu.memory_space<vmem>>, vector<16x128xf32>
      %c0_12 = arith.constant 0 : index
      %c0_13 = arith.constant 0 : index
      %13 = vector.load %arg5[%c0_12, %c0_13] : memref<1x128xf32, #tpu.memory_space<vmem>>, vector<1x128xf32>
      %14 = vector.broadcast %13 : vector<1x128xf32> to vector<16x128xf32>
      %15 = arith.addf %12, %14 : vector<16x128xf32>
      %16 = arith.truncf %15 : vector<16x128xf32> to vector<16x128xbf16>
      %c0_14 = arith.constant 0 : index
      %c0_15 = arith.constant 0 : index
      %17 = vector.load %arg6[%c0_14, %c0_15] : memref<16x128xbf16, #tpu.memory_space<vmem>>, vector<16x128xbf16>
      tpu.vector_store %arg6[%c0_14, %c0_15], %16 {strides = array<i32>} : memref<16x128xbf16, #tpu.memory_space<vmem>>, vector<16x128xbf16>,
    } else {
    }
    return
  }
  func.func @transform_0(%arg0: i32, %arg1: i32, %arg2: i32) -> (i32, i32) {
    %c0_i32 = arith.constant 0 : i32
    return %arg0, %arg2 : i32, i32
  }
  func.func @transform_1(%arg0: i32, %arg1: i32, %arg2: i32) -> (i32, i32) {
    %c0_i32 = arith.constant 0 : i32
    return %arg2, %arg1 : i32, i32
  }
  func.func @transform_2(%arg0: i32, %arg1: i32, %arg2: i32) -> (i32, i32) {
    %c0_i32 = arith.constant 0 : i32
    %c0_i32_0 = arith.constant 0 : i32
    return %c0_i32, %arg1 : i32, i32
  }
  func.func @transform_3(%arg0: i32, %arg1: i32, %arg2: i32) -> (i32, i32) {
    %c0_i32 = arith.constant 0 : i32
    return %arg0, %arg1 : i32, i32
  }
}

module attributes {stable_mosaic.version = 11 : i64} {
  func.func @_matmul_res_ln_kernel(%arg0: i32, %arg1: i32, %arg2: memref<16x128xbf16, #tpu.memory_space<vmem>>, %arg3: memref<128x128xbf16, #tpu.memory_space<vmem>>, %arg4: memref<1x128xf32, #tpu.memory_space<vmem>>, %arg5: memref<16x128xbf16, #tpu.memory_space<vmem>>, %arg6: memref<1x128xf32, #tpu.memory_space<vmem>>, %arg7: memref<1x128xf32, #tpu.memory_space<vmem>>, %arg8: memref<16x128xbf16, #tpu.memory_space<vmem>>, %arg9: memref<16x128xf32, #tpu.memory_space<vmem>>) attributes {dimension_semantics = [#tpu.dimension_semantics<parallel>, #tpu.dimension_semantics<arbitrary>], iteration_bounds = array<i64: 1, 1>, scalar_prefetch = 0 : i64, scratch_operands = 1 : i64, tpu.core_type = #tpu.core_type<tc>, window_params = [{transform_indices = @transform_0, window_bounds = array<i64: 16, 128>}, {transform_indices = @transform_1, window_bounds = array<i64: 128, 128>}, {pipeline_mode = #tpu.pipeline_mode<synchronous>, transform_indices = @transform_2, window_bounds = array<i64: 1, 128>}, {transform_indices = @transform_3, window_bounds = array<i64: 16, 128>}, {pipeline_mode = #tpu.pipeline_mode<synchronous>, transform_indices = @transform_4, window_bounds = array<i64: 1, 128>}, {pipeline_mode = #tpu.pipeline_mode<synchronous>, transform_indices = @transform_5, window_bounds = array<i64: 1, 128>}, {transform_indices = @transform_6, window_bounds = array<i64: 16, 128>}]} {
    %c0_i32 = arith.constant 0 : i32
    %0 = arith.cmpi eq, %arg1, %c0_i32 : i32
    %1 = arith.extui %0 : i1 to i32
    %c0_i32_0 = arith.constant 0 : i32
    %2 = arith.cmpi ne, %1, %c0_i32_0 : i32
    scf.if %2 {
      %cst_10 = arith.constant 0.000000e+00 : f32
      %12 = vector.broadcast %cst_10 : f32 to vector<16x128xf32>
      %c0_11 = arith.constant 0 : index
      %c0_12 = arith.constant 0 : index
      %13 = vector.load %arg9[%c0_11, %c0_12] : memref<16x128xf32, #tpu.memory_space<vmem>>, vector<16x128xf32>
      tpu.vector_store %arg9[%c0_11, %c0_12], %12 {strides = array<i32>} : memref<16x128xf32, #tpu.memory_space<vmem>>, vector<16x128xf32>,
    } else {
    }
    %c0 = arith.constant 0 : index
    %c0_1 = arith.constant 0 : index
    %3 = vector.load %arg9[%c0, %c0_1] : memref<16x128xf32, #tpu.memory_space<vmem>>, vector<16x128xf32>
    %c0_2 = arith.constant 0 : index
    %c0_3 = arith.constant 0 : index
    %4 = vector.load %arg2[%c0_2, %c0_3] : memref<16x128xbf16, #tpu.memory_space<vmem>>, vector<16x128xbf16>
    %c0_4 = arith.constant 0 : index
    %c0_5 = arith.constant 0 : index
    %5 = vector.load %arg3[%c0_4, %c0_5] : memref<128x128xbf16, #tpu.memory_space<vmem>>, vector<128x128xbf16>
    %cst = arith.constant dense<0.000000e+00> : vector<16x128xf32>
    %6 = tpu.matmul %4, %5, %cst {dimension_numbers = #tpu.dot_dimension_numbers<[1], [0], [0], [1], [0, 0, 1, 1], [], []>} : vector<16x128xbf16>, vector<128x128xbf16>, vector<16x128xf32> -> vector<16x128xf32>
    %7 = arith.addf %3, %6 : vector<16x128xf32>
    %c0_6 = arith.constant 0 : index
    %c0_7 = arith.constant 0 : index
    %8 = vector.load %arg9[%c0_6, %c0_7] : memref<16x128xf32, #tpu.memory_space<vmem>>, vector<16x128xf32>
    tpu.vector_store %arg9[%c0_6, %c0_7], %7 {strides = array<i32>} : memref<16x128xf32, #tpu.memory_space<vmem>>, vector<16x128xf32>,
    %c0_i32_8 = arith.constant 0 : i32
    %9 = arith.cmpi eq, %arg1, %c0_i32_8 : i32
    %10 = arith.extui %9 : i1 to i32
    %c0_i32_9 = arith.constant 0 : i32
    %11 = arith.cmpi ne, %10, %c0_i32_9 : i32
    scf.if %11 {
      %c0_10 = arith.constant 0 : index
      %c0_11 = arith.constant 0 : index
      %12 = vector.load %arg9[%c0_10, %c0_11] : memref<16x128xf32, #tpu.memory_space<vmem>>, vector<16x128xf32>
      %c0_12 = arith.constant 0 : index
      %c0_13 = arith.constant 0 : index
      %13 = vector.load %arg4[%c0_12, %c0_13] : memref<1x128xf32, #tpu.memory_space<vmem>>, vector<1x128xf32>
      %14 = vector.broadcast %13 : vector<1x128xf32> to vector<16x128xf32>
      %15 = arith.addf %12, %14 : vector<16x128xf32>
      %c0_14 = arith.constant 0 : index
      %c0_15 = arith.constant 0 : index
      %16 = vector.load %arg5[%c0_14, %c0_15] : memref<16x128xbf16, #tpu.memory_space<vmem>>, vector<16x128xbf16>
      %17 = arith.extf %16 : vector<16x128xbf16> to vector<16x128xf32>
      %18 = arith.addf %15, %17 : vector<16x128xf32>
      %cst_16 = arith.constant dense<0.000000e+00> : vector<16xf32>
      %19 = vector.multi_reduction <add>, %18, %cst_16 [1] : vector<16x128xf32> to vector<16xf32>
      %20 = vector.shape_cast %19 : vector<16xf32> to vector<16x1xf32>
      %cst_17 = arith.constant 1.280000e+02 : f32
      %21 = vector.broadcast %cst_17 : f32 to vector<16x1xf32>
      %22 = arith.divf %20, %21 : vector<16x1xf32>
      %23 = vector.broadcast %22 : vector<16x1xf32> to vector<16x128xf32>
      %24 = arith.subf %18, %23 : vector<16x128xf32>
      %25 = arith.mulf %24, %24 : vector<16x128xf32>
      %cst_18 = arith.constant dense<0.000000e+00> : vector<16xf32>
      %26 = vector.multi_reduction <add>, %25, %cst_18 [1] : vector<16x128xf32> to vector<16xf32>
      %27 = vector.shape_cast %26 : vector<16xf32> to vector<16x1xf32>
      %cst_19 = arith.constant 1.280000e+02 : f32
      %28 = vector.broadcast %cst_19 : f32 to vector<16x1xf32>
      %29 = arith.divf %27, %28 : vector<16x1xf32>
      %cst_20 = arith.constant 9.99999996E-13 : f32
      %30 = vector.broadcast %cst_20 : f32 to vector<16x1xf32>
      %31 = arith.addf %29, %30 : vector<16x1xf32>
      %32 = math.rsqrt %31 : vector<16x1xf32>
      %33 = vector.broadcast %22 : vector<16x1xf32> to vector<16x128xf32>
      %34 = arith.subf %18, %33 : vector<16x128xf32>
      %35 = vector.broadcast %32 : vector<16x1xf32> to vector<16x128xf32>
      %36 = arith.mulf %34, %35 : vector<16x128xf32>
      %c0_21 = arith.constant 0 : index
      %c0_22 = arith.constant 0 : index
      %37 = vector.load %arg6[%c0_21, %c0_22] : memref<1x128xf32, #tpu.memory_space<vmem>>, vector<1x128xf32>
      %38 = vector.broadcast %37 : vector<1x128xf32> to vector<16x128xf32>
      %39 = arith.mulf %36, %38 : vector<16x128xf32>
      %c0_23 = arith.constant 0 : index
      %c0_24 = arith.constant 0 : index
      %40 = vector.load %arg7[%c0_23, %c0_24] : memref<1x128xf32, #tpu.memory_space<vmem>>, vector<1x128xf32>
      %41 = vector.broadcast %40 : vector<1x128xf32> to vector<16x128xf32>
      %42 = arith.addf %39, %41 : vector<16x128xf32>
      %43 = arith.truncf %42 : vector<16x128xf32> to vector<16x128xbf16>
      %c0_25 = arith.constant 0 : index
      %c0_26 = arith.constant 0 : index
      %44 = vector.load %arg8[%c0_25, %c0_26] : memref<16x128xbf16, #tpu.memory_space<vmem>>, vector<16x128xbf16>
      tpu.vector_store %arg8[%c0_25, %c0_26], %43 {strides = array<i32>} : memref<16x128xbf16, #tpu.memory_space<vmem>>, vector<16x128xbf16>,
    } else {
    }
    return
  }
  func.func @transform_0(%arg0: i32, %arg1: i32) -> (i32, i32) {
    %c0_i32 = arith.constant 0 : i32
    return %arg0, %arg1 : i32, i32
  }
  func.func @transform_1(%arg0: i32, %arg1: i32) -> (i32, i32) {
    %c0_i32 = arith.constant 0 : i32
    %c0_i32_0 = arith.constant 0 : i32
    return %arg1, %c0_i32 : i32, i32
  }
  func.func @transform_2(%arg0: i32, %arg1: i32) -> (i32, i32) {
    %c0_i32 = arith.constant 0 : i32
    %c0_i32_0 = arith.constant 0 : i32
    %c0_i32_1 = arith.constant 0 : i32
    return %c0_i32, %c0_i32_0 : i32, i32
  }
  func.func @transform_3(%arg0: i32, %arg1: i32) -> (i32, i32) {
    %c0_i32 = arith.constant 0 : i32
    %c0_i32_0 = arith.constant 0 : i32
    return %arg0, %c0_i32 : i32, i32
  }
  func.func @transform_4(%arg0: i32, %arg1: i32) -> (i32, i32) {
    %c0_i32 = arith.constant 0 : i32
    %c0_i32_0 = arith.constant 0 : i32
    %c0_i32_1 = arith.constant 0 : i32
    return %c0_i32, %c0_i32_0 : i32, i32
  }
  func.func @transform_5(%arg0: i32, %arg1: i32) -> (i32, i32) {
    %c0_i32 = arith.constant 0 : i32
    %c0_i32_0 = arith.constant 0 : i32
    %c0_i32_1 = arith.constant 0 : i32
    return %c0_i32, %c0_i32_0 : i32, i32
  }
  func.func @transform_6(%arg0: i32, %arg1: i32) -> (i32, i32) {
    %c0_i32 = arith.constant 0 : i32
    %c0_i32_0 = arith.constant 0 : i32
    return %arg0, %c0_i32 : i32, i32
  }
}

module attributes {stable_mosaic.version = 11 : i64} {
  func.func @_matmul_kernel(%arg0: i32, %arg1: i32, %arg2: i32, %arg3: memref<16x128xbf16, #tpu.memory_space<vmem>>, %arg4: memref<128x256xbf16, #tpu.memory_space<vmem>>, %arg5: memref<1x256xf32, #tpu.memory_space<vmem>>, %arg6: memref<16x256xbf16, #tpu.memory_space<vmem>>, %arg7: memref<16x256xf32, #tpu.memory_space<vmem>>) attributes {dimension_semantics = [#tpu.dimension_semantics<parallel>, #tpu.dimension_semantics<parallel>, #tpu.dimension_semantics<arbitrary>], iteration_bounds = array<i64: 1, 1, 1>, scalar_prefetch = 0 : i64, scratch_operands = 1 : i64, tpu.core_type = #tpu.core_type<tc>, window_params = [{transform_indices = @transform_0, window_bounds = array<i64: 16, 128>}, {transform_indices = @transform_1, window_bounds = array<i64: 128, 256>}, {transform_indices = @transform_2, window_bounds = array<i64: 1, 256>}, {transform_indices = @transform_3, window_bounds = array<i64: 16, 256>}]} {
    %c0_i32 = arith.constant 0 : i32
    %0 = arith.cmpi eq, %arg2, %c0_i32 : i32
    %1 = arith.extui %0 : i1 to i32
    %c0_i32_0 = arith.constant 0 : i32
    %2 = arith.cmpi ne, %1, %c0_i32_0 : i32
    scf.if %2 {
      %cst_10 = arith.constant 0.000000e+00 : f32
      %12 = vector.broadcast %cst_10 : f32 to vector<16x256xf32>
      %c0_11 = arith.constant 0 : index
      %c0_12 = arith.constant 0 : index
      %13 = vector.load %arg7[%c0_11, %c0_12] : memref<16x256xf32, #tpu.memory_space<vmem>>, vector<16x256xf32>
      tpu.vector_store %arg7[%c0_11, %c0_12], %12 {strides = array<i32>} : memref<16x256xf32, #tpu.memory_space<vmem>>, vector<16x256xf32>,
    } else {
    }
    %c0 = arith.constant 0 : index
    %c0_1 = arith.constant 0 : index
    %3 = vector.load %arg7[%c0, %c0_1] : memref<16x256xf32, #tpu.memory_space<vmem>>, vector<16x256xf32>
    %c0_2 = arith.constant 0 : index
    %c0_3 = arith.constant 0 : index
    %4 = vector.load %arg3[%c0_2, %c0_3] : memref<16x128xbf16, #tpu.memory_space<vmem>>, vector<16x128xbf16>
    %c0_4 = arith.constant 0 : index
    %c0_5 = arith.constant 0 : index
    %5 = vector.load %arg4[%c0_4, %c0_5] : memref<128x256xbf16, #tpu.memory_space<vmem>>, vector<128x256xbf16>
    %cst = arith.constant dense<0.000000e+00> : vector<16x256xf32>
    %6 = tpu.matmul %4, %5, %cst {dimension_numbers = #tpu.dot_dimension_numbers<[1], [0], [0], [1], [0, 0, 1, 1], [], []>} : vector<16x128xbf16>, vector<128x256xbf16>, vector<16x256xf32> -> vector<16x256xf32>
    %7 = arith.addf %3, %6 : vector<16x256xf32>
    %c0_6 = arith.constant 0 : index
    %c0_7 = arith.constant 0 : index
    %8 = vector.load %arg7[%c0_6, %c0_7] : memref<16x256xf32, #tpu.memory_space<vmem>>, vector<16x256xf32>
    tpu.vector_store %arg7[%c0_6, %c0_7], %7 {strides = array<i32>} : memref<16x256xf32, #tpu.memory_space<vmem>>, vector<16x256xf32>,
    %c0_i32_8 = arith.constant 0 : i32
    %9 = arith.cmpi eq, %arg2, %c0_i32_8 : i32
    %10 = arith.extui %9 : i1 to i32
    %c0_i32_9 = arith.constant 0 : i32
    %11 = arith.cmpi ne, %10, %c0_i32_9 : i32
    scf.if %11 {
      %c0_10 = arith.constant 0 : index
      %c0_11 = arith.constant 0 : index
      %12 = vector.load %arg7[%c0_10, %c0_11] : memref<16x256xf32, #tpu.memory_space<vmem>>, vector<16x256xf32>
      %c0_12 = arith.constant 0 : index
      %c0_13 = arith.constant 0 : index
      %13 = vector.load %arg5[%c0_12, %c0_13] : memref<1x256xf32, #tpu.memory_space<vmem>>, vector<1x256xf32>
      %14 = vector.broadcast %13 : vector<1x256xf32> to vector<16x256xf32>
      %15 = arith.addf %12, %14 : vector<16x256xf32>
      %16 = arith.mulf %15, %15 : vector<16x256xf32>
      %17 = arith.mulf %15, %16 : vector<16x256xf32>
      %cst_14 = arith.constant 4.471500e-02 : f32
      %18 = vector.broadcast %cst_14 : f32 to vector<16x256xf32>
      %19 = arith.mulf %18, %17 : vector<16x256xf32>
      %20 = arith.addf %15, %19 : vector<16x256xf32>
      %cst_15 = arith.constant 0.797884583 : f32
      %21 = vector.broadcast %cst_15 : f32 to vector<16x256xf32>
      %22 = arith.mulf %21, %20 : vector<16x256xf32>
      %23 = math.tanh %22 : vector<16x256xf32>
      %cst_16 = arith.constant 1.000000e+00 : f32
      %24 = vector.broadcast %cst_16 : f32 to vector<16x256xf32>
      %25 = arith.addf %24, %23 : vector<16x256xf32>
      %cst_17 = arith.constant 5.000000e-01 : f32
      %26 = vector.broadcast %cst_17 : f32 to vector<16x256xf32>
      %27 = arith.mulf %26, %25 : vector<16x256xf32>
      %28 = arith.mulf %15, %27 : vector<16x256xf32>
      %29 = arith.truncf %28 : vector<16x256xf32> to vector<16x256xbf16>
      %c0_18 = arith.constant 0 : index
      %c0_19 = arith.constant 0 : index
      %30 = vector.load %arg6[%c0_18, %c0_19] : memref<16x256xbf16, #tpu.memory_space<vmem>>, vector<16x256xbf16>
      tpu.vector_store %arg6[%c0_18, %c0_19], %29 {strides = array<i32>} : memref<16x256xbf16, #tpu.memory_space<vmem>>, vector<16x256xbf16>,
    } else {
    }
    return
  }
  func.func @transform_0(%arg0: i32, %arg1: i32, %arg2: i32) -> (i32, i32) {
    %c0_i32 = arith.constant 0 : i32
    return %arg0, %arg2 : i32, i32
  }
  func.func @transform_1(%arg0: i32, %arg1: i32, %arg2: i32) -> (i32, i32) {
    %c0_i32 = arith.constant 0 : i32
    return %arg2, %arg1 : i32, i32
  }
  func.func @transform_2(%arg0: i32, %arg1: i32, %arg2: i32) -> (i32, i32) {
    %c0_i32 = arith.constant 0 : i32
    %c0_i32_0 = arith.constant 0 : i32
    return %c0_i32, %arg1 : i32, i32
  }
  func.func @transform_3(%arg0: i32, %arg1: i32, %arg2: i32) -> (i32, i32) {
    %c0_i32 = arith.constant 0 : i32
    return %arg0, %arg1 : i32, i32
  }
}

module attributes {stable_mosaic.version = 11 : i64} {
  func.func @_matmul_kernel(%arg0: i32, %arg1: i32, %arg2: i32, %arg3: memref<16x128xbf16, #tpu.memory_space<vmem>>, %arg4: memref<128x256xbf16, #tpu.memory_space<vmem>>, %arg5: memref<1x256xf32, #tpu.memory_space<vmem>>, %arg6: memref<16x256xbf16, #tpu.memory_space<vmem>>, %arg7: memref<16x256xf32, #tpu.memory_space<vmem>>) attributes {dimension_semantics = [#tpu.dimension_semantics<parallel>, #tpu.dimension_semantics<parallel>, #tpu.dimension_semantics<arbitrary>], iteration_bounds = array<i64: 1, 2, 1>, scalar_prefetch = 0 : i64, scratch_operands = 1 : i64, tpu.core_type = #tpu.core_type<tc>, window_params = [{transform_indices = @transform_0, window_bounds = array<i64: 16, 128>}, {transform_indices = @transform_1, window_bounds = array<i64: 128, 256>}, {transform_indices = @transform_2, window_bounds = array<i64: 1, 256>}, {transform_indices = @transform_3, window_bounds = array<i64: 16, 256>}]} {
    %c0_i32 = arith.constant 0 : i32
    %0 = arith.cmpi eq, %arg2, %c0_i32 : i32
    %1 = arith.extui %0 : i1 to i32
    %c0_i32_0 = arith.constant 0 : i32
    %2 = arith.cmpi ne, %1, %c0_i32_0 : i32
    scf.if %2 {
      %cst_10 = arith.constant 0.000000e+00 : f32
      %12 = vector.broadcast %cst_10 : f32 to vector<16x256xf32>
      %c0_11 = arith.constant 0 : index
      %c0_12 = arith.constant 0 : index
      %13 = vector.load %arg7[%c0_11, %c0_12] : memref<16x256xf32, #tpu.memory_space<vmem>>, vector<16x256xf32>
      tpu.vector_store %arg7[%c0_11, %c0_12], %12 {strides = array<i32>} : memref<16x256xf32, #tpu.memory_space<vmem>>, vector<16x256xf32>,
    } else {
    }
    %c0 = arith.constant 0 : index
    %c0_1 = arith.constant 0 : index
    %3 = vector.load %arg7[%c0, %c0_1] : memref<16x256xf32, #tpu.memory_space<vmem>>, vector<16x256xf32>
    %c0_2 = arith.constant 0 : index
    %c0_3 = arith.constant 0 : index
    %4 = vector.load %arg3[%c0_2, %c0_3] : memref<16x128xbf16, #tpu.memory_space<vmem>>, vector<16x128xbf16>
    %c0_4 = arith.constant 0 : index
    %c0_5 = arith.constant 0 : index
    %5 = vector.load %arg4[%c0_4, %c0_5] : memref<128x256xbf16, #tpu.memory_space<vmem>>, vector<128x256xbf16>
    %cst = arith.constant dense<0.000000e+00> : vector<16x256xf32>
    %6 = tpu.matmul %4, %5, %cst {dimension_numbers = #tpu.dot_dimension_numbers<[1], [0], [0], [1], [0, 0, 1, 1], [], []>} : vector<16x128xbf16>, vector<128x256xbf16>, vector<16x256xf32> -> vector<16x256xf32>
    %7 = arith.addf %3, %6 : vector<16x256xf32>
    %c0_6 = arith.constant 0 : index
    %c0_7 = arith.constant 0 : index
    %8 = vector.load %arg7[%c0_6, %c0_7] : memref<16x256xf32, #tpu.memory_space<vmem>>, vector<16x256xf32>
    tpu.vector_store %arg7[%c0_6, %c0_7], %7 {strides = array<i32>} : memref<16x256xf32, #tpu.memory_space<vmem>>, vector<16x256xf32>,
    %c0_i32_8 = arith.constant 0 : i32
    %9 = arith.cmpi eq, %arg2, %c0_i32_8 : i32
    %10 = arith.extui %9 : i1 to i32
    %c0_i32_9 = arith.constant 0 : i32
    %11 = arith.cmpi ne, %10, %c0_i32_9 : i32
    scf.if %11 {
      %c0_10 = arith.constant 0 : index
      %c0_11 = arith.constant 0 : index
      %12 = vector.load %arg7[%c0_10, %c0_11] : memref<16x256xf32, #tpu.memory_space<vmem>>, vector<16x256xf32>
      %c0_12 = arith.constant 0 : index
      %c0_13 = arith.constant 0 : index
      %13 = vector.load %arg5[%c0_12, %c0_13] : memref<1x256xf32, #tpu.memory_space<vmem>>, vector<1x256xf32>
      %14 = vector.broadcast %13 : vector<1x256xf32> to vector<16x256xf32>
      %15 = arith.addf %12, %14 : vector<16x256xf32>
      %16 = arith.truncf %15 : vector<16x256xf32> to vector<16x256xbf16>
      %c0_14 = arith.constant 0 : index
      %c0_15 = arith.constant 0 : index
      %17 = vector.load %arg6[%c0_14, %c0_15] : memref<16x256xbf16, #tpu.memory_space<vmem>>, vector<16x256xbf16>
      tpu.vector_store %arg6[%c0_14, %c0_15], %16 {strides = array<i32>} : memref<16x256xbf16, #tpu.memory_space<vmem>>, vector<16x256xbf16>,
    } else {
    }
    return
  }
  func.func @transform_0(%arg0: i32, %arg1: i32, %arg2: i32) -> (i32, i32) {
    %c0_i32 = arith.constant 0 : i32
    return %arg0, %arg2 : i32, i32
  }
  func.func @transform_1(%arg0: i32, %arg1: i32, %arg2: i32) -> (i32, i32) {
    %c0_i32 = arith.constant 0 : i32
    return %arg2, %arg1 : i32, i32
  }
  func.func @transform_2(%arg0: i32, %arg1: i32, %arg2: i32) -> (i32, i32) {
    %c0_i32 = arith.constant 0 : i32
    %c0_i32_0 = arith.constant 0 : i32
    return %c0_i32, %arg1 : i32, i32
  }
  func.func @transform_3(%arg0: i32, %arg1: i32, %arg2: i32) -> (i32, i32) {
    %c0_i32 = arith.constant 0 : i32
    return %arg0, %arg1 : i32, i32
  }
}

module attributes {stable_mosaic.version = 11 : i64} {
  func.func @_matmul_res_ln_kernel(%arg0: i32, %arg1: i32, %arg2: memref<16x256xbf16, #tpu.memory_space<vmem>>, %arg3: memref<256x128xbf16, #tpu.memory_space<vmem>>, %arg4: memref<1x128xf32, #tpu.memory_space<vmem>>, %arg5: memref<16x128xbf16, #tpu.memory_space<vmem>>, %arg6: memref<1x128xf32, #tpu.memory_space<vmem>>, %arg7: memref<1x128xf32, #tpu.memory_space<vmem>>, %arg8: memref<16x128xbf16, #tpu.memory_space<vmem>>, %arg9: memref<16x128xf32, #tpu.memory_space<vmem>>) attributes {dimension_semantics = [#tpu.dimension_semantics<parallel>, #tpu.dimension_semantics<arbitrary>], iteration_bounds = array<i64: 1, 1>, scalar_prefetch = 0 : i64, scratch_operands = 1 : i64, tpu.core_type = #tpu.core_type<tc>, window_params = [{transform_indices = @transform_0, window_bounds = array<i64: 16, 256>}, {transform_indices = @transform_1, window_bounds = array<i64: 256, 128>}, {pipeline_mode = #tpu.pipeline_mode<synchronous>, transform_indices = @transform_2, window_bounds = array<i64: 1, 128>}, {transform_indices = @transform_3, window_bounds = array<i64: 16, 128>}, {pipeline_mode = #tpu.pipeline_mode<synchronous>, transform_indices = @transform_4, window_bounds = array<i64: 1, 128>}, {pipeline_mode = #tpu.pipeline_mode<synchronous>, transform_indices = @transform_5, window_bounds = array<i64: 1, 128>}, {transform_indices = @transform_6, window_bounds = array<i64: 16, 128>}]} {
    %c0_i32 = arith.constant 0 : i32
    %0 = arith.cmpi eq, %arg1, %c0_i32 : i32
    %1 = arith.extui %0 : i1 to i32
    %c0_i32_0 = arith.constant 0 : i32
    %2 = arith.cmpi ne, %1, %c0_i32_0 : i32
    scf.if %2 {
      %cst_10 = arith.constant 0.000000e+00 : f32
      %12 = vector.broadcast %cst_10 : f32 to vector<16x128xf32>
      %c0_11 = arith.constant 0 : index
      %c0_12 = arith.constant 0 : index
      %13 = vector.load %arg9[%c0_11, %c0_12] : memref<16x128xf32, #tpu.memory_space<vmem>>, vector<16x128xf32>
      tpu.vector_store %arg9[%c0_11, %c0_12], %12 {strides = array<i32>} : memref<16x128xf32, #tpu.memory_space<vmem>>, vector<16x128xf32>,
    } else {
    }
    %c0 = arith.constant 0 : index
    %c0_1 = arith.constant 0 : index
    %3 = vector.load %arg9[%c0, %c0_1] : memref<16x128xf32, #tpu.memory_space<vmem>>, vector<16x128xf32>
    %c0_2 = arith.constant 0 : index
    %c0_3 = arith.constant 0 : index
    %4 = vector.load %arg2[%c0_2, %c0_3] : memref<16x256xbf16, #tpu.memory_space<vmem>>, vector<16x256xbf16>
    %c0_4 = arith.constant 0 : index
    %c0_5 = arith.constant 0 : index
    %5 = vector.load %arg3[%c0_4, %c0_5] : memref<256x128xbf16, #tpu.memory_space<vmem>>, vector<256x128xbf16>
    %cst = arith.constant dense<0.000000e+00> : vector<16x128xf32>
    %6 = tpu.matmul %4, %5, %cst {dimension_numbers = #tpu.dot_dimension_numbers<[1], [0], [0], [1], [0, 0, 1, 1], [], []>} : vector<16x256xbf16>, vector<256x128xbf16>, vector<16x128xf32> -> vector<16x128xf32>
    %7 = arith.addf %3, %6 : vector<16x128xf32>
    %c0_6 = arith.constant 0 : index
    %c0_7 = arith.constant 0 : index
    %8 = vector.load %arg9[%c0_6, %c0_7] : memref<16x128xf32, #tpu.memory_space<vmem>>, vector<16x128xf32>
    tpu.vector_store %arg9[%c0_6, %c0_7], %7 {strides = array<i32>} : memref<16x128xf32, #tpu.memory_space<vmem>>, vector<16x128xf32>,
    %c0_i32_8 = arith.constant 0 : i32
    %9 = arith.cmpi eq, %arg1, %c0_i32_8 : i32
    %10 = arith.extui %9 : i1 to i32
    %c0_i32_9 = arith.constant 0 : i32
    %11 = arith.cmpi ne, %10, %c0_i32_9 : i32
    scf.if %11 {
      %c0_10 = arith.constant 0 : index
      %c0_11 = arith.constant 0 : index
      %12 = vector.load %arg9[%c0_10, %c0_11] : memref<16x128xf32, #tpu.memory_space<vmem>>, vector<16x128xf32>
      %c0_12 = arith.constant 0 : index
      %c0_13 = arith.constant 0 : index
      %13 = vector.load %arg4[%c0_12, %c0_13] : memref<1x128xf32, #tpu.memory_space<vmem>>, vector<1x128xf32>
      %14 = vector.broadcast %13 : vector<1x128xf32> to vector<16x128xf32>
      %15 = arith.addf %12, %14 : vector<16x128xf32>
      %c0_14 = arith.constant 0 : index
      %c0_15 = arith.constant 0 : index
      %16 = vector.load %arg5[%c0_14, %c0_15] : memref<16x128xbf16, #tpu.memory_space<vmem>>, vector<16x128xbf16>
      %17 = arith.extf %16 : vector<16x128xbf16> to vector<16x128xf32>
      %18 = arith.addf %15, %17 : vector<16x128xf32>
      %cst_16 = arith.constant dense<0.000000e+00> : vector<16xf32>
      %19 = vector.multi_reduction <add>, %18, %cst_16 [1] : vector<16x128xf32> to vector<16xf32>
      %20 = vector.shape_cast %19 : vector<16xf32> to vector<16x1xf32>
      %cst_17 = arith.constant 1.280000e+02 : f32
      %21 = vector.broadcast %cst_17 : f32 to vector<16x1xf32>
      %22 = arith.divf %20, %21 : vector<16x1xf32>
      %23 = vector.broadcast %22 : vector<16x1xf32> to vector<16x128xf32>
      %24 = arith.subf %18, %23 : vector<16x128xf32>
      %25 = arith.mulf %24, %24 : vector<16x128xf32>
      %cst_18 = arith.constant dense<0.000000e+00> : vector<16xf32>
      %26 = vector.multi_reduction <add>, %25, %cst_18 [1] : vector<16x128xf32> to vector<16xf32>
      %27 = vector.shape_cast %26 : vector<16xf32> to vector<16x1xf32>
      %cst_19 = arith.constant 1.280000e+02 : f32
      %28 = vector.broadcast %cst_19 : f32 to vector<16x1xf32>
      %29 = arith.divf %27, %28 : vector<16x1xf32>
      %cst_20 = arith.constant 9.99999996E-13 : f32
      %30 = vector.broadcast %cst_20 : f32 to vector<16x1xf32>
      %31 = arith.addf %29, %30 : vector<16x1xf32>
      %32 = math.rsqrt %31 : vector<16x1xf32>
      %33 = vector.broadcast %22 : vector<16x1xf32> to vector<16x128xf32>
      %34 = arith.subf %18, %33 : vector<16x128xf32>
      %35 = vector.broadcast %32 : vector<16x1xf32> to vector<16x128xf32>
      %36 = arith.mulf %34, %35 : vector<16x128xf32>
      %c0_21 = arith.constant 0 : index
      %c0_22 = arith.constant 0 : index
      %37 = vector.load %arg6[%c0_21, %c0_22] : memref<1x128xf32, #tpu.memory_space<vmem>>, vector<1x128xf32>
      %38 = vector.broadcast %37 : vector<1x128xf32> to vector<16x128xf32>
      %39 = arith.mulf %36, %38 : vector<16x128xf32>
      %c0_23 = arith.constant 0 : index
      %c0_24 = arith.constant 0 : index
      %40 = vector.load %arg7[%c0_23, %c0_24] : memref<1x128xf32, #tpu.memory_space<vmem>>, vector<1x128xf32>
      %41 = vector.broadcast %40 : vector<1x128xf32> to vector<16x128xf32>
      %42 = arith.addf %39, %41 : vector<16x128xf32>
      %43 = arith.truncf %42 : vector<16x128xf32> to vector<16x128xbf16>
      %c0_25 = arith.constant 0 : index
      %c0_26 = arith.constant 0 : index
      %44 = vector.load %arg8[%c0_25, %c0_26] : memref<16x128xbf16, #tpu.memory_space<vmem>>, vector<16x128xbf16>
      tpu.vector_store %arg8[%c0_25, %c0_26], %43 {strides = array<i32>} : memref<16x128xbf16, #tpu.memory_space<vmem>>, vector<16x128xbf16>,
    } else {
    }
    return
  }
  func.func @transform_0(%arg0: i32, %arg1: i32) -> (i32, i32) {
    %c0_i32 = arith.constant 0 : i32
    return %arg0, %arg1 : i32, i32
  }
  func.func @transform_1(%arg0: i32, %arg1: i32) -> (i32, i32) {
    %c0_i32 = arith.constant 0 : i32
    %c0_i32_0 = arith.constant 0 : i32
    return %arg1, %c0_i32 : i32, i32
  }
  func.func @transform_2(%arg0: i32, %arg1: i32) -> (i32, i32) {
    %c0_i32 = arith.constant 0 : i32
    %c0_i32_0 = arith.constant 0 : i32
    %c0_i32_1 = arith.constant 0 : i32
    return %c0_i32, %c0_i32_0 : i32, i32
  }
  func.func @transform_3(%arg0: i32, %arg1: i32) -> (i32, i32) {
    %c0_i32 = arith.constant 0 : i32
    %c0_i32_0 = arith.constant 0 : i32
    return %arg0, %c0_i32 : i32, i32
  }
  func.func @transform_4(%arg0: i32, %arg1: i32) -> (i32, i32) {
    %c0_i32 = arith.constant 0 : i32
    %c0_i32_0 = arith.constant 0 : i32
    %c0_i32_1 = arith.constant 0 : i32
    return %c0_i32, %c0_i32_0 : i32, i32
  }
  func.func @transform_5(%arg0: i32, %arg1: i32) -> (i32, i32) {
    %c0_i32 = arith.constant 0 : i32
    %c0_i32_0 = arith.constant 0 : i32
    %c0_i32_1 = arith.constant 0 : i32
    return %c0_i32, %c0_i32_0 : i32, i32
  }
  func.func @transform_6(%arg0: i32, %arg1: i32) -> (i32, i32) {
    %c0_i32 = arith.constant 0 : i32
    %c0_i32_0 = arith.constant 0 : i32
    return %arg0, %c0_i32 : i32, i32
  }
}

module attributes {stable_mosaic.version = 11 : i64} {
  func.func @_matmul_kernel(%arg0: i32, %arg1: i32, %arg2: i32, %arg3: memref<16x128xbf16, #tpu.memory_space<vmem>>, %arg4: memref<128x128xbf16, #tpu.memory_space<vmem>>, %arg5: memref<1x128xf32, #tpu.memory_space<vmem>>, %arg6: memref<16x128xf32, #tpu.memory_space<vmem>>, %arg7: memref<16x128xf32, #tpu.memory_space<vmem>>) attributes {dimension_semantics = [#tpu.dimension_semantics<parallel>, #tpu.dimension_semantics<parallel>, #tpu.dimension_semantics<arbitrary>], iteration_bounds = array<i64: 1, 1, 1>, scalar_prefetch = 0 : i64, scratch_operands = 1 : i64, tpu.core_type = #tpu.core_type<tc>, window_params = [{transform_indices = @transform_0, window_bounds = array<i64: 16, 128>}, {transform_indices = @transform_1, window_bounds = array<i64: 128, 128>}, {transform_indices = @transform_2, window_bounds = array<i64: 1, 128>}, {transform_indices = @transform_3, window_bounds = array<i64: 16, 128>}]} {
    %c0_i32 = arith.constant 0 : i32
    %0 = arith.cmpi eq, %arg2, %c0_i32 : i32
    %1 = arith.extui %0 : i1 to i32
    %c0_i32_0 = arith.constant 0 : i32
    %2 = arith.cmpi ne, %1, %c0_i32_0 : i32
    scf.if %2 {
      %cst_10 = arith.constant 0.000000e+00 : f32
      %12 = vector.broadcast %cst_10 : f32 to vector<16x128xf32>
      %c0_11 = arith.constant 0 : index
      %c0_12 = arith.constant 0 : index
      %13 = vector.load %arg7[%c0_11, %c0_12] : memref<16x128xf32, #tpu.memory_space<vmem>>, vector<16x128xf32>
      tpu.vector_store %arg7[%c0_11, %c0_12], %12 {strides = array<i32>} : memref<16x128xf32, #tpu.memory_space<vmem>>, vector<16x128xf32>,
    } else {
    }
    %c0 = arith.constant 0 : index
    %c0_1 = arith.constant 0 : index
    %3 = vector.load %arg7[%c0, %c0_1] : memref<16x128xf32, #tpu.memory_space<vmem>>, vector<16x128xf32>
    %c0_2 = arith.constant 0 : index
    %c0_3 = arith.constant 0 : index
    %4 = vector.load %arg3[%c0_2, %c0_3] : memref<16x128xbf16, #tpu.memory_space<vmem>>, vector<16x128xbf16>
    %c0_4 = arith.constant 0 : index
    %c0_5 = arith.constant 0 : index
    %5 = vector.load %arg4[%c0_4, %c0_5] : memref<128x128xbf16, #tpu.memory_space<vmem>>, vector<128x128xbf16>
    %cst = arith.constant dense<0.000000e+00> : vector<16x128xf32>
    %6 = tpu.matmul %4, %5, %cst {dimension_numbers = #tpu.dot_dimension_numbers<[1], [0], [0], [1], [0, 0, 1, 1], [], []>} : vector<16x128xbf16>, vector<128x128xbf16>, vector<16x128xf32> -> vector<16x128xf32>
    %7 = arith.addf %3, %6 : vector<16x128xf32>
    %c0_6 = arith.constant 0 : index
    %c0_7 = arith.constant 0 : index
    %8 = vector.load %arg7[%c0_6, %c0_7] : memref<16x128xf32, #tpu.memory_space<vmem>>, vector<16x128xf32>
    tpu.vector_store %arg7[%c0_6, %c0_7], %7 {strides = array<i32>} : memref<16x128xf32, #tpu.memory_space<vmem>>, vector<16x128xf32>,
    %c0_i32_8 = arith.constant 0 : i32
    %9 = arith.cmpi eq, %arg2, %c0_i32_8 : i32
    %10 = arith.extui %9 : i1 to i32
    %c0_i32_9 = arith.constant 0 : i32
    %11 = arith.cmpi ne, %10, %c0_i32_9 : i32
    scf.if %11 {
      %c0_10 = arith.constant 0 : index
      %c0_11 = arith.constant 0 : index
      %12 = vector.load %arg7[%c0_10, %c0_11] : memref<16x128xf32, #tpu.memory_space<vmem>>, vector<16x128xf32>
      %c0_12 = arith.constant 0 : index
      %c0_13 = arith.constant 0 : index
      %13 = vector.load %arg5[%c0_12, %c0_13] : memref<1x128xf32, #tpu.memory_space<vmem>>, vector<1x128xf32>
      %14 = vector.broadcast %13 : vector<1x128xf32> to vector<16x128xf32>
      %15 = arith.addf %12, %14 : vector<16x128xf32>
      %c0_14 = arith.constant 0 : index
      %c0_15 = arith.constant 0 : index
      %16 = vector.load %arg6[%c0_14, %c0_15] : memref<16x128xf32, #tpu.memory_space<vmem>>, vector<16x128xf32>
      tpu.vector_store %arg6[%c0_14, %c0_15], %15 {strides = array<i32>} : memref<16x128xf32, #tpu.memory_space<vmem>>, vector<16x128xf32>,
    } else {
    }
    return
  }
  func.func @transform_0(%arg0: i32, %arg1: i32, %arg2: i32) -> (i32, i32) {
    %c0_i32 = arith.constant 0 : i32
    return %arg0, %arg2 : i32, i32
  }
  func.func @transform_1(%arg0: i32, %arg1: i32, %arg2: i32) -> (i32, i32) {
    %c0_i32 = arith.constant 0 : i32
    return %arg2, %arg1 : i32, i32
  }
  func.func @transform_2(%arg0: i32, %arg1: i32, %arg2: i32) -> (i32, i32) {
    %c0_i32 = arith.constant 0 : i32
    %c0_i32_0 = arith.constant 0 : i32
    return %c0_i32, %arg1 : i32, i32
  }
  func.func @transform_3(%arg0: i32, %arg1: i32, %arg2: i32) -> (i32, i32) {
    %c0_i32 = arith.constant 0 : i32
    return %arg0, %arg1 : i32, i32
  }
}

module attributes {stable_mosaic.version = 11 : i64} {
  func.func @_lstm_kernel(%arg0: i32, %arg1: memref<2x8x256xbf16, #tpu.memory_space<vmem>>, %arg2: memref<64x256xbf16, #tpu.memory_space<vmem>>, %arg3: memref<2x8x64xbf16, #tpu.memory_space<vmem>>, %arg4: memref<2x64xf32, #tpu.memory_space<vmem>>, %arg5: memref<2x64xf32, #tpu.memory_space<vmem>>) attributes {dimension_semantics = [#tpu.dimension_semantics<arbitrary>], iteration_bounds = array<i64: 1>, scalar_prefetch = 0 : i64, scratch_operands = 2 : i64, tpu.core_type = #tpu.core_type<tc>, window_params = [{transform_indices = @transform_0, window_bounds = array<i64: 2, 8, 256>}, {pipeline_mode = #tpu.pipeline_mode<synchronous>, transform_indices = @transform_1, window_bounds = array<i64: 64, 256>}, {transform_indices = @transform_2, window_bounds = array<i64: 2, 8, 64>}]} {
    %c0_i32 = arith.constant 0 : i32
    %0 = arith.cmpi eq, %arg0, %c0_i32 : i32
    %1 = arith.extui %0 : i1 to i32
    %c0_i32_0 = arith.constant 0 : i32
    %2 = arith.cmpi ne, %1, %c0_i32_0 : i32
    scf.if %2 {
      %cst_130 = arith.constant 0.000000e+00 : f32
      %324 = vector.broadcast %cst_130 : f32 to vector<2x64xf32>
      %c0_131 = arith.constant 0 : index
      %c0_132 = arith.constant 0 : index
      %325 = vector.load %arg4[%c0_131, %c0_132] : memref<2x64xf32, #tpu.memory_space<vmem>>, vector<2x64xf32>
      tpu.vector_store %arg4[%c0_131, %c0_132], %324 {strides = array<i32>} : memref<2x64xf32, #tpu.memory_space<vmem>>, vector<2x64xf32>,
      %cst_133 = arith.constant 0.000000e+00 : f32
      %326 = vector.broadcast %cst_133 : f32 to vector<2x64xf32>
      %c0_134 = arith.constant 0 : index
      %c0_135 = arith.constant 0 : index
      %327 = vector.load %arg5[%c0_134, %c0_135] : memref<2x64xf32, #tpu.memory_space<vmem>>, vector<2x64xf32>
      tpu.vector_store %arg5[%c0_134, %c0_135], %326 {strides = array<i32>} : memref<2x64xf32, #tpu.memory_space<vmem>>, vector<2x64xf32>,
    } else {
    }
    %c0 = arith.constant 0 : index
    %c0_1 = arith.constant 0 : index
    %3 = vector.load %arg2[%c0, %c0_1] : memref<64x256xbf16, #tpu.memory_space<vmem>>, vector<64x256xbf16>
    %c0_i32_2 = arith.constant 0 : i32
    %c0_3 = arith.constant 0 : index
    %4 = arith.index_cast %c0_i32_2 : i32 to index
    %c0_4 = arith.constant 0 : index
    %5 = vector.load %arg1[%c0_3, %4, %c0_4] : memref<2x8x256xbf16, #tpu.memory_space<vmem>>, vector<2x1x256xbf16>
    %6 = vector.shape_cast %5 : vector<2x1x256xbf16> to vector<2x256xbf16>
    %7 = arith.extf %6 : vector<2x256xbf16> to vector<2x256xf32>
    %c0_5 = arith.constant 0 : index
    %c0_6 = arith.constant 0 : index
    %8 = vector.load %arg4[%c0_5, %c0_6] : memref<2x64xf32, #tpu.memory_space<vmem>>, vector<2x64xf32>
    %9 = arith.truncf %8 : vector<2x64xf32> to vector<2x64xbf16>
    %cst = arith.constant dense<0.000000e+00> : vector<2x256xf32>
    %10 = tpu.matmul %9, %3, %cst {dimension_numbers = #tpu.dot_dimension_numbers<[1], [0], [0], [1], [0, 0, 1, 1], [], []>} : vector<2x64xbf16>, vector<64x256xbf16>, vector<2x256xf32> -> vector<2x256xf32>
    %11 = arith.addf %7, %10 : vector<2x256xf32>
    %12 = vector.extract_strided_slice %11 {offsets = [0, 0], sizes = [2, 64], strides = [1, 1]} : vector<2x256xf32> to vector<2x64xf32>
    %13 = arith.negf %12 : vector<2x64xf32>
    %14 = math.exp %13 : vector<2x64xf32>
    %cst_7 = arith.constant 1.000000e+00 : f32
    %15 = vector.broadcast %cst_7 : f32 to vector<2x64xf32>
    %16 = arith.addf %15, %14 : vector<2x64xf32>
    %17 = arith.divf %15, %16 : vector<2x64xf32>
    %18 = vector.extract_strided_slice %11 {offsets = [0, 64], sizes = [2, 64], strides = [1, 1]} : vector<2x256xf32> to vector<2x64xf32>
    %19 = arith.negf %18 : vector<2x64xf32>
    %20 = math.exp %19 : vector<2x64xf32>
    %cst_8 = arith.constant 1.000000e+00 : f32
    %21 = vector.broadcast %cst_8 : f32 to vector<2x64xf32>
    %22 = arith.addf %21, %20 : vector<2x64xf32>
    %23 = arith.divf %21, %22 : vector<2x64xf32>
    %24 = vector.extract_strided_slice %11 {offsets = [0, 128], sizes = [2, 64], strides = [1, 1]} : vector<2x256xf32> to vector<2x64xf32>
    %25 = math.tanh %24 : vector<2x64xf32>
    %26 = vector.extract_strided_slice %11 {offsets = [0, 192], sizes = [2, 64], strides = [1, 1]} : vector<2x256xf32> to vector<2x64xf32>
    %27 = arith.negf %26 : vector<2x64xf32>
    %28 = math.exp %27 : vector<2x64xf32>
    %cst_9 = arith.constant 1.000000e+00 : f32
    %29 = vector.broadcast %cst_9 : f32 to vector<2x64xf32>
    %30 = arith.addf %29, %28 : vector<2x64xf32>
    %31 = arith.divf %29, %30 : vector<2x64xf32>
    %c0_10 = arith.constant 0 : index
    %c0_11 = arith.constant 0 : index
    %32 = vector.load %arg5[%c0_10, %c0_11] : memref<2x64xf32, #tpu.memory_space<vmem>>, vector<2x64xf32>
    %33 = arith.mulf %23, %32 : vector<2x64xf32>
    %34 = arith.mulf %17, %25 : vector<2x64xf32>
    %35 = arith.addf %33, %34 : vector<2x64xf32>
    %36 = math.tanh %35 : vector<2x64xf32>
    %37 = arith.mulf %31, %36 : vector<2x64xf32>
    %c0_12 = arith.constant 0 : index
    %c0_13 = arith.constant 0 : index
    %38 = vector.load %arg5[%c0_12, %c0_13] : memref<2x64xf32, #tpu.memory_space<vmem>>, vector<2x64xf32>
    tpu.vector_store %arg5[%c0_12, %c0_13], %35 {strides = array<i32>} : memref<2x64xf32, #tpu.memory_space<vmem>>, vector<2x64xf32>,
    %c0_14 = arith.constant 0 : index
    %c0_15 = arith.constant 0 : index
    %39 = vector.load %arg4[%c0_14, %c0_15] : memref<2x64xf32, #tpu.memory_space<vmem>>, vector<2x64xf32>
    tpu.vector_store %arg4[%c0_14, %c0_15], %37 {strides = array<i32>} : memref<2x64xf32, #tpu.memory_space<vmem>>, vector<2x64xf32>,
    %40 = arith.truncf %37 : vector<2x64xf32> to vector<2x64xbf16>
    %41 = vector.shape_cast %40 : vector<2x64xbf16> to vector<2x1x64xbf16>
    %c0_16 = arith.constant 0 : index
    %42 = arith.index_cast %c0_i32_2 : i32 to index
    %c0_17 = arith.constant 0 : index
    %43 = vector.load %arg3[%c0_16, %42, %c0_17] : memref<2x8x64xbf16, #tpu.memory_space<vmem>>, vector<2x1x64xbf16>
    tpu.vector_store %arg3[%c0_16, %42, %c0_17], %41 {strides = array<i32>} : memref<2x8x64xbf16, #tpu.memory_space<vmem>>, vector<2x1x64xbf16>,
    %c1_i32 = arith.constant 1 : i32
    %c0_18 = arith.constant 0 : index
    %44 = arith.index_cast %c1_i32 : i32 to index
    %c0_19 = arith.constant 0 : index
    %45 = vector.load %arg1[%c0_18, %44, %c0_19] : memref<2x8x256xbf16, #tpu.memory_space<vmem>>, vector<2x1x256xbf16>
    %46 = vector.shape_cast %45 : vector<2x1x256xbf16> to vector<2x256xbf16>
    %47 = arith.extf %46 : vector<2x256xbf16> to vector<2x256xf32>
    %c0_20 = arith.constant 0 : index
    %c0_21 = arith.constant 0 : index
    %48 = vector.load %arg4[%c0_20, %c0_21] : memref<2x64xf32, #tpu.memory_space<vmem>>, vector<2x64xf32>
    %49 = arith.truncf %48 : vector<2x64xf32> to vector<2x64xbf16>
    %cst_22 = arith.constant dense<0.000000e+00> : vector<2x256xf32>
    %50 = tpu.matmul %49, %3, %cst_22 {dimension_numbers = #tpu.dot_dimension_numbers<[1], [0], [0], [1], [0, 0, 1, 1], [], []>} : vector<2x64xbf16>, vector<64x256xbf16>, vector<2x256xf32> -> vector<2x256xf32>
    %51 = arith.addf %47, %50 : vector<2x256xf32>
    %52 = vector.extract_strided_slice %51 {offsets = [0, 0], sizes = [2, 64], strides = [1, 1]} : vector<2x256xf32> to vector<2x64xf32>
    %53 = arith.negf %52 : vector<2x64xf32>
    %54 = math.exp %53 : vector<2x64xf32>
    %cst_23 = arith.constant 1.000000e+00 : f32
    %55 = vector.broadcast %cst_23 : f32 to vector<2x64xf32>
    %56 = arith.addf %55, %54 : vector<2x64xf32>
    %57 = arith.divf %55, %56 : vector<2x64xf32>
    %58 = vector.extract_strided_slice %51 {offsets = [0, 64], sizes = [2, 64], strides = [1, 1]} : vector<2x256xf32> to vector<2x64xf32>
    %59 = arith.negf %58 : vector<2x64xf32>
    %60 = math.exp %59 : vector<2x64xf32>
    %cst_24 = arith.constant 1.000000e+00 : f32
    %61 = vector.broadcast %cst_24 : f32 to vector<2x64xf32>
    %62 = arith.addf %61, %60 : vector<2x64xf32>
    %63 = arith.divf %61, %62 : vector<2x64xf32>
    %64 = vector.extract_strided_slice %51 {offsets = [0, 128], sizes = [2, 64], strides = [1, 1]} : vector<2x256xf32> to vector<2x64xf32>
    %65 = math.tanh %64 : vector<2x64xf32>
    %66 = vector.extract_strided_slice %51 {offsets = [0, 192], sizes = [2, 64], strides = [1, 1]} : vector<2x256xf32> to vector<2x64xf32>
    %67 = arith.negf %66 : vector<2x64xf32>
    %68 = math.exp %67 : vector<2x64xf32>
    %cst_25 = arith.constant 1.000000e+00 : f32
    %69 = vector.broadcast %cst_25 : f32 to vector<2x64xf32>
    %70 = arith.addf %69, %68 : vector<2x64xf32>
    %71 = arith.divf %69, %70 : vector<2x64xf32>
    %c0_26 = arith.constant 0 : index
    %c0_27 = arith.constant 0 : index
    %72 = vector.load %arg5[%c0_26, %c0_27] : memref<2x64xf32, #tpu.memory_space<vmem>>, vector<2x64xf32>
    %73 = arith.mulf %63, %72 : vector<2x64xf32>
    %74 = arith.mulf %57, %65 : vector<2x64xf32>
    %75 = arith.addf %73, %74 : vector<2x64xf32>
    %76 = math.tanh %75 : vector<2x64xf32>
    %77 = arith.mulf %71, %76 : vector<2x64xf32>
    %c0_28 = arith.constant 0 : index
    %c0_29 = arith.constant 0 : index
    %78 = vector.load %arg5[%c0_28, %c0_29] : memref<2x64xf32, #tpu.memory_space<vmem>>, vector<2x64xf32>
    tpu.vector_store %arg5[%c0_28, %c0_29], %75 {strides = array<i32>} : memref<2x64xf32, #tpu.memory_space<vmem>>, vector<2x64xf32>,
    %c0_30 = arith.constant 0 : index
    %c0_31 = arith.constant 0 : index
    %79 = vector.load %arg4[%c0_30, %c0_31] : memref<2x64xf32, #tpu.memory_space<vmem>>, vector<2x64xf32>
    tpu.vector_store %arg4[%c0_30, %c0_31], %77 {strides = array<i32>} : memref<2x64xf32, #tpu.memory_space<vmem>>, vector<2x64xf32>,
    %80 = arith.truncf %77 : vector<2x64xf32> to vector<2x64xbf16>
    %81 = vector.shape_cast %80 : vector<2x64xbf16> to vector<2x1x64xbf16>
    %c0_32 = arith.constant 0 : index
    %82 = arith.index_cast %c1_i32 : i32 to index
    %c0_33 = arith.constant 0 : index
    %83 = vector.load %arg3[%c0_32, %82, %c0_33] : memref<2x8x64xbf16, #tpu.memory_space<vmem>>, vector<2x1x64xbf16>
    tpu.vector_store %arg3[%c0_32, %82, %c0_33], %81 {strides = array<i32>} : memref<2x8x64xbf16, #tpu.memory_space<vmem>>, vector<2x1x64xbf16>,
    %c2_i32 = arith.constant 2 : i32
    %c0_34 = arith.constant 0 : index
    %84 = arith.index_cast %c2_i32 : i32 to index
    %c0_35 = arith.constant 0 : index
    %85 = vector.load %arg1[%c0_34, %84, %c0_35] : memref<2x8x256xbf16, #tpu.memory_space<vmem>>, vector<2x1x256xbf16>
    %86 = vector.shape_cast %85 : vector<2x1x256xbf16> to vector<2x256xbf16>
    %87 = arith.extf %86 : vector<2x256xbf16> to vector<2x256xf32>
    %c0_36 = arith.constant 0 : index
    %c0_37 = arith.constant 0 : index
    %88 = vector.load %arg4[%c0_36, %c0_37] : memref<2x64xf32, #tpu.memory_space<vmem>>, vector<2x64xf32>
    %89 = arith.truncf %88 : vector<2x64xf32> to vector<2x64xbf16>
    %cst_38 = arith.constant dense<0.000000e+00> : vector<2x256xf32>
    %90 = tpu.matmul %89, %3, %cst_38 {dimension_numbers = #tpu.dot_dimension_numbers<[1], [0], [0], [1], [0, 0, 1, 1], [], []>} : vector<2x64xbf16>, vector<64x256xbf16>, vector<2x256xf32> -> vector<2x256xf32>
    %91 = arith.addf %87, %90 : vector<2x256xf32>
    %92 = vector.extract_strided_slice %91 {offsets = [0, 0], sizes = [2, 64], strides = [1, 1]} : vector<2x256xf32> to vector<2x64xf32>
    %93 = arith.negf %92 : vector<2x64xf32>
    %94 = math.exp %93 : vector<2x64xf32>
    %cst_39 = arith.constant 1.000000e+00 : f32
    %95 = vector.broadcast %cst_39 : f32 to vector<2x64xf32>
    %96 = arith.addf %95, %94 : vector<2x64xf32>
    %97 = arith.divf %95, %96 : vector<2x64xf32>
    %98 = vector.extract_strided_slice %91 {offsets = [0, 64], sizes = [2, 64], strides = [1, 1]} : vector<2x256xf32> to vector<2x64xf32>
    %99 = arith.negf %98 : vector<2x64xf32>
    %100 = math.exp %99 : vector<2x64xf32>
    %cst_40 = arith.constant 1.000000e+00 : f32
    %101 = vector.broadcast %cst_40 : f32 to vector<2x64xf32>
    %102 = arith.addf %101, %100 : vector<2x64xf32>
    %103 = arith.divf %101, %102 : vector<2x64xf32>
    %104 = vector.extract_strided_slice %91 {offsets = [0, 128], sizes = [2, 64], strides = [1, 1]} : vector<2x256xf32> to vector<2x64xf32>
    %105 = math.tanh %104 : vector<2x64xf32>
    %106 = vector.extract_strided_slice %91 {offsets = [0, 192], sizes = [2, 64], strides = [1, 1]} : vector<2x256xf32> to vector<2x64xf32>
    %107 = arith.negf %106 : vector<2x64xf32>
    %108 = math.exp %107 : vector<2x64xf32>
    %cst_41 = arith.constant 1.000000e+00 : f32
    %109 = vector.broadcast %cst_41 : f32 to vector<2x64xf32>
    %110 = arith.addf %109, %108 : vector<2x64xf32>
    %111 = arith.divf %109, %110 : vector<2x64xf32>
    %c0_42 = arith.constant 0 : index
    %c0_43 = arith.constant 0 : index
    %112 = vector.load %arg5[%c0_42, %c0_43] : memref<2x64xf32, #tpu.memory_space<vmem>>, vector<2x64xf32>
    %113 = arith.mulf %103, %112 : vector<2x64xf32>
    %114 = arith.mulf %97, %105 : vector<2x64xf32>
    %115 = arith.addf %113, %114 : vector<2x64xf32>
    %116 = math.tanh %115 : vector<2x64xf32>
    %117 = arith.mulf %111, %116 : vector<2x64xf32>
    %c0_44 = arith.constant 0 : index
    %c0_45 = arith.constant 0 : index
    %118 = vector.load %arg5[%c0_44, %c0_45] : memref<2x64xf32, #tpu.memory_space<vmem>>, vector<2x64xf32>
    tpu.vector_store %arg5[%c0_44, %c0_45], %115 {strides = array<i32>} : memref<2x64xf32, #tpu.memory_space<vmem>>, vector<2x64xf32>,
    %c0_46 = arith.constant 0 : index
    %c0_47 = arith.constant 0 : index
    %119 = vector.load %arg4[%c0_46, %c0_47] : memref<2x64xf32, #tpu.memory_space<vmem>>, vector<2x64xf32>
    tpu.vector_store %arg4[%c0_46, %c0_47], %117 {strides = array<i32>} : memref<2x64xf32, #tpu.memory_space<vmem>>, vector<2x64xf32>,
    %120 = arith.truncf %117 : vector<2x64xf32> to vector<2x64xbf16>
    %121 = vector.shape_cast %120 : vector<2x64xbf16> to vector<2x1x64xbf16>
    %c0_48 = arith.constant 0 : index
    %122 = arith.index_cast %c2_i32 : i32 to index
    %c0_49 = arith.constant 0 : index
    %123 = vector.load %arg3[%c0_48, %122, %c0_49] : memref<2x8x64xbf16, #tpu.memory_space<vmem>>, vector<2x1x64xbf16>
    tpu.vector_store %arg3[%c0_48, %122, %c0_49], %121 {strides = array<i32>} : memref<2x8x64xbf16, #tpu.memory_space<vmem>>, vector<2x1x64xbf16>,
    %c3_i32 = arith.constant 3 : i32
    %c0_50 = arith.constant 0 : index
    %124 = arith.index_cast %c3_i32 : i32 to index
    %c0_51 = arith.constant 0 : index
    %125 = vector.load %arg1[%c0_50, %124, %c0_51] : memref<2x8x256xbf16, #tpu.memory_space<vmem>>, vector<2x1x256xbf16>
    %126 = vector.shape_cast %125 : vector<2x1x256xbf16> to vector<2x256xbf16>
    %127 = arith.extf %126 : vector<2x256xbf16> to vector<2x256xf32>
    %c0_52 = arith.constant 0 : index
    %c0_53 = arith.constant 0 : index
    %128 = vector.load %arg4[%c0_52, %c0_53] : memref<2x64xf32, #tpu.memory_space<vmem>>, vector<2x64xf32>
    %129 = arith.truncf %128 : vector<2x64xf32> to vector<2x64xbf16>
    %cst_54 = arith.constant dense<0.000000e+00> : vector<2x256xf32>
    %130 = tpu.matmul %129, %3, %cst_54 {dimension_numbers = #tpu.dot_dimension_numbers<[1], [0], [0], [1], [0, 0, 1, 1], [], []>} : vector<2x64xbf16>, vector<64x256xbf16>, vector<2x256xf32> -> vector<2x256xf32>
    %131 = arith.addf %127, %130 : vector<2x256xf32>
    %132 = vector.extract_strided_slice %131 {offsets = [0, 0], sizes = [2, 64], strides = [1, 1]} : vector<2x256xf32> to vector<2x64xf32>
    %133 = arith.negf %132 : vector<2x64xf32>
    %134 = math.exp %133 : vector<2x64xf32>
    %cst_55 = arith.constant 1.000000e+00 : f32
    %135 = vector.broadcast %cst_55 : f32 to vector<2x64xf32>
    %136 = arith.addf %135, %134 : vector<2x64xf32>
    %137 = arith.divf %135, %136 : vector<2x64xf32>
    %138 = vector.extract_strided_slice %131 {offsets = [0, 64], sizes = [2, 64], strides = [1, 1]} : vector<2x256xf32> to vector<2x64xf32>
    %139 = arith.negf %138 : vector<2x64xf32>
    %140 = math.exp %139 : vector<2x64xf32>
    %cst_56 = arith.constant 1.000000e+00 : f32
    %141 = vector.broadcast %cst_56 : f32 to vector<2x64xf32>
    %142 = arith.addf %141, %140 : vector<2x64xf32>
    %143 = arith.divf %141, %142 : vector<2x64xf32>
    %144 = vector.extract_strided_slice %131 {offsets = [0, 128], sizes = [2, 64], strides = [1, 1]} : vector<2x256xf32> to vector<2x64xf32>
    %145 = math.tanh %144 : vector<2x64xf32>
    %146 = vector.extract_strided_slice %131 {offsets = [0, 192], sizes = [2, 64], strides = [1, 1]} : vector<2x256xf32> to vector<2x64xf32>
    %147 = arith.negf %146 : vector<2x64xf32>
    %148 = math.exp %147 : vector<2x64xf32>
    %cst_57 = arith.constant 1.000000e+00 : f32
    %149 = vector.broadcast %cst_57 : f32 to vector<2x64xf32>
    %150 = arith.addf %149, %148 : vector<2x64xf32>
    %151 = arith.divf %149, %150 : vector<2x64xf32>
    %c0_58 = arith.constant 0 : index
    %c0_59 = arith.constant 0 : index
    %152 = vector.load %arg5[%c0_58, %c0_59] : memref<2x64xf32, #tpu.memory_space<vmem>>, vector<2x64xf32>
    %153 = arith.mulf %143, %152 : vector<2x64xf32>
    %154 = arith.mulf %137, %145 : vector<2x64xf32>
    %155 = arith.addf %153, %154 : vector<2x64xf32>
    %156 = math.tanh %155 : vector<2x64xf32>
    %157 = arith.mulf %151, %156 : vector<2x64xf32>
    %c0_60 = arith.constant 0 : index
    %c0_61 = arith.constant 0 : index
    %158 = vector.load %arg5[%c0_60, %c0_61] : memref<2x64xf32, #tpu.memory_space<vmem>>, vector<2x64xf32>
    tpu.vector_store %arg5[%c0_60, %c0_61], %155 {strides = array<i32>} : memref<2x64xf32, #tpu.memory_space<vmem>>, vector<2x64xf32>,
    %c0_62 = arith.constant 0 : index
    %c0_63 = arith.constant 0 : index
    %159 = vector.load %arg4[%c0_62, %c0_63] : memref<2x64xf32, #tpu.memory_space<vmem>>, vector<2x64xf32>
    tpu.vector_store %arg4[%c0_62, %c0_63], %157 {strides = array<i32>} : memref<2x64xf32, #tpu.memory_space<vmem>>, vector<2x64xf32>,
    %160 = arith.truncf %157 : vector<2x64xf32> to vector<2x64xbf16>
    %161 = vector.shape_cast %160 : vector<2x64xbf16> to vector<2x1x64xbf16>
    %c0_64 = arith.constant 0 : index
    %162 = arith.index_cast %c3_i32 : i32 to index
    %c0_65 = arith.constant 0 : index
    %163 = vector.load %arg3[%c0_64, %162, %c0_65] : memref<2x8x64xbf16, #tpu.memory_space<vmem>>, vector<2x1x64xbf16>
    tpu.vector_store %arg3[%c0_64, %162, %c0_65], %161 {strides = array<i32>} : memref<2x8x64xbf16, #tpu.memory_space<vmem>>, vector<2x1x64xbf16>,
    %c4_i32 = arith.constant 4 : i32
    %c0_66 = arith.constant 0 : index
    %164 = arith.index_cast %c4_i32 : i32 to index
    %c0_67 = arith.constant 0 : index
    %165 = vector.load %arg1[%c0_66, %164, %c0_67] : memref<2x8x256xbf16, #tpu.memory_space<vmem>>, vector<2x1x256xbf16>
    %166 = vector.shape_cast %165 : vector<2x1x256xbf16> to vector<2x256xbf16>
    %167 = arith.extf %166 : vector<2x256xbf16> to vector<2x256xf32>
    %c0_68 = arith.constant 0 : index
    %c0_69 = arith.constant 0 : index
    %168 = vector.load %arg4[%c0_68, %c0_69] : memref<2x64xf32, #tpu.memory_space<vmem>>, vector<2x64xf32>
    %169 = arith.truncf %168 : vector<2x64xf32> to vector<2x64xbf16>
    %cst_70 = arith.constant dense<0.000000e+00> : vector<2x256xf32>
    %170 = tpu.matmul %169, %3, %cst_70 {dimension_numbers = #tpu.dot_dimension_numbers<[1], [0], [0], [1], [0, 0, 1, 1], [], []>} : vector<2x64xbf16>, vector<64x256xbf16>, vector<2x256xf32> -> vector<2x256xf32>
    %171 = arith.addf %167, %170 : vector<2x256xf32>
    %172 = vector.extract_strided_slice %171 {offsets = [0, 0], sizes = [2, 64], strides = [1, 1]} : vector<2x256xf32> to vector<2x64xf32>
    %173 = arith.negf %172 : vector<2x64xf32>
    %174 = math.exp %173 : vector<2x64xf32>
    %cst_71 = arith.constant 1.000000e+00 : f32
    %175 = vector.broadcast %cst_71 : f32 to vector<2x64xf32>
    %176 = arith.addf %175, %174 : vector<2x64xf32>
    %177 = arith.divf %175, %176 : vector<2x64xf32>
    %178 = vector.extract_strided_slice %171 {offsets = [0, 64], sizes = [2, 64], strides = [1, 1]} : vector<2x256xf32> to vector<2x64xf32>
    %179 = arith.negf %178 : vector<2x64xf32>
    %180 = math.exp %179 : vector<2x64xf32>
    %cst_72 = arith.constant 1.000000e+00 : f32
    %181 = vector.broadcast %cst_72 : f32 to vector<2x64xf32>
    %182 = arith.addf %181, %180 : vector<2x64xf32>
    %183 = arith.divf %181, %182 : vector<2x64xf32>
    %184 = vector.extract_strided_slice %171 {offsets = [0, 128], sizes = [2, 64], strides = [1, 1]} : vector<2x256xf32> to vector<2x64xf32>
    %185 = math.tanh %184 : vector<2x64xf32>
    %186 = vector.extract_strided_slice %171 {offsets = [0, 192], sizes = [2, 64], strides = [1, 1]} : vector<2x256xf32> to vector<2x64xf32>
    %187 = arith.negf %186 : vector<2x64xf32>
    %188 = math.exp %187 : vector<2x64xf32>
    %cst_73 = arith.constant 1.000000e+00 : f32
    %189 = vector.broadcast %cst_73 : f32 to vector<2x64xf32>
    %190 = arith.addf %189, %188 : vector<2x64xf32>
    %191 = arith.divf %189, %190 : vector<2x64xf32>
    %c0_74 = arith.constant 0 : index
    %c0_75 = arith.constant 0 : index
    %192 = vector.load %arg5[%c0_74, %c0_75] : memref<2x64xf32, #tpu.memory_space<vmem>>, vector<2x64xf32>
    %193 = arith.mulf %183, %192 : vector<2x64xf32>
    %194 = arith.mulf %177, %185 : vector<2x64xf32>
    %195 = arith.addf %193, %194 : vector<2x64xf32>
    %196 = math.tanh %195 : vector<2x64xf32>
    %197 = arith.mulf %191, %196 : vector<2x64xf32>
    %c0_76 = arith.constant 0 : index
    %c0_77 = arith.constant 0 : index
    %198 = vector.load %arg5[%c0_76, %c0_77] : memref<2x64xf32, #tpu.memory_space<vmem>>, vector<2x64xf32>
    tpu.vector_store %arg5[%c0_76, %c0_77], %195 {strides = array<i32>} : memref<2x64xf32, #tpu.memory_space<vmem>>, vector<2x64xf32>,
    %c0_78 = arith.constant 0 : index
    %c0_79 = arith.constant 0 : index
    %199 = vector.load %arg4[%c0_78, %c0_79] : memref<2x64xf32, #tpu.memory_space<vmem>>, vector<2x64xf32>
    tpu.vector_store %arg4[%c0_78, %c0_79], %197 {strides = array<i32>} : memref<2x64xf32, #tpu.memory_space<vmem>>, vector<2x64xf32>,
    %200 = arith.truncf %197 : vector<2x64xf32> to vector<2x64xbf16>
    %201 = vector.shape_cast %200 : vector<2x64xbf16> to vector<2x1x64xbf16>
    %c0_80 = arith.constant 0 : index
    %202 = arith.index_cast %c4_i32 : i32 to index
    %c0_81 = arith.constant 0 : index
    %203 = vector.load %arg3[%c0_80, %202, %c0_81] : memref<2x8x64xbf16, #tpu.memory_space<vmem>>, vector<2x1x64xbf16>
    tpu.vector_store %arg3[%c0_80, %202, %c0_81], %201 {strides = array<i32>} : memref<2x8x64xbf16, #tpu.memory_space<vmem>>, vector<2x1x64xbf16>,
    %c5_i32 = arith.constant 5 : i32
    %c0_82 = arith.constant 0 : index
    %204 = arith.index_cast %c5_i32 : i32 to index
    %c0_83 = arith.constant 0 : index
    %205 = vector.load %arg1[%c0_82, %204, %c0_83] : memref<2x8x256xbf16, #tpu.memory_space<vmem>>, vector<2x1x256xbf16>
    %206 = vector.shape_cast %205 : vector<2x1x256xbf16> to vector<2x256xbf16>
    %207 = arith.extf %206 : vector<2x256xbf16> to vector<2x256xf32>
    %c0_84 = arith.constant 0 : index
    %c0_85 = arith.constant 0 : index
    %208 = vector.load %arg4[%c0_84, %c0_85] : memref<2x64xf32, #tpu.memory_space<vmem>>, vector<2x64xf32>
    %209 = arith.truncf %208 : vector<2x64xf32> to vector<2x64xbf16>
    %cst_86 = arith.constant dense<0.000000e+00> : vector<2x256xf32>
    %210 = tpu.matmul %209, %3, %cst_86 {dimension_numbers = #tpu.dot_dimension_numbers<[1], [0], [0], [1], [0, 0, 1, 1], [], []>} : vector<2x64xbf16>, vector<64x256xbf16>, vector<2x256xf32> -> vector<2x256xf32>
    %211 = arith.addf %207, %210 : vector<2x256xf32>
    %212 = vector.extract_strided_slice %211 {offsets = [0, 0], sizes = [2, 64], strides = [1, 1]} : vector<2x256xf32> to vector<2x64xf32>
    %213 = arith.negf %212 : vector<2x64xf32>
    %214 = math.exp %213 : vector<2x64xf32>
    %cst_87 = arith.constant 1.000000e+00 : f32
    %215 = vector.broadcast %cst_87 : f32 to vector<2x64xf32>
    %216 = arith.addf %215, %214 : vector<2x64xf32>
    %217 = arith.divf %215, %216 : vector<2x64xf32>
    %218 = vector.extract_strided_slice %211 {offsets = [0, 64], sizes = [2, 64], strides = [1, 1]} : vector<2x256xf32> to vector<2x64xf32>
    %219 = arith.negf %218 : vector<2x64xf32>
    %220 = math.exp %219 : vector<2x64xf32>
    %cst_88 = arith.constant 1.000000e+00 : f32
    %221 = vector.broadcast %cst_88 : f32 to vector<2x64xf32>
    %222 = arith.addf %221, %220 : vector<2x64xf32>
    %223 = arith.divf %221, %222 : vector<2x64xf32>
    %224 = vector.extract_strided_slice %211 {offsets = [0, 128], sizes = [2, 64], strides = [1, 1]} : vector<2x256xf32> to vector<2x64xf32>
    %225 = math.tanh %224 : vector<2x64xf32>
    %226 = vector.extract_strided_slice %211 {offsets = [0, 192], sizes = [2, 64], strides = [1, 1]} : vector<2x256xf32> to vector<2x64xf32>
    %227 = arith.negf %226 : vector<2x64xf32>
    %228 = math.exp %227 : vector<2x64xf32>
    %cst_89 = arith.constant 1.000000e+00 : f32
    %229 = vector.broadcast %cst_89 : f32 to vector<2x64xf32>
    %230 = arith.addf %229, %228 : vector<2x64xf32>
    %231 = arith.divf %229, %230 : vector<2x64xf32>
    %c0_90 = arith.constant 0 : index
    %c0_91 = arith.constant 0 : index
    %232 = vector.load %arg5[%c0_90, %c0_91] : memref<2x64xf32, #tpu.memory_space<vmem>>, vector<2x64xf32>
    %233 = arith.mulf %223, %232 : vector<2x64xf32>
    %234 = arith.mulf %217, %225 : vector<2x64xf32>
    %235 = arith.addf %233, %234 : vector<2x64xf32>
    %236 = math.tanh %235 : vector<2x64xf32>
    %237 = arith.mulf %231, %236 : vector<2x64xf32>
    %c0_92 = arith.constant 0 : index
    %c0_93 = arith.constant 0 : index
    %238 = vector.load %arg5[%c0_92, %c0_93] : memref<2x64xf32, #tpu.memory_space<vmem>>, vector<2x64xf32>
    tpu.vector_store %arg5[%c0_92, %c0_93], %235 {strides = array<i32>} : memref<2x64xf32, #tpu.memory_space<vmem>>, vector<2x64xf32>,
    %c0_94 = arith.constant 0 : index
    %c0_95 = arith.constant 0 : index
    %239 = vector.load %arg4[%c0_94, %c0_95] : memref<2x64xf32, #tpu.memory_space<vmem>>, vector<2x64xf32>
    tpu.vector_store %arg4[%c0_94, %c0_95], %237 {strides = array<i32>} : memref<2x64xf32, #tpu.memory_space<vmem>>, vector<2x64xf32>,
    %240 = arith.truncf %237 : vector<2x64xf32> to vector<2x64xbf16>
    %241 = vector.shape_cast %240 : vector<2x64xbf16> to vector<2x1x64xbf16>
    %c0_96 = arith.constant 0 : index
    %242 = arith.index_cast %c5_i32 : i32 to index
    %c0_97 = arith.constant 0 : index
    %243 = vector.load %arg3[%c0_96, %242, %c0_97] : memref<2x8x64xbf16, #tpu.memory_space<vmem>>, vector<2x1x64xbf16>
    tpu.vector_store %arg3[%c0_96, %242, %c0_97], %241 {strides = array<i32>} : memref<2x8x64xbf16, #tpu.memory_space<vmem>>, vector<2x1x64xbf16>,
    %c6_i32 = arith.constant 6 : i32
    %c0_98 = arith.constant 0 : index
    %244 = arith.index_cast %c6_i32 : i32 to index
    %c0_99 = arith.constant 0 : index
    %245 = vector.load %arg1[%c0_98, %244, %c0_99] : memref<2x8x256xbf16, #tpu.memory_space<vmem>>, vector<2x1x256xbf16>
    %246 = vector.shape_cast %245 : vector<2x1x256xbf16> to vector<2x256xbf16>
    %247 = arith.extf %246 : vector<2x256xbf16> to vector<2x256xf32>
    %c0_100 = arith.constant 0 : index
    %c0_101 = arith.constant 0 : index
    %248 = vector.load %arg4[%c0_100, %c0_101] : memref<2x64xf32, #tpu.memory_space<vmem>>, vector<2x64xf32>
    %249 = arith.truncf %248 : vector<2x64xf32> to vector<2x64xbf16>
    %cst_102 = arith.constant dense<0.000000e+00> : vector<2x256xf32>
    %250 = tpu.matmul %249, %3, %cst_102 {dimension_numbers = #tpu.dot_dimension_numbers<[1], [0], [0], [1], [0, 0, 1, 1], [], []>} : vector<2x64xbf16>, vector<64x256xbf16>, vector<2x256xf32> -> vector<2x256xf32>
    %251 = arith.addf %247, %250 : vector<2x256xf32>
    %252 = vector.extract_strided_slice %251 {offsets = [0, 0], sizes = [2, 64], strides = [1, 1]} : vector<2x256xf32> to vector<2x64xf32>
    %253 = arith.negf %252 : vector<2x64xf32>
    %254 = math.exp %253 : vector<2x64xf32>
    %cst_103 = arith.constant 1.000000e+00 : f32
    %255 = vector.broadcast %cst_103 : f32 to vector<2x64xf32>
    %256 = arith.addf %255, %254 : vector<2x64xf32>
    %257 = arith.divf %255, %256 : vector<2x64xf32>
    %258 = vector.extract_strided_slice %251 {offsets = [0, 64], sizes = [2, 64], strides = [1, 1]} : vector<2x256xf32> to vector<2x64xf32>
    %259 = arith.negf %258 : vector<2x64xf32>
    %260 = math.exp %259 : vector<2x64xf32>
    %cst_104 = arith.constant 1.000000e+00 : f32
    %261 = vector.broadcast %cst_104 : f32 to vector<2x64xf32>
    %262 = arith.addf %261, %260 : vector<2x64xf32>
    %263 = arith.divf %261, %262 : vector<2x64xf32>
    %264 = vector.extract_strided_slice %251 {offsets = [0, 128], sizes = [2, 64], strides = [1, 1]} : vector<2x256xf32> to vector<2x64xf32>
    %265 = math.tanh %264 : vector<2x64xf32>
    %266 = vector.extract_strided_slice %251 {offsets = [0, 192], sizes = [2, 64], strides = [1, 1]} : vector<2x256xf32> to vector<2x64xf32>
    %267 = arith.negf %266 : vector<2x64xf32>
    %268 = math.exp %267 : vector<2x64xf32>
    %cst_105 = arith.constant 1.000000e+00 : f32
    %269 = vector.broadcast %cst_105 : f32 to vector<2x64xf32>
    %270 = arith.addf %269, %268 : vector<2x64xf32>
    %271 = arith.divf %269, %270 : vector<2x64xf32>
    %c0_106 = arith.constant 0 : index
    %c0_107 = arith.constant 0 : index
    %272 = vector.load %arg5[%c0_106, %c0_107] : memref<2x64xf32, #tpu.memory_space<vmem>>, vector<2x64xf32>
    %273 = arith.mulf %263, %272 : vector<2x64xf32>
    %274 = arith.mulf %257, %265 : vector<2x64xf32>
    %275 = arith.addf %273, %274 : vector<2x64xf32>
    %276 = math.tanh %275 : vector<2x64xf32>
    %277 = arith.mulf %271, %276 : vector<2x64xf32>
    %c0_108 = arith.constant 0 : index
    %c0_109 = arith.constant 0 : index
    %278 = vector.load %arg5[%c0_108, %c0_109] : memref<2x64xf32, #tpu.memory_space<vmem>>, vector<2x64xf32>
    tpu.vector_store %arg5[%c0_108, %c0_109], %275 {strides = array<i32>} : memref<2x64xf32, #tpu.memory_space<vmem>>, vector<2x64xf32>,
    %c0_110 = arith.constant 0 : index
    %c0_111 = arith.constant 0 : index
    %279 = vector.load %arg4[%c0_110, %c0_111] : memref<2x64xf32, #tpu.memory_space<vmem>>, vector<2x64xf32>
    tpu.vector_store %arg4[%c0_110, %c0_111], %277 {strides = array<i32>} : memref<2x64xf32, #tpu.memory_space<vmem>>, vector<2x64xf32>,
    %280 = arith.truncf %277 : vector<2x64xf32> to vector<2x64xbf16>
    %281 = vector.shape_cast %280 : vector<2x64xbf16> to vector<2x1x64xbf16>
    %c0_112 = arith.constant 0 : index
    %282 = arith.index_cast %c6_i32 : i32 to index
    %c0_113 = arith.constant 0 : index
    %283 = vector.load %arg3[%c0_112, %282, %c0_113] : memref<2x8x64xbf16, #tpu.memory_space<vmem>>, vector<2x1x64xbf16>
    tpu.vector_store %arg3[%c0_112, %282, %c0_113], %281 {strides = array<i32>} : memref<2x8x64xbf16, #tpu.memory_space<vmem>>, vector<2x1x64xbf16>,
    %c7_i32 = arith.constant 7 : i32
    %c0_114 = arith.constant 0 : index
    %284 = arith.index_cast %c7_i32 : i32 to index
    %c0_115 = arith.constant 0 : index
    %285 = vector.load %arg1[%c0_114, %284, %c0_115] : memref<2x8x256xbf16, #tpu.memory_space<vmem>>, vector<2x1x256xbf16>
    %286 = vector.shape_cast %285 : vector<2x1x256xbf16> to vector<2x256xbf16>
    %287 = arith.extf %286 : vector<2x256xbf16> to vector<2x256xf32>
    %c0_116 = arith.constant 0 : index
    %c0_117 = arith.constant 0 : index
    %288 = vector.load %arg4[%c0_116, %c0_117] : memref<2x64xf32, #tpu.memory_space<vmem>>, vector<2x64xf32>
    %289 = arith.truncf %288 : vector<2x64xf32> to vector<2x64xbf16>
    %cst_118 = arith.constant dense<0.000000e+00> : vector<2x256xf32>
    %290 = tpu.matmul %289, %3, %cst_118 {dimension_numbers = #tpu.dot_dimension_numbers<[1], [0], [0], [1], [0, 0, 1, 1], [], []>} : vector<2x64xbf16>, vector<64x256xbf16>, vector<2x256xf32> -> vector<2x256xf32>
    %291 = arith.addf %287, %290 : vector<2x256xf32>
    %292 = vector.extract_strided_slice %291 {offsets = [0, 0], sizes = [2, 64], strides = [1, 1]} : vector<2x256xf32> to vector<2x64xf32>
    %293 = arith.negf %292 : vector<2x64xf32>
    %294 = math.exp %293 : vector<2x64xf32>
    %cst_119 = arith.constant 1.000000e+00 : f32
    %295 = vector.broadcast %cst_119 : f32 to vector<2x64xf32>
    %296 = arith.addf %295, %294 : vector<2x64xf32>
    %297 = arith.divf %295, %296 : vector<2x64xf32>
    %298 = vector.extract_strided_slice %291 {offsets = [0, 64], sizes = [2, 64], strides = [1, 1]} : vector<2x256xf32> to vector<2x64xf32>
    %299 = arith.negf %298 : vector<2x64xf32>
    %300 = math.exp %299 : vector<2x64xf32>
    %cst_120 = arith.constant 1.000000e+00 : f32
    %301 = vector.broadcast %cst_120 : f32 to vector<2x64xf32>
    %302 = arith.addf %301, %300 : vector<2x64xf32>
    %303 = arith.divf %301, %302 : vector<2x64xf32>
    %304 = vector.extract_strided_slice %291 {offsets = [0, 128], sizes = [2, 64], strides = [1, 1]} : vector<2x256xf32> to vector<2x64xf32>
    %305 = math.tanh %304 : vector<2x64xf32>
    %306 = vector.extract_strided_slice %291 {offsets = [0, 192], sizes = [2, 64], strides = [1, 1]} : vector<2x256xf32> to vector<2x64xf32>
    %307 = arith.negf %306 : vector<2x64xf32>
    %308 = math.exp %307 : vector<2x64xf32>
    %cst_121 = arith.constant 1.000000e+00 : f32
    %309 = vector.broadcast %cst_121 : f32 to vector<2x64xf32>
    %310 = arith.addf %309, %308 : vector<2x64xf32>
    %311 = arith.divf %309, %310 : vector<2x64xf32>
    %c0_122 = arith.constant 0 : index
    %c0_123 = arith.constant 0 : index
    %312 = vector.load %arg5[%c0_122, %c0_123] : memref<2x64xf32, #tpu.memory_space<vmem>>, vector<2x64xf32>
    %313 = arith.mulf %303, %312 : vector<2x64xf32>
    %314 = arith.mulf %297, %305 : vector<2x64xf32>
    %315 = arith.addf %313, %314 : vector<2x64xf32>
    %316 = math.tanh %315 : vector<2x64xf32>
    %317 = arith.mulf %311, %316 : vector<2x64xf32>
    %c0_124 = arith.constant 0 : index
    %c0_125 = arith.constant 0 : index
    %318 = vector.load %arg5[%c0_124, %c0_125] : memref<2x64xf32, #tpu.memory_space<vmem>>, vector<2x64xf32>
    tpu.vector_store %arg5[%c0_124, %c0_125], %315 {strides = array<i32>} : memref<2x64xf32, #tpu.memory_space<vmem>>, vector<2x64xf32>,
    %c0_126 = arith.constant 0 : index
    %c0_127 = arith.constant 0 : index
    %319 = vector.load %arg4[%c0_126, %c0_127] : memref<2x64xf32, #tpu.memory_space<vmem>>, vector<2x64xf32>
    tpu.vector_store %arg4[%c0_126, %c0_127], %317 {strides = array<i32>} : memref<2x64xf32, #tpu.memory_space<vmem>>, vector<2x64xf32>,
    %320 = arith.truncf %317 : vector<2x64xf32> to vector<2x64xbf16>
    %321 = vector.shape_cast %320 : vector<2x64xbf16> to vector<2x1x64xbf16>
    %c0_128 = arith.constant 0 : index
    %322 = arith.index_cast %c7_i32 : i32 to index
    %c0_129 = arith.constant 0 : index
    %323 = vector.load %arg3[%c0_128, %322, %c0_129] : memref<2x8x64xbf16, #tpu.memory_space<vmem>>, vector<2x1x64xbf16>
    tpu.vector_store %arg3[%c0_128, %322, %c0_129], %321 {strides = array<i32>} : memref<2x8x64xbf16, #tpu.memory_space<vmem>>, vector<2x1x64xbf16>,
    %c8_i32 = arith.constant 8 : i32
    return
  }
  func.func @transform_0(%arg0: i32) -> (i32, i32, i32) {
    %c0_i32 = arith.constant 0 : i32
    %c0_i32_0 = arith.constant 0 : i32
    %c0_i32_1 = arith.constant 0 : i32
    return %c0_i32, %arg0, %c0_i32_0 : i32, i32, i32
  }
  func.func @transform_1(%arg0: i32) -> (i32, i32) {
    %c0_i32 = arith.constant 0 : i32
    %c0_i32_0 = arith.constant 0 : i32
    %c0_i32_1 = arith.constant 0 : i32
    return %c0_i32, %c0_i32_0 : i32, i32
  }
  func.func @transform_2(%arg0: i32) -> (i32, i32, i32) {
    %c0_i32 = arith.constant 0 : i32
    %c0_i32_0 = arith.constant 0 : i32
    %c0_i32_1 = arith.constant 0 : i32
    return %c0_i32, %arg0, %c0_i32_0 : i32, i32, i32
  }
}

module attributes {stable_mosaic.version = 11 : i64} {
  func.func @_lstm_kernel(%arg0: i32, %arg1: memref<2x8x256xbf16, #tpu.memory_space<vmem>>, %arg2: memref<64x256xbf16, #tpu.memory_space<vmem>>, %arg3: memref<2x8x64xbf16, #tpu.memory_space<vmem>>, %arg4: memref<2x64xf32, #tpu.memory_space<vmem>>, %arg5: memref<2x64xf32, #tpu.memory_space<vmem>>) attributes {dimension_semantics = [#tpu.dimension_semantics<arbitrary>], iteration_bounds = array<i64: 1>, scalar_prefetch = 0 : i64, scratch_operands = 2 : i64, tpu.core_type = #tpu.core_type<tc>, window_params = [{transform_indices = @transform_0, window_bounds = array<i64: 2, 8, 256>}, {pipeline_mode = #tpu.pipeline_mode<synchronous>, transform_indices = @transform_1, window_bounds = array<i64: 64, 256>}, {transform_indices = @transform_2, window_bounds = array<i64: 2, 8, 64>}]} {
    %c0_i32 = arith.constant 0 : i32
    %0 = arith.cmpi eq, %arg0, %c0_i32 : i32
    %1 = arith.extui %0 : i1 to i32
    %c0_i32_0 = arith.constant 0 : i32
    %2 = arith.cmpi ne, %1, %c0_i32_0 : i32
    scf.if %2 {
      %cst_138 = arith.constant 0.000000e+00 : f32
      %332 = vector.broadcast %cst_138 : f32 to vector<2x64xf32>
      %c0_139 = arith.constant 0 : index
      %c0_140 = arith.constant 0 : index
      %333 = vector.load %arg4[%c0_139, %c0_140] : memref<2x64xf32, #tpu.memory_space<vmem>>, vector<2x64xf32>
      tpu.vector_store %arg4[%c0_139, %c0_140], %332 {strides = array<i32>} : memref<2x64xf32, #tpu.memory_space<vmem>>, vector<2x64xf32>,
      %cst_141 = arith.constant 0.000000e+00 : f32
      %334 = vector.broadcast %cst_141 : f32 to vector<2x64xf32>
      %c0_142 = arith.constant 0 : index
      %c0_143 = arith.constant 0 : index
      %335 = vector.load %arg5[%c0_142, %c0_143] : memref<2x64xf32, #tpu.memory_space<vmem>>, vector<2x64xf32>
      tpu.vector_store %arg5[%c0_142, %c0_143], %334 {strides = array<i32>} : memref<2x64xf32, #tpu.memory_space<vmem>>, vector<2x64xf32>,
    } else {
    }
    %c0 = arith.constant 0 : index
    %c0_1 = arith.constant 0 : index
    %3 = vector.load %arg2[%c0, %c0_1] : memref<64x256xbf16, #tpu.memory_space<vmem>>, vector<64x256xbf16>
    %c0_i32_2 = arith.constant 0 : i32
    %c7_i32 = arith.constant 7 : i32
    %4 = arith.subi %c7_i32, %c0_i32_2 : i32
    %c0_3 = arith.constant 0 : index
    %5 = arith.index_cast %4 : i32 to index
    %c0_4 = arith.constant 0 : index
    %6 = vector.load %arg1[%c0_3, %5, %c0_4] : memref<2x8x256xbf16, #tpu.memory_space<vmem>>, vector<2x1x256xbf16>
    %7 = vector.shape_cast %6 : vector<2x1x256xbf16> to vector<2x256xbf16>
    %8 = arith.extf %7 : vector<2x256xbf16> to vector<2x256xf32>
    %c0_5 = arith.constant 0 : index
    %c0_6 = arith.constant 0 : index
    %9 = vector.load %arg4[%c0_5, %c0_6] : memref<2x64xf32, #tpu.memory_space<vmem>>, vector<2x64xf32>
    %10 = arith.truncf %9 : vector<2x64xf32> to vector<2x64xbf16>
    %cst = arith.constant dense<0.000000e+00> : vector<2x256xf32>
    %11 = tpu.matmul %10, %3, %cst {dimension_numbers = #tpu.dot_dimension_numbers<[1], [0], [0], [1], [0, 0, 1, 1], [], []>} : vector<2x64xbf16>, vector<64x256xbf16>, vector<2x256xf32> -> vector<2x256xf32>
    %12 = arith.addf %8, %11 : vector<2x256xf32>
    %13 = vector.extract_strided_slice %12 {offsets = [0, 0], sizes = [2, 64], strides = [1, 1]} : vector<2x256xf32> to vector<2x64xf32>
    %14 = arith.negf %13 : vector<2x64xf32>
    %15 = math.exp %14 : vector<2x64xf32>
    %cst_7 = arith.constant 1.000000e+00 : f32
    %16 = vector.broadcast %cst_7 : f32 to vector<2x64xf32>
    %17 = arith.addf %16, %15 : vector<2x64xf32>
    %18 = arith.divf %16, %17 : vector<2x64xf32>
    %19 = vector.extract_strided_slice %12 {offsets = [0, 64], sizes = [2, 64], strides = [1, 1]} : vector<2x256xf32> to vector<2x64xf32>
    %20 = arith.negf %19 : vector<2x64xf32>
    %21 = math.exp %20 : vector<2x64xf32>
    %cst_8 = arith.constant 1.000000e+00 : f32
    %22 = vector.broadcast %cst_8 : f32 to vector<2x64xf32>
    %23 = arith.addf %22, %21 : vector<2x64xf32>
    %24 = arith.divf %22, %23 : vector<2x64xf32>
    %25 = vector.extract_strided_slice %12 {offsets = [0, 128], sizes = [2, 64], strides = [1, 1]} : vector<2x256xf32> to vector<2x64xf32>
    %26 = math.tanh %25 : vector<2x64xf32>
    %27 = vector.extract_strided_slice %12 {offsets = [0, 192], sizes = [2, 64], strides = [1, 1]} : vector<2x256xf32> to vector<2x64xf32>
    %28 = arith.negf %27 : vector<2x64xf32>
    %29 = math.exp %28 : vector<2x64xf32>
    %cst_9 = arith.constant 1.000000e+00 : f32
    %30 = vector.broadcast %cst_9 : f32 to vector<2x64xf32>
    %31 = arith.addf %30, %29 : vector<2x64xf32>
    %32 = arith.divf %30, %31 : vector<2x64xf32>
    %c0_10 = arith.constant 0 : index
    %c0_11 = arith.constant 0 : index
    %33 = vector.load %arg5[%c0_10, %c0_11] : memref<2x64xf32, #tpu.memory_space<vmem>>, vector<2x64xf32>
    %34 = arith.mulf %24, %33 : vector<2x64xf32>
    %35 = arith.mulf %18, %26 : vector<2x64xf32>
    %36 = arith.addf %34, %35 : vector<2x64xf32>
    %37 = math.tanh %36 : vector<2x64xf32>
    %38 = arith.mulf %32, %37 : vector<2x64xf32>
    %c0_12 = arith.constant 0 : index
    %c0_13 = arith.constant 0 : index
    %39 = vector.load %arg5[%c0_12, %c0_13] : memref<2x64xf32, #tpu.memory_space<vmem>>, vector<2x64xf32>
    tpu.vector_store %arg5[%c0_12, %c0_13], %36 {strides = array<i32>} : memref<2x64xf32, #tpu.memory_space<vmem>>, vector<2x64xf32>,
    %c0_14 = arith.constant 0 : index
    %c0_15 = arith.constant 0 : index
    %40 = vector.load %arg4[%c0_14, %c0_15] : memref<2x64xf32, #tpu.memory_space<vmem>>, vector<2x64xf32>
    tpu.vector_store %arg4[%c0_14, %c0_15], %38 {strides = array<i32>} : memref<2x64xf32, #tpu.memory_space<vmem>>, vector<2x64xf32>,
    %41 = arith.truncf %38 : vector<2x64xf32> to vector<2x64xbf16>
    %42 = vector.shape_cast %41 : vector<2x64xbf16> to vector<2x1x64xbf16>
    %c0_16 = arith.constant 0 : index
    %43 = arith.index_cast %4 : i32 to index
    %c0_17 = arith.constant 0 : index
    %44 = vector.load %arg3[%c0_16, %43, %c0_17] : memref<2x8x64xbf16, #tpu.memory_space<vmem>>, vector<2x1x64xbf16>
    tpu.vector_store %arg3[%c0_16, %43, %c0_17], %42 {strides = array<i32>} : memref<2x8x64xbf16, #tpu.memory_space<vmem>>, vector<2x1x64xbf16>,
    %c1_i32 = arith.constant 1 : i32
    %c7_i32_18 = arith.constant 7 : i32
    %45 = arith.subi %c7_i32_18, %c1_i32 : i32
    %c0_19 = arith.constant 0 : index
    %46 = arith.index_cast %45 : i32 to index
    %c0_20 = arith.constant 0 : index
    %47 = vector.load %arg1[%c0_19, %46, %c0_20] : memref<2x8x256xbf16, #tpu.memory_space<vmem>>, vector<2x1x256xbf16>
    %48 = vector.shape_cast %47 : vector<2x1x256xbf16> to vector<2x256xbf16>
    %49 = arith.extf %48 : vector<2x256xbf16> to vector<2x256xf32>
    %c0_21 = arith.constant 0 : index
    %c0_22 = arith.constant 0 : index
    %50 = vector.load %arg4[%c0_21, %c0_22] : memref<2x64xf32, #tpu.memory_space<vmem>>, vector<2x64xf32>
    %51 = arith.truncf %50 : vector<2x64xf32> to vector<2x64xbf16>
    %cst_23 = arith.constant dense<0.000000e+00> : vector<2x256xf32>
    %52 = tpu.matmul %51, %3, %cst_23 {dimension_numbers = #tpu.dot_dimension_numbers<[1], [0], [0], [1], [0, 0, 1, 1], [], []>} : vector<2x64xbf16>, vector<64x256xbf16>, vector<2x256xf32> -> vector<2x256xf32>
    %53 = arith.addf %49, %52 : vector<2x256xf32>
    %54 = vector.extract_strided_slice %53 {offsets = [0, 0], sizes = [2, 64], strides = [1, 1]} : vector<2x256xf32> to vector<2x64xf32>
    %55 = arith.negf %54 : vector<2x64xf32>
    %56 = math.exp %55 : vector<2x64xf32>
    %cst_24 = arith.constant 1.000000e+00 : f32
    %57 = vector.broadcast %cst_24 : f32 to vector<2x64xf32>
    %58 = arith.addf %57, %56 : vector<2x64xf32>
    %59 = arith.divf %57, %58 : vector<2x64xf32>
    %60 = vector.extract_strided_slice %53 {offsets = [0, 64], sizes = [2, 64], strides = [1, 1]} : vector<2x256xf32> to vector<2x64xf32>
    %61 = arith.negf %60 : vector<2x64xf32>
    %62 = math.exp %61 : vector<2x64xf32>
    %cst_25 = arith.constant 1.000000e+00 : f32
    %63 = vector.broadcast %cst_25 : f32 to vector<2x64xf32>
    %64 = arith.addf %63, %62 : vector<2x64xf32>
    %65 = arith.divf %63, %64 : vector<2x64xf32>
    %66 = vector.extract_strided_slice %53 {offsets = [0, 128], sizes = [2, 64], strides = [1, 1]} : vector<2x256xf32> to vector<2x64xf32>
    %67 = math.tanh %66 : vector<2x64xf32>
    %68 = vector.extract_strided_slice %53 {offsets = [0, 192], sizes = [2, 64], strides = [1, 1]} : vector<2x256xf32> to vector<2x64xf32>
    %69 = arith.negf %68 : vector<2x64xf32>
    %70 = math.exp %69 : vector<2x64xf32>
    %cst_26 = arith.constant 1.000000e+00 : f32
    %71 = vector.broadcast %cst_26 : f32 to vector<2x64xf32>
    %72 = arith.addf %71, %70 : vector<2x64xf32>
    %73 = arith.divf %71, %72 : vector<2x64xf32>
    %c0_27 = arith.constant 0 : index
    %c0_28 = arith.constant 0 : index
    %74 = vector.load %arg5[%c0_27, %c0_28] : memref<2x64xf32, #tpu.memory_space<vmem>>, vector<2x64xf32>
    %75 = arith.mulf %65, %74 : vector<2x64xf32>
    %76 = arith.mulf %59, %67 : vector<2x64xf32>
    %77 = arith.addf %75, %76 : vector<2x64xf32>
    %78 = math.tanh %77 : vector<2x64xf32>
    %79 = arith.mulf %73, %78 : vector<2x64xf32>
    %c0_29 = arith.constant 0 : index
    %c0_30 = arith.constant 0 : index
    %80 = vector.load %arg5[%c0_29, %c0_30] : memref<2x64xf32, #tpu.memory_space<vmem>>, vector<2x64xf32>
    tpu.vector_store %arg5[%c0_29, %c0_30], %77 {strides = array<i32>} : memref<2x64xf32, #tpu.memory_space<vmem>>, vector<2x64xf32>,
    %c0_31 = arith.constant 0 : index
    %c0_32 = arith.constant 0 : index
    %81 = vector.load %arg4[%c0_31, %c0_32] : memref<2x64xf32, #tpu.memory_space<vmem>>, vector<2x64xf32>
    tpu.vector_store %arg4[%c0_31, %c0_32], %79 {strides = array<i32>} : memref<2x64xf32, #tpu.memory_space<vmem>>, vector<2x64xf32>,
    %82 = arith.truncf %79 : vector<2x64xf32> to vector<2x64xbf16>
    %83 = vector.shape_cast %82 : vector<2x64xbf16> to vector<2x1x64xbf16>
    %c0_33 = arith.constant 0 : index
    %84 = arith.index_cast %45 : i32 to index
    %c0_34 = arith.constant 0 : index
    %85 = vector.load %arg3[%c0_33, %84, %c0_34] : memref<2x8x64xbf16, #tpu.memory_space<vmem>>, vector<2x1x64xbf16>
    tpu.vector_store %arg3[%c0_33, %84, %c0_34], %83 {strides = array<i32>} : memref<2x8x64xbf16, #tpu.memory_space<vmem>>, vector<2x1x64xbf16>,
    %c2_i32 = arith.constant 2 : i32
    %c7_i32_35 = arith.constant 7 : i32
    %86 = arith.subi %c7_i32_35, %c2_i32 : i32
    %c0_36 = arith.constant 0 : index
    %87 = arith.index_cast %86 : i32 to index
    %c0_37 = arith.constant 0 : index
    %88 = vector.load %arg1[%c0_36, %87, %c0_37] : memref<2x8x256xbf16, #tpu.memory_space<vmem>>, vector<2x1x256xbf16>
    %89 = vector.shape_cast %88 : vector<2x1x256xbf16> to vector<2x256xbf16>
    %90 = arith.extf %89 : vector<2x256xbf16> to vector<2x256xf32>
    %c0_38 = arith.constant 0 : index
    %c0_39 = arith.constant 0 : index
    %91 = vector.load %arg4[%c0_38, %c0_39] : memref<2x64xf32, #tpu.memory_space<vmem>>, vector<2x64xf32>
    %92 = arith.truncf %91 : vector<2x64xf32> to vector<2x64xbf16>
    %cst_40 = arith.constant dense<0.000000e+00> : vector<2x256xf32>
    %93 = tpu.matmul %92, %3, %cst_40 {dimension_numbers = #tpu.dot_dimension_numbers<[1], [0], [0], [1], [0, 0, 1, 1], [], []>} : vector<2x64xbf16>, vector<64x256xbf16>, vector<2x256xf32> -> vector<2x256xf32>
    %94 = arith.addf %90, %93 : vector<2x256xf32>
    %95 = vector.extract_strided_slice %94 {offsets = [0, 0], sizes = [2, 64], strides = [1, 1]} : vector<2x256xf32> to vector<2x64xf32>
    %96 = arith.negf %95 : vector<2x64xf32>
    %97 = math.exp %96 : vector<2x64xf32>
    %cst_41 = arith.constant 1.000000e+00 : f32
    %98 = vector.broadcast %cst_41 : f32 to vector<2x64xf32>
    %99 = arith.addf %98, %97 : vector<2x64xf32>
    %100 = arith.divf %98, %99 : vector<2x64xf32>
    %101 = vector.extract_strided_slice %94 {offsets = [0, 64], sizes = [2, 64], strides = [1, 1]} : vector<2x256xf32> to vector<2x64xf32>
    %102 = arith.negf %101 : vector<2x64xf32>
    %103 = math.exp %102 : vector<2x64xf32>
    %cst_42 = arith.constant 1.000000e+00 : f32
    %104 = vector.broadcast %cst_42 : f32 to vector<2x64xf32>
    %105 = arith.addf %104, %103 : vector<2x64xf32>
    %106 = arith.divf %104, %105 : vector<2x64xf32>
    %107 = vector.extract_strided_slice %94 {offsets = [0, 128], sizes = [2, 64], strides = [1, 1]} : vector<2x256xf32> to vector<2x64xf32>
    %108 = math.tanh %107 : vector<2x64xf32>
    %109 = vector.extract_strided_slice %94 {offsets = [0, 192], sizes = [2, 64], strides = [1, 1]} : vector<2x256xf32> to vector<2x64xf32>
    %110 = arith.negf %109 : vector<2x64xf32>
    %111 = math.exp %110 : vector<2x64xf32>
    %cst_43 = arith.constant 1.000000e+00 : f32
    %112 = vector.broadcast %cst_43 : f32 to vector<2x64xf32>
    %113 = arith.addf %112, %111 : vector<2x64xf32>
    %114 = arith.divf %112, %113 : vector<2x64xf32>
    %c0_44 = arith.constant 0 : index
    %c0_45 = arith.constant 0 : index
    %115 = vector.load %arg5[%c0_44, %c0_45] : memref<2x64xf32, #tpu.memory_space<vmem>>, vector<2x64xf32>
    %116 = arith.mulf %106, %115 : vector<2x64xf32>
    %117 = arith.mulf %100, %108 : vector<2x64xf32>
    %118 = arith.addf %116, %117 : vector<2x64xf32>
    %119 = math.tanh %118 : vector<2x64xf32>
    %120 = arith.mulf %114, %119 : vector<2x64xf32>
    %c0_46 = arith.constant 0 : index
    %c0_47 = arith.constant 0 : index
    %121 = vector.load %arg5[%c0_46, %c0_47] : memref<2x64xf32, #tpu.memory_space<vmem>>, vector<2x64xf32>
    tpu.vector_store %arg5[%c0_46, %c0_47], %118 {strides = array<i32>} : memref<2x64xf32, #tpu.memory_space<vmem>>, vector<2x64xf32>,
    %c0_48 = arith.constant 0 : index
    %c0_49 = arith.constant 0 : index
    %122 = vector.load %arg4[%c0_48, %c0_49] : memref<2x64xf32, #tpu.memory_space<vmem>>, vector<2x64xf32>
    tpu.vector_store %arg4[%c0_48, %c0_49], %120 {strides = array<i32>} : memref<2x64xf32, #tpu.memory_space<vmem>>, vector<2x64xf32>,
    %123 = arith.truncf %120 : vector<2x64xf32> to vector<2x64xbf16>
    %124 = vector.shape_cast %123 : vector<2x64xbf16> to vector<2x1x64xbf16>
    %c0_50 = arith.constant 0 : index
    %125 = arith.index_cast %86 : i32 to index
    %c0_51 = arith.constant 0 : index
    %126 = vector.load %arg3[%c0_50, %125, %c0_51] : memref<2x8x64xbf16, #tpu.memory_space<vmem>>, vector<2x1x64xbf16>
    tpu.vector_store %arg3[%c0_50, %125, %c0_51], %124 {strides = array<i32>} : memref<2x8x64xbf16, #tpu.memory_space<vmem>>, vector<2x1x64xbf16>,
    %c3_i32 = arith.constant 3 : i32
    %c7_i32_52 = arith.constant 7 : i32
    %127 = arith.subi %c7_i32_52, %c3_i32 : i32
    %c0_53 = arith.constant 0 : index
    %128 = arith.index_cast %127 : i32 to index
    %c0_54 = arith.constant 0 : index
    %129 = vector.load %arg1[%c0_53, %128, %c0_54] : memref<2x8x256xbf16, #tpu.memory_space<vmem>>, vector<2x1x256xbf16>
    %130 = vector.shape_cast %129 : vector<2x1x256xbf16> to vector<2x256xbf16>
    %131 = arith.extf %130 : vector<2x256xbf16> to vector<2x256xf32>
    %c0_55 = arith.constant 0 : index
    %c0_56 = arith.constant 0 : index
    %132 = vector.load %arg4[%c0_55, %c0_56] : memref<2x64xf32, #tpu.memory_space<vmem>>, vector<2x64xf32>
    %133 = arith.truncf %132 : vector<2x64xf32> to vector<2x64xbf16>
    %cst_57 = arith.constant dense<0.000000e+00> : vector<2x256xf32>
    %134 = tpu.matmul %133, %3, %cst_57 {dimension_numbers = #tpu.dot_dimension_numbers<[1], [0], [0], [1], [0, 0, 1, 1], [], []>} : vector<2x64xbf16>, vector<64x256xbf16>, vector<2x256xf32> -> vector<2x256xf32>
    %135 = arith.addf %131, %134 : vector<2x256xf32>
    %136 = vector.extract_strided_slice %135 {offsets = [0, 0], sizes = [2, 64], strides = [1, 1]} : vector<2x256xf32> to vector<2x64xf32>
    %137 = arith.negf %136 : vector<2x64xf32>
    %138 = math.exp %137 : vector<2x64xf32>
    %cst_58 = arith.constant 1.000000e+00 : f32
    %139 = vector.broadcast %cst_58 : f32 to vector<2x64xf32>
    %140 = arith.addf %139, %138 : vector<2x64xf32>
    %141 = arith.divf %139, %140 : vector<2x64xf32>
    %142 = vector.extract_strided_slice %135 {offsets = [0, 64], sizes = [2, 64], strides = [1, 1]} : vector<2x256xf32> to vector<2x64xf32>
    %143 = arith.negf %142 : vector<2x64xf32>
    %144 = math.exp %143 : vector<2x64xf32>
    %cst_59 = arith.constant 1.000000e+00 : f32
    %145 = vector.broadcast %cst_59 : f32 to vector<2x64xf32>
    %146 = arith.addf %145, %144 : vector<2x64xf32>
    %147 = arith.divf %145, %146 : vector<2x64xf32>
    %148 = vector.extract_strided_slice %135 {offsets = [0, 128], sizes = [2, 64], strides = [1, 1]} : vector<2x256xf32> to vector<2x64xf32>
    %149 = math.tanh %148 : vector<2x64xf32>
    %150 = vector.extract_strided_slice %135 {offsets = [0, 192], sizes = [2, 64], strides = [1, 1]} : vector<2x256xf32> to vector<2x64xf32>
    %151 = arith.negf %150 : vector<2x64xf32>
    %152 = math.exp %151 : vector<2x64xf32>
    %cst_60 = arith.constant 1.000000e+00 : f32
    %153 = vector.broadcast %cst_60 : f32 to vector<2x64xf32>
    %154 = arith.addf %153, %152 : vector<2x64xf32>
    %155 = arith.divf %153, %154 : vector<2x64xf32>
    %c0_61 = arith.constant 0 : index
    %c0_62 = arith.constant 0 : index
    %156 = vector.load %arg5[%c0_61, %c0_62] : memref<2x64xf32, #tpu.memory_space<vmem>>, vector<2x64xf32>
    %157 = arith.mulf %147, %156 : vector<2x64xf32>
    %158 = arith.mulf %141, %149 : vector<2x64xf32>
    %159 = arith.addf %157, %158 : vector<2x64xf32>
    %160 = math.tanh %159 : vector<2x64xf32>
    %161 = arith.mulf %155, %160 : vector<2x64xf32>
    %c0_63 = arith.constant 0 : index
    %c0_64 = arith.constant 0 : index
    %162 = vector.load %arg5[%c0_63, %c0_64] : memref<2x64xf32, #tpu.memory_space<vmem>>, vector<2x64xf32>
    tpu.vector_store %arg5[%c0_63, %c0_64], %159 {strides = array<i32>} : memref<2x64xf32, #tpu.memory_space<vmem>>, vector<2x64xf32>,
    %c0_65 = arith.constant 0 : index
    %c0_66 = arith.constant 0 : index
    %163 = vector.load %arg4[%c0_65, %c0_66] : memref<2x64xf32, #tpu.memory_space<vmem>>, vector<2x64xf32>
    tpu.vector_store %arg4[%c0_65, %c0_66], %161 {strides = array<i32>} : memref<2x64xf32, #tpu.memory_space<vmem>>, vector<2x64xf32>,
    %164 = arith.truncf %161 : vector<2x64xf32> to vector<2x64xbf16>
    %165 = vector.shape_cast %164 : vector<2x64xbf16> to vector<2x1x64xbf16>
    %c0_67 = arith.constant 0 : index
    %166 = arith.index_cast %127 : i32 to index
    %c0_68 = arith.constant 0 : index
    %167 = vector.load %arg3[%c0_67, %166, %c0_68] : memref<2x8x64xbf16, #tpu.memory_space<vmem>>, vector<2x1x64xbf16>
    tpu.vector_store %arg3[%c0_67, %166, %c0_68], %165 {strides = array<i32>} : memref<2x8x64xbf16, #tpu.memory_space<vmem>>, vector<2x1x64xbf16>,
    %c4_i32 = arith.constant 4 : i32
    %c7_i32_69 = arith.constant 7 : i32
    %168 = arith.subi %c7_i32_69, %c4_i32 : i32
    %c0_70 = arith.constant 0 : index
    %169 = arith.index_cast %168 : i32 to index
    %c0_71 = arith.constant 0 : index
    %170 = vector.load %arg1[%c0_70, %169, %c0_71] : memref<2x8x256xbf16, #tpu.memory_space<vmem>>, vector<2x1x256xbf16>
    %171 = vector.shape_cast %170 : vector<2x1x256xbf16> to vector<2x256xbf16>
    %172 = arith.extf %171 : vector<2x256xbf16> to vector<2x256xf32>
    %c0_72 = arith.constant 0 : index
    %c0_73 = arith.constant 0 : index
    %173 = vector.load %arg4[%c0_72, %c0_73] : memref<2x64xf32, #tpu.memory_space<vmem>>, vector<2x64xf32>
    %174 = arith.truncf %173 : vector<2x64xf32> to vector<2x64xbf16>
    %cst_74 = arith.constant dense<0.000000e+00> : vector<2x256xf32>
    %175 = tpu.matmul %174, %3, %cst_74 {dimension_numbers = #tpu.dot_dimension_numbers<[1], [0], [0], [1], [0, 0, 1, 1], [], []>} : vector<2x64xbf16>, vector<64x256xbf16>, vector<2x256xf32> -> vector<2x256xf32>
    %176 = arith.addf %172, %175 : vector<2x256xf32>
    %177 = vector.extract_strided_slice %176 {offsets = [0, 0], sizes = [2, 64], strides = [1, 1]} : vector<2x256xf32> to vector<2x64xf32>
    %178 = arith.negf %177 : vector<2x64xf32>
    %179 = math.exp %178 : vector<2x64xf32>
    %cst_75 = arith.constant 1.000000e+00 : f32
    %180 = vector.broadcast %cst_75 : f32 to vector<2x64xf32>
    %181 = arith.addf %180, %179 : vector<2x64xf32>
    %182 = arith.divf %180, %181 : vector<2x64xf32>
    %183 = vector.extract_strided_slice %176 {offsets = [0, 64], sizes = [2, 64], strides = [1, 1]} : vector<2x256xf32> to vector<2x64xf32>
    %184 = arith.negf %183 : vector<2x64xf32>
    %185 = math.exp %184 : vector<2x64xf32>
    %cst_76 = arith.constant 1.000000e+00 : f32
    %186 = vector.broadcast %cst_76 : f32 to vector<2x64xf32>
    %187 = arith.addf %186, %185 : vector<2x64xf32>
    %188 = arith.divf %186, %187 : vector<2x64xf32>
    %189 = vector.extract_strided_slice %176 {offsets = [0, 128], sizes = [2, 64], strides = [1, 1]} : vector<2x256xf32> to vector<2x64xf32>
    %190 = math.tanh %189 : vector<2x64xf32>
    %191 = vector.extract_strided_slice %176 {offsets = [0, 192], sizes = [2, 64], strides = [1, 1]} : vector<2x256xf32> to vector<2x64xf32>
    %192 = arith.negf %191 : vector<2x64xf32>
    %193 = math.exp %192 : vector<2x64xf32>
    %cst_77 = arith.constant 1.000000e+00 : f32
    %194 = vector.broadcast %cst_77 : f32 to vector<2x64xf32>
    %195 = arith.addf %194, %193 : vector<2x64xf32>
    %196 = arith.divf %194, %195 : vector<2x64xf32>
    %c0_78 = arith.constant 0 : index
    %c0_79 = arith.constant 0 : index
    %197 = vector.load %arg5[%c0_78, %c0_79] : memref<2x64xf32, #tpu.memory_space<vmem>>, vector<2x64xf32>
    %198 = arith.mulf %188, %197 : vector<2x64xf32>
    %199 = arith.mulf %182, %190 : vector<2x64xf32>
    %200 = arith.addf %198, %199 : vector<2x64xf32>
    %201 = math.tanh %200 : vector<2x64xf32>
    %202 = arith.mulf %196, %201 : vector<2x64xf32>
    %c0_80 = arith.constant 0 : index
    %c0_81 = arith.constant 0 : index
    %203 = vector.load %arg5[%c0_80, %c0_81] : memref<2x64xf32, #tpu.memory_space<vmem>>, vector<2x64xf32>
    tpu.vector_store %arg5[%c0_80, %c0_81], %200 {strides = array<i32>} : memref<2x64xf32, #tpu.memory_space<vmem>>, vector<2x64xf32>,
    %c0_82 = arith.constant 0 : index
    %c0_83 = arith.constant 0 : index
    %204 = vector.load %arg4[%c0_82, %c0_83] : memref<2x64xf32, #tpu.memory_space<vmem>>, vector<2x64xf32>
    tpu.vector_store %arg4[%c0_82, %c0_83], %202 {strides = array<i32>} : memref<2x64xf32, #tpu.memory_space<vmem>>, vector<2x64xf32>,
    %205 = arith.truncf %202 : vector<2x64xf32> to vector<2x64xbf16>
    %206 = vector.shape_cast %205 : vector<2x64xbf16> to vector<2x1x64xbf16>
    %c0_84 = arith.constant 0 : index
    %207 = arith.index_cast %168 : i32 to index
    %c0_85 = arith.constant 0 : index
    %208 = vector.load %arg3[%c0_84, %207, %c0_85] : memref<2x8x64xbf16, #tpu.memory_space<vmem>>, vector<2x1x64xbf16>
    tpu.vector_store %arg3[%c0_84, %207, %c0_85], %206 {strides = array<i32>} : memref<2x8x64xbf16, #tpu.memory_space<vmem>>, vector<2x1x64xbf16>,
    %c5_i32 = arith.constant 5 : i32
    %c7_i32_86 = arith.constant 7 : i32
    %209 = arith.subi %c7_i32_86, %c5_i32 : i32
    %c0_87 = arith.constant 0 : index
    %210 = arith.index_cast %209 : i32 to index
    %c0_88 = arith.constant 0 : index
    %211 = vector.load %arg1[%c0_87, %210, %c0_88] : memref<2x8x256xbf16, #tpu.memory_space<vmem>>, vector<2x1x256xbf16>
    %212 = vector.shape_cast %211 : vector<2x1x256xbf16> to vector<2x256xbf16>
    %213 = arith.extf %212 : vector<2x256xbf16> to vector<2x256xf32>
    %c0_89 = arith.constant 0 : index
    %c0_90 = arith.constant 0 : index
    %214 = vector.load %arg4[%c0_89, %c0_90] : memref<2x64xf32, #tpu.memory_space<vmem>>, vector<2x64xf32>
    %215 = arith.truncf %214 : vector<2x64xf32> to vector<2x64xbf16>
    %cst_91 = arith.constant dense<0.000000e+00> : vector<2x256xf32>
    %216 = tpu.matmul %215, %3, %cst_91 {dimension_numbers = #tpu.dot_dimension_numbers<[1], [0], [0], [1], [0, 0, 1, 1], [], []>} : vector<2x64xbf16>, vector<64x256xbf16>, vector<2x256xf32> -> vector<2x256xf32>
    %217 = arith.addf %213, %216 : vector<2x256xf32>
    %218 = vector.extract_strided_slice %217 {offsets = [0, 0], sizes = [2, 64], strides = [1, 1]} : vector<2x256xf32> to vector<2x64xf32>
    %219 = arith.negf %218 : vector<2x64xf32>
    %220 = math.exp %219 : vector<2x64xf32>
    %cst_92 = arith.constant 1.000000e+00 : f32
    %221 = vector.broadcast %cst_92 : f32 to vector<2x64xf32>
    %222 = arith.addf %221, %220 : vector<2x64xf32>
    %223 = arith.divf %221, %222 : vector<2x64xf32>
    %224 = vector.extract_strided_slice %217 {offsets = [0, 64], sizes = [2, 64], strides = [1, 1]} : vector<2x256xf32> to vector<2x64xf32>
    %225 = arith.negf %224 : vector<2x64xf32>
    %226 = math.exp %225 : vector<2x64xf32>
    %cst_93 = arith.constant 1.000000e+00 : f32
    %227 = vector.broadcast %cst_93 : f32 to vector<2x64xf32>
    %228 = arith.addf %227, %226 : vector<2x64xf32>
    %229 = arith.divf %227, %228 : vector<2x64xf32>
    %230 = vector.extract_strided_slice %217 {offsets = [0, 128], sizes = [2, 64], strides = [1, 1]} : vector<2x256xf32> to vector<2x64xf32>
    %231 = math.tanh %230 : vector<2x64xf32>
    %232 = vector.extract_strided_slice %217 {offsets = [0, 192], sizes = [2, 64], strides = [1, 1]} : vector<2x256xf32> to vector<2x64xf32>
    %233 = arith.negf %232 : vector<2x64xf32>
    %234 = math.exp %233 : vector<2x64xf32>
    %cst_94 = arith.constant 1.000000e+00 : f32
    %235 = vector.broadcast %cst_94 : f32 to vector<2x64xf32>
    %236 = arith.addf %235, %234 : vector<2x64xf32>
    %237 = arith.divf %235, %236 : vector<2x64xf32>
    %c0_95 = arith.constant 0 : index
    %c0_96 = arith.constant 0 : index
    %238 = vector.load %arg5[%c0_95, %c0_96] : memref<2x64xf32, #tpu.memory_space<vmem>>, vector<2x64xf32>
    %239 = arith.mulf %229, %238 : vector<2x64xf32>
    %240 = arith.mulf %223, %231 : vector<2x64xf32>
    %241 = arith.addf %239, %240 : vector<2x64xf32>
    %242 = math.tanh %241 : vector<2x64xf32>
    %243 = arith.mulf %237, %242 : vector<2x64xf32>
    %c0_97 = arith.constant 0 : index
    %c0_98 = arith.constant 0 : index
    %244 = vector.load %arg5[%c0_97, %c0_98] : memref<2x64xf32, #tpu.memory_space<vmem>>, vector<2x64xf32>
    tpu.vector_store %arg5[%c0_97, %c0_98], %241 {strides = array<i32>} : memref<2x64xf32, #tpu.memory_space<vmem>>, vector<2x64xf32>,
    %c0_99 = arith.constant 0 : index
    %c0_100 = arith.constant 0 : index
    %245 = vector.load %arg4[%c0_99, %c0_100] : memref<2x64xf32, #tpu.memory_space<vmem>>, vector<2x64xf32>
    tpu.vector_store %arg4[%c0_99, %c0_100], %243 {strides = array<i32>} : memref<2x64xf32, #tpu.memory_space<vmem>>, vector<2x64xf32>,
    %246 = arith.truncf %243 : vector<2x64xf32> to vector<2x64xbf16>
    %247 = vector.shape_cast %246 : vector<2x64xbf16> to vector<2x1x64xbf16>
    %c0_101 = arith.constant 0 : index
    %248 = arith.index_cast %209 : i32 to index
    %c0_102 = arith.constant 0 : index
    %249 = vector.load %arg3[%c0_101, %248, %c0_102] : memref<2x8x64xbf16, #tpu.memory_space<vmem>>, vector<2x1x64xbf16>
    tpu.vector_store %arg3[%c0_101, %248, %c0_102], %247 {strides = array<i32>} : memref<2x8x64xbf16, #tpu.memory_space<vmem>>, vector<2x1x64xbf16>,
    %c6_i32 = arith.constant 6 : i32
    %c7_i32_103 = arith.constant 7 : i32
    %250 = arith.subi %c7_i32_103, %c6_i32 : i32
    %c0_104 = arith.constant 0 : index
    %251 = arith.index_cast %250 : i32 to index
    %c0_105 = arith.constant 0 : index
    %252 = vector.load %arg1[%c0_104, %251, %c0_105] : memref<2x8x256xbf16, #tpu.memory_space<vmem>>, vector<2x1x256xbf16>
    %253 = vector.shape_cast %252 : vector<2x1x256xbf16> to vector<2x256xbf16>
    %254 = arith.extf %253 : vector<2x256xbf16> to vector<2x256xf32>
    %c0_106 = arith.constant 0 : index
    %c0_107 = arith.constant 0 : index
    %255 = vector.load %arg4[%c0_106, %c0_107] : memref<2x64xf32, #tpu.memory_space<vmem>>, vector<2x64xf32>
    %256 = arith.truncf %255 : vector<2x64xf32> to vector<2x64xbf16>
    %cst_108 = arith.constant dense<0.000000e+00> : vector<2x256xf32>
    %257 = tpu.matmul %256, %3, %cst_108 {dimension_numbers = #tpu.dot_dimension_numbers<[1], [0], [0], [1], [0, 0, 1, 1], [], []>} : vector<2x64xbf16>, vector<64x256xbf16>, vector<2x256xf32> -> vector<2x256xf32>
    %258 = arith.addf %254, %257 : vector<2x256xf32>
    %259 = vector.extract_strided_slice %258 {offsets = [0, 0], sizes = [2, 64], strides = [1, 1]} : vector<2x256xf32> to vector<2x64xf32>
    %260 = arith.negf %259 : vector<2x64xf32>
    %261 = math.exp %260 : vector<2x64xf32>
    %cst_109 = arith.constant 1.000000e+00 : f32
    %262 = vector.broadcast %cst_109 : f32 to vector<2x64xf32>
    %263 = arith.addf %262, %261 : vector<2x64xf32>
    %264 = arith.divf %262, %263 : vector<2x64xf32>
    %265 = vector.extract_strided_slice %258 {offsets = [0, 64], sizes = [2, 64], strides = [1, 1]} : vector<2x256xf32> to vector<2x64xf32>
    %266 = arith.negf %265 : vector<2x64xf32>
    %267 = math.exp %266 : vector<2x64xf32>
    %cst_110 = arith.constant 1.000000e+00 : f32
    %268 = vector.broadcast %cst_110 : f32 to vector<2x64xf32>
    %269 = arith.addf %268, %267 : vector<2x64xf32>
    %270 = arith.divf %268, %269 : vector<2x64xf32>
    %271 = vector.extract_strided_slice %258 {offsets = [0, 128], sizes = [2, 64], strides = [1, 1]} : vector<2x256xf32> to vector<2x64xf32>
    %272 = math.tanh %271 : vector<2x64xf32>
    %273 = vector.extract_strided_slice %258 {offsets = [0, 192], sizes = [2, 64], strides = [1, 1]} : vector<2x256xf32> to vector<2x64xf32>
    %274 = arith.negf %273 : vector<2x64xf32>
    %275 = math.exp %274 : vector<2x64xf32>
    %cst_111 = arith.constant 1.000000e+00 : f32
    %276 = vector.broadcast %cst_111 : f32 to vector<2x64xf32>
    %277 = arith.addf %276, %275 : vector<2x64xf32>
    %278 = arith.divf %276, %277 : vector<2x64xf32>
    %c0_112 = arith.constant 0 : index
    %c0_113 = arith.constant 0 : index
    %279 = vector.load %arg5[%c0_112, %c0_113] : memref<2x64xf32, #tpu.memory_space<vmem>>, vector<2x64xf32>
    %280 = arith.mulf %270, %279 : vector<2x64xf32>
    %281 = arith.mulf %264, %272 : vector<2x64xf32>
    %282 = arith.addf %280, %281 : vector<2x64xf32>
    %283 = math.tanh %282 : vector<2x64xf32>
    %284 = arith.mulf %278, %283 : vector<2x64xf32>
    %c0_114 = arith.constant 0 : index
    %c0_115 = arith.constant 0 : index
    %285 = vector.load %arg5[%c0_114, %c0_115] : memref<2x64xf32, #tpu.memory_space<vmem>>, vector<2x64xf32>
    tpu.vector_store %arg5[%c0_114, %c0_115], %282 {strides = array<i32>} : memref<2x64xf32, #tpu.memory_space<vmem>>, vector<2x64xf32>,
    %c0_116 = arith.constant 0 : index
    %c0_117 = arith.constant 0 : index
    %286 = vector.load %arg4[%c0_116, %c0_117] : memref<2x64xf32, #tpu.memory_space<vmem>>, vector<2x64xf32>
    tpu.vector_store %arg4[%c0_116, %c0_117], %284 {strides = array<i32>} : memref<2x64xf32, #tpu.memory_space<vmem>>, vector<2x64xf32>,
    %287 = arith.truncf %284 : vector<2x64xf32> to vector<2x64xbf16>
    %288 = vector.shape_cast %287 : vector<2x64xbf16> to vector<2x1x64xbf16>
    %c0_118 = arith.constant 0 : index
    %289 = arith.index_cast %250 : i32 to index
    %c0_119 = arith.constant 0 : index
    %290 = vector.load %arg3[%c0_118, %289, %c0_119] : memref<2x8x64xbf16, #tpu.memory_space<vmem>>, vector<2x1x64xbf16>
    tpu.vector_store %arg3[%c0_118, %289, %c0_119], %288 {strides = array<i32>} : memref<2x8x64xbf16, #tpu.memory_space<vmem>>, vector<2x1x64xbf16>,
    %c7_i32_120 = arith.constant 7 : i32
    %c7_i32_121 = arith.constant 7 : i32
    %291 = arith.subi %c7_i32_121, %c7_i32_120 : i32
    %c0_122 = arith.constant 0 : index
    %292 = arith.index_cast %291 : i32 to index
    %c0_123 = arith.constant 0 : index
    %293 = vector.load %arg1[%c0_122, %292, %c0_123] : memref<2x8x256xbf16, #tpu.memory_space<vmem>>, vector<2x1x256xbf16>
    %294 = vector.shape_cast %293 : vector<2x1x256xbf16> to vector<2x256xbf16>
    %295 = arith.extf %294 : vector<2x256xbf16> to vector<2x256xf32>
    %c0_124 = arith.constant 0 : index
    %c0_125 = arith.constant 0 : index
    %296 = vector.load %arg4[%c0_124, %c0_125] : memref<2x64xf32, #tpu.memory_space<vmem>>, vector<2x64xf32>
    %297 = arith.truncf %296 : vector<2x64xf32> to vector<2x64xbf16>
    %cst_126 = arith.constant dense<0.000000e+00> : vector<2x256xf32>
    %298 = tpu.matmul %297, %3, %cst_126 {dimension_numbers = #tpu.dot_dimension_numbers<[1], [0], [0], [1], [0, 0, 1, 1], [], []>} : vector<2x64xbf16>, vector<64x256xbf16>, vector<2x256xf32> -> vector<2x256xf32>
    %299 = arith.addf %295, %298 : vector<2x256xf32>
    %300 = vector.extract_strided_slice %299 {offsets = [0, 0], sizes = [2, 64], strides = [1, 1]} : vector<2x256xf32> to vector<2x64xf32>
    %301 = arith.negf %300 : vector<2x64xf32>
    %302 = math.exp %301 : vector<2x64xf32>
    %cst_127 = arith.constant 1.000000e+00 : f32
    %303 = vector.broadcast %cst_127 : f32 to vector<2x64xf32>
    %304 = arith.addf %303, %302 : vector<2x64xf32>
    %305 = arith.divf %303, %304 : vector<2x64xf32>
    %306 = vector.extract_strided_slice %299 {offsets = [0, 64], sizes = [2, 64], strides = [1, 1]} : vector<2x256xf32> to vector<2x64xf32>
    %307 = arith.negf %306 : vector<2x64xf32>
    %308 = math.exp %307 : vector<2x64xf32>
    %cst_128 = arith.constant 1.000000e+00 : f32
    %309 = vector.broadcast %cst_128 : f32 to vector<2x64xf32>
    %310 = arith.addf %309, %308 : vector<2x64xf32>
    %311 = arith.divf %309, %310 : vector<2x64xf32>
    %312 = vector.extract_strided_slice %299 {offsets = [0, 128], sizes = [2, 64], strides = [1, 1]} : vector<2x256xf32> to vector<2x64xf32>
    %313 = math.tanh %312 : vector<2x64xf32>
    %314 = vector.extract_strided_slice %299 {offsets = [0, 192], sizes = [2, 64], strides = [1, 1]} : vector<2x256xf32> to vector<2x64xf32>
    %315 = arith.negf %314 : vector<2x64xf32>
    %316 = math.exp %315 : vector<2x64xf32>
    %cst_129 = arith.constant 1.000000e+00 : f32
    %317 = vector.broadcast %cst_129 : f32 to vector<2x64xf32>
    %318 = arith.addf %317, %316 : vector<2x64xf32>
    %319 = arith.divf %317, %318 : vector<2x64xf32>
    %c0_130 = arith.constant 0 : index
    %c0_131 = arith.constant 0 : index
    %320 = vector.load %arg5[%c0_130, %c0_131] : memref<2x64xf32, #tpu.memory_space<vmem>>, vector<2x64xf32>
    %321 = arith.mulf %311, %320 : vector<2x64xf32>
    %322 = arith.mulf %305, %313 : vector<2x64xf32>
    %323 = arith.addf %321, %322 : vector<2x64xf32>
    %324 = math.tanh %323 : vector<2x64xf32>
    %325 = arith.mulf %319, %324 : vector<2x64xf32>
    %c0_132 = arith.constant 0 : index
    %c0_133 = arith.constant 0 : index
    %326 = vector.load %arg5[%c0_132, %c0_133] : memref<2x64xf32, #tpu.memory_space<vmem>>, vector<2x64xf32>
    tpu.vector_store %arg5[%c0_132, %c0_133], %323 {strides = array<i32>} : memref<2x64xf32, #tpu.memory_space<vmem>>, vector<2x64xf32>,
    %c0_134 = arith.constant 0 : index
    %c0_135 = arith.constant 0 : index
    %327 = vector.load %arg4[%c0_134, %c0_135] : memref<2x64xf32, #tpu.memory_space<vmem>>, vector<2x64xf32>
    tpu.vector_store %arg4[%c0_134, %c0_135], %325 {strides = array<i32>} : memref<2x64xf32, #tpu.memory_space<vmem>>, vector<2x64xf32>,
    %328 = arith.truncf %325 : vector<2x64xf32> to vector<2x64xbf16>
    %329 = vector.shape_cast %328 : vector<2x64xbf16> to vector<2x1x64xbf16>
    %c0_136 = arith.constant 0 : index
    %330 = arith.index_cast %291 : i32 to index
    %c0_137 = arith.constant 0 : index
    %331 = vector.load %arg3[%c0_136, %330, %c0_137] : memref<2x8x64xbf16, #tpu.memory_space<vmem>>, vector<2x1x64xbf16>
    tpu.vector_store %arg3[%c0_136, %330, %c0_137], %329 {strides = array<i32>} : memref<2x8x64xbf16, #tpu.memory_space<vmem>>, vector<2x1x64xbf16>,
    %c8_i32 = arith.constant 8 : i32
    return
  }
  func.func @transform_0(%arg0: i32) -> (i32, i32, i32) {
    %c0_i32 = arith.constant 0 : i32
    %0 = arith.subi %c0_i32, %arg0 : i32
    %c0_i32_0 = arith.constant 0 : i32
    %c1_i32 = arith.constant 1 : i32
    %c0_i32_1 = arith.constant 0 : i32
    return %c0_i32_0, %0, %c1_i32 : i32, i32, i32
  }
  func.func @transform_1(%arg0: i32) -> (i32, i32) {
    %c0_i32 = arith.constant 0 : i32
    %c0_i32_0 = arith.constant 0 : i32
    %c0_i32_1 = arith.constant 0 : i32
    return %c0_i32, %c0_i32_0 : i32, i32
  }
  func.func @transform_2(%arg0: i32) -> (i32, i32, i32) {
    %c0_i32 = arith.constant 0 : i32
    %0 = arith.subi %c0_i32, %arg0 : i32
    %c0_i32_0 = arith.constant 0 : i32
    %c0_i32_1 = arith.constant 0 : i32
    %c0_i32_2 = arith.constant 0 : i32
    return %c0_i32_0, %0, %c0_i32_1 : i32, i32, i32
  }
}

</mosaic_0001>

<bundles_post_ra>
// kernel: _lambda_.18
= control target key start
LH: loop header
LB: loop body
LE: loop exit
PB: predicated region body
PF: predicated region fallthrough
CT: control target
= control target key end

     0   :  { %s121_s0 = inlined_call_operand.vmem [shape: f32[16,128], index: 0, kind: input, shape index: {}]   ;;  %s122_s1 = inlined_call_operand.vmem [shape: f32[1,128], index: 1, kind: input, shape index: {}]   ;;  %s123_s2 = inlined_call_operand.vmem [shape: f32[1,128], index: 2, kind: input, shape index: {}]   ;;  %s124_s3 = inlined_call_operand.vmem [shape: bf16[16,128], index: 3, kind: output, shape index: {}]  }
   0x1   :  { %v14_v0 = vld [vmem:[%s121_s0] sm:$0xff]  ;;  %v15_v1 = vld [vmem:[%s121_s0 + $0x8] sm:$0xff] }
   0x2   :  { %16 = vadd.xlane.f32.xlu0 %v14_v0  ;;  %v71_v18 = vld [vmem:[%s122_s1] ss:$0 sm:$0xff] }
   0x3   :  { %v72_v22 = vld [vmem:[%s123_s2] ss:$0 sm:$0xff] }
   0x6   :  { %18 = vadd.xlane.f32.xlu0 %v15_v1 }
  0x8f   :  { %v17_v2 = vpop.xlane.xlu0 %16 }
  0x90   :  { %v21_v3 = vmul.f32 0.0078125, %v17_v2 }
  0x92   :  { %v23_v4 = vsub.f32 %v14_v0, %v21_v3 }
  0x93   :  { %v19_v5 = vpop.xlane.xlu0 %18 }
  0x94   :  { %v22_v6 = vmul.f32 0.0078125, %v19_v5  ;;  %v25_v7 = vmul.f32 %v23_v4, %v23_v4 }
  0x96   :  { %v24_v8 = vsub.f32 %v15_v1, %v22_v6  ;;  %27 = vadd.xlane.f32.xlu1 %v25_v7 }
  0x98   :  { %v26_v9 = vmul.f32 %v24_v8, %v24_v8 }
  0x9a   :  { %29 = vadd.xlane.f32.xlu1 %v26_v9 }
 0x123   :  { %v28_v10 = vpop.xlane.xlu1 %27 }
 0x124   :  { %v31_v11 = vmul.f32 0.0078125, %v28_v10 }
 0x126   :  { %v33_v12 = vadd.f32 1e-12, %v31_v11 }
 0x127   :  { %v30_v13 = vpop.xlane.xlu1 %29 }
 0x128   :  { %82 = vrsqrt.f32 %v33_v12  ;;  %v32_v14 = vmul.f32 0.0078125, %v30_v13 }
 0x12a   :  { %v34_v15 = vadd.f32 1e-12, %v32_v14 }
 0x12c   :  { %84 = vrsqrt.f32 %v34_v15 }
 0x132   :  { %v83_v16 = vpop.eup %82 }
 0x133   :  { %v37_v17 = vmul.f32 %v83_v16, %v23_v4 }
 0x135   :  { %v46_v20 = vmul.f32 %v71_v18, %v37_v17 }
 0x136   :  { %v85_v19 = vpop.eup %84 }
 0x137   :  { %v38_v21 = vmul.f32 %v85_v19, %v24_v8  ;;  %v55_v24 = vadd.f32 %v72_v22, %v46_v20 }
 0x139   :  { %v47_v23 = vmul.f32 %v71_v18, %v38_v21 }
 0x13b   :  { %v56_v25 = vadd.f32 %v72_v22, %v47_v23 }
 0x13d   :  { %v80_v26 = vpack.c.bf16 %v56_v25, %v55_v24 }
 0x13f   :  { %81 = vst [vmem:[%s124_s3] sm:$0xff] %v80_v26  }

// kernel: _lambda_.19
= control target key start
LH: loop header
LB: loop body
LE: loop exit
PB: predicated region body
PF: predicated region fallthrough
CT: control target
= control target key end

     0   :  { %s820_s12 = smov 0   ;;  %s822_s13 = smov 0   ;;  %s922_s0 = inlined_call_operand.vmem [shape: bf16[16,128], index: 0, kind: input, shape index: {}]   ;;  %s923_s1 = inlined_call_operand.vmem [shape: bf16[128,384], index: 1, kind: input, shape index: {}]   ;;  %s924_s2 = inlined_call_operand.vmem [shape: f32[1,384], index: 2, kind: input, shape index: {}]   ;;  %s925_s3 = inlined_call_operand.vmem [shape: bf16[16,384], index: 3, kind: output, shape index: {}]  }
   0x1   :  { %s824_s14 = smov 0   ;;  %s826_s15 = smov 0  }
   0x2   :  { %s828_s16 = smov 0  }
   0x3 LB: > { %s28_s17 = sadd.s32 1, %s792_s15  ;;  %s645_s18 = sadd.s32 4294967295, %s796_s16   ;;  %s796_s16 = sphi %s828_s16, %s13_s16   ;;  %s792_s15 = sphi %s826_s15, %s930_s15   ;;  %s788_s14 = sphi %s824_s14, %s929_s14   ;;  %s784_s13 = sphi %s822_s13, %s928_s13   ;;  %s780_s12 = sphi %s820_s12, %s927_s12  }
   0x4   : > { %p30_p0 = scmp.ge.s32.totalorder %s28_s17, 3  ;;  %p76_p1 = scmp.ne.s32.totalorder %s784_s13, %s780_s12 }
   0x5   : > { %p77_p2 = scmp.eq.s32.totalorder %s796_s16, 0  ;;  %p134_p4 = scmp.eq.s32.totalorder %s645_s18, 2 }
   0x6   : > { %s932_s17 = smov (%p30_p0, %s28_s17), 0  ;;  %s69_s20 = sadd.s32 1, %s784_s13 }
   0x7   : > { %p78_p3 = por %p77_p2, %p76_p1  ;;  %s65_s19 = ssub.s32 %s792_s15, %s932_s17 }
   0x8   : > { %p67_p5 = scmp.eq.s32.totalorder %s65_s19, 0  ;;  %p855_p6 = por %p134_p4, %p76_p1 }
   0x9   : > { %p649_p7 = scmp.ge.s32.totalorder %s796_s16, 3 }
   0xa   : > { %s860_s22 = scalar_select %p67_p5, %s784_s13, %s69_s20  }
   0xb   : > { %168 = sbr.rel (%p649_p7) target bundleno = 32 (0x20), region = 20 }
  0x12   : > { %171 = sbr.rel (!%p78_p3) target bundleno = 32 (0x20), region = 24  ;;  %s173_s23 = sand.u32 (%p78_p3), 1, %s784_s13  }
  0x13   : > { %s651_s24 = sshll.u32 (%p78_p3), %s792_s15, 2  ;;  %s650_s25 = sshll.u32 (%p78_p3), %s173_s23, 6 }
  0x14   : > { %s868_s28 = scalar_lea.vmem (%p78_p3), %s923_s1, %s651_s24  ;;  %s175_s29 = scalar_lea.vmem (%p78_p3), [#allocation3], %s650_s25 }
  0x15   : > { %v196_v0 = vld [vmem:[%s868_s28] sm:$0xf] (%p78_p3)  ;;  %v198_v1 = vld [vmem:[%s868_s28 + $0xc] sm:$0xf] (%p78_p3)  ;;  %v200_v2 = vld [vmem:[%s868_s28 + $0x18] sm:$0xf] (%p78_p3) }
  0x16   : > { %197 = vst [vmem:[%s175_s29] sm:$0xf] (%p78_p3), %v196_v0  ;;  %199 = vst [vmem:[%s175_s29 + $0x4] sm:$0xf] (%p78_p3), %v198_v1  ;;  %v202_v3 = vld [vmem:[%s868_s28 + $0x24] sm:$0xf] (%p78_p3) }
  0x17   : > { %v204_v4 = vld [vmem:[%s868_s28 + $0x30] sm:$0xf] (%p78_p3)  ;;  %201 = vst [vmem:[%s175_s29 + $0x8] sm:$0xf] (%p78_p3), %v200_v2  ;;  %203 = vst [vmem:[%s175_s29 + $0xc] sm:$0xf] (%p78_p3), %v202_v3 }
  0x18   : > { %205 = vst [vmem:[%s175_s29 + $0x10] sm:$0xf] (%p78_p3), %v204_v4  ;;  %v206_v5 = vld [vmem:[%s868_s28 + $0x3c] sm:$0xf] (%p78_p3)  ;;  %v208_v6 = vld [vmem:[%s868_s28 + $0x48] sm:$0xf] (%p78_p3) }
  0x19   : > { %v210_v7 = vld [vmem:[%s868_s28 + $0x54] sm:$0xf]  ;;  %207 = vst [vmem:[%s175_s29 + $0x14] sm:$0xf] %v206_v5  ;;  %209 = vst [vmem:[%s175_s29 + $0x18] sm:$0xf] %v208_v6 }
  0x1a   : > { %211 = vst [vmem:[%s175_s29 + $0x1c] sm:$0xf] %v210_v7  ;;  %v212_v8 = vld [vmem:[%s868_s28 + $0x60] sm:$0xf]  ;;  %v214_v9 = vld [vmem:[%s868_s28 + $0x6c] sm:$0xf] }
  0x1b   : > { %v216_v10 = vld [vmem:[%s868_s28 + $0x78] sm:$0xf]  ;;  %213 = vst [vmem:[%s175_s29 + $0x20] sm:$0xf] %v212_v8  ;;  %215 = vst [vmem:[%s175_s29 + $0x24] sm:$0xf] %v214_v9 }
  0x1c   : > { %217 = vst [vmem:[%s175_s29 + $0x28] sm:$0xf] %v216_v10  ;;  %v218_v11 = vld [vmem:[%s868_s28 + $0x84] sm:$0xf]  ;;  %v220_v12 = vld [vmem:[%s868_s28 + $0x90] sm:$0xf] }
  0x1d   : > { %v222_v13 = vld [vmem:[%s868_s28 + $0x9c] sm:$0xf]  ;;  %219 = vst [vmem:[%s175_s29 + $0x2c] sm:$0xf] %v218_v11  ;;  %221 = vst [vmem:[%s175_s29 + $0x30] sm:$0xf] %v220_v12 }
  0x1e   : > { %223 = vst [vmem:[%s175_s29 + $0x34] sm:$0xf] %v222_v13  ;;  %v224_v14 = vld [vmem:[%s868_s28 + $0xa8] sm:$0xf]  ;;  %v226_v15 = vld [vmem:[%s868_s28 + $0xb4] sm:$0xf] }
  0x1f   : > { %225 = vst [vmem:[%s175_s29 + $0x38] sm:$0xf] %v224_v14  ;;  %227 = vst [vmem:[%s175_s29 + $0x3c] sm:$0xf] %v226_v15 }
  0x20 PF: > { %p652_p8 = scmp.ge.s32.totalorder %s796_s16, 1  ;;  %p287_p9 = scmp.lt.s32.totalorder %s796_s16, 4 }
  0x22   : > { %p288_p10 = pnand %p652_p8, %p287_p9 }
  0x23   : > { %s294_s30 = sand.u32 (!%p288_p10), 1, %s780_s12   ;;  %v798_v16 = vmov (!%p288_p10), 0.0   ;;  %vm799_vm0 = vmmov (!%p288_p10), 0   ;;  %v757_v25 = vld [vmem:[%s922_s0] sm:$0xff] (!%p288_p10)   ;;  %p337_p11 = scmp.lt.s32.totalorder (!%p288_p10), %s788_s14, 2 }
  0x24   : > { %291 = sbr.rel (%p288_p10) target bundleno = 297 (0x129), region = 69  ;;  %687 = vmatprep.subr.bf16.mxu0 (!%p288_p10), %v798_v16  ;;  %s653_s4 = sshll.u32 (!%p288_p10), %s294_s30, 6  ;;  %703 = vmatprep.mubr.msk.bf16.mxu0 (!%p288_p10), %vm799_vm0, %v798_v16 }
  0x25   : > { %s296_s5 = scalar_lea.vmem (!%p288_p10), [#allocation3], %s653_s4  ;;  %s654_s18 = sshll.u32 (!%p288_p10), %s294_s30, 3 }
  0x26   : > { %v749_v17 = vld [vmem:[%s296_s5] sm:$0xff] (!%p288_p10)   ;;  %v750_v18 = vld [vmem:[%s296_s5 + $0x8] sm:$0xff] (!%p288_p10)   ;;  %v751_v19 = vld [vmem:[%s296_s5 + $0x10] sm:$0xff] (!%p288_p10)   ;;  %s326_s19 = scalar_lea.vmem (!%p288_p10), [#allocation4], %s654_s18 }
  0x27   : > { %688 = vmatpush3.bf16.msra.mxu0 (!%p288_p10), %v749_v17  ;;  %v752_v20 = vld [vmem:[%s296_s5 + $0x18] sm:$0xff] (!%p288_p10)   ;;  %v753_v21 = vld [vmem:[%s296_s5 + $0x20] sm:$0xff] (!%p288_p10)   ;;  %v754_v22 = vld [vmem:[%s296_s5 + $0x28] sm:$0xff] (!%p288_p10)  }
  0x28   : > { %689 = vmatprep.subr.bf16.mxu0 (!%p288_p10), %v798_v16  ;;  %v755_v23 = vld [vmem:[%s296_s5 + $0x30] sm:$0xff] (!%p288_p10)   ;;  %v756_v24 = vld [vmem:[%s296_s5 + $0x38] sm:$0xff] (!%p288_p10)  }
  0x2b   : > { %690 = vmatpush3.bf16.msra.mxu0 %v750_v18  ;;  %s338_s8 = scalar_select %p337_p11, %s788_s14, 2 }
  0x2c   : > { %691 = vmatprep.subr.bf16.mxu0 %v798_v16  ;;  %s668_s20 = sshll.u32 (%p855_p6), %s788_s14, 2 }
  0x2d   : > { %s339_s11 = scalar_lea.vmem %s924_s2, %s338_s8  ;;  %s502_s25 = scalar_lea.vmem (%p855_p6), %s925_s3, %s668_s20 }
  0x2e   : > { %v664_v27 = vld [vmem:[%s339_s11] ss:$0 sm:$0xff] }
  0x2f   : > { %692 = vmatpush3.bf16.msra.mxu0 %v751_v19 }
  0x30   : > { %693 = vmatprep.subr.bf16.mxu0 %v798_v16 }
  0x33   : > { %694 = vmatpush3.bf16.msra.mxu0 %v752_v20 }
  0x34   : > { %695 = vmatprep.subr.bf16.mxu0 %v798_v16 }
  0x37   : > { %696 = vmatpush3.bf16.msra.mxu0 %v753_v21 }
  0x38   : > { %697 = vmatprep.subr.bf16.mxu0 %v798_v16 }
  0x3b   : > { %698 = vmatpush3.bf16.msra.mxu0 %v754_v22 }
  0x3c   : > { %699 = vmatprep.subr.bf16.mxu0 %v798_v16 }
  0x3f   : > { %700 = vmatpush3.bf16.msra.mxu0 %v755_v23 }
  0x40   : > { %701 = vmatprep.subr.bf16.mxu0 %v798_v16 }
  0x43   : > { %702 = vmatpush3.bf16.msra.mxu0 %v756_v24 }
  0x46   : > { %704 = vmatmul.mubr.bf16.vlgmr.msra.gmra.mrb[0].mxu0 %v757_v25 }
 0x119   : > { %v456_v26 = vpop.f32.mrb[0].mxu0 }
 0x11a   : > { %v705_v28 = vpop.f32.mrb[1].mxu0  ;;  %v479_v30 = vadd.f32 %v664_v27, %v456_v26  ;;  %497 = sbr.rel (!%p855_p6) target bundleno = 297 (0x129), region = 85 }
 0x11b   : > { %v459_v29 = vpop.f32.mrb[2].mxu0 }
 0x11c   : > { %v480_v31 = vadd.f32 %v664_v27, %v459_v29  ;;  %v706_v32 = vpop.f32.mrb[3].mxu0 }
 0x11e   : > { %v676_v33 = vpack.c.bf16 %v480_v31, %v479_v30 }
 0x120   : > { %677 = vst [vmem:[%s326_s19] sm:$0xff] %v676_v33  }
 0x127   : > { %v518_v34 = vld [vmem:[%s326_s19] sm:$0xf]  ;;  %v520_v35 = vld [vmem:[%s326_s19 + $0x4] sm:$0xf] }
 0x128   : > { %519 = vst [vmem:[%s502_s25] sm:$0xf] %v518_v34  ;;  %521 = vst [vmem:[%s502_s25 + $0xc] sm:$0xf] %v520_v35 }
 0x129 PF: > { %s13_s16 = sadd.s32 1, %s796_s16   ;;  %s927_s12 = smov %s784_s13 }
 0x12a   : > { %p10_p12 = scmp.ge.s32.totalorder %s13_s16, 5   ;;  %s928_s13 = smov %s860_s22 }
 0x12b   : > { %s929_s14 = smov %s792_s15  ;;  %s930_s15 = smov %s932_s17 }
 0x12c   :  { %12 = sbr.rel (!%p10_p12) target bundleno = 3 (0x3), region = 163 }

// kernel: _lambda_.20
= control target key start
LH: loop header
LB: loop body
LE: loop exit
PB: predicated region body
PF: predicated region fallthrough
CT: control target
= control target key end

     0   :  { %s564_s9 = smov 0   ;;  %s615_s0 = inlined_call_operand.vmem [shape: bf16[2,8,384], index: 0, kind: input, shape index: {}]   ;;  %s616_s1 = inlined_call_operand.vmem [shape: f32[2,1,8], index: 1, kind: input, shape index: {}]   ;;  %s617_s2 = inlined_call_operand.vmem [shape: bf16[2,8,128], index: 2, kind: output, shape index: {}]  }
   0x1 LB: > { %s466_s10 = sadd.s32 4294967295, %s544_s9   ;;  %p470_p0 = scmp.ge.s32.totalorder %s544_s9, 1  ;;  %s544_s9 = sphi %s564_s9, %s12_s9  }
   0x2   : > { %p120_p1 = scmp.lt.s32.totalorder %s544_s9, 3 }
   0x4   : > { %p121_p2 = pnand %p470_p0, %p120_p1 }
   0x5   : > { %p144_p3 = scmp.lt.s32.totalorder (!%p121_p2), %s466_s10, 1  ;;  %v546_v0 = vmov (!%p121_p2), 0.0   ;;  %vm547_vm0 = vmmov (!%p121_p2), 0   ;;  %vm161_vm1 = vcmask (!%p121_p2), 523264   ;;  %vm216_vm2 = vcmask (!%p121_p2), 64512   ;;  %s548_s18 = smov (!%p121_p2), 64  }
   0x6   : > { %124 = sbr.rel (%p121_p2) target bundleno = 1429 (0x595), region = 28  ;;  %491 = vmatprep.subr.bf16.mxu0 (!%p121_p2), %v546_v0  ;;  %493 = vmatprep.mubr.msk.bf16.mxu0 (!%p121_p2), %vm547_vm0, %v546_v0  ;;  %vm232_vm3 = vcmask (!%p121_p2), 1043456  }
   0x7   : > { %497 = vmatprep.subr.bf16.mxu1 (!%p121_p2), %v546_v0  ;;  %499 = vmatprep.mubr.msk.bf16.mxu1 (!%p121_p2), %vm547_vm0, %v546_v0 }
   0xd   : > { %s619_s10 = smov (!%p144_p3, %s466_s10), 1 }
   0xe   : > { %s515_s11 = smul.u32 12, %s619_s10  ;;  %s151_s17 = scalar_lea.vmem %s616_s1, %s619_s10 }
   0xf   : > { %v474_v5 = vld [vmem:[%s151_s17] ss:$0 sm:$0xff]  ;;  %s472_s19 = sshll.u32 %s619_s10, 2 }
  0x10   : > { %s580_s14 = scalar_lea.vmem %s615_s0, %s515_s11  ;;  %s155_s22 = scalar_lea.vmem %s617_s2, %s472_s19 }
  0x11   : > { %v159_v1 = vld [vmem:[%s580_s14 + $0x4] sm:$0xf]  ;;  %v158_v3 = vld [vmem:[%s580_s14] sm:$0xf]  ;;  %v160_v19 = vld [vmem:[%s580_s14 + $0x8] sm:$0xf] }
  0x12   : > { %v166_v2 = vsel %vm161_vm1, %v159_v1, 0  ;;  %v477_v12 = vcombine.low %v159_v1, %v159_v1  ;;  %v476_v13 = vcombine.low %v158_v3, %v158_v3  ;;  %v234_v20 = vsel %vm232_vm3, %v160_v19, 0 }
  0x13   : > { %492 = vmatpush3.bf16.xpose.msra.mxu0 %v166_v2  ;;  %498 = vmatpush3.bf16.msra.mxu1 %v234_v20  ;;  %v479_v39 = vcombine.low %v160_v19, %v160_v19 }
  0x14   : > { %509 = vmatprep.subr.bf16.mxu0 %v546_v0  ;;  %284 = vrot.lane.b32.xlu1 %v477_v12, %s548_s18 }
  0x15   : > { %503 = vmatprep.subr.bf16.mxu1 %v546_v0 }
  0x18   : > { %279 = vrot.lane.b32.xlu1 %v476_v13, %s548_s18 }
  0x1a   : > { %494 = vmatmul.mubr.msk.bf16.vlgmr.msra.gmra.mrb[0].mxu0 %vm161_vm1, %v158_v3 }
  0x1b   : > { %511 = vmatprep.mubr.msk.bf16.mxu0 %vm547_vm0, %v546_v0 }
  0x86   : > { %v285_v23 = vpop.permute.xlu1 %284 }
  0x87   : > { %v290_v25 = vsel %vm161_vm1, %v285_v23, 0 }
  0x8a   : > { %v280_v27 = vpop.permute.xlu1 %279 }
  0xed   : > { %v202_v4 = vpop.f32.mrb[0].mxu0 }
  0xee   : > { %v208_v6 = vmul.f32 0.125, %v202_v4  ;;  %v495_v7 = vpop.f32.mrb[1].mxu0 }
  0xef   : > { %v205_v8 = vpop.f32.mrb[2].mxu0 }
  0xf0   : > { %v496_v9 = vpop.f32.mrb[3].mxu0  ;;  %v215_v10 = vadd.f32 %v474_v5, %v208_v6 }
  0xf2   : > { %v217_v11 = vsel %vm216_vm2, %v215_v10, -inf }
  0xf3   : > { %218 = vmax.xlane.f32.xlu0 %v217_v11 }
 0x180   : > { %v219_v14 = vpop.xlane.xlu0 %218 }
 0x181   : > { %v220_v15 = vsub.f32 %v215_v10, %v219_v14 }
 0x183   : > { %v221_v16 = vmul.f32 1.442695, %v220_v15 }
 0x185   : > { %530 = vpow2.f32 %v221_v16 }
 0x18f   : > { %v531_v17 = vpop.eup %530 }
 0x190   : > { %v223_v18 = vsel %vm216_vm2, %v531_v17, 0.0 }
 0x191   : > { %224 = vadd.xlane.f32.xlu0 %v223_v18 }
 0x21e   : > { %v225_v21 = vpop.xlane.xlu0 %224 }
 0x21f   : > { %532 = vrcp.f32 %v225_v21 }
 0x229   : > { %v533_v22 = vpop.eup %532 }
 0x22a   : > { %v227_v24 = vmul.f32 %v533_v22, %v531_v17 }
 0x22c   : > { %v228_v26 = vpack.c.bf16 %v227_v24, %v227_v24 }
 0x22e   : > { %500 = vmatmul.mubr.msk.bf16.vlgmr.msra.gmra.mrb[0].mxu1 %vm216_vm2, %v228_v26 }
 0x22f   : > { %504 = vmatpush3.bf16.xpose.msra.mxu1 %v290_v25  ;;  %505 = vmatprep.mubr.msk.bf16.mxu1 %vm547_vm0, %v546_v0 }
 0x236   : > { %506 = vmatmul.mubr.msk.bf16.vlgmr.msra.gmra.mrb[4].mxu1 %vm161_vm1, %v280_v27 }
 0x301   : > { %v270_v28 = vpop.f32.mrb[0].mxu1 }
 0x302   : > { %v501_v29 = vpop.f32.mrb[1].mxu1 }
 0x303   : > { %v273_v30 = vpop.f32.mrb[2].mxu1 }
 0x304   : > { %v502_v31 = vpop.f32.mrb[3].mxu1 }
 0x309   : > { %v326_v32 = vpop.f32.mrb[4].mxu1 }
 0x30a   : > { %v332_v33 = vmul.f32 0.125, %v326_v32  ;;  %v507_v34 = vpop.f32.mrb[5].mxu1 }
 0x30b   : > { %v329_v35 = vpop.f32.mrb[6].mxu1 }
 0x30c   : > { %v508_v36 = vpop.f32.mrb[7].mxu1  ;;  %v333_v37 = vadd.f32 %v474_v5, %v332_v33 }
 0x30e   : > { %v334_v38 = vsel %vm216_vm2, %v333_v37, -inf }
 0x30f   : > { %335 = vmax.xlane.f32.xlu0 %v334_v38 }
 0x325   : > { %349 = vrot.lane.b32.xlu0 %v479_v39, %s548_s18 }
 0x39c   : > { %v336_v40 = vpop.xlane.xlu0 %335 }
 0x39d   : > { %v337_v41 = vsub.f32 %v333_v37, %v336_v40 }
 0x39f   : > { %v338_v42 = vmul.f32 1.442695, %v337_v41 }
 0x3a0   : > { %v350_v45 = vpop.permute.xlu0 %349 }
 0x3a1   : > { %534 = vpow2.f32 %v338_v42  ;;  %v355_v46 = vsel %vm232_vm3, %v350_v45, 0 }
 0x3a2   : > { %510 = vmatpush3.bf16.msra.mxu0 %v355_v46 }
 0x3ab   : > { %v535_v43 = vpop.eup %534 }
 0x3ac   : > { %v340_v44 = vsel %vm216_vm2, %v535_v43, 0.0 }
 0x3ad   : > { %341 = vadd.xlane.f32.xlu1 %v340_v44 }
 0x43a   : > { %v342_v47 = vpop.xlane.xlu1 %341 }
 0x43b   : > { %536 = vrcp.f32 %v342_v47 }
 0x445   : > { %v537_v48 = vpop.eup %536 }
 0x446   : > { %v344_v49 = vmul.f32 %v537_v48, %v535_v43 }
 0x448   : > { %v345_v50 = vpack.c.bf16 %v344_v49, %v344_v49 }
 0x44a   : > { %512 = vmatmul.mubr.msk.bf16.vlgmr.msra.gmra.mrb[4].mxu0 %vm216_vm2, %v345_v50 }
 0x51d   : > { %v391_v51 = vpop.f32.mrb[4].mxu0 }
 0x51e   : > { %398 = vrot.lane.b32.xlu0 %v391_v51, %s548_s18  ;;  %v513_v52 = vpop.f32.mrb[5].mxu0 }
 0x51f   : > { %v394_v53 = vpop.f32.mrb[6].mxu0 }
 0x520   : > { %v514_v54 = vpop.f32.mrb[7].mxu0 }
 0x590   : > { %v399_v55 = vpop.permute.xlu0 %398 }
 0x591   : > { %v401_v56 = vsel %vm161_vm1, %v270_v28, %v399_v55 }
 0x592   : > { %v402_v57 = vpack.c.bf16 %v401_v56, %v401_v56 }
 0x594   : > { %403 = vst [vmem:[%s155_s22] sm:$0xf] %v402_v57 }
 0x595 PF: > { %s12_s9 = sadd.s32 1, %s544_s9  }
 0x596   : > { %p9_p4 = scmp.ge.s32.totalorder %s12_s9, 4  }
 0x598   :  { %11 = sbr.rel (!%p9_p4) target bundleno = 1 (0x1), region = 61 }

// kernel: _lambda_.21
= control target key start
LH: loop header
LB: loop body
LE: loop exit
PB: predicated region body
PF: predicated region fallthrough
CT: control target
= control target key end

     0   :  { %v293_v0 = vmov 0.0   ;;  %vm294_vm0 = vmmov 0   ;;  %s372_s1 = inlined_call_operand.vmem [shape: bf16[128,128], index: 1, kind: input, shape index: {}]   ;;  %s373_s0 = inlined_call_operand.vmem [shape: bf16[16,128], index: 0, kind: input, shape index: {}]   ;;  %s374_s3 = inlined_call_operand.vmem [shape: bf16[16,128], index: 3, kind: input, shape index: {}]   ;;  %s375_s2 = inlined_call_operand.vmem [shape: f32[1,128], index: 2, kind: input, shape index: {}]   ;;  %s376_s4 = inlined_call_operand.vmem [shape: f32[1,128], index: 4, kind: input, shape index: {}]   ;;  %s377_s5 = inlined_call_operand.vmem [shape: f32[1,128], index: 5, kind: input, shape index: {}]   ;;  %s378_s6 = inlined_call_operand.vmem [shape: bf16[16,128], index: 6, kind: output, shape index: {}]  }
   0x1   :  { %258 = vmatprep.subr.bf16.mxu0 %v293_v0  ;;  %v280_v1 = vld [vmem:[%s372_s1] sm:$0xff]   ;;  %274 = vmatprep.mubr.msk.bf16.mxu0 %vm294_vm0, %v293_v0  ;;  %v281_v2 = vld [vmem:[%s372_s1 + $0x8] sm:$0xff]   ;;  %v282_v3 = vld [vmem:[%s372_s1 + $0x10] sm:$0xff]  }
   0x2   :  { %259 = vmatpush3.bf16.msra.mxu0 %v280_v1  ;;  %v283_v4 = vld [vmem:[%s372_s1 + $0x18] sm:$0xff]   ;;  %v284_v5 = vld [vmem:[%s372_s1 + $0x20] sm:$0xff]   ;;  %v285_v6 = vld [vmem:[%s372_s1 + $0x28] sm:$0xff]  }
   0x3   :  { %260 = vmatprep.subr.bf16.mxu0 %v293_v0  ;;  %v286_v7 = vld [vmem:[%s372_s1 + $0x30] sm:$0xff]   ;;  %v287_v8 = vld [vmem:[%s372_s1 + $0x38] sm:$0xff]   ;;  %v288_v9 = vld [vmem:[%s373_s0] sm:$0xff]  }
   0x4   :  { %v241_v10 = vld [vmem:[%s374_s3] sm:$0xff]  }
   0x5   :  { %v233_v11 = vld [vmem:[%s375_s2] ss:$0 sm:$0xff]  ;;  %v242_v12 = vunpack.c.l.bf16 %v241_v10  ;;  %v243_v20 = vunpack.c.h.bf16 %v241_v10 }
   0x6   :  { %261 = vmatpush3.bf16.msra.mxu0 %v281_v2  ;;  %v234_v38 = vld [vmem:[%s376_s4] ss:$0 sm:$0xff] }
   0x7   :  { %262 = vmatprep.subr.bf16.mxu0 %v293_v0  ;;  %v235_v42 = vld [vmem:[%s377_s5] ss:$0 sm:$0xff] }
   0xa   :  { %263 = vmatpush3.bf16.msra.mxu0 %v282_v3 }
   0xb   :  { %264 = vmatprep.subr.bf16.mxu0 %v293_v0 }
   0xe   :  { %265 = vmatpush3.bf16.msra.mxu0 %v283_v4 }
   0xf   :  { %266 = vmatprep.subr.bf16.mxu0 %v293_v0 }
  0x12   :  { %267 = vmatpush3.bf16.msra.mxu0 %v284_v5 }
  0x13   :  { %268 = vmatprep.subr.bf16.mxu0 %v293_v0 }
  0x16   :  { %269 = vmatpush3.bf16.msra.mxu0 %v285_v6 }
  0x17   :  { %270 = vmatprep.subr.bf16.mxu0 %v293_v0 }
  0x1a   :  { %271 = vmatpush3.bf16.msra.mxu0 %v286_v7 }
  0x1b   :  { %272 = vmatprep.subr.bf16.mxu0 %v293_v0 }
  0x1e   :  { %273 = vmatpush3.bf16.msra.mxu0 %v287_v8 }
  0x21   :  { %275 = vmatmul.mubr.bf16.vlgmr.msra.gmra.mrb[0].mxu0 %v288_v9 }
  0xf4   :  { %v138_v13 = vpop.f32.mrb[0].mxu0 }
  0xf5   :  { %v161_v14 = vadd.f32 %v233_v11, %v138_v13  ;;  %v276_v15 = vpop.f32.mrb[1].mxu0 }
  0xf6   :  { %v141_v16 = vpop.f32.mrb[2].mxu0 }
  0xf7   :  { %v162_v17 = vadd.f32 %v233_v11, %v141_v16  ;;  %v277_v18 = vpop.f32.mrb[3].mxu0  ;;  %v167_v19 = vadd.f32 %v242_v12, %v161_v14 }
  0xf9   :  { %169 = vadd.xlane.f32.xlu0 %v167_v19  ;;  %v168_v21 = vadd.f32 %v243_v20, %v162_v17 }
  0xfd   :  { %171 = vadd.xlane.f32.xlu0 %v168_v21 }
 0x186   :  { %v170_v22 = vpop.xlane.xlu0 %169 }
 0x187   :  { %v174_v23 = vmul.f32 0.0078125, %v170_v22 }
 0x189   :  { %v176_v24 = vsub.f32 %v167_v19, %v174_v23 }
 0x18a   :  { %v172_v25 = vpop.xlane.xlu0 %171 }
 0x18b   :  { %v175_v26 = vmul.f32 0.0078125, %v172_v25  ;;  %v178_v27 = vmul.f32 %v176_v24, %v176_v24 }
 0x18d   :  { %v177_v28 = vsub.f32 %v168_v21, %v175_v26  ;;  %180 = vadd.xlane.f32.xlu1 %v178_v27 }
 0x18f   :  { %v179_v29 = vmul.f32 %v177_v28, %v177_v28 }
 0x191   :  { %182 = vadd.xlane.f32.xlu1 %v179_v29 }
 0x21a   :  { %v181_v30 = vpop.xlane.xlu1 %180 }
 0x21b   :  { %v184_v31 = vmul.f32 0.0078125, %v181_v30 }
 0x21d   :  { %v186_v32 = vadd.f32 1e-12, %v184_v31 }
 0x21e   :  { %v183_v33 = vpop.xlane.xlu1 %182 }
 0x21f   :  { %289 = vrsqrt.f32 %v186_v32  ;;  %v185_v34 = vmul.f32 0.0078125, %v183_v33 }
 0x221   :  { %v187_v35 = vadd.f32 1e-12, %v185_v34 }
 0x223   :  { %291 = vrsqrt.f32 %v187_v35 }
 0x229   :  { %v290_v36 = vpop.eup %289 }
 0x22a   :  { %v190_v37 = vmul.f32 %v290_v36, %v176_v24 }
 0x22c   :  { %v199_v40 = vmul.f32 %v234_v38, %v190_v37 }
 0x22d   :  { %v292_v39 = vpop.eup %291 }
 0x22e   :  { %v191_v41 = vmul.f32 %v292_v39, %v177_v28  ;;  %v208_v44 = vadd.f32 %v235_v42, %v199_v40 }
 0x230   :  { %v200_v43 = vmul.f32 %v234_v38, %v191_v41 }
 0x232   :  { %v209_v45 = vadd.f32 %v235_v42, %v200_v43 }
 0x234   :  { %v247_v46 = vpack.c.bf16 %v209_v45, %v208_v44 }
 0x236   :  { %248 = vst [vmem:[%s378_s6] sm:$0xff] %v247_v46  }

// kernel: _lambda_.22
= control target key start
LH: loop header
LB: loop body
LE: loop exit
PB: predicated region body
PF: predicated region fallthrough
CT: control target
= control target key end

     0   :  { %v314_v1 = vmov 0   ;;  %v191_v18 = vlaneseq  ;;  %s395_s1 = inlined_call_operand.vmem [shape: bf16[128,256], index: 1, kind: input, shape index: {}]   ;;  %s396_s0 = inlined_call_operand.vmem [shape: bf16[16,128], index: 0, kind: input, shape index: {}]   ;;  %s397_s2 = inlined_call_operand.vmem [shape: f32[1,256], index: 2, kind: input, shape index: {}]   ;;  %s398_s3 = inlined_call_operand.vmem [shape: bf16[16,256], index: 3, kind: output, shape index: {}]  }
   0x1   :  { %v281_v0 = vld [vmem:[%s395_s1 + $0x4] ss:$8 sps:$4 sm:$0xff]   ;;  %163 = vmatprep.mubr.bf16.mxu0 %v314_v1  ;;  %v283_v2 = vld [vmem:[%s395_s1] ss:$8 sps:$4 sm:$0xff]   ;;  %v284_v3 = vld [vmem:[%s395_s1 + $0x14] ss:$8 sps:$4 sm:$0xff]  }
   0x2   :  { %131 = vmatprep.subr.bf16.mxu0 %v281_v0  ;;  %v286_v4 = vld [vmem:[%s395_s1 + $0x10] ss:$8 sps:$4 sm:$0xff]   ;;  %v287_v5 = vld [vmem:[%s395_s1 + $0x24] ss:$8 sps:$4 sm:$0xff]   ;;  %v289_v6 = vld [vmem:[%s395_s1 + $0x20] ss:$8 sps:$4 sm:$0xff]  }
   0x3   :  { %132 = vmatpush1.bf16.msra.mxu0 %v283_v2  ;;  %v290_v7 = vld [vmem:[%s395_s1 + $0x34] ss:$8 sps:$4 sm:$0xff]   ;;  %v292_v8 = vld [vmem:[%s395_s1 + $0x30] ss:$8 sps:$4 sm:$0xff]   ;;  %v293_v9 = vld [vmem:[%s395_s1 + $0x44] ss:$8 sps:$4 sm:$0xff]  }
   0x4   :  { %133 = vmatprep.subr.bf16.mxu0 %v284_v3  ;;  %v295_v10 = vld [vmem:[%s395_s1 + $0x40] ss:$8 sps:$4 sm:$0xff]   ;;  %v296_v11 = vld [vmem:[%s395_s1 + $0x54] ss:$8 sps:$4 sm:$0xff]   ;;  %v298_v12 = vld [vmem:[%s395_s1 + $0x50] ss:$8 sps:$4 sm:$0xff]  }
   0x5   :  { %v299_v13 = vld [vmem:[%s395_s1 + $0x64] ss:$8 sps:$4 sm:$0xff]   ;;  %v301_v14 = vld [vmem:[%s395_s1 + $0x60] ss:$8 sps:$4 sm:$0xff]   ;;  %v302_v15 = vld [vmem:[%s395_s1 + $0x74] ss:$8 sps:$4 sm:$0xff]  }
   0x6   :  { %v304_v16 = vld [vmem:[%s395_s1 + $0x70] ss:$8 sps:$4 sm:$0xff]   ;;  %v305_v17 = vld [vmem:[%s396_s0] sm:$0xff]   ;;  %v192_v19 = vshrl.u32 %v191_v18, 7 }
   0x7   :  { %134 = vmatpush1.bf16.msra.mxu0 %v286_v4  ;;  %v189_v21 = vld [vmem:[%s397_s2] sm:$0x3] }
   0x8   :  { %135 = vmatprep.subr.bf16.mxu0 %v287_v5  ;;  %v193_v20 = vsub.s32 0, %v192_v19  ;;  %v197_v22 = vsub.s32 1, %v192_v19 }
   0xa   :  { %v194_v23 = vrot.slane %v189_v21, %v193_v20  ;;  %v198_v24 = vrot.slane %v189_v21, %v197_v22 }
   0xb   :  { %136 = vmatpush1.bf16.msra.mxu0 %v289_v6 }
   0xc   :  { %137 = vmatprep.subr.bf16.mxu0 %v290_v7 }
   0xf   :  { %138 = vmatpush1.bf16.msra.mxu0 %v292_v8 }
  0x10   :  { %139 = vmatprep.subr.bf16.mxu0 %v293_v9 }
  0x13   :  { %140 = vmatpush1.bf16.msra.mxu0 %v295_v10 }
  0x14   :  { %141 = vmatprep.subr.bf16.mxu0 %v296_v11 }
  0x17   :  { %142 = vmatpush1.bf16.msra.mxu0 %v298_v12 }
  0x18   :  { %143 = vmatprep.subr.bf16.mxu0 %v299_v13 }
  0x1b   :  { %144 = vmatpush1.bf16.msra.mxu0 %v301_v14 }
  0x1c   :  { %145 = vmatprep.subr.bf16.mxu0 %v302_v15 }
  0x1f   :  { %146 = vmatpush1.bf16.msra.mxu0 %v304_v16 }
  0x22   :  { %164 = vmatmul.mubr.bf16.vlgmr.msra.gmra.mrb[0].mxu0 %v305_v17 }
  0xf5   :  { %v165_v25 = vpop.f32.mrb[0].mxu0 }
  0xf6   :  { %v201_v26 = vadd.f32 %v194_v23, %v165_v25  ;;  %v167_v27 = vpop.f32.mrb[1].mxu0 }
  0xf7   :  { %v202_v28 = vadd.f32 %v198_v24, %v167_v27  ;;  %v169_v29 = vpop.f32.mrb[2].mxu0 }
  0xf8   :  { %v205_v30 = vmul.f32 %v201_v26, %v201_v26  ;;  %v203_v31 = vadd.f32 %v194_v23, %v169_v29  ;;  %v171_v32 = vpop.f32.mrb[3].mxu0 }
  0xf9   :  { %v206_v33 = vmul.f32 %v202_v28, %v202_v28  ;;  %v204_v34 = vadd.f32 %v198_v24, %v171_v32 }
  0xfa   :  { %v209_v35 = vmul.f32 %v205_v30, %v201_v26  ;;  %v207_v36 = vmul.f32 %v203_v31, %v203_v31 }
  0xfb   :  { %v210_v37 = vmul.f32 %v206_v33, %v202_v28  ;;  %v208_v38 = vmul.f32 %v204_v34, %v204_v34 }
  0xfc   :  { %v213_v39 = vmul.f32 0.044715, %v209_v35  ;;  %v211_v40 = vmul.f32 %v207_v36, %v203_v31 }
  0xfd   :  { %v214_v41 = vmul.f32 0.044715, %v210_v37  ;;  %v212_v42 = vmul.f32 %v208_v38, %v204_v34 }
  0xfe   :  { %v217_v43 = vadd.f32 %v213_v39, %v201_v26  ;;  %v215_v44 = vmul.f32 0.044715, %v211_v40 }
  0xff   :  { %v218_v45 = vadd.f32 %v214_v41, %v202_v28  ;;  %v216_v46 = vmul.f32 0.044715, %v212_v42 }
 0x100   :  { %v221_v47 = vmul.f32 0.7978846, %v217_v43  ;;  %v219_v48 = vadd.f32 %v215_v44, %v203_v31 }
 0x101   :  { %v222_v49 = vmul.f32 0.7978846, %v218_v45  ;;  %v220_v50 = vadd.f32 %v216_v46, %v204_v34 }
 0x102   :  { %306 = vtanh.f32 %v221_v47  ;;  %v223_v51 = vmul.f32 0.7978846, %v219_v48 }
 0x103   :  { %308 = vtanh.f32 %v222_v49  ;;  %v224_v52 = vmul.f32 0.7978846, %v220_v50 }
 0x104   :  { %310 = vtanh.f32 %v223_v51 }
 0x105   :  { %312 = vtanh.f32 %v224_v52 }
 0x10c   :  { %v307_v53 = vpop.eup %306 }
 0x10d   :  { %v309_v54 = vpop.eup %308  ;;  %v229_v55 = vadd.f32 1.0, %v307_v53 }
 0x10e   :  { %v311_v56 = vpop.eup %310  ;;  %v230_v57 = vadd.f32 1.0, %v309_v54 }
 0x10f   :  { %v313_v58 = vpop.eup %312  ;;  %v233_v59 = vmul.f32 0.5, %v229_v55  ;;  %v231_v60 = vadd.f32 1.0, %v311_v56 }
 0x110   :  { %v234_v61 = vmul.f32 0.5, %v230_v57  ;;  %v232_v62 = vadd.f32 1.0, %v313_v58 }
 0x111   :  { %v237_v63 = vmul.f32 %v233_v59, %v201_v26  ;;  %v235_v0 = vmul.f32 0.5, %v231_v60 }
 0x112   :  { %v238_v1 = vmul.f32 %v234_v61, %v202_v28  ;;  %v236_v2 = vmul.f32 0.5, %v232_v62 }
 0x113   :  { %v239_v3 = vmul.f32 %v235_v0, %v203_v31 }
 0x114   :  { %v278_v4 = vpack.c.bf16 %v238_v1, %v237_v63  ;;  %v240_v5 = vmul.f32 %v236_v2, %v204_v34 }
 0x116   :  { %253 = vst [vmem:[%s398_s3] sm:$0xff] %v278_v4  ;;  %v279_v6 = vpack.c.bf16 %v240_v5, %v239_v3 }
 0x118   :  { %254 = vst [vmem:[%s398_s3 + $0x8] sm:$0xff] %v279_v6 }

// kernel: _lambda_.29
= control target key start
LH: loop header
LB: loop body
LE: loop exit
PB: predicated region body
PF: predicated region fallthrough
CT: control target
= control target key end

     0   :  { %s864_s12 = smov 0   ;;  %s866_s13 = smov 0   ;;  %s965_s0 = inlined_call_operand.vmem [shape: bf16[16,128], index: 0, kind: input, shape index: {}]   ;;  %s966_s1 = inlined_call_operand.vmem [shape: bf16[128,512], index: 1, kind: input, shape index: {}]   ;;  %s967_s2 = inlined_call_operand.vmem [shape: f32[1,512], index: 2, kind: input, shape index: {}]   ;;  %s968_s3 = inlined_call_operand.vmem [shape: bf16[16,512], index: 3, kind: output, shape index: {}]  }
   0x1   :  { %s868_s14 = smov 0   ;;  %s870_s15 = smov 0  }
   0x2   :  { %s872_s16 = smov 0  }
   0x3 LB: > { %s28_s17 = sadd.s32 1, %s837_s15  ;;  %s697_s18 = sadd.s32 4294967295, %s841_s16   ;;  %s841_s16 = sphi %s872_s16, %s13_s16   ;;  %s837_s15 = sphi %s870_s15, %s973_s15   ;;  %s833_s14 = sphi %s868_s14, %s972_s14   ;;  %s829_s13 = sphi %s866_s13, %s971_s13   ;;  %s825_s12 = sphi %s864_s12, %s970_s12  }
   0x4   : > { %p30_p0 = scmp.ge.s32.totalorder %s28_s17, 2  ;;  %p76_p1 = scmp.ne.s32.totalorder %s829_s13, %s825_s12 }
   0x5   : > { %p77_p2 = scmp.eq.s32.totalorder %s841_s16, 0  ;;  %p134_p4 = scmp.eq.s32.totalorder %s697_s18, 1 }
   0x6   : > { %s975_s17 = smov (%p30_p0, %s28_s17), 0  ;;  %s69_s20 = sadd.s32 1, %s829_s13 }
   0x7   : > { %p78_p3 = por %p77_p2, %p76_p1  ;;  %s65_s19 = ssub.s32 %s837_s15, %s975_s17 }
   0x8   : > { %p67_p5 = scmp.eq.s32.totalorder %s65_s19, 0  ;;  %p899_p6 = por %p134_p4, %p76_p1 }
   0x9   : > { %p701_p7 = scmp.ge.s32.totalorder %s841_s16, 2 }
   0xa   : > { %s904_s22 = scalar_select %p67_p5, %s829_s13, %s69_s20  }
   0xb   : > { %168 = sbr.rel (%p701_p7) target bundleno = 30 (0x1e), region = 20 }
  0x12   : > { %171 = sbr.rel (!%p78_p3) target bundleno = 30 (0x1e), region = 24  ;;  %s173_s23 = sand.u32 (%p78_p3), 1, %s829_s13  }
  0x13   : > { %s733_s24 = sshll.u32 (%p78_p3), %s837_s15, 3  ;;  %s702_s25 = sshll.u32 (%p78_p3), %s173_s23, 7 }
  0x14   : > { %s912_s28 = scalar_lea.vmem (%p78_p3), %s966_s1, %s733_s24  ;;  %s175_s29 = scalar_lea.vmem (%p78_p3), [#allocation3], %s702_s25 }
  0x15   : > { %v239_v0 = vld [vmem:[%s912_s28] sm:$0xff] (%p78_p3)  ;;  %v241_v1 = vld [vmem:[%s912_s28 + $0x10] sm:$0xff] (%p78_p3) }
  0x16   : > { %v243_v2 = vld [vmem:[%s912_s28 + $0x20] sm:$0xff] (%p78_p3)  ;;  %240 = vst [vmem:[%s175_s29] sm:$0xff] (%p78_p3), %v239_v0  ;;  %242 = vst [vmem:[%s175_s29 + $0x8] sm:$0xff] (%p78_p3), %v241_v1  ;;  %v245_v3 = vld [vmem:[%s912_s28 + $0x30] sm:$0xff] (%p78_p3) }
  0x17   : > { %244 = vst [vmem:[%s175_s29 + $0x10] sm:$0xff] (%p78_p3), %v243_v2  ;;  %v247_v4 = vld [vmem:[%s912_s28 + $0x40] sm:$0xff] (%p78_p3)  ;;  %v249_v5 = vld [vmem:[%s912_s28 + $0x50] sm:$0xff] (%p78_p3)  ;;  %246 = vst [vmem:[%s175_s29 + $0x18] sm:$0xff] (%p78_p3), %v245_v3 }
  0x18   : > { %248 = vst [vmem:[%s175_s29 + $0x20] sm:$0xff] (%p78_p3), %v247_v4  ;;  %250 = vst [vmem:[%s175_s29 + $0x28] sm:$0xff] (%p78_p3), %v249_v5  ;;  %v251_v6 = vld [vmem:[%s912_s28 + $0x60] sm:$0xff] (%p78_p3)  ;;  %v253_v7 = vld [vmem:[%s912_s28 + $0x70] sm:$0xff] (%p78_p3) }
  0x19   : > { %v255_v8 = vld [vmem:[%s912_s28 + $0x80] sm:$0xff]  ;;  %252 = vst [vmem:[%s175_s29 + $0x30] sm:$0xff] %v251_v6  ;;  %254 = vst [vmem:[%s175_s29 + $0x38] sm:$0xff] %v253_v7  ;;  %v257_v9 = vld [vmem:[%s912_s28 + $0x90] sm:$0xff] }
  0x1a   : > { %256 = vst [vmem:[%s175_s29 + $0x40] sm:$0xff] %v255_v8  ;;  %v259_v10 = vld [vmem:[%s912_s28 + $0xa0] sm:$0xff]  ;;  %v261_v11 = vld [vmem:[%s912_s28 + $0xb0] sm:$0xff]  ;;  %258 = vst [vmem:[%s175_s29 + $0x48] sm:$0xff] %v257_v9 }
  0x1b   : > { %260 = vst [vmem:[%s175_s29 + $0x50] sm:$0xff] %v259_v10  ;;  %262 = vst [vmem:[%s175_s29 + $0x58] sm:$0xff] %v261_v11  ;;  %v263_v12 = vld [vmem:[%s912_s28 + $0xc0] sm:$0xff]  ;;  %v265_v13 = vld [vmem:[%s912_s28 + $0xd0] sm:$0xff] }
  0x1c   : > { %v267_v14 = vld [vmem:[%s912_s28 + $0xe0] sm:$0xff]  ;;  %264 = vst [vmem:[%s175_s29 + $0x60] sm:$0xff] %v263_v12  ;;  %266 = vst [vmem:[%s175_s29 + $0x68] sm:$0xff] %v265_v13  ;;  %v269_v15 = vld [vmem:[%s912_s28 + $0xf0] sm:$0xff] }
  0x1d   : > { %268 = vst [vmem:[%s175_s29 + $0x70] sm:$0xff] %v267_v14  ;;  %270 = vst [vmem:[%s175_s29 + $0x78] sm:$0xff] %v269_v15 }
  0x1e PF: > { %p705_p8 = scmp.ge.s32.totalorder %s841_s16, 1  ;;  %p283_p9 = scmp.lt.s32.totalorder %s841_s16, 3 }
  0x20   : > { %p284_p10 = pnand %p705_p8, %p283_p9 }
  0x21   : > { %s290_s30 = sand.u32 (!%p284_p10), 1, %s825_s12   ;;  %v843_v16 = vmov (!%p284_p10), 0   ;;  %v802_v33 = vld [vmem:[%s965_s0] sm:$0xff] (!%p284_p10)   ;;  %s708_s8 = sshll.u32 (!%p284_p10), %s833_s14, 1  ;;  %v519_v34 = vlaneseq (!%p284_p10) }
  0x22   : > { %287 = sbr.rel (%p284_p10) target bundleno = 297 (0x129), region = 66  ;;  %s706_s4 = sshll.u32 (!%p284_p10), %s290_s30, 7  ;;  %491 = vmatprep.mubr.bf16.mxu0 (!%p284_p10), %v843_v16 }
  0x23   : > { %s292_s5 = scalar_lea.vmem (!%p284_p10), [#allocation3], %s706_s4  ;;  %p336_p11 = scmp.lt.s32.totalorder (!%p284_p10), %s708_s8, 3  ;;  %v520_v35 = vshrl.u32 (!%p284_p10), %v519_v34, 7 }
  0x24   : > { %v778_v17 = vld [vmem:[%s292_s5 + $0x4] ss:$8 sps:$4 sm:$0xff] (!%p284_p10)   ;;  %v780_v18 = vld [vmem:[%s292_s5] ss:$8 sps:$4 sm:$0xff] (!%p284_p10)   ;;  %v781_v19 = vld [vmem:[%s292_s5 + $0x14] ss:$8 sps:$4 sm:$0xff] (!%p284_p10)  }
  0x25   : > { %459 = vmatprep.subr.bf16.mxu0 (!%p284_p10), %v778_v17  ;;  %v783_v20 = vld [vmem:[%s292_s5 + $0x10] ss:$8 sps:$4 sm:$0xff] (!%p284_p10)   ;;  %v784_v21 = vld [vmem:[%s292_s5 + $0x24] ss:$8 sps:$4 sm:$0xff] (!%p284_p10)   ;;  %v786_v22 = vld [vmem:[%s292_s5 + $0x20] ss:$8 sps:$4 sm:$0xff] (!%p284_p10)  }
  0x26   : > { %460 = vmatpush1.bf16.msra.mxu0 (!%p284_p10), %v780_v18  ;;  %v787_v23 = vld [vmem:[%s292_s5 + $0x34] ss:$8 sps:$4 sm:$0xff] (!%p284_p10)   ;;  %v789_v24 = vld [vmem:[%s292_s5 + $0x30] ss:$8 sps:$4 sm:$0xff] (!%p284_p10)   ;;  %v790_v25 = vld [vmem:[%s292_s5 + $0x44] ss:$8 sps:$4 sm:$0xff] (!%p284_p10)  }
  0x27   : > { %461 = vmatprep.subr.bf16.mxu0 (!%p284_p10), %v781_v19  ;;  %v792_v26 = vld [vmem:[%s292_s5 + $0x40] ss:$8 sps:$4 sm:$0xff] (!%p284_p10)   ;;  %v793_v27 = vld [vmem:[%s292_s5 + $0x54] ss:$8 sps:$4 sm:$0xff] (!%p284_p10)   ;;  %v795_v28 = vld [vmem:[%s292_s5 + $0x50] ss:$8 sps:$4 sm:$0xff] (!%p284_p10)  }
  0x28   : > { %v796_v29 = vld [vmem:[%s292_s5 + $0x64] ss:$8 sps:$4 sm:$0xff] (!%p284_p10)   ;;  %v798_v30 = vld [vmem:[%s292_s5 + $0x60] ss:$8 sps:$4 sm:$0xff] (!%p284_p10)   ;;  %v799_v31 = vld [vmem:[%s292_s5 + $0x74] ss:$8 sps:$4 sm:$0xff] (!%p284_p10)  }
  0x29   : > { %v801_v32 = vld [vmem:[%s292_s5 + $0x70] ss:$8 sps:$4 sm:$0xff]   ;;  %s977_s8 = smov (!%p336_p11, %s708_s8), 3  ;;  %v521_v36 = vsub.s32 0, %v520_v35  ;;  %v525_v38 = vsub.s32 1, %v520_v35  ;;  %s707_s18 = sshll.u32 %s290_s30, 4 }
  0x2a   : > { %462 = vmatpush1.bf16.msra.mxu0 %v783_v20  ;;  %s338_s11 = scalar_lea.vmem %s967_s2, %s977_s8  ;;  %s323_s19 = scalar_lea.vmem [#allocation4], %s707_s18 }
  0x2b   : > { %463 = vmatprep.subr.bf16.mxu0 %v784_v21  ;;  %v517_v37 = vld [vmem:[%s338_s11] sm:$0x3]  ;;  %s736_s20 = sshll.u32 (%p899_p6), %s833_s14, 3 }
  0x2c   : > { %v522_v39 = vrot.slane %v517_v37, %v521_v36  ;;  %v526_v40 = vrot.slane %v517_v37, %v525_v38  ;;  %s559_s24 = scalar_lea.vmem (%p899_p6), %s968_s3, %s736_s20 }
  0x2e   : > { %464 = vmatpush1.bf16.msra.mxu0 %v786_v22 }
  0x2f   : > { %465 = vmatprep.subr.bf16.mxu0 %v787_v23 }
  0x32   : > { %466 = vmatpush1.bf16.msra.mxu0 %v789_v24 }
  0x33   : > { %467 = vmatprep.subr.bf16.mxu0 %v790_v25 }
  0x36   : > { %468 = vmatpush1.bf16.msra.mxu0 %v792_v26 }
  0x37   : > { %469 = vmatprep.subr.bf16.mxu0 %v793_v27 }
  0x3a   : > { %470 = vmatpush1.bf16.msra.mxu0 %v795_v28 }
  0x3b   : > { %471 = vmatprep.subr.bf16.mxu0 %v796_v29 }
  0x3e   : > { %472 = vmatpush1.bf16.msra.mxu0 %v798_v30 }
  0x3f   : > { %473 = vmatprep.subr.bf16.mxu0 %v799_v31 }
  0x42   : > { %474 = vmatpush1.bf16.msra.mxu0 %v801_v32 }
  0x45   : > { %492 = vmatmul.mubr.bf16.vlgmr.msra.gmra.mrb[0].mxu0 %v802_v33 }
 0x118   : > { %v493_v41 = vpop.f32.mrb[0].mxu0 }
 0x119   : > { %v529_v42 = vadd.f32 %v522_v39, %v493_v41  ;;  %v495_v43 = vpop.f32.mrb[1].mxu0 }
 0x11a   : > { %v530_v44 = vadd.f32 %v526_v40, %v495_v43  ;;  %v497_v45 = vpop.f32.mrb[2].mxu0  ;;  %553 = sbr.rel (!%p899_p6) target bundleno = 297 (0x129), region = 82 }
 0x11b   : > { %v531_v46 = vadd.f32 %v522_v39, %v497_v45  ;;  %v499_v47 = vpop.f32.mrb[3].mxu0 }
 0x11c   : > { %v734_v48 = vpack.c.bf16 %v530_v44, %v529_v42  ;;  %v532_v49 = vadd.f32 %v526_v40, %v499_v47 }
 0x11e   : > { %545 = vst [vmem:[%s323_s19] sm:$0xff] %v734_v48  ;;  %v735_v50 = vpack.c.bf16 %v532_v49, %v531_v46 }
 0x120   : > { %546 = vst [vmem:[%s323_s19 + $0x8] sm:$0xff] %v735_v50 }
 0x125   : > { %v589_v51 = vld [vmem:[%s323_s19] sm:$0xff] }
 0x126   : > { %590 = vst [vmem:[%s559_s24] sm:$0xff] %v589_v51 }
 0x127   : > { %v591_v52 = vld [vmem:[%s323_s19 + $0x8] sm:$0xff] }
 0x128   : > { %592 = vst [vmem:[%s559_s24 + $0x10] sm:$0xff] %v591_v52 }
 0x129 PF: > { %s13_s16 = sadd.s32 1, %s841_s16   ;;  %s970_s12 = smov %s829_s13 }
 0x12a   : > { %p10_p12 = scmp.ge.s32.totalorder %s13_s16, 4   ;;  %s971_s13 = smov %s904_s22 }
 0x12b   : > { %s972_s14 = smov %s837_s15  ;;  %s973_s15 = smov %s975_s17 }
 0x12c   :  { %12 = sbr.rel (!%p10_p12) target bundleno = 3 (0x3), region = 157 }

// kernel: _lambda_.23
= control target key start
LH: loop header
LB: loop body
LE: loop exit
PB: predicated region body
PF: predicated region fallthrough
CT: control target
= control target key end

     0   :  { %s475_s1 = inlined_call_operand.vmem [shape: bf16[256,128], index: 1, kind: input, shape index: {}]   ;;  %s476_s0 = inlined_call_operand.vmem [shape: bf16[16,256], index: 0, kind: input, shape index: {}]   ;;  %s477_s3 = inlined_call_operand.vmem [shape: bf16[16,128], index: 3, kind: input, shape index: {}]   ;;  %s478_s2 = inlined_call_operand.vmem [shape: f32[1,128], index: 2, kind: input, shape index: {}]   ;;  %s479_s4 = inlined_call_operand.vmem [shape: f32[1,128], index: 4, kind: input, shape index: {}]   ;;  %s480_s5 = inlined_call_operand.vmem [shape: f32[1,128], index: 5, kind: input, shape index: {}]   ;;  %s481_s6 = inlined_call_operand.vmem [shape: bf16[16,128], index: 6, kind: output, shape index: {}]  }
   0x1   :  { %v348_v0 = vld [vmem:[%s475_s1 + $0x40] sm:$0xff]   ;;  %v350_v2 = vld [vmem:[%s475_s1 + $0x48] sm:$0xff]   ;;  %v352_v4 = vld [vmem:[%s475_s1 + $0x50] sm:$0xff]  }
   0x2   :  { %v349_v1 = vld [vmem:[%s475_s1] sm:$0xff]   ;;  %326 = vmatprep.subr.bf16.mxu0 %v348_v0  ;;  %v351_v3 = vld [vmem:[%s475_s1 + $0x8] sm:$0xff]   ;;  %v353_v5 = vld [vmem:[%s475_s1 + $0x10] sm:$0xff]  }
   0x3   :  { %327 = vmatpush3.bf16.msra.mxu0 %v349_v1  ;;  %v354_v6 = vld [vmem:[%s475_s1 + $0x58] sm:$0xff]   ;;  %v356_v8 = vld [vmem:[%s475_s1 + $0x60] sm:$0xff]   ;;  %v358_v10 = vld [vmem:[%s475_s1 + $0x68] sm:$0xff]  }
   0x4   :  { %328 = vmatprep.subr.bf16.mxu0 %v350_v2  ;;  %v355_v7 = vld [vmem:[%s475_s1 + $0x18] sm:$0xff]   ;;  %v357_v9 = vld [vmem:[%s475_s1 + $0x20] sm:$0xff]   ;;  %v359_v12 = vld [vmem:[%s475_s1 + $0x28] sm:$0xff]  }
   0x5   :  { %v366_v11 = vld [vmem:[%s476_s0 + $0x4] ss:$8 sps:$4 sm:$0xff]   ;;  %v360_v13 = vld [vmem:[%s475_s1 + $0x70] sm:$0xff]   ;;  %v362_v15 = vld [vmem:[%s475_s1 + $0x78] sm:$0xff]  }
   0x6   :  { %204 = vmatprep.mubr.bf16.mxu0 %v366_v11  ;;  %v361_v14 = vld [vmem:[%s475_s1 + $0x30] sm:$0xff]   ;;  %v363_v16 = vld [vmem:[%s475_s1 + $0x38] sm:$0xff]   ;;  %v364_v17 = vld [vmem:[%s476_s0] ss:$8 sps:$4 sm:$0xff]  }
   0x7   :  { %329 = vmatpush3.bf16.msra.mxu0 %v351_v3  ;;  %v318_v18 = vld [vmem:[%s477_s3] sm:$0xff]  }
   0x8   :  { %330 = vmatprep.subr.bf16.mxu0 %v352_v4  ;;  %v310_v21 = vld [vmem:[%s478_s2] ss:$0 sm:$0xff]  ;;  %v319_v24 = vunpack.c.l.bf16 %v318_v18  ;;  %v320_v30 = vunpack.c.h.bf16 %v318_v18 }
   0x9   :  { %v311_v48 = vld [vmem:[%s479_s4] ss:$0 sm:$0xff] }
   0xa   :  { %v312_v52 = vld [vmem:[%s480_s5] ss:$0 sm:$0xff] }
   0xb   :  { %331 = vmatpush3.bf16.msra.mxu0 %v353_v5 }
   0xc   :  { %332 = vmatprep.subr.bf16.mxu0 %v354_v6 }
   0xf   :  { %333 = vmatpush3.bf16.msra.mxu0 %v355_v7 }
  0x10   :  { %334 = vmatprep.subr.bf16.mxu0 %v356_v8 }
  0x13   :  { %335 = vmatpush3.bf16.msra.mxu0 %v357_v9 }
  0x14   :  { %336 = vmatprep.subr.bf16.mxu0 %v358_v10 }
  0x17   :  { %337 = vmatpush3.bf16.msra.mxu0 %v359_v12 }
  0x18   :  { %338 = vmatprep.subr.bf16.mxu0 %v360_v13 }
  0x1b   :  { %339 = vmatpush3.bf16.msra.mxu0 %v361_v14 }
  0x1c   :  { %340 = vmatprep.subr.bf16.mxu0 %v362_v15 }
  0x1f   :  { %341 = vmatpush3.bf16.msra.mxu0 %v363_v16 }
  0x22   :  { %205 = vmatmul.mubr.bf16.vlgmr.msra.gmra.mrb[0].mxu0 %v364_v17 }
  0xf5   :  { %v342_v19 = vpop.f32.mrb[0].mxu0 }
  0xf6   :  { %v343_v20 = vpop.f32.mrb[1].mxu0 }
  0xf7   :  { %v344_v22 = vadd.f32 %v343_v20, %v342_v19  ;;  %v345_v23 = vpop.f32.mrb[2].mxu0 }
  0xf8   :  { %v346_v25 = vpop.f32.mrb[3].mxu0 }
  0xf9   :  { %v229_v26 = vadd.f32 %v344_v22, %v310_v21  ;;  %v347_v27 = vadd.f32 %v346_v25, %v345_v23 }
  0xfb   :  { %v230_v28 = vadd.f32 %v347_v27, %v310_v21  ;;  %v235_v29 = vadd.f32 %v319_v24, %v229_v26 }
  0xfd   :  { %237 = vadd.xlane.f32.xlu0 %v235_v29  ;;  %v236_v31 = vadd.f32 %v320_v30, %v230_v28 }
 0x101   :  { %239 = vadd.xlane.f32.xlu0 %v236_v31 }
 0x18a   :  { %v238_v32 = vpop.xlane.xlu0 %237 }
 0x18b   :  { %v242_v33 = vmul.f32 0.0078125, %v238_v32 }
 0x18d   :  { %v244_v34 = vsub.f32 %v235_v29, %v242_v33 }
 0x18e   :  { %v240_v35 = vpop.xlane.xlu0 %239 }
 0x18f   :  { %v243_v36 = vmul.f32 0.0078125, %v240_v35  ;;  %v246_v37 = vmul.f32 %v244_v34, %v244_v34 }
 0x191   :  { %v245_v38 = vsub.f32 %v236_v31, %v243_v36  ;;  %248 = vadd.xlane.f32.xlu1 %v246_v37 }
 0x193   :  { %v247_v39 = vmul.f32 %v245_v38, %v245_v38 }
 0x195   :  { %250 = vadd.xlane.f32.xlu1 %v247_v39 }
 0x21e   :  { %v249_v40 = vpop.xlane.xlu1 %248 }
 0x21f   :  { %v252_v41 = vmul.f32 0.0078125, %v249_v40 }
 0x221   :  { %v254_v42 = vadd.f32 1e-12, %v252_v41 }
 0x222   :  { %v251_v43 = vpop.xlane.xlu1 %250 }
 0x223   :  { %367 = vrsqrt.f32 %v254_v42  ;;  %v253_v44 = vmul.f32 0.0078125, %v251_v43 }
 0x225   :  { %v255_v45 = vadd.f32 1e-12, %v253_v44 }
 0x227   :  { %369 = vrsqrt.f32 %v255_v45 }
 0x22d   :  { %v368_v46 = vpop.eup %367 }
 0x22e   :  { %v258_v47 = vmul.f32 %v368_v46, %v244_v34 }
 0x230   :  { %v267_v50 = vmul.f32 %v311_v48, %v258_v47 }
 0x231   :  { %v370_v49 = vpop.eup %369 }
 0x232   :  { %v259_v51 = vmul.f32 %v370_v49, %v245_v38  ;;  %v276_v54 = vadd.f32 %v312_v52, %v267_v50 }
 0x234   :  { %v268_v53 = vmul.f32 %v311_v48, %v259_v51 }
 0x236   :  { %v277_v55 = vadd.f32 %v312_v52, %v268_v53 }
 0x238   :  { %v324_v56 = vpack.c.bf16 %v277_v55, %v276_v54 }
 0x23a   :  { %325 = vst [vmem:[%s481_s6] sm:$0xff] %v324_v56  }

// kernel: _lambda_.35
= control target key start
LH: loop header
LB: loop body
LE: loop exit
PB: predicated region body
PF: predicated region fallthrough
CT: control target
= control target key end

     0   :  { %v210_v0 = vmov 0.0   ;;  %vm211_vm0 = vmmov 0   ;;  %s268_s1 = inlined_call_operand.vmem [shape: bf16[128,128], index: 1, kind: input, shape index: {}]   ;;  %s269_s0 = inlined_call_operand.vmem [shape: bf16[16,128], index: 0, kind: input, shape index: {}]   ;;  %s270_s2 = inlined_call_operand.vmem [shape: f32[1,128], index: 2, kind: input, shape index: {}]   ;;  %s271_s3 = inlined_call_operand.vmem [shape: f32[16,128], index: 3, kind: output, shape index: {}]  }
   0x1   :  { %179 = vmatprep.subr.bf16.mxu0 %v210_v0  ;;  %v201_v1 = vld [vmem:[%s268_s1] sm:$0xff]   ;;  %195 = vmatprep.mubr.msk.bf16.mxu0 %vm211_vm0, %v210_v0  ;;  %v202_v2 = vld [vmem:[%s268_s1 + $0x8] sm:$0xff]   ;;  %v203_v3 = vld [vmem:[%s268_s1 + $0x10] sm:$0xff]  }
   0x2   :  { %180 = vmatpush3.bf16.msra.mxu0 %v201_v1  ;;  %v204_v4 = vld [vmem:[%s268_s1 + $0x18] sm:$0xff]   ;;  %v205_v5 = vld [vmem:[%s268_s1 + $0x20] sm:$0xff]   ;;  %v206_v6 = vld [vmem:[%s268_s1 + $0x28] sm:$0xff]  }
   0x3   :  { %181 = vmatprep.subr.bf16.mxu0 %v210_v0  ;;  %v207_v7 = vld [vmem:[%s268_s1 + $0x30] sm:$0xff]   ;;  %v208_v8 = vld [vmem:[%s268_s1 + $0x38] sm:$0xff]   ;;  %v209_v9 = vld [vmem:[%s269_s0] sm:$0xff]  }
   0x4   :  { %v169_v10 = vld [vmem:[%s270_s2] ss:$0 sm:$0xff] }
   0x6   :  { %182 = vmatpush3.bf16.msra.mxu0 %v202_v2 }
   0x7   :  { %183 = vmatprep.subr.bf16.mxu0 %v210_v0 }
   0xa   :  { %184 = vmatpush3.bf16.msra.mxu0 %v203_v3 }
   0xb   :  { %185 = vmatprep.subr.bf16.mxu0 %v210_v0 }
   0xe   :  { %186 = vmatpush3.bf16.msra.mxu0 %v204_v4 }
   0xf   :  { %187 = vmatprep.subr.bf16.mxu0 %v210_v0 }
  0x12   :  { %188 = vmatpush3.bf16.msra.mxu0 %v205_v5 }
  0x13   :  { %189 = vmatprep.subr.bf16.mxu0 %v210_v0 }
  0x16   :  { %190 = vmatpush3.bf16.msra.mxu0 %v206_v6 }
  0x17   :  { %191 = vmatprep.subr.bf16.mxu0 %v210_v0 }
  0x1a   :  { %192 = vmatpush3.bf16.msra.mxu0 %v207_v7 }
  0x1b   :  { %193 = vmatprep.subr.bf16.mxu0 %v210_v0 }
  0x1e   :  { %194 = vmatpush3.bf16.msra.mxu0 %v208_v8 }
  0x21   :  { %196 = vmatmul.mubr.bf16.vlgmr.msra.gmra.mrb[0].mxu0 %v209_v9 }
  0xf4   :  { %v129_v11 = vpop.f32.mrb[0].mxu0 }
  0xf5   :  { %v152_v12 = vadd.f32 %v169_v10, %v129_v11  ;;  %v197_v13 = vpop.f32.mrb[1].mxu0 }
  0xf6   :  { %v132_v14 = vpop.f32.mrb[2].mxu0 }
  0xf7   :  { %154 = vst [vmem:[%s271_s3] sm:$0xff] %v152_v12  ;;  %v153_v15 = vadd.f32 %v169_v10, %v132_v14  ;;  %v198_v16 = vpop.f32.mrb[3].mxu0 }
  0xf9   :  { %155 = vst [vmem:[%s271_s3 + $0x8] sm:$0xff] %v153_v15 }

// kernel: _lambda_.31
= control target key start
LH: loop header
LB: loop body
LE: loop exit
PB: predicated region body
PF: predicated region fallthrough
CT: control target
= control target key end

     0   :  { %vm71_vm0 = vcmask 517120   ;;  %v1729_v2 = vmov 0   ;;  %v1730_v4 = vmov 0.0   ;;  %s1731_s28 = smov 64   ;;  %vm130_vm1 = vcmask 523264   ;;  %s2165_s0 = inlined_call_operand.vmem [shape: bf16[2,8,512], index: 0, kind: input, shape index: {}]   ;;  %s2166_s1 = inlined_call_operand.vmem [shape: bf16[64,256], index: 1, kind: input, shape index: {}]   ;;  %s2167_s2 = inlined_call_operand.vmem [shape: bf16[2,8,64], index: 2, kind: output, shape index: {}]  }
   0x1   :  { %v1750_v0 = vld [vmem:[%s2166_s1 + $0x4] ss:$8 sps:$4 sm:$0xff]   ;;  %v1755_v1 = vld [vmem:[%s2166_s1] ss:$8 sps:$4 sm:$0xff]   ;;  %166 = vmatprep.mubr.bf16.mxu0 %v1729_v2  ;;  %333 = vmatprep.mubr.bf16.mxu1 %v1729_v2  ;;  %v1763_v3 = vld [vmem:[%s2166_s1 + $0x14] ss:$8 sps:$4 sm:$0xff]  }
   0x2   :  { %134 = vmatprep.subr.bf16.mxu0 %v1750_v0  ;;  %72 = vst.msk [vmem:[#allocation2] sm:$0x3] %vm71_vm0, %v1730_v4  ;;  %73 = vst.msk [vmem:[#allocation3] sm:$0x3] %vm71_vm0, %v1730_v4  ;;  %301 = vmatprep.subr.bf16.mxu1 %v1750_v0  ;;  %v1772_v5 = vld [vmem:[%s2166_s1 + $0x10] ss:$8 sps:$4 sm:$0xff]  }
   0x3   :  { %135 = vmatpush1.bf16.msra.mxu0 %v1755_v1  ;;  %302 = vmatpush1.bf16.msra.mxu1 %v1755_v1  ;;  %v1779_v6 = vld [vmem:[%s2166_s1 + $0x24] ss:$8 sps:$4 sm:$0xff]   ;;  %v1439_v8 = vld [vmem:[%s2165_s0 + $0x18] sm:$0xff]  ;;  %v1792_v9 = vld [vmem:[%s2166_s1 + $0x20] ss:$8 sps:$4 sm:$0xff]   ;;  %vm254_vm2 = vcmask 516096  }
   0x4   :  { %136 = vmatprep.subr.bf16.mxu0 %v1763_v3  ;;  %303 = vmatprep.subr.bf16.mxu1 %v1763_v3  ;;  %v1438_v7 = vld [vmem:[%s2165_s0 + $0x8] sm:$0xff]  ;;  %46 = vst [vmem:[#allocation4 + $0x8] sm:$0xff] %v1439_v8  ;;  %v1799_v10 = vld [vmem:[%s2166_s1 + $0x34] ss:$8 sps:$4 sm:$0xff]   ;;  %v1806_v13 = vld [vmem:[%s2166_s1 + $0x30] ss:$8 sps:$4 sm:$0xff]  }
   0x5   :  { %44 = vst [vmem:[#allocation4] sm:$0xff] %v1438_v7  ;;  %vm252_vm3 = vcmask 523271   ;;  %vm413_vm4 = vcmask 1047559   ;;  %vm418_vm5 = vcmask 523270   ;;  %vm573_vm6 = vcmask 1046534  }
   0x6   :  { %vm578_vm7 = vcmask 522245   ;;  %vm734_vm8 = vcmask 1045509   ;;  %vm739_vm9 = vcmask 521220   ;;  %vm894_vm10 = vcmask 1044484  }
   0x7   :  { %137 = vmatpush1.bf16.msra.mxu0 %v1772_v5  ;;  %304 = vmatpush1.bf16.msra.mxu1 %v1772_v5  ;;  %vm899_vm11 = vcmask 520195   ;;  %vm1055_vm12 = vcmask 1043459   ;;  %vm1060_vm13 = vcmask 519170   ;;  %vm1212_vm14 = vcmask 1042434  }
   0x8   :  { %138 = vmatprep.subr.bf16.mxu0 %v1779_v6  ;;  %305 = vmatprep.subr.bf16.mxu1 %v1779_v6  ;;  %vm1217_vm15 = vcmask 518145  }
   0x9   :  { %v215_v11 = vld [vmem:[#allocation3] sm:$0x3]  ;;  %v88_v14 = vld [vmem:[#allocation2] sm:$0x3] }
   0xa   :  { %v218_v12 = vrot.slane %v215_v11, 2  ;;  %v217_v15 = vrot.slane %v215_v11, 1  ;;  %v89_v16 = vpack.c.bf16 %v88_v14, %v88_v14 }
   0xb   :  { %139 = vmatpush1.bf16.msra.mxu0 %v1792_v9  ;;  %306 = vmatpush1.bf16.msra.mxu1 %v1792_v9  ;;  %v83_v18 = vld [vmem:[#allocation4 + $0x8] sm:$0x88] }
   0xc   :  { %140 = vmatprep.subr.bf16.mxu0 %v1799_v10  ;;  %221 = vrot.lane.b32.xlu0 %v218_v12, %s1731_s28  ;;  %v82_v17 = vld [vmem:[#allocation4] sm:$0x88]  ;;  %v86_v20 = vunpack.c.l.bf16 %v83_v18  ;;  %v87_v33 = vunpack.c.h.bf16 %v83_v18 }
   0xd   :  { %307 = vmatprep.subr.bf16.mxu1 %v1799_v10  ;;  %v84_v19 = vunpack.c.l.bf16 %v82_v17  ;;  %v85_v31 = vunpack.c.h.bf16 %v82_v17 }
   0xf   :  { %141 = vmatpush1.bf16.msra.mxu0 %v1806_v13  ;;  %308 = vmatpush1.bf16.msra.mxu1 %v1806_v13 }
  0x10   :  { %219 = vrot.lane.b32.xlu0 %v217_v15, %s1731_s28  ;;  %461 = vmatprep.subr.bf16.mxu0 %v1750_v0 }
  0x11   :  { %622 = vmatprep.subr.bf16.mxu1 %v1750_v0 }
  0x12   :  { %1448 = vmatmul.mubr.msk.bf16.vlgmr.msra.gmra.mrb[0].mxu0 %vm130_vm1, %v89_v16 }
  0x13   :  { %462 = vmatpush1.bf16.msra.mxu0 %v1755_v1  ;;  %493 = vmatprep.mubr.bf16.mxu0 %v1729_v2 }
  0x14   :  { %463 = vmatprep.subr.bf16.mxu0 %v1763_v3 }
  0x17   :  { %464 = vmatpush1.bf16.msra.mxu0 %v1772_v5 }
  0x18   :  { %465 = vmatprep.subr.bf16.mxu0 %v1779_v6 }
  0x1b   :  { %466 = vmatpush1.bf16.msra.mxu0 %v1792_v9 }
  0x1c   :  { %467 = vmatprep.subr.bf16.mxu0 %v1799_v10 }
  0x1f   :  { %468 = vmatpush1.bf16.msra.mxu0 %v1806_v13 }
  0x20   :  { %782 = vmatprep.subr.bf16.mxu0 %v1750_v0 }
  0x7e   :  { %v222_v49 = vpop.permute.xlu0 %221 }
  0x82   :  { %v220_v54 = vpop.permute.xlu0 %219 }
  0xe5   :  { %v168_v21 = vpop.f32.mrb[0].mxu0 }
  0xe6   :  { %v177_v22 = vrot.slane %v168_v21, 1  ;;  %v179_v23 = vrot.slane %v168_v21, 2  ;;  %v170_v24 = vpop.f32.mrb[1].mxu0 }
  0xe7   :  { %v172_v25 = vpop.f32.mrb[2].mxu0  ;;  %v178_v32 = vrot.slane %v170_v24, 1  ;;  %v180_v34 = vrot.slane %v170_v24, 2  ;;  %v291_v24 = vld [vmem:[#allocation4 + $0x8] sm:$0x88] }
  0xe8   :  { %v185_v26 = vadd.f32 %v177_v22, %v84_v19  ;;  %v187_v27 = vadd.f32 %v179_v23, %v86_v20  ;;  %v173_v28 = vpop.f32.mrb[3].mxu0  ;;  %v290_v23 = vld [vmem:[#allocation4] sm:$0x88] }
  0xe9   :  { %v186_v35 = vadd.f32 %v178_v32, %v85_v31  ;;  %v188_v36 = vadd.f32 %v180_v34, %v87_v33  ;;  %v292_v25 = vunpack.c.l.bf16 %v290_v23 }
  0xea   :  { %v1449_v29 = vmul.f32 -1.442695, %v185_v26  ;;  %v1450_v30 = vmul.f32 -1.442695, %v187_v27  ;;  %v294_v26 = vunpack.c.l.bf16 %v291_v24 }
  0xeb   :  { %v1452_v47 = vmul.f32 -1.442695, %v188_v36  ;;  %v1451_v48 = vmul.f32 -1.442695, %v186_v35 }
  0xec   :  { %1535 = vpow2.f32 %v1449_v29 }
  0xed   :  { %1537 = vpow2.f32 %v1450_v30 }
  0xee   :  { %1539 = vtanh.f32 %v186_v35 }
  0xef   :  { %1541 = vtanh.f32 %v188_v36 }
  0xf6   :  { %v1536_v37 = vpop.eup %1535 }
  0xf7   :  { %v1538_v38 = vpop.eup %1537  ;;  %v195_v39 = vadd.f32 1.0, %v1536_v37  ;;  %v293_v37 = vunpack.c.h.bf16 %v290_v23 }
  0xf8   :  { %v196_v40 = vadd.f32 1.0, %v1538_v38  ;;  %v1540_v41 = vpop.eup %1539 }
  0xf9   :  { %1543 = vrcp.f32 %v195_v39  ;;  %v1542_v42 = vpop.eup %1541  ;;  %v295_v39 = vunpack.c.h.bf16 %v291_v24 }
  0xfa   :  { %1545 = vrcp.f32 %v196_v40 }
  0xfb   :  { %1547 = vpow2.f32 %v1452_v47 }
  0xfc   :  { %1549 = vpow2.f32 %v1451_v48 }
 0x103   :  { %v1544_v43 = vpop.eup %1543 }
 0x104   :  { %v1546_v44 = vpop.eup %1545  ;;  %v227_v45 = vmul.f32 %v1544_v43, %v1540_v41  ;;  %v225_v58 = vmul.f32 %v1544_v43, %v220_v54 }
 0x105   :  { %v228_v46 = vmul.f32 %v1546_v44, %v1542_v42  ;;  %v1548_v50 = vpop.eup %1547  ;;  %v226_v53 = vmul.f32 %v1546_v44, %v222_v49 }
 0x106   :  { %v210_v51 = vadd.f32 1.0, %v1548_v50  ;;  %v1550_v52 = vpop.eup %1549 }
 0x107   :  { %233 = vrot.lane.b32.xlu1 %v228_v46, %s1731_s28  ;;  %v209_v57 = vadd.f32 1.0, %v1550_v52 }
 0x108   :  { %1551 = vrcp.f32 %v210_v51 }
 0x10b   :  { %231 = vrot.lane.b32.xlu1 %v227_v45, %s1731_s28 }
 0x112   :  { %v1552_v61 = vpop.eup %1551 }
 0x179   :  { %v234_v55 = vpop.permute.xlu1 %233 }
 0x17a   :  { %v238_v56 = vadd.f32 %v234_v55, %v226_v53 }
 0x17c   :  { %1553 = vtanh.f32 %v238_v56  ;;  %v245_v12 = vrot.slane %v238_v56, 7 }
 0x17d   :  { %v232_v59 = vpop.permute.xlu1 %231  ;;  %1555 = vrcp.f32 %v209_v57 }
 0x17e   :  { %v237_v60 = vadd.f32 %v232_v59, %v225_v58 }
 0x180   :  { %1557 = vtanh.f32 %v237_v60 }
 0x186   :  { %v1554_v62 = vpop.eup %1553 }
 0x187   :  { %v1829_v63 = vmul.f32 %v1554_v62, %v1552_v61  ;;  %v1556_v4 = vpop.eup %1555 }
 0x189   :  { %v258_v7 = vrot.slane %v1829_v63, 7 }
 0x18a   :  { %v1558_v8 = vpop.eup %1557 }
 0x18b   :  { %261 = vrot.lane.b32.xlu1 %v258_v7, %s1731_s28  ;;  %v1833_v11 = vmul.f32 %v1558_v8, %v1556_v4 }
 0x18d   :  { %259 = vrot.lane.b32.xlu0 %v1833_v11, %s1731_s28 }
 0x18f   :  { %248 = vrot.lane.b32.xlu1 %v245_v12, %s1731_s28 }
 0x191   :  { %246 = vrot.lane.b32.xlu0 %v237_v60, %s1731_s28 }
 0x1fd   :  { %v262_v14 = vpop.permute.xlu1 %261 }
 0x1fe   :  { %266 = vst.msk [vmem:[#allocation2 + $0x1] sm:$0x1] %vm254_vm2, %v262_v14 }
 0x1ff   :  { %v260_v15 = vpop.permute.xlu0 %259 }
 0x200   :  { %265 = vst.msk [vmem:[#allocation2 - $0x7] sm:$0x80] %vm252_vm3, %v260_v15 }
 0x201   :  { %v249_v16 = vpop.permute.xlu1 %248 }
 0x202   :  { %255 = vst.msk [vmem:[#allocation3 + $0x1] sm:$0x1] %vm254_vm2, %v249_v16 }
 0x203   :  { %v247_v17 = vpop.permute.xlu0 %246 }
 0x204   :  { %253 = vst.msk [vmem:[#allocation3 - $0x7] sm:$0x80] %vm252_vm3, %v247_v17  ;;  %vm282_vm3 = vsmask.f32 7950 }
 0x207   :  { %v296_v18 = vld [vmem:[#allocation2] sm:$0x3] }
 0x208   :  { %v297_v19 = vpack.c.bf16 %v296_v18, %v296_v18 }
 0x20a   :  { %1455 = vmatmul.mubr.msk.bf16.vlgmr.msra.gmra.mrb[0].mxu1 %vm130_vm1, %v297_v19 }
 0x20b   :  { %v382_v20 = vld [vmem:[#allocation3] sm:$0x3]  ;;  %623 = vmatpush1.bf16.msra.mxu1 %v1755_v1  ;;  %654 = vmatprep.mubr.bf16.mxu1 %v1729_v2 }
 0x20c   :  { %v385_v21 = vrot.slane %v382_v20, 3  ;;  %v384_v22 = vrot.slane %v382_v20, 2  ;;  %624 = vmatprep.subr.bf16.mxu1 %v1763_v3 }
 0x20e   :  { %388 = vrot.lane.b32.xlu0 %v385_v21, %s1731_s28  ;;  %386 = vrot.lane.b32.xlu1 %v384_v22, %s1731_s28 }
 0x20f   :  { %625 = vmatpush1.bf16.msra.mxu1 %v1772_v5 }
 0x210   :  { %626 = vmatprep.subr.bf16.mxu1 %v1779_v6 }
 0x213   :  { %627 = vmatpush1.bf16.msra.mxu1 %v1792_v9 }
 0x214   :  { %628 = vmatprep.subr.bf16.mxu1 %v1799_v10 }
 0x217   :  { %629 = vmatpush1.bf16.msra.mxu1 %v1806_v13 }
 0x218   :  { %943 = vmatprep.subr.bf16.mxu1 %v1750_v0 }
 0x280   :  { %v387_v57 = vpop.permute.xlu1 %386  ;;  %v389_v58 = vpop.permute.xlu0 %388 }
 0x2dd   :  { %v335_v27 = vpop.f32.mrb[0].mxu1 }
 0x2de   :  { %v344_v28 = vrot.slane %v335_v27, 2  ;;  %v346_v29 = vrot.slane %v335_v27, 3  ;;  %v337_v30 = vpop.f32.mrb[1].mxu1 }
 0x2df   :  { %v339_v31 = vpop.f32.mrb[2].mxu1  ;;  %v345_v38 = vrot.slane %v337_v30, 2  ;;  %v347_v40 = vrot.slane %v337_v30, 3 }
 0x2e0   :  { %v352_v32 = vadd.f32 %v344_v28, %v292_v25  ;;  %v354_v33 = vadd.f32 %v346_v29, %v294_v26  ;;  %v340_v34 = vpop.f32.mrb[3].mxu1  ;;  %v450_v31 = vld [vmem:[#allocation4] sm:$0x44] }
 0x2e1   :  { %v353_v41 = vadd.f32 %v345_v38, %v293_v37  ;;  %v355_v42 = vadd.f32 %v347_v40, %v295_v39 }
 0x2e2   :  { %v1456_v35 = vmul.f32 -1.442695, %v352_v32  ;;  %v1457_v36 = vmul.f32 -1.442695, %v354_v33  ;;  %v451_v32 = vld [vmem:[#allocation4 + $0x8] sm:$0x44]  ;;  %v452_v33 = vunpack.c.l.bf16 %v450_v31 }
 0x2e3   :  { %v1458_v53 = vmul.f32 -1.442695, %v353_v41  ;;  %v1459_v54 = vmul.f32 -1.442695, %v355_v42  ;;  %v454_v34 = vunpack.c.l.bf16 %v451_v32 }
 0x2e4   :  { %1559 = vpow2.f32 %v1456_v35 }
 0x2e5   :  { %1561 = vpow2.f32 %v1457_v36 }
 0x2e6   :  { %1563 = vtanh.f32 %v353_v41 }
 0x2e7   :  { %1565 = vtanh.f32 %v355_v42 }
 0x2ee   :  { %v1560_v43 = vpop.eup %1559 }
 0x2ef   :  { %v1562_v44 = vpop.eup %1561  ;;  %v362_v45 = vadd.f32 1.0, %v1560_v43 }
 0x2f0   :  { %v363_v46 = vadd.f32 1.0, %v1562_v44  ;;  %v1564_v47 = vpop.eup %1563 }
 0x2f1   :  { %1567 = vrcp.f32 %v362_v45  ;;  %v1566_v48 = vpop.eup %1565  ;;  %v453_v45 = vunpack.c.h.bf16 %v450_v31 }
 0x2f2   :  { %1569 = vrcp.f32 %v363_v46 }
 0x2f3   :  { %1571 = vpow2.f32 %v1458_v53 }
 0x2f4   :  { %1573 = vpow2.f32 %v1459_v54 }
 0x2fb   :  { %v1568_v49 = vpop.eup %1567 }
 0x2fc   :  { %v1570_v50 = vpop.eup %1569  ;;  %v394_v51 = vmul.f32 %v1568_v49, %v1564_v47  ;;  %v392_v61 = vmul.f32 %v1568_v49, %v387_v57  ;;  %v455_v47 = vunpack.c.h.bf16 %v451_v32 }
 0x2fd   :  { %v395_v52 = vmul.f32 %v1570_v50, %v1566_v48  ;;  %v1572_v55 = vpop.eup %1571  ;;  %v393_v62 = vmul.f32 %v1570_v50, %v389_v58 }
 0x2fe   :  { %398 = vrot.lane.b32.xlu1 %v394_v51, %s1731_s28  ;;  %v1574_v56 = vpop.eup %1573  ;;  %v376_v59 = vadd.f32 1.0, %v1572_v55 }
 0x2ff   :  { %400 = vrot.lane.b32.xlu0 %v395_v52, %s1731_s28  ;;  %v377_v60 = vadd.f32 1.0, %v1574_v56 }
 0x300   :  { %1575 = vrcp.f32 %v376_v59 }
 0x301   :  { %1577 = vrcp.f32 %v377_v60 }
 0x30a   :  { %v1576_v16 = vpop.eup %1575 }
 0x30b   :  { %v1578_v17 = vpop.eup %1577 }
 0x370   :  { %v399_v4 = vpop.permute.xlu1 %398 }
 0x371   :  { %v401_v7 = vpop.permute.xlu0 %400  ;;  %v404_v8 = vadd.f32 %v399_v4, %v392_v61 }
 0x372   :  { %v405_v12 = vadd.f32 %v401_v7, %v393_v62 }
 0x373   :  { %1579 = vtanh.f32 %v404_v8 }
 0x374   :  { %1581 = vtanh.f32 %v405_v12  ;;  %v412_v14 = vrot.slane %v405_v12, 7 }
 0x376   :  { %v414_v15 = vsel %vm413_vm4, %v412_v14, %v404_v8 }
 0x377   :  { %415 = vrot.lane.b32.xlu1 %v414_v15, %s1731_s28 }
 0x37d   :  { %v1580_v18 = vpop.eup %1579 }
 0x37e   :  { %v1582_v19 = vpop.eup %1581  ;;  %v1856_v20 = vmul.f32 %v1580_v18, %v1576_v16 }
 0x37f   :  { %v1858_v21 = vmul.f32 %v1582_v19, %v1578_v17 }
 0x381   :  { %v422_v22 = vrot.slane %v1858_v21, 7 }
 0x383   :  { %v423_v23 = vsel %vm413_vm4, %v422_v22, %v1856_v20 }
 0x384   :  { %424 = vrot.lane.b32.xlu0 %v423_v23, %s1731_s28 }
 0x3e9   :  { %v416_v24 = vpop.permute.xlu1 %415 }
 0x3ea   :  { %419 = vst.msk [vmem:[#allocation3 - $0x6] sm:$0xc0] %vm418_vm5, %v416_v24 }
 0x3f1   :  { %v542_v25 = vld [vmem:[#allocation3] sm:$0x3] }
 0x3f2   :  { %v544_v26 = vrot.slane %v542_v25, 3  ;;  %v545_v27 = vrot.slane %v542_v25, 4 }
 0x3f4   :  { %546 = vrot.lane.b32.xlu1 %v544_v26, %s1731_s28  ;;  %548 = vrot.lane.b32.xlu0 %v545_v27, %s1731_s28 }
 0x3f6   :  { %v425_v28 = vpop.permute.xlu0 %424 }
 0x3f7   :  { %427 = vst.msk [vmem:[#allocation2 - $0x6] sm:$0xc0] %vm418_vm5, %v425_v28  ;;  %vm602_vm5 = vcmask 518146  }
 0x3fe   :  { %v456_v29 = vld [vmem:[#allocation2] sm:$0x3] }
 0x3ff   :  { %v457_v30 = vpack.c.bf16 %v456_v29, %v456_v29 }
 0x401   :  { %1462 = vmatmul.mubr.msk.bf16.vlgmr.msra.gmra.mrb[4].mxu0 %vm130_vm1, %v457_v30 }
 0x402   :  { %783 = vmatpush1.bf16.msra.mxu0 %v1755_v1  ;;  %814 = vmatprep.mubr.bf16.mxu0 %v1729_v2 }
 0x403   :  { %784 = vmatprep.subr.bf16.mxu0 %v1763_v3 }
 0x406   :  { %785 = vmatpush1.bf16.msra.mxu0 %v1772_v5 }
 0x407   :  { %786 = vmatprep.subr.bf16.mxu0 %v1779_v6 }
 0x40a   :  { %787 = vmatpush1.bf16.msra.mxu0 %v1792_v9 }
 0x40b   :  { %788 = vmatprep.subr.bf16.mxu0 %v1799_v10 }
 0x40e   :  { %789 = vmatpush1.bf16.msra.mxu0 %v1806_v13 }
 0x40f   :  { %1103 = vmatprep.subr.bf16.mxu0 %v1750_v0 }
 0x466   :  { %v547_v8 = vpop.permute.xlu1 %546  ;;  %v549_v12 = vpop.permute.xlu0 %548 }
 0x4d4   :  { %v495_v35 = vpop.f32.mrb[4].mxu0 }
 0x4d5   :  { %v504_v36 = vrot.slane %v495_v35, 3  ;;  %v506_v37 = vrot.slane %v495_v35, 4  ;;  %v497_v38 = vpop.f32.mrb[5].mxu0 }
 0x4d6   :  { %v499_v39 = vpop.f32.mrb[6].mxu0  ;;  %v505_v46 = vrot.slane %v497_v38, 3  ;;  %v507_v48 = vrot.slane %v497_v38, 4 }
 0x4d7   :  { %v512_v40 = vadd.f32 %v504_v36, %v452_v33  ;;  %v514_v41 = vadd.f32 %v506_v37, %v454_v34  ;;  %v500_v42 = vpop.f32.mrb[7].mxu0 }
 0x4d8   :  { %v513_v49 = vadd.f32 %v505_v46, %v453_v45  ;;  %v515_v50 = vadd.f32 %v507_v48, %v455_v47  ;;  %v612_v42 = vld [vmem:[#allocation4 + $0x8] sm:$0x44] }
 0x4d9   :  { %v1463_v43 = vmul.f32 -1.442695, %v512_v40  ;;  %v1464_v44 = vmul.f32 -1.442695, %v514_v41  ;;  %v611_v41 = vld [vmem:[#allocation4] sm:$0x44] }
 0x4da   :  { %v1465_v61 = vmul.f32 -1.442695, %v513_v49  ;;  %v1466_v62 = vmul.f32 -1.442695, %v515_v50 }
 0x4db   :  { %1583 = vpow2.f32 %v1463_v43  ;;  %v613_v43 = vunpack.c.l.bf16 %v611_v41 }
 0x4dc   :  { %1585 = vpow2.f32 %v1464_v44  ;;  %v615_v44 = vunpack.c.l.bf16 %v612_v42 }
 0x4dd   :  { %1587 = vtanh.f32 %v513_v49 }
 0x4de   :  { %1589 = vtanh.f32 %v515_v50 }
 0x4e5   :  { %v1584_v51 = vpop.eup %1583 }
 0x4e6   :  { %v1586_v52 = vpop.eup %1585  ;;  %v522_v53 = vadd.f32 1.0, %v1584_v51 }
 0x4e7   :  { %v523_v54 = vadd.f32 1.0, %v1586_v52  ;;  %v1588_v55 = vpop.eup %1587 }
 0x4e8   :  { %1591 = vrcp.f32 %v522_v53  ;;  %v1590_v56 = vpop.eup %1589 }
 0x4e9   :  { %1593 = vrcp.f32 %v523_v54 }
 0x4ea   :  { %1595 = vpow2.f32 %v1465_v61 }
 0x4eb   :  { %1597 = vpow2.f32 %v1466_v62 }
 0x4f2   :  { %v1592_v57 = vpop.eup %1591 }
 0x4f3   :  { %v1594_v58 = vpop.eup %1593  ;;  %v554_v59 = vmul.f32 %v1592_v57, %v1588_v55  ;;  %v552_v16 = vmul.f32 %v1592_v57, %v547_v8  ;;  %v614_v55 = vunpack.c.h.bf16 %v611_v41  ;;  %v616_v57 = vunpack.c.h.bf16 %v612_v42 }
 0x4f4   :  { %v555_v60 = vmul.f32 %v1594_v58, %v1590_v56  ;;  %v1596_v4 = vpop.eup %1595  ;;  %v553_v18 = vmul.f32 %v1594_v58, %v549_v12 }
 0x4f5   :  { %558 = vrot.lane.b32.xlu1 %v554_v59, %s1731_s28  ;;  %v1598_v7 = vpop.eup %1597  ;;  %v536_v14 = vadd.f32 1.0, %v1596_v4 }
 0x4f6   :  { %560 = vrot.lane.b32.xlu0 %v555_v60, %s1731_s28  ;;  %v537_v15 = vadd.f32 1.0, %v1598_v7 }
 0x4f7   :  { %1599 = vrcp.f32 %v536_v14 }
 0x4f8   :  { %1601 = vrcp.f32 %v537_v15 }
 0x501   :  { %v1600_v26 = vpop.eup %1599 }
 0x502   :  { %v1602_v27 = vpop.eup %1601 }
 0x567   :  { %v559_v17 = vpop.permute.xlu1 %558 }
 0x568   :  { %v564_v19 = vadd.f32 %v559_v17, %v552_v16  ;;  %v561_v22 = vpop.permute.xlu0 %560 }
 0x569   :  { %v565_v23 = vadd.f32 %v561_v22, %v553_v18 }
 0x56a   :  { %1603 = vtanh.f32 %v564_v19 }
 0x56b   :  { %1605 = vtanh.f32 %v565_v23  ;;  %v572_v24 = vrot.slane %v565_v23, 7 }
 0x56d   :  { %v574_v25 = vsel %vm573_vm6, %v572_v24, %v564_v19 }
 0x56e   :  { %575 = vrot.lane.b32.xlu1 %v574_v25, %s1731_s28 }
 0x574   :  { %v1604_v28 = vpop.eup %1603 }
 0x575   :  { %v1606_v29 = vpop.eup %1605  ;;  %v1878_v30 = vmul.f32 %v1604_v28, %v1600_v26 }
 0x576   :  { %v1880_v31 = vmul.f32 %v1606_v29, %v1602_v27 }
 0x578   :  { %v582_v32 = vrot.slane %v1880_v31, 7 }
 0x57a   :  { %v583_v33 = vsel %vm573_vm6, %v582_v32, %v1878_v30  ;;  %vm603_vm6 = vsmask.f32 7946 }
 0x57b   :  { %584 = vrot.lane.b32.xlu0 %v583_v33, %s1731_s28 }
 0x5e0   :  { %v576_v34 = vpop.permute.xlu1 %575 }
 0x5e1   :  { %579 = vst.msk [vmem:[#allocation3 - $0x5] sm:$0x60] %vm578_vm7, %v576_v34 }
 0x5e8   :  { %v703_v35 = vld [vmem:[#allocation3] sm:$0x3] }
 0x5e9   :  { %v705_v36 = vrot.slane %v703_v35, 4  ;;  %v706_v37 = vrot.slane %v703_v35, 5 }
 0x5eb   :  { %707 = vrot.lane.b32.xlu1 %v705_v36, %s1731_s28  ;;  %709 = vrot.lane.b32.xlu0 %v706_v37, %s1731_s28 }
 0x5ed   :  { %v585_v38 = vpop.permute.xlu0 %584 }
 0x5ee   :  { %587 = vst.msk [vmem:[#allocation2 - $0x5] sm:$0x60] %vm578_vm7, %v585_v38  ;;  %vm1370_vm7 = vcmask 1041409  }
 0x5f5   :  { %v617_v39 = vld [vmem:[#allocation2] sm:$0x3] }
 0x5f6   :  { %v618_v40 = vpack.c.bf16 %v617_v39, %v617_v39 }
 0x5f8   :  { %1469 = vmatmul.mubr.msk.bf16.vlgmr.msra.gmra.mrb[4].mxu1 %vm130_vm1, %v618_v40 }
 0x5f9   :  { %944 = vmatpush1.bf16.msra.mxu1 %v1755_v1  ;;  %975 = vmatprep.mubr.bf16.mxu1 %v1729_v2 }
 0x5fa   :  { %945 = vmatprep.subr.bf16.mxu1 %v1763_v3 }
 0x5fd   :  { %946 = vmatpush1.bf16.msra.mxu1 %v1772_v5 }
 0x5fe   :  { %947 = vmatprep.subr.bf16.mxu1 %v1779_v6 }
 0x601   :  { %948 = vmatpush1.bf16.msra.mxu1 %v1792_v9 }
 0x602   :  { %949 = vmatprep.subr.bf16.mxu1 %v1799_v10 }
 0x605   :  { %950 = vmatpush1.bf16.msra.mxu1 %v1806_v13 }
 0x606   :  { %1261 = vmatprep.subr.bf16.mxu1 %v1750_v0 }
 0x65d   :  { %v708_v23 = vpop.permute.xlu1 %707  ;;  %v710_v24 = vpop.permute.xlu0 %709 }
 0x6cb   :  { %v656_v45 = vpop.f32.mrb[4].mxu1 }
 0x6cc   :  { %v665_v46 = vrot.slane %v656_v45, 4  ;;  %v667_v47 = vrot.slane %v656_v45, 5  ;;  %v658_v48 = vpop.f32.mrb[5].mxu1 }
 0x6cd   :  { %v660_v49 = vpop.f32.mrb[6].mxu1  ;;  %v666_v56 = vrot.slane %v658_v48, 4  ;;  %v668_v0 = vrot.slane %v658_v48, 5 }
 0x6ce   :  { %v673_v50 = vadd.f32 %v665_v46, %v613_v43  ;;  %v675_v51 = vadd.f32 %v667_v47, %v615_v44  ;;  %v661_v52 = vpop.f32.mrb[7].mxu1 }
 0x6cf   :  { %v674_v58 = vadd.f32 %v666_v56, %v614_v55  ;;  %v676_v59 = vadd.f32 %v668_v0, %v616_v57  ;;  %v771_v52 = vld [vmem:[#allocation4] sm:$0x22] }
 0x6d0   :  { %v1470_v53 = vmul.f32 -1.442695, %v673_v50  ;;  %v1471_v54 = vmul.f32 -1.442695, %v675_v51 }
 0x6d1   :  { %v1472_v17 = vmul.f32 -1.442695, %v674_v58  ;;  %v1473_v18 = vmul.f32 -1.442695, %v676_v59 }
 0x6d2   :  { %1607 = vpow2.f32 %v1470_v53  ;;  %v772_v53 = vld [vmem:[#allocation4 + $0x8] sm:$0x22] }
 0x6d3   :  { %1609 = vpow2.f32 %v1471_v54  ;;  %v773_v54 = vunpack.c.l.bf16 %v771_v52  ;;  %v775_v55 = vunpack.c.l.bf16 %v772_v53 }
 0x6d4   :  { %1611 = vtanh.f32 %v674_v58 }
 0x6d5   :  { %1613 = vtanh.f32 %v676_v59 }
 0x6dc   :  { %v1608_v60 = vpop.eup %1607 }
 0x6dd   :  { %v1610_v61 = vpop.eup %1609  ;;  %v683_v62 = vadd.f32 1.0, %v1608_v60 }
 0x6de   :  { %v684_v4 = vadd.f32 1.0, %v1610_v61  ;;  %v1612_v7 = vpop.eup %1611 }
 0x6df   :  { %1615 = vrcp.f32 %v683_v62  ;;  %v1614_v8 = vpop.eup %1613 }
 0x6e0   :  { %1617 = vrcp.f32 %v684_v4  ;;  %v774_v4 = vunpack.c.h.bf16 %v771_v52 }
 0x6e1   :  { %1619 = vpow2.f32 %v1472_v17 }
 0x6e2   :  { %1621 = vpow2.f32 %v1473_v18 }
 0x6e9   :  { %v1616_v12 = vpop.eup %1615 }
 0x6ea   :  { %v1618_v14 = vpop.eup %1617  ;;  %v715_v15 = vmul.f32 %v1616_v12, %v1612_v7  ;;  %v713_v27 = vmul.f32 %v1616_v12, %v708_v23 }
 0x6eb   :  { %v716_v16 = vmul.f32 %v1618_v14, %v1614_v8  ;;  %v1620_v19 = vpop.eup %1619  ;;  %v714_v29 = vmul.f32 %v1618_v14, %v710_v24  ;;  %v776_v8 = vunpack.c.h.bf16 %v772_v53 }
 0x6ec   :  { %719 = vrot.lane.b32.xlu1 %v715_v15, %s1731_s28  ;;  %v1622_v22 = vpop.eup %1621  ;;  %v697_v25 = vadd.f32 1.0, %v1620_v19 }
 0x6ed   :  { %721 = vrot.lane.b32.xlu0 %v716_v16, %s1731_s28  ;;  %v698_v26 = vadd.f32 1.0, %v1622_v22 }
 0x6ee   :  { %1623 = vrcp.f32 %v697_v25 }
 0x6ef   :  { %1625 = vrcp.f32 %v698_v26 }
 0x6f8   :  { %v1624_v37 = vpop.eup %1623 }
 0x6f9   :  { %v1626_v38 = vpop.eup %1625 }
 0x75e   :  { %v720_v28 = vpop.permute.xlu1 %719 }
 0x75f   :  { %v725_v32 = vadd.f32 %v720_v28, %v713_v27  ;;  %v722_v33 = vpop.permute.xlu0 %721 }
 0x760   :  { %v726_v34 = vadd.f32 %v722_v33, %v714_v29 }
 0x761   :  { %1627 = vtanh.f32 %v725_v32 }
 0x762   :  { %1629 = vtanh.f32 %v726_v34  ;;  %v733_v35 = vrot.slane %v726_v34, 7 }
 0x764   :  { %v735_v36 = vsel %vm734_vm8, %v733_v35, %v725_v32 }
 0x765   :  { %736 = vrot.lane.b32.xlu1 %v735_v36, %s1731_s28 }
 0x76b   :  { %v1628_v39 = vpop.eup %1627 }
 0x76c   :  { %v1630_v40 = vpop.eup %1629  ;;  %v1900_v41 = vmul.f32 %v1628_v39, %v1624_v37 }
 0x76d   :  { %v1902_v42 = vmul.f32 %v1630_v40, %v1626_v38 }
 0x76f   :  { %v743_v43 = vrot.slane %v1902_v42, 7 }
 0x771   :  { %v744_v44 = vsel %vm734_vm8, %v743_v43, %v1900_v41  ;;  %vm2030_vm8 = vmand %vm602_vm5, %vm603_vm6  ;;  %vm1399_vm6 = vsmask.f32 256 }
 0x772   :  { %745 = vrot.lane.b32.xlu0 %v744_v44, %s1731_s28 }
 0x7d7   :  { %v737_v45 = vpop.permute.xlu1 %736 }
 0x7d8   :  { %740 = vst.msk [vmem:[#allocation3 - $0x4] sm:$0x30] %vm739_vm9, %v737_v45 }
 0x7df   :  { %v863_v46 = vld [vmem:[#allocation3] sm:$0x3] }
 0x7e0   :  { %v865_v47 = vrot.slane %v863_v46, 5  ;;  %v866_v48 = vrot.slane %v863_v46, 6 }
 0x7e2   :  { %867 = vrot.lane.b32.xlu1 %v865_v47, %s1731_s28  ;;  %869 = vrot.lane.b32.xlu0 %v866_v48, %s1731_s28 }
 0x7e4   :  { %v746_v49 = vpop.permute.xlu0 %745 }
 0x7e5   :  { %748 = vst.msk [vmem:[#allocation2 - $0x4] sm:$0x30] %vm739_vm9, %v746_v49  ;;  %vm923_vm9 = vcmask 517121  }
 0x7ec   :  { %v777_v50 = vld [vmem:[#allocation2] sm:$0x3] }
 0x7ed   :  { %v778_v51 = vpack.c.bf16 %v777_v50, %v777_v50 }
 0x7ef   :  { %1476 = vmatmul.mubr.msk.bf16.vlgmr.msra.gmra.mrb[8].mxu0 %vm130_vm1, %v778_v51 }
 0x7f0   :  { %1104 = vmatpush1.bf16.msra.mxu0 %v1755_v1  ;;  %1135 = vmatprep.mubr.bf16.mxu0 %v1729_v2 }
 0x7f1   :  { %1105 = vmatprep.subr.bf16.mxu0 %v1763_v3 }
 0x7f4   :  { %1106 = vmatpush1.bf16.msra.mxu0 %v1772_v5 }
 0x7f5   :  { %1107 = vmatprep.subr.bf16.mxu0 %v1779_v6 }
 0x7f8   :  { %1108 = vmatpush1.bf16.msra.mxu0 %v1792_v9 }
 0x7f9   :  { %1109 = vmatprep.subr.bf16.mxu0 %v1799_v10 }
 0x7fc   :  { %1110 = vmatpush1.bf16.msra.mxu0 %v1806_v13 }
 0x854   :  { %v868_v34 = vpop.permute.xlu1 %867  ;;  %v870_v35 = vpop.permute.xlu0 %869 }
 0x8c2   :  { %v816_v56 = vpop.f32.mrb[8].mxu0 }
 0x8c3   :  { %v825_v1 = vrot.slane %v816_v56, 5  ;;  %v827_v57 = vrot.slane %v816_v56, 6  ;;  %v818_v0 = vpop.f32.mrb[9].mxu0 }
 0x8c4   :  { %v820_v58 = vpop.f32.mrb[10].mxu0  ;;  %v826_v7 = vrot.slane %v818_v0, 5  ;;  %v828_v12 = vrot.slane %v818_v0, 6 }
 0x8c5   :  { %v833_v3 = vadd.f32 %v825_v1, %v773_v54  ;;  %v835_v59 = vadd.f32 %v827_v57, %v775_v55  ;;  %v821_v60 = vpop.f32.mrb[11].mxu0 }
 0x8c6   :  { %v834_v14 = vadd.f32 %v826_v7, %v774_v4  ;;  %v836_v15 = vadd.f32 %v828_v12, %v776_v8  ;;  %v1727_v60 = vld [vmem:[%s2166_s1] ss:$8 sps:$4 sm:$0xff]   ;;  %v933_v4 = vld [vmem:[#allocation4 + $0x8] sm:$0x22] }
 0x8c7   :  { %v1477_v61 = vmul.f32 -1.442695, %v833_v3  ;;  %v1478_v62 = vmul.f32 -1.442695, %v835_v59  ;;  %v936_v8 = vunpack.c.l.bf16 %v933_v4 }
 0x8c8   :  { %v1479_v28 = vmul.f32 -1.442695, %v834_v14  ;;  %v1480_v29 = vmul.f32 -1.442695, %v836_v15 }
 0x8c9   :  { %1631 = vpow2.f32 %v1477_v61  ;;  %v1728_v61 = vld [vmem:[%s2166_s1 + $0x14] ss:$8 sps:$4 sm:$0xff]  }
 0x8ca   :  { %1633 = vpow2.f32 %v1478_v62  ;;  %v932_v62 = vld [vmem:[#allocation4] sm:$0x22] }
 0x8cb   :  { %1635 = vtanh.f32 %v834_v14  ;;  %v934_v7 = vunpack.c.l.bf16 %v932_v62 }
 0x8cc   :  { %1637 = vtanh.f32 %v836_v15 }
 0x8d3   :  { %v1632_v16 = vpop.eup %1631 }
 0x8d4   :  { %v1634_v17 = vpop.eup %1633  ;;  %v843_v18 = vadd.f32 1.0, %v1632_v16 }
 0x8d5   :  { %v844_v19 = vadd.f32 1.0, %v1634_v17  ;;  %v1636_v22 = vpop.eup %1635 }
 0x8d6   :  { %1639 = vrcp.f32 %v843_v18  ;;  %v1638_v23 = vpop.eup %1637 }
 0x8d7   :  { %1641 = vrcp.f32 %v844_v19 }
 0x8d8   :  { %1643 = vpow2.f32 %v1479_v28 }
 0x8d9   :  { %1645 = vpow2.f32 %v1480_v29 }
 0x8e0   :  { %v1640_v24 = vpop.eup %1639 }
 0x8e1   :  { %v1642_v25 = vpop.eup %1641  ;;  %v875_v26 = vmul.f32 %v1640_v24, %v1636_v22  ;;  %v873_v38 = vmul.f32 %v1640_v24, %v868_v34  ;;  %v937_v22 = vunpack.c.h.bf16 %v933_v4 }
 0x8e2   :  { %v876_v27 = vmul.f32 %v1642_v25, %v1638_v23  ;;  %v1644_v32 = vpop.eup %1643  ;;  %v874_v40 = vmul.f32 %v1642_v25, %v870_v35 }
 0x8e3   :  { %879 = vrot.lane.b32.xlu1 %v875_v26, %s1731_s28  ;;  %v1646_v33 = vpop.eup %1645  ;;  %v857_v36 = vadd.f32 1.0, %v1644_v32 }
 0x8e4   :  { %881 = vrot.lane.b32.xlu0 %v876_v27, %s1731_s28  ;;  %v858_v37 = vadd.f32 1.0, %v1646_v33 }
 0x8e5   :  { %1647 = vrcp.f32 %v857_v36 }
 0x8e6   :  { %1649 = vrcp.f32 %v858_v37 }
 0x8ef   :  { %v1648_v48 = vpop.eup %1647 }
 0x8f0   :  { %v1650_v49 = vpop.eup %1649 }
 0x955   :  { %v880_v39 = vpop.permute.xlu1 %879 }
 0x956   :  { %v885_v43 = vadd.f32 %v880_v39, %v873_v38  ;;  %v882_v44 = vpop.permute.xlu0 %881 }
 0x957   :  { %v886_v45 = vadd.f32 %v882_v44, %v874_v40 }
 0x958   :  { %1651 = vtanh.f32 %v885_v43 }
 0x959   :  { %1653 = vtanh.f32 %v886_v45  ;;  %v893_v46 = vrot.slane %v886_v45, 7 }
 0x95b   :  { %v895_v47 = vsel %vm894_vm10, %v893_v46, %v885_v43 }
 0x95c   :  { %896 = vrot.lane.b32.xlu1 %v895_v47, %s1731_s28 }
 0x962   :  { %v1652_v50 = vpop.eup %1651 }
 0x963   :  { %v1654_v51 = vpop.eup %1653  ;;  %v1921_v52 = vmul.f32 %v1652_v50, %v1648_v48 }
 0x964   :  { %v1923_v53 = vmul.f32 %v1654_v51, %v1650_v49 }
 0x966   :  { %v903_v54 = vrot.slane %v1923_v53, 7 }
 0x968   :  { %v904_v55 = vsel %vm894_vm10, %v903_v54, %v1921_v52  ;;  %vm924_vm10 = vsmask.f32 7942 }
 0x969   :  { %905 = vrot.lane.b32.xlu0 %v904_v55, %s1731_s28 }
 0x9ce   :  { %v897_v56 = vpop.permute.xlu1 %896 }
 0x9cf   :  { %900 = vst.msk [vmem:[#allocation3 - $0x3] sm:$0x18] %vm899_vm11, %v897_v56 }
 0x9d6   :  { %v1024_v1 = vld [vmem:[#allocation3] sm:$0x3] }
 0x9d7   :  { %v1026_v57 = vrot.slane %v1024_v1, 6  ;;  %v1027_v0 = vrot.slane %v1024_v1, 7 }
 0x9d9   :  { %1028 = vrot.lane.b32.xlu1 %v1026_v57, %s1731_s28  ;;  %1030 = vrot.lane.b32.xlu0 %v1027_v0, %s1731_s28 }
 0x9db   :  { %v906_v58 = vpop.permute.xlu0 %905 }
 0x9dc   :  { %908 = vst.msk [vmem:[#allocation2 - $0x3] sm:$0x18] %vm899_vm11, %v906_v58  ;;  %vm2052_vm11 = vmand %vm923_vm9, %vm924_vm10 }
 0x9e3   :  { %v938_v3 = vld [vmem:[#allocation2] sm:$0x3] }
 0x9e4   :  { %v939_v59 = vpack.c.bf16 %v938_v3, %v938_v3 }
 0x9e6   :  { %1483 = vmatmul.mubr.msk.bf16.vlgmr.msra.gmra.mrb[8].mxu1 %vm130_vm1, %v939_v59 }
 0x9e7   :  { %1262 = vmatpush1.bf16.msra.mxu1 %v1727_v60  ;;  %1293 = vmatprep.mubr.bf16.mxu1 %v1729_v2 }
 0x9e8   :  { %1263 = vmatprep.subr.bf16.mxu1 %v1728_v61 }
 0x9eb   :  { %1264 = vmatpush1.bf16.msra.mxu1 %v1772_v5 }
 0x9ec   :  { %1265 = vmatprep.subr.bf16.mxu1 %v1779_v6 }
 0x9ef   :  { %1266 = vmatpush1.bf16.msra.mxu1 %v1792_v9  ;;  %v935_v9 = vunpack.c.h.bf16 %v932_v62 }
 0x9f0   :  { %1267 = vmatprep.subr.bf16.mxu1 %v1799_v10 }
 0x9f3   :  { %1268 = vmatpush1.bf16.msra.mxu1 %v1806_v13 }
 0xa4b   :  { %v1029_v43 = vpop.permute.xlu1 %1028  ;;  %v1031_v44 = vpop.permute.xlu0 %1030 }
 0xab9   :  { %v977_v2 = vpop.f32.mrb[8].mxu1 }
 0xaba   :  { %v986_v12 = vrot.slane %v977_v2, 6  ;;  %v988_v14 = vrot.slane %v977_v2, 7  ;;  %v979_v15 = vpop.f32.mrb[9].mxu1 }
 0xabb   :  { %v981_v16 = vpop.f32.mrb[10].mxu1  ;;  %v987_v10 = vrot.slane %v979_v15, 6  ;;  %v989_v13 = vrot.slane %v979_v15, 7  ;;  %v1092_v15 = vld [vmem:[#allocation4] sm:$0x11] }
 0xabc   :  { %v994_v17 = vadd.f32 %v986_v12, %v934_v7  ;;  %v996_v18 = vadd.f32 %v988_v14, %v936_v8  ;;  %v982_v5 = vpop.f32.mrb[11].mxu1  ;;  %v1093_v14 = vld [vmem:[#allocation4 + $0x8] sm:$0x11] }
 0xabd   :  { %v995_v23 = vadd.f32 %v987_v10, %v935_v9  ;;  %v997_v24 = vadd.f32 %v989_v13, %v937_v22  ;;  %v1096_v16 = vunpack.c.l.bf16 %v1093_v14 }
 0xabe   :  { %v1484_v19 = vmul.f32 -1.442695, %v994_v17  ;;  %v1485_v6 = vmul.f32 -1.442695, %v996_v18  ;;  %v1094_v17 = vunpack.c.l.bf16 %v1092_v15 }
 0xabf   :  { %v1486_v37 = vmul.f32 -1.442695, %v995_v23  ;;  %v1487_v38 = vmul.f32 -1.442695, %v997_v24 }
 0xac0   :  { %1655 = vpow2.f32 %v1484_v19 }
 0xac1   :  { %1657 = vpow2.f32 %v1485_v6 }
 0xac2   :  { %1659 = vtanh.f32 %v995_v23 }
 0xac3   :  { %1661 = vtanh.f32 %v997_v24  ;;  %v1097_v24 = vunpack.c.h.bf16 %v1093_v14 }
 0xaca   :  { %v1656_v25 = vpop.eup %1655 }
 0xacb   :  { %v1658_v26 = vpop.eup %1657  ;;  %v1004_v27 = vadd.f32 1.0, %v1656_v25  ;;  %v1095_v25 = vunpack.c.h.bf16 %v1092_v15 }
 0xacc   :  { %v1005_v28 = vadd.f32 1.0, %v1658_v26  ;;  %v1660_v29 = vpop.eup %1659 }
 0xacd   :  { %1663 = vrcp.f32 %v1004_v27  ;;  %v1662_v32 = vpop.eup %1661 }
 0xace   :  { %1665 = vrcp.f32 %v1005_v28 }
 0xacf   :  { %1667 = vpow2.f32 %v1486_v37 }
 0xad0   :  { %1669 = vpow2.f32 %v1487_v38 }
 0xad7   :  { %v1664_v33 = vpop.eup %1663 }
 0xad8   :  { %v1666_v34 = vpop.eup %1665  ;;  %v1036_v35 = vmul.f32 %v1664_v33, %v1660_v29  ;;  %v1034_v47 = vmul.f32 %v1664_v33, %v1029_v43 }
 0xad9   :  { %v1037_v36 = vmul.f32 %v1666_v34, %v1662_v32  ;;  %v1668_v39 = vpop.eup %1667  ;;  %v1035_v49 = vmul.f32 %v1666_v34, %v1031_v44 }
 0xada   :  { %1040 = vrot.lane.b32.xlu1 %v1036_v35, %s1731_s28  ;;  %v1670_v40 = vpop.eup %1669  ;;  %v1018_v45 = vadd.f32 1.0, %v1668_v39 }
 0xadb   :  { %1042 = vrot.lane.b32.xlu0 %v1037_v36, %s1731_s28  ;;  %v1019_v46 = vadd.f32 1.0, %v1670_v40 }
 0xadc   :  { %1671 = vrcp.f32 %v1018_v45 }
 0xadd   :  { %1673 = vrcp.f32 %v1019_v46 }
 0xae6   :  { %v1672_v1 = vpop.eup %1671 }
 0xae7   :  { %v1674_v57 = vpop.eup %1673 }
 0xb4c   :  { %v1041_v48 = vpop.permute.xlu1 %1040 }
 0xb4d   :  { %v1046_v50 = vadd.f32 %v1041_v48, %v1034_v47  ;;  %v1043_v51 = vpop.permute.xlu0 %1042 }
 0xb4e   :  { %v1047_v54 = vadd.f32 %v1043_v51, %v1035_v49 }
 0xb4f   :  { %1675 = vtanh.f32 %v1046_v50 }
 0xb50   :  { %1677 = vtanh.f32 %v1047_v54  ;;  %v1054_v55 = vrot.slane %v1047_v54, 7 }
 0xb52   :  { %v1056_v56 = vsel %vm1055_vm12, %v1054_v55, %v1046_v50 }
 0xb53   :  { %1057 = vrot.lane.b32.xlu1 %v1056_v56, %s1731_s28 }
 0xb59   :  { %v1676_v0 = vpop.eup %1675 }
 0xb5a   :  { %v1678_v58 = vpop.eup %1677  ;;  %v1946_v3 = vmul.f32 %v1676_v0, %v1672_v1 }
 0xb5b   :  { %v1948_v59 = vmul.f32 %v1678_v58, %v1674_v57 }
 0xb5d   :  { %v1064_v60 = vrot.slane %v1948_v59, 7 }
 0xb5f   :  { %v1065_v61 = vsel %vm1055_vm12, %v1064_v60, %v1946_v3  ;;  %vm1242_vm12 = vsmask.f32 7938 }
 0xb60   :  { %1066 = vrot.lane.b32.xlu0 %v1065_v61, %s1731_s28 }
 0xbc5   :  { %v1058_v62 = vpop.permute.xlu1 %1057 }
 0xbc6   :  { %1061 = vst.msk [vmem:[#allocation3 - $0x2] sm:$0xc] %vm1060_vm13, %v1058_v62 }
 0xbcd   :  { %v1182_v4 = vld [vmem:[#allocation3] sm:$0x3] }
 0xbce   :  { %1187 = vrot.lane.b32.xlu0 %v1182_v4, %s1731_s28  ;;  %v1184_v7 = vrot.slane %v1182_v4, 7 }
 0xbd0   :  { %1185 = vrot.lane.b32.xlu1 %v1184_v7, %s1731_s28 }
 0xbd2   :  { %v1067_v8 = vpop.permute.xlu0 %1066 }
 0xbd3   :  { %1069 = vst.msk [vmem:[#allocation2 - $0x2] sm:$0xc] %vm1060_vm13, %v1067_v8  ;;  %vm2073_vm13 = vmand %vm254_vm2, %vm1242_vm12 }
 0xbda   :  { %v1098_v2 = vld [vmem:[#allocation2] sm:$0x3] }
 0xbdb   :  { %v1099_v12 = vpack.c.bf16 %v1098_v2, %v1098_v2 }
 0xbdd   :  { %1490 = vmatmul.mubr.msk.bf16.vlgmr.msra.gmra.mrb[12].mxu0 %vm130_vm1, %v1099_v12 }
 0xc40   :  { %v1188_v46 = vpop.permute.xlu0 %1187 }
 0xc42   :  { %v1186_v48 = vpop.permute.xlu1 %1185 }
 0xcb0   :  { %v1137_v18 = vpop.f32.mrb[12].mxu0 }
 0xcb1   :  { %v1146_v5 = vrot.slane %v1137_v18, 7  ;;  %v1154_v19 = vadd.f32 %v1137_v18, %v1096_v16  ;;  %v1139_v6 = vpop.f32.mrb[13].mxu0 }
 0xcb2   :  { %v1141_v9 = vpop.f32.mrb[14].mxu0  ;;  %v1147_v26 = vrot.slane %v1139_v6, 7  ;;  %v1155_v27 = vadd.f32 %v1139_v6, %v1097_v24  ;;  %v1251_v6 = vld [vmem:[#allocation4 + $0x8] sm:$0x11] }
 0xcb3   :  { %v1152_v10 = vadd.f32 %v1146_v5, %v1094_v17  ;;  %v1492_v22 = vmul.f32 -1.442695, %v1154_v19  ;;  %v1142_v13 = vpop.f32.mrb[15].mxu0  ;;  %v1250_v19 = vld [vmem:[#allocation4] sm:$0x11] }
 0xcb4   :  { %v1153_v29 = vadd.f32 %v1147_v26, %v1095_v25  ;;  %v1494_v43 = vmul.f32 -1.442695, %v1155_v27  ;;  %v1252_v9 = vunpack.c.l.bf16 %v1250_v19 }
 0xcb5   :  { %v1491_v23 = vmul.f32 -1.442695, %v1152_v10  ;;  %1679 = vpow2.f32 %v1492_v22  ;;  %v1254_v10 = vunpack.c.l.bf16 %v1251_v6 }
 0xcb6   :  { %v1493_v44 = vmul.f32 -1.442695, %v1153_v29 }
 0xcb7   :  { %1681 = vpow2.f32 %v1491_v23 }
 0xcb8   :  { %1683 = vtanh.f32 %v1155_v27 }
 0xcbf   :  { %v1680_v28 = vpop.eup %1679 }
 0xcc0   :  { %v1163_v32 = vadd.f32 1.0, %v1680_v28 }
 0xcc1   :  { %v1682_v33 = vpop.eup %1681 }
 0xcc2   :  { %v1162_v34 = vadd.f32 1.0, %v1682_v33  ;;  %1685 = vrcp.f32 %v1163_v32  ;;  %v1684_v35 = vpop.eup %1683  ;;  %v1253_v32 = vunpack.c.h.bf16 %v1250_v19  ;;  %v1255_v33 = vunpack.c.h.bf16 %v1251_v6  ;;  %v605_v19 = vld [vmem:[%s2167_s2] sm:$0x4] }
 0xcc3   :  { %1687 = vtanh.f32 %v1153_v29 }
 0xcc4   :  { %1689 = vrcp.f32 %v1162_v34 }
 0xcc5   :  { %1691 = vpow2.f32 %v1494_v43 }
 0xcc6   :  { %1693 = vpow2.f32 %v1493_v44 }
 0xccc   :  { %v1686_v36 = vpop.eup %1685 }
 0xccd   :  { %v1688_v37 = vpop.eup %1687  ;;  %v1194_v38 = vmul.f32 %v1686_v36, %v1684_v35  ;;  %v1192_v50 = vmul.f32 %v1686_v36, %v1188_v46 }
 0xcce   :  { %v1690_v39 = vpop.eup %1689 }
 0xccf   :  { %1199 = vrot.lane.b32.xlu0 %v1194_v38, %s1731_s28  ;;  %v1193_v40 = vmul.f32 %v1690_v39, %v1688_v37  ;;  %v1692_v45 = vpop.eup %1691  ;;  %v1191_v56 = vmul.f32 %v1690_v39, %v1186_v48 }
 0xcd0   :  { %v1694_v47 = vpop.eup %1693  ;;  %v1177_v49 = vadd.f32 1.0, %v1692_v45 }
 0xcd1   :  { %1197 = vrot.lane.b32.xlu1 %v1193_v40, %s1731_s28  ;;  %v1176_v51 = vadd.f32 1.0, %v1694_v47 }
 0xcd2   :  { %1695 = vrcp.f32 %v1177_v49  ;;  %v1504_v49 = vpack.c.bf16 %v1833_v11, %v1833_v11  ;;  %v1512_v11 = vpack.c.bf16 %v1921_v52, %v1921_v52  ;;  %v1506_v52 = vpack.c.bf16 %v1856_v20, %v1856_v20 }
 0xcd3   :  { %v1514_v20 = vpack.c.bf16 %v1946_v3, %v1946_v3 }
 0xcdc   :  { %v1696_v60 = vpop.eup %1695 }
 0xd41   :  { %v1200_v54 = vpop.permute.xlu0 %1199 }
 0xd42   :  { %v1204_v55 = vadd.f32 %v1200_v54, %v1192_v50  ;;  %v1505_v50 = vpack.c.bf16 %v1829_v63, %v1829_v63  ;;  %v1509_v54 = vpack.c.bf16 %v1880_v31, %v1880_v31  ;;  %v1513_v63 = vpack.c.bf16 %v1923_v53, %v1923_v53 }
 0xd43   :  { %v1198_v1 = vpop.permute.xlu1 %1197  ;;  %v1507_v53 = vpack.c.bf16 %v1858_v21, %v1858_v21  ;;  %v1515_v21 = vpack.c.bf16 %v1948_v59, %v1948_v59 }
 0xd44   :  { %1697 = vtanh.f32 %v1204_v55  ;;  %v1211_v57 = vrot.slane %v1204_v55, 7  ;;  %v1203_v0 = vadd.f32 %v1198_v1, %v1191_v56  ;;  %v1510_v55 = vpack.c.bf16 %v1900_v41, %v1900_v41 }
 0xd45   :  { %1699 = vrcp.f32 %v1176_v51  ;;  %v1508_v51 = vpack.c.bf16 %v1878_v30, %v1878_v30  ;;  %v1511_v56 = vpack.c.bf16 %v1902_v42, %v1902_v42 }
 0xd46   :  { %1701 = vtanh.f32 %v1203_v0  ;;  %v1213_v58 = vsel %vm1212_vm14, %v1211_v57, %v1203_v0 }
 0xd47   :  { %1214 = vrot.lane.b32.xlu1 %v1213_v58, %s1731_s28 }
 0xd4e   :  { %v1698_v61 = vpop.eup %1697 }
 0xd4f   :  { %v1700_v62 = vpop.eup %1699  ;;  %v1959_v4 = vmul.f32 %v1698_v61, %v1696_v60 }
 0xd50   :  { %v1702_v7 = vpop.eup %1701 }
 0xd51   :  { %v1961_v8 = vmul.f32 %v1702_v7, %v1700_v62  ;;  %v1221_v2 = vrot.slane %v1959_v4, 7  ;;  %v1517_v31 = vpack.c.bf16 %v1959_v4, %v1959_v4 }
 0xd53   :  { %v1222_v12 = vsel %vm1212_vm14, %v1221_v2, %v1961_v8  ;;  %v1516_v30 = vpack.c.bf16 %v1961_v8, %v1961_v8  ;;  %v284_v2 = vld [vmem:[%s2167_s2] sm:$0x8]  ;;  %vm442_vm14 = vsmask.f32 3328 }
 0xd54   :  { %1223 = vrot.lane.b32.xlu0 %v1222_v12, %s1731_s28 }
 0xdb9   :  { %v1215_v14 = vpop.permute.xlu1 %1214 }
 0xdba   :  { %1218 = vst.msk [vmem:[#allocation3 - $0x1] sm:$0x6] %vm1217_vm15, %v1215_v14 }
 0xdc1   :  { %v1340_v15 = vld [vmem:[#allocation3] sm:$0x3] }
 0xdc2   :  { %1343 = vrot.lane.b32.xlu0 %v1340_v15, %s1731_s28  ;;  %v1342_v16 = vrot.slane %v1340_v15, 1  ;;  %v287_v15 = vld [vmem:[%s2167_s2 + $0x4] sm:$0x8] }
 0xdc4   :  { %1345 = vrot.lane.b32.xlu1 %v1342_v16, %s1731_s28 }
 0xdc6   :  { %v1224_v17 = vpop.permute.xlu0 %1223 }
 0xdc7   :  { %1226 = vst.msk [vmem:[#allocation2 - $0x1] sm:$0x6] %vm1217_vm15, %v1224_v17 }
 0xdce   :  { %v1256_v18 = vld [vmem:[#allocation2] sm:$0x3] }
 0xdcf   :  { %v1257_v5 = vpack.c.bf16 %v1256_v18, %v1256_v18 }
 0xdd1   :  { %1497 = vmatmul.mubr.msk.bf16.vlgmr.msra.gmra.mrb[12].mxu1 %vm130_vm1, %v1257_v5  ;;  %vm281_vm1 = vcmask 519171  }
 0xdd2   :  { %vm2014_vm4 = vmand %vm281_vm1, %vm282_vm3  ;;  %vm763_vm3 = vsmask.f32 2304 }
 0xdd3   :  { %vm2095_vm15 = vmand %vm281_vm1, %vm442_vm14 }
 0xdd4   :  { %vm764_vm1 = vmand %vm602_vm5, %vm763_vm3 }
 0xe34   :  { %v1344_v0 = vpop.permute.xlu0 %1343 }
 0xe36   :  { %v1346_v42 = vpop.permute.xlu1 %1345 }
 0xea4   :  { %v1295_v22 = vpop.f32.mrb[12].mxu1 }
 0xea5   :  { %v1304_v13 = vrot.slane %v1295_v22, 1  ;;  %v1310_v23 = vadd.f32 %v1295_v22, %v1252_v9  ;;  %v1297_v24 = vpop.f32.mrb[13].mxu1  ;;  %v608_v22 = vld [vmem:[%s2167_s2 + $0x4] sm:$0x4] }
 0xea6   :  { %v1299_v25 = vpop.f32.mrb[14].mxu1  ;;  %v1305_v34 = vrot.slane %v1297_v24, 1  ;;  %v1311_v35 = vadd.f32 %v1297_v24, %v1253_v32 }
 0xea7   :  { %v1312_v26 = vadd.f32 %v1304_v13, %v1254_v10  ;;  %v1498_v27 = vmul.f32 -1.442695, %v1310_v23  ;;  %v1300_v28 = vpop.f32.mrb[15].mxu1  ;;  %v926_v25 = vld [vmem:[%s2167_s2] sm:$0x2] }
 0xea8   :  { %v1313_v37 = vadd.f32 %v1305_v34, %v1255_v33  ;;  %v1500_v1 = vmul.f32 -1.442695, %v1311_v35 }
 0xea9   :  { %1703 = vpow2.f32 %v1498_v27  ;;  %v1499_v29 = vmul.f32 -1.442695, %v1312_v26 }
 0xeaa   :  { %v1501_v57 = vmul.f32 -1.442695, %v1313_v37 }
 0xeab   :  { %1705 = vpow2.f32 %v1499_v29  ;;  %v929_v29 = vld [vmem:[%s2167_s2 + $0x4] sm:$0x2] }
 0xeac   :  { %1707 = vtanh.f32 %v1311_v35 }
 0xeb3   :  { %v1704_v36 = vpop.eup %1703 }
 0xeb4   :  { %v1320_v38 = vadd.f32 1.0, %v1704_v36 }
 0xeb5   :  { %v1706_v39 = vpop.eup %1705 }
 0xeb6   :  { %v1321_v40 = vadd.f32 1.0, %v1706_v39  ;;  %1709 = vrcp.f32 %v1320_v38  ;;  %v1708_v43 = vpop.eup %1707 }
 0xeb7   :  { %1711 = vtanh.f32 %v1313_v37  ;;  %v1244_v37 = vld [vmem:[%s2167_s2] sm:$0x1] }
 0xeb8   :  { %1713 = vrcp.f32 %v1321_v40 }
 0xeb9   :  { %1715 = vpow2.f32 %v1500_v1 }
 0xeba   :  { %1717 = vpow2.f32 %v1501_v57 }
 0xec0   :  { %v1710_v44 = vpop.eup %1709 }
 0xec1   :  { %v1712_v45 = vpop.eup %1711  ;;  %v1351_v46 = vmul.f32 %v1710_v44, %v1708_v43  ;;  %v1349_v61 = vmul.f32 %v1710_v44, %v1344_v0  ;;  %v1247_v44 = vld [vmem:[%s2167_s2 + $0x4] sm:$0x1] }
 0xec2   :  { %v1714_v47 = vpop.eup %1713 }
 0xec3   :  { %1355 = vrot.lane.b32.xlu0 %v1351_v46, %s1731_s28  ;;  %v1352_v48 = vmul.f32 %v1714_v47, %v1712_v45  ;;  %v1716_v41 = vpop.eup %1715  ;;  %v1350_v7 = vmul.f32 %v1714_v47, %v1346_v42 }
 0xec4   :  { %v1718_v58 = vpop.eup %1717  ;;  %v1334_v60 = vadd.f32 1.0, %v1716_v41 }
 0xec5   :  { %1357 = vrot.lane.b32.xlu1 %v1352_v48, %s1731_s28  ;;  %v1335_v3 = vadd.f32 1.0, %v1718_v58 }
 0xec6   :  { %1719 = vrcp.f32 %v1334_v60 }
 0xec7   :  { %275 = vrot.lane.b32.xlu0 %v1504_v49, %s1731_s28 }
 0xec9   :  { %277 = vrot.lane.b32.xlu1 %v1505_v50, %s1731_s28 }
 0xecb   :  { %596 = vrot.lane.b32.xlu0 %v1508_v51, %s1731_s28 }
 0xecd   :  { %598 = vrot.lane.b32.xlu1 %v1509_v54, %s1731_s28 }
 0xecf   :  { %917 = vrot.lane.b32.xlu0 %v1512_v11, %s1731_s28 }
 0xed0   :  { %v1720_v27 = vpop.eup %1719 }
 0xed1   :  { %919 = vrot.lane.b32.xlu1 %v1513_v63, %s1731_s28 }
 0xed3   :  { %1235 = vrot.lane.b32.xlu0 %v1516_v30, %s1731_s28 }
 0xed5   :  { %1237 = vrot.lane.b32.xlu1 %v1517_v31, %s1731_s28 }
 0xed7   :  { %436 = vrot.lane.b32.xlu0 %v1506_v52, %s1731_s28 }
 0xed9   :  { %438 = vrot.lane.b32.xlu1 %v1507_v53, %s1731_s28 }
 0xedb   :  { %757 = vrot.lane.b32.xlu0 %v1510_v55, %s1731_s28 }
 0xedd   :  { %759 = vrot.lane.b32.xlu1 %v1511_v56, %s1731_s28 }
 0xedf   :  { %1078 = vrot.lane.b32.xlu0 %v1514_v20, %s1731_s28 }
 0xee1   :  { %1080 = vrot.lane.b32.xlu1 %v1515_v21, %s1731_s28 }
 0xf35   :  { %v1356_v62 = vpop.permute.xlu0 %1355 }
 0xf36   :  { %v1361_v4 = vadd.f32 %v1356_v62, %v1349_v61 }
 0xf37   :  { %v1358_v59 = vpop.permute.xlu1 %1357 }
 0xf38   :  { %1721 = vtanh.f32 %v1361_v4  ;;  %v1362_v12 = vadd.f32 %v1358_v59, %v1350_v7 }
 0xf39   :  { %1723 = vrcp.f32 %v1335_v3  ;;  %v276_v14 = vpop.permute.xlu0 %275 }
 0xf3a   :  { %1725 = vtanh.f32 %v1362_v12  ;;  %v1369_v16 = vrot.slane %v1362_v12, 7  ;;  %v285_v17 = vsel %vm2014_vm4, %v276_v14, %v284_v2 }
 0xf3b   :  { %286 = vst [vmem:[%s2167_s2] sm:$0x8] %v285_v17  ;;  %v278_v18 = vpop.permute.xlu1 %277 }
 0xf3c   :  { %v288_v6 = vsel %vm2014_vm4, %v278_v18, %v287_v15  ;;  %v1371_v9 = vsel %vm1370_vm7, %v1369_v16, %v1361_v4  ;;  %vm1084_vm4 = vsmask.f32 1280 }
 0xf3d   :  { %289 = vst [vmem:[%s2167_s2 + $0x4] sm:$0x8] %v288_v6  ;;  %v597_v10 = vpop.permute.xlu0 %596  ;;  %vm1085_vm5 = vmand %vm923_vm9, %vm1084_vm4 }
 0xf3e   :  { %v606_v13 = vsel %vm2030_vm8, %v597_v10, %v605_v19 }
 0xf3f   :  { %607 = vst [vmem:[%s2167_s2] sm:$0x4] %v606_v13  ;;  %v599_v23 = vpop.permute.xlu1 %598 }
 0xf40   :  { %v609_v26 = vsel %vm2030_vm8, %v599_v23, %v608_v22 }
 0xf41   :  { %610 = vst [vmem:[%s2167_s2 + $0x4] sm:$0x4] %v609_v26  ;;  %v918_v28 = vpop.permute.xlu0 %917 }
 0xf42   :  { %v1722_v32 = vpop.eup %1721  ;;  %v927_v33 = vsel %vm2052_vm11, %v918_v28, %v926_v25  ;;  %v444_v11 = vld [vmem:[%s2167_s2] sm:$0x8] }
 0xf43   :  { %v1724_v34 = vpop.eup %1723  ;;  %928 = vst [vmem:[%s2167_s2] sm:$0x2] %v927_v33  ;;  %v920_v35 = vpop.permute.xlu1 %919  ;;  %v1365_v38 = vmul.f32 %v1722_v32, %v1720_v27 }
 0xf44   :  { %v1726_v39 = vpop.eup %1725  ;;  %v930_v40 = vsel %vm2052_vm11, %v920_v35, %v929_v29  ;;  %v447_v52 = vld [vmem:[%s2167_s2 + $0x4] sm:$0x8] }
 0xf45   :  { %931 = vst [vmem:[%s2167_s2 + $0x4] sm:$0x2] %v930_v40  ;;  %v1236_v43 = vpop.permute.xlu0 %1235  ;;  %v1518_v45 = vpack.c.bf16 %v1365_v38, %v1365_v38  ;;  %v1366_v46 = vmul.f32 %v1726_v39, %v1724_v34 }
 0xf46   :  { %v1245_v47 = vsel %vm2073_vm13, %v1236_v43, %v1244_v37  ;;  %v765_v56 = vld [vmem:[%s2167_s2] sm:$0x4] }
 0xf47   :  { %1246 = vst [vmem:[%s2167_s2] sm:$0x1] %v1245_v47  ;;  %v1238_v48 = vpop.permute.xlu1 %1237  ;;  %1393 = vrot.lane.b32.xlu0 %v1518_v45, %s1731_s28  ;;  %v1519_v49 = vpack.c.bf16 %v1366_v46, %v1366_v46  ;;  %v1379_v51 = vrot.slane %v1366_v46, 7 }
 0xf48   :  { %v1248_v54 = vsel %vm2073_vm13, %v1238_v48, %v1247_v44  ;;  %v768_v1 = vld [vmem:[%s2167_s2 + $0x4] sm:$0x4] }
 0xf49   :  { %1249 = vst [vmem:[%s2167_s2 + $0x4] sm:$0x1] %v1248_v54  ;;  %1395 = vrot.lane.b32.xlu1 %v1519_v49, %s1731_s28  ;;  %v437_v63 = vpop.permute.xlu0 %436  ;;  %v1380_v30 = vsel %vm1370_vm7, %v1379_v51, %v1365_v38  ;;  %vm1400_vm7 = vmand %vm254_vm2, %vm1399_vm6 }
 0xf4a   :  { %v445_v31 = vsel %vm2095_vm15, %v437_v63, %v444_v11  ;;  %v1086_v0 = vld [vmem:[%s2167_s2] sm:$0x2] }
 0xf4b   :  { %446 = vst [vmem:[%s2167_s2] sm:$0x8] %v445_v31  ;;  %v439_v53 = vpop.permute.xlu1 %438  ;;  %1372 = vrot.lane.b32.xlu0 %v1371_v9, %s1731_s28 }
 0xf4c   :  { %v448_v55 = vsel %vm2095_vm15, %v439_v53, %v447_v52  ;;  %v1089_v60 = vld [vmem:[%s2167_s2 + $0x4] sm:$0x2] }
 0xf4d   :  { %449 = vst [vmem:[%s2167_s2 + $0x4] sm:$0x8] %v448_v55  ;;  %1381 = vrot.lane.b32.xlu1 %v1380_v30, %s1731_s28  ;;  %v758_v20 = vpop.permute.xlu0 %757 }
 0xf4e   :  { %v766_v21 = vsel %vm764_vm1, %v758_v20, %v765_v56  ;;  %v1401_v62 = vld [vmem:[%s2167_s2] sm:$0x1] }
 0xf4f   :  { %767 = vst [vmem:[%s2167_s2] sm:$0x4] %v766_v21  ;;  %v760_v57 = vpop.permute.xlu1 %759 }
 0xf50   :  { %v769_v41 = vsel %vm764_vm1, %v760_v57, %v768_v1  ;;  %v1404_v59 = vld [vmem:[%s2167_s2 + $0x4] sm:$0x1] }
 0xf51   :  { %770 = vst [vmem:[%s2167_s2 + $0x4] sm:$0x4] %v769_v41  ;;  %v1079_v58 = vpop.permute.xlu0 %1078 }
 0xf52   :  { %v1087_v42 = vsel %vm1085_vm5, %v1079_v58, %v1086_v0 }
 0xf53   :  { %1088 = vst [vmem:[%s2167_s2] sm:$0x2] %v1087_v42  ;;  %v1081_v61 = vpop.permute.xlu1 %1080 }
 0xf54   :  { %v1090_v3 = vsel %vm1085_vm5, %v1081_v61, %v1089_v60 }
 0xf55   :  { %1091 = vst [vmem:[%s2167_s2 + $0x4] sm:$0x2] %v1090_v3 }
 0xfb9   :  { %v1394_v4 = vpop.permute.xlu0 %1393 }
 0xfba   :  { %v1402_v7 = vsel %vm1400_vm7, %v1394_v4, %v1401_v62 }
 0xfbb   :  { %1403 = vst [vmem:[%s2167_s2] sm:$0x1] %v1402_v7  ;;  %v1396_v8 = vpop.permute.xlu1 %1395 }
 0xfbc   :  { %v1405_v2 = vsel %vm1400_vm7, %v1396_v8, %v1404_v59 }
 0xfbd   :  { %1406 = vst [vmem:[%s2167_s2 + $0x4] sm:$0x1] %v1405_v2  ;;  %v1373_v12 = vpop.permute.xlu0 %1372 }
 0xfbe   :  { %1376 = vst.msk [vmem:[#allocation3] sm:$0x3] %vm71_vm0, %v1373_v12 }
 0xfbf   :  { %v1382_v14 = vpop.permute.xlu1 %1381 }
 0xfc0   :  { %1384 = vst.msk [vmem:[#allocation2] sm:$0x3] %vm71_vm0, %v1382_v14 }

// kernel: _lambda_.30
= control target key start
LH: loop header
LB: loop body
LE: loop exit
PB: predicated region body
PF: predicated region fallthrough
CT: control target
= control target key end

     0   :  { %vm54_vm0 = vcmask 517120   ;;  %v1685_v2 = vmov 0   ;;  %v1686_v4 = vmov 0.0   ;;  %s1687_s28 = smov 64   ;;  %vm113_vm1 = vcmask 523264   ;;  %s2101_s0 = inlined_call_operand.vmem [shape: bf16[2,8,512], index: 0, kind: input, shape index: {}]   ;;  %s2102_s1 = inlined_call_operand.vmem [shape: bf16[64,256], index: 1, kind: input, shape index: {}]   ;;  %s2103_s2 = inlined_call_operand.vmem [shape: bf16[2,8,64], index: 2, kind: output, shape index: {}]  }
   0x1   :  { %v1706_v0 = vld [vmem:[%s2102_s1 + $0x4] ss:$8 sps:$4 sm:$0xff]   ;;  %v1711_v1 = vld [vmem:[%s2102_s1] ss:$8 sps:$4 sm:$0xff]   ;;  %149 = vmatprep.mubr.bf16.mxu0 %v1685_v2  ;;  %307 = vmatprep.mubr.bf16.mxu1 %v1685_v2  ;;  %v1719_v3 = vld [vmem:[%s2102_s1 + $0x14] ss:$8 sps:$4 sm:$0xff]  }
   0x2   :  { %117 = vmatprep.subr.bf16.mxu0 %v1706_v0  ;;  %55 = vst.msk [vmem:[#allocation2] sm:$0x3] %vm54_vm0, %v1686_v4  ;;  %56 = vst.msk [vmem:[#allocation3] sm:$0x3] %vm54_vm0, %v1686_v4  ;;  %275 = vmatprep.subr.bf16.mxu1 %v1706_v0  ;;  %v1728_v5 = vld [vmem:[%s2102_s1 + $0x10] ss:$8 sps:$4 sm:$0xff]  }
   0x3   :  { %118 = vmatpush1.bf16.msra.mxu0 %v1711_v1  ;;  %276 = vmatpush1.bf16.msra.mxu1 %v1711_v1  ;;  %v1735_v6 = vld [vmem:[%s2102_s1 + $0x24] ss:$8 sps:$4 sm:$0xff]   ;;  %v40_v8 = vld [vmem:[%s2101_s0 + $0x10] sm:$0xff]  ;;  %v1748_v9 = vld [vmem:[%s2102_s1 + $0x20] ss:$8 sps:$4 sm:$0xff]   ;;  %vm226_vm2 = vcmask 1041409  }
   0x4   :  { %119 = vmatprep.subr.bf16.mxu0 %v1719_v3  ;;  %277 = vmatprep.subr.bf16.mxu1 %v1719_v3  ;;  %v38_v7 = vld [vmem:[%s2101_s0] sm:$0xff]  ;;  %41 = vst [vmem:[#allocation4 + $0x8] sm:$0xff] %v40_v8  ;;  %v1755_v10 = vld [vmem:[%s2102_s1 + $0x34] ss:$8 sps:$4 sm:$0xff]   ;;  %v1762_v13 = vld [vmem:[%s2102_s1 + $0x30] ss:$8 sps:$4 sm:$0xff]  }
   0x5   :  { %39 = vst [vmem:[#allocation4] sm:$0xff] %v38_v7  ;;  %vm384_vm3 = vcmask 1042434   ;;  %vm389_vm4 = vcmask 518145   ;;  %vm544_vm5 = vcmask 1043459   ;;  %vm549_vm6 = vcmask 519170  }
   0x6   :  { %vm705_vm7 = vcmask 1044484   ;;  %vm710_vm8 = vcmask 520195   ;;  %vm865_vm9 = vcmask 1045509   ;;  %vm870_vm10 = vcmask 521220  }
   0x7   :  { %120 = vmatpush1.bf16.msra.mxu0 %v1728_v5  ;;  %278 = vmatpush1.bf16.msra.mxu1 %v1728_v5  ;;  %vm1026_vm11 = vcmask 1046534   ;;  %vm1031_vm12 = vcmask 522245   ;;  %vm1186_vm13 = vcmask 1047559   ;;  %vm1191_vm14 = vcmask 523270  }
   0x8   :  { %121 = vmatprep.subr.bf16.mxu0 %v1735_v6  ;;  %279 = vmatprep.subr.bf16.mxu1 %v1735_v6  ;;  %vm255_vm15 = vcmask 516096  }
   0x9   :  { %v196_v11 = vld [vmem:[#allocation3] sm:$0x3]  ;;  %v71_v14 = vld [vmem:[#allocation2] sm:$0x3] }
   0xa   :  { %v198_v12 = vrot.slane %v196_v11, 1  ;;  %v72_v15 = vpack.c.bf16 %v71_v14, %v71_v14 }
   0xb   :  { %122 = vmatpush1.bf16.msra.mxu0 %v1748_v9  ;;  %280 = vmatpush1.bf16.msra.mxu1 %v1748_v9  ;;  %v66_v17 = vld [vmem:[#allocation4 + $0x8] sm:$0x11] }
   0xc   :  { %123 = vmatprep.subr.bf16.mxu0 %v1755_v10  ;;  %201 = vrot.lane.b32.xlu0 %v198_v12, %s1687_s28  ;;  %v65_v16 = vld [vmem:[#allocation4] sm:$0x11]  ;;  %v69_v19 = vunpack.c.l.bf16 %v66_v17  ;;  %v70_v30 = vunpack.c.h.bf16 %v66_v17 }
   0xd   :  { %281 = vmatprep.subr.bf16.mxu1 %v1755_v10  ;;  %v67_v18 = vunpack.c.l.bf16 %v65_v16  ;;  %v68_v29 = vunpack.c.h.bf16 %v65_v16 }
   0xf   :  { %124 = vmatpush1.bf16.msra.mxu0 %v1762_v13  ;;  %282 = vmatpush1.bf16.msra.mxu1 %v1762_v13 }
  0x10   :  { %199 = vrot.lane.b32.xlu0 %v196_v11, %s1687_s28  ;;  %432 = vmatprep.subr.bf16.mxu0 %v1706_v0 }
  0x11   :  { %593 = vmatprep.subr.bf16.mxu1 %v1706_v0 }
  0x12   :  { %1406 = vmatmul.mubr.msk.bf16.vlgmr.msra.gmra.mrb[0].mxu0 %vm113_vm1, %v72_v15 }
  0x13   :  { %433 = vmatpush1.bf16.msra.mxu0 %v1711_v1  ;;  %464 = vmatprep.mubr.bf16.mxu0 %v1685_v2 }
  0x14   :  { %434 = vmatprep.subr.bf16.mxu0 %v1719_v3 }
  0x17   :  { %435 = vmatpush1.bf16.msra.mxu0 %v1728_v5 }
  0x18   :  { %436 = vmatprep.subr.bf16.mxu0 %v1735_v6 }
  0x1b   :  { %437 = vmatpush1.bf16.msra.mxu0 %v1748_v9 }
  0x1c   :  { %438 = vmatprep.subr.bf16.mxu0 %v1755_v10 }
  0x1f   :  { %439 = vmatpush1.bf16.msra.mxu0 %v1762_v13 }
  0x20   :  { %753 = vmatprep.subr.bf16.mxu0 %v1706_v0 }
  0x7e   :  { %v202_v46 = vpop.permute.xlu0 %201 }
  0x82   :  { %v200_v51 = vpop.permute.xlu0 %199 }
  0xe5   :  { %v151_v20 = vpop.f32.mrb[0].mxu0 }
  0xe6   :  { %v160_v21 = vrot.slane %v151_v20, 1  ;;  %v166_v22 = vadd.f32 %v151_v20, %v67_v18  ;;  %v153_v23 = vpop.f32.mrb[1].mxu0  ;;  %v264_v20 = vld [vmem:[#allocation4] sm:$0x11] }
  0xe7   :  { %v155_v24 = vpop.f32.mrb[2].mxu0  ;;  %v161_v31 = vrot.slane %v153_v23, 1  ;;  %v167_v32 = vadd.f32 %v153_v23, %v68_v29 }
  0xe8   :  { %v168_v25 = vadd.f32 %v160_v21, %v69_v19  ;;  %v1407_v26 = vmul.f32 -1.442695, %v166_v22  ;;  %v156_v27 = vpop.f32.mrb[3].mxu0  ;;  %v265_v19 = vld [vmem:[#allocation4 + $0x8] sm:$0x11]  ;;  %v266_v22 = vunpack.c.l.bf16 %v264_v20 }
  0xe9   :  { %v169_v34 = vadd.f32 %v161_v31, %v70_v30  ;;  %v1409_v45 = vmul.f32 -1.442695, %v167_v32  ;;  %v268_v21 = vunpack.c.l.bf16 %v265_v19 }
  0xea   :  { %1493 = vpow2.f32 %v1407_v26  ;;  %v1408_v28 = vmul.f32 -1.442695, %v168_v25 }
  0xeb   :  { %v1410_v44 = vmul.f32 -1.442695, %v169_v34 }
  0xec   :  { %1495 = vpow2.f32 %v1408_v28 }
  0xed   :  { %1497 = vtanh.f32 %v167_v32  ;;  %v269_v32 = vunpack.c.h.bf16 %v265_v19 }
  0xf4   :  { %v1494_v33 = vpop.eup %1493 }
  0xf5   :  { %v176_v35 = vadd.f32 1.0, %v1494_v33  ;;  %v267_v33 = vunpack.c.h.bf16 %v264_v20 }
  0xf6   :  { %v1496_v36 = vpop.eup %1495 }
  0xf7   :  { %v177_v37 = vadd.f32 1.0, %v1496_v36  ;;  %1499 = vrcp.f32 %v176_v35  ;;  %v1498_v38 = vpop.eup %1497 }
  0xf8   :  { %1501 = vtanh.f32 %v169_v34 }
  0xf9   :  { %1503 = vrcp.f32 %v177_v37 }
  0xfa   :  { %1505 = vpow2.f32 %v1410_v44 }
  0xfb   :  { %1507 = vpow2.f32 %v1409_v45 }
 0x101   :  { %v1500_v39 = vpop.eup %1499 }
 0x102   :  { %v1502_v40 = vpop.eup %1501  ;;  %v207_v41 = vmul.f32 %v1500_v39, %v1498_v38  ;;  %v205_v55 = vmul.f32 %v1500_v39, %v200_v51 }
 0x103   :  { %v1504_v42 = vpop.eup %1503 }
 0x104   :  { %v208_v43 = vmul.f32 %v1504_v42, %v1502_v40  ;;  %v1506_v47 = vpop.eup %1505  ;;  %v206_v50 = vmul.f32 %v1504_v42, %v202_v46 }
 0x105   :  { %v191_v48 = vadd.f32 1.0, %v1506_v47  ;;  %v1508_v49 = vpop.eup %1507 }
 0x106   :  { %213 = vrot.lane.b32.xlu1 %v208_v43, %s1687_s28  ;;  %v190_v54 = vadd.f32 1.0, %v1508_v49 }
 0x107   :  { %1509 = vrcp.f32 %v191_v48 }
 0x10a   :  { %211 = vrot.lane.b32.xlu1 %v207_v41, %s1687_s28 }
 0x111   :  { %v1510_v60 = vpop.eup %1509 }
 0x178   :  { %v214_v52 = vpop.permute.xlu1 %213 }
 0x179   :  { %v218_v53 = vadd.f32 %v214_v52, %v206_v50 }
 0x17b   :  { %1511 = vtanh.f32 %v218_v53  ;;  %v225_v57 = vrot.slane %v218_v53, 7 }
 0x17c   :  { %v212_v56 = vpop.permute.xlu1 %211  ;;  %1513 = vrcp.f32 %v190_v54 }
 0x17d   :  { %v217_v58 = vadd.f32 %v212_v56, %v205_v55 }
 0x17f   :  { %1515 = vtanh.f32 %v217_v58  ;;  %v227_v59 = vsel %vm226_vm2, %v225_v57, %v217_v58 }
 0x180   :  { %228 = vrot.lane.b32.xlu1 %v227_v59, %s1687_s28 }
 0x185   :  { %v1512_v61 = vpop.eup %1511 }
 0x186   :  { %v1786_v62 = vmul.f32 %v1512_v61, %v1510_v60  ;;  %v1514_v63 = vpop.eup %1513 }
 0x188   :  { %v235_v8 = vrot.slane %v1786_v62, 7 }
 0x189   :  { %v1516_v4 = vpop.eup %1515 }
 0x18a   :  { %v1788_v7 = vmul.f32 %v1516_v4, %v1514_v63 }
 0x18c   :  { %v236_v11 = vsel %vm226_vm2, %v235_v8, %v1788_v7  ;;  %vm573_vm2 = vcmask 517121  }
 0x18d   :  { %237 = vrot.lane.b32.xlu0 %v236_v11, %s1687_s28 }
 0x1f2   :  { %v229_v12 = vpop.permute.xlu1 %228 }
 0x1f3   :  { %232 = vst.msk [vmem:[#allocation3] sm:$0x3] %vm54_vm0, %v229_v12 }
 0x1fa   :  { %v354_v14 = vld [vmem:[#allocation3] sm:$0x3] }
 0x1fb   :  { %359 = vrot.lane.b32.xlu0 %v354_v14, %s1687_s28  ;;  %v356_v15 = vrot.slane %v354_v14, 7 }
 0x1fd   :  { %357 = vrot.lane.b32.xlu1 %v356_v15, %s1687_s28 }
 0x1ff   :  { %v238_v16 = vpop.permute.xlu0 %237 }
 0x200   :  { %240 = vst.msk [vmem:[#allocation2] sm:$0x3] %vm54_vm0, %v238_v16  ;;  %vm256_vm0 = vsmask.f32 256 }
 0x207   :  { %v270_v17 = vld [vmem:[#allocation2] sm:$0x3] }
 0x208   :  { %v271_v18 = vpack.c.bf16 %v270_v17, %v270_v17 }
 0x20a   :  { %1413 = vmatmul.mubr.msk.bf16.vlgmr.msra.gmra.mrb[0].mxu1 %vm113_vm1, %v271_v18 }
 0x20b   :  { %594 = vmatpush1.bf16.msra.mxu1 %v1711_v1  ;;  %625 = vmatprep.mubr.bf16.mxu1 %v1685_v2 }
 0x20c   :  { %595 = vmatprep.subr.bf16.mxu1 %v1719_v3 }
 0x20f   :  { %596 = vmatpush1.bf16.msra.mxu1 %v1728_v5 }
 0x210   :  { %597 = vmatprep.subr.bf16.mxu1 %v1735_v6 }
 0x213   :  { %598 = vmatpush1.bf16.msra.mxu1 %v1748_v9 }
 0x214   :  { %599 = vmatprep.subr.bf16.mxu1 %v1755_v10 }
 0x217   :  { %600 = vmatpush1.bf16.msra.mxu1 %v1762_v13 }
 0x218   :  { %914 = vmatprep.subr.bf16.mxu1 %v1706_v0 }
 0x26d   :  { %v360_v50 = vpop.permute.xlu0 %359 }
 0x26f   :  { %v358_v52 = vpop.permute.xlu1 %357 }
 0x2dd   :  { %v309_v23 = vpop.f32.mrb[0].mxu1 }
 0x2de   :  { %v318_v24 = vrot.slane %v309_v23, 7  ;;  %v326_v25 = vadd.f32 %v309_v23, %v268_v21  ;;  %v311_v26 = vpop.f32.mrb[1].mxu1 }
 0x2df   :  { %v313_v27 = vpop.f32.mrb[2].mxu1  ;;  %v319_v34 = vrot.slane %v311_v26, 7  ;;  %v327_v35 = vadd.f32 %v311_v26, %v269_v32  ;;  %v422_v26 = vld [vmem:[#allocation4 + $0x8] sm:$0x22] }
 0x2e0   :  { %v324_v28 = vadd.f32 %v318_v24, %v266_v22  ;;  %v1415_v29 = vmul.f32 -1.442695, %v326_v25  ;;  %v314_v30 = vpop.f32.mrb[3].mxu1  ;;  %v421_v25 = vld [vmem:[#allocation4] sm:$0x22] }
 0x2e1   :  { %v325_v37 = vadd.f32 %v319_v34, %v267_v33  ;;  %v1417_v47 = vmul.f32 -1.442695, %v327_v35  ;;  %v423_v27 = vunpack.c.l.bf16 %v421_v25 }
 0x2e2   :  { %v1414_v31 = vmul.f32 -1.442695, %v324_v28  ;;  %1517 = vpow2.f32 %v1415_v29  ;;  %v425_v28 = vunpack.c.l.bf16 %v422_v26 }
 0x2e3   :  { %v1416_v48 = vmul.f32 -1.442695, %v325_v37 }
 0x2e4   :  { %1519 = vpow2.f32 %v1414_v31 }
 0x2e5   :  { %1521 = vtanh.f32 %v327_v35 }
 0x2ec   :  { %v1518_v36 = vpop.eup %1517 }
 0x2ed   :  { %v335_v38 = vadd.f32 1.0, %v1518_v36 }
 0x2ee   :  { %v1520_v39 = vpop.eup %1519 }
 0x2ef   :  { %v334_v40 = vadd.f32 1.0, %v1520_v39  ;;  %1523 = vrcp.f32 %v335_v38  ;;  %v1522_v41 = vpop.eup %1521  ;;  %v424_v39 = vunpack.c.h.bf16 %v421_v25 }
 0x2f0   :  { %1525 = vtanh.f32 %v325_v37 }
 0x2f1   :  { %1527 = vrcp.f32 %v334_v40 }
 0x2f2   :  { %1529 = vpow2.f32 %v1417_v47 }
 0x2f3   :  { %1531 = vpow2.f32 %v1416_v48 }
 0x2f9   :  { %v1524_v42 = vpop.eup %1523 }
 0x2fa   :  { %v1526_v43 = vpop.eup %1525  ;;  %v366_v44 = vmul.f32 %v1524_v42, %v1522_v41  ;;  %v364_v54 = vmul.f32 %v1524_v42, %v360_v50  ;;  %v426_v41 = vunpack.c.h.bf16 %v422_v26 }
 0x2fb   :  { %v1528_v45 = vpop.eup %1527 }
 0x2fc   :  { %371 = vrot.lane.b32.xlu0 %v366_v44, %s1687_s28  ;;  %v365_v46 = vmul.f32 %v1528_v45, %v1526_v43  ;;  %v1530_v49 = vpop.eup %1529  ;;  %v363_v58 = vmul.f32 %v1528_v45, %v358_v52 }
 0x2fd   :  { %v1532_v51 = vpop.eup %1531  ;;  %v349_v53 = vadd.f32 1.0, %v1530_v49 }
 0x2fe   :  { %369 = vrot.lane.b32.xlu1 %v365_v46, %s1687_s28  ;;  %v348_v55 = vadd.f32 1.0, %v1532_v51 }
 0x2ff   :  { %1533 = vrcp.f32 %v349_v53 }
 0x309   :  { %v1534_v4 = vpop.eup %1533 }
 0x36e   :  { %v372_v56 = vpop.permute.xlu0 %371 }
 0x36f   :  { %v376_v57 = vadd.f32 %v372_v56, %v364_v54 }
 0x370   :  { %v370_v59 = vpop.permute.xlu1 %369 }
 0x371   :  { %1535 = vtanh.f32 %v376_v57  ;;  %v383_v60 = vrot.slane %v376_v57, 7  ;;  %v375_v61 = vadd.f32 %v370_v59, %v363_v58 }
 0x372   :  { %1537 = vrcp.f32 %v348_v55 }
 0x373   :  { %1539 = vtanh.f32 %v375_v61  ;;  %v385_v63 = vsel %vm384_vm3, %v383_v60, %v375_v61 }
 0x374   :  { %386 = vrot.lane.b32.xlu1 %v385_v63, %s1687_s28 }
 0x37b   :  { %v1536_v8 = vpop.eup %1535 }
 0x37c   :  { %v1538_v11 = vpop.eup %1537  ;;  %v1810_v12 = vmul.f32 %v1536_v8, %v1534_v4 }
 0x37d   :  { %v1540_v14 = vpop.eup %1539 }
 0x37e   :  { %v1812_v15 = vmul.f32 %v1540_v14, %v1538_v11  ;;  %v393_v16 = vrot.slane %v1810_v12, 7 }
 0x380   :  { %v394_v17 = vsel %vm384_vm3, %v393_v16, %v1812_v15  ;;  %vm574_vm3 = vsmask.f32 1280 }
 0x381   :  { %395 = vrot.lane.b32.xlu0 %v394_v17, %s1687_s28 }
 0x3e6   :  { %v387_v18 = vpop.permute.xlu1 %386 }
 0x3e7   :  { %390 = vst.msk [vmem:[#allocation3 - $0x1] sm:$0x6] %vm389_vm4, %v387_v18 }
 0x3ee   :  { %v513_v19 = vld [vmem:[#allocation3] sm:$0x3] }
 0x3ef   :  { %v515_v20 = vrot.slane %v513_v19, 6  ;;  %v516_v21 = vrot.slane %v513_v19, 7 }
 0x3f1   :  { %517 = vrot.lane.b32.xlu1 %v515_v20, %s1687_s28  ;;  %519 = vrot.lane.b32.xlu0 %v516_v21, %s1687_s28 }
 0x3f3   :  { %v396_v22 = vpop.permute.xlu0 %395 }
 0x3f4   :  { %398 = vst.msk [vmem:[#allocation2 - $0x1] sm:$0x6] %vm389_vm4, %v396_v22  ;;  %vm575_vm4 = vmand %vm573_vm2, %vm574_vm3  ;;  %vm1382_vm3 = vsmask.f32 7950 }
 0x3fb   :  { %v427_v23 = vld [vmem:[#allocation2] sm:$0x3] }
 0x3fc   :  { %v428_v24 = vpack.c.bf16 %v427_v23, %v427_v23 }
 0x3fe   :  { %1420 = vmatmul.mubr.msk.bf16.vlgmr.msra.gmra.mrb[4].mxu0 %vm113_vm1, %v428_v24 }
 0x3ff   :  { %754 = vmatpush1.bf16.msra.mxu0 %v1711_v1  ;;  %785 = vmatprep.mubr.bf16.mxu0 %v1685_v2 }
 0x400   :  { %755 = vmatprep.subr.bf16.mxu0 %v1719_v3 }
 0x403   :  { %756 = vmatpush1.bf16.msra.mxu0 %v1728_v5 }
 0x404   :  { %757 = vmatprep.subr.bf16.mxu0 %v1735_v6 }
 0x407   :  { %758 = vmatpush1.bf16.msra.mxu0 %v1748_v9 }
 0x408   :  { %759 = vmatprep.subr.bf16.mxu0 %v1755_v10 }
 0x40b   :  { %760 = vmatpush1.bf16.msra.mxu0 %v1762_v13 }
 0x40c   :  { %1074 = vmatprep.subr.bf16.mxu0 %v1706_v0 }
 0x463   :  { %v518_v59 = vpop.permute.xlu1 %517  ;;  %v520_v60 = vpop.permute.xlu0 %519 }
 0x4d1   :  { %v466_v29 = vpop.f32.mrb[4].mxu0 }
 0x4d2   :  { %v475_v30 = vrot.slane %v466_v29, 6  ;;  %v477_v31 = vrot.slane %v466_v29, 7  ;;  %v468_v32 = vpop.f32.mrb[5].mxu0 }
 0x4d3   :  { %v470_v33 = vpop.f32.mrb[6].mxu0  ;;  %v476_v40 = vrot.slane %v468_v32, 6  ;;  %v478_v42 = vrot.slane %v468_v32, 7 }
 0x4d4   :  { %v483_v34 = vadd.f32 %v475_v30, %v423_v27  ;;  %v485_v35 = vadd.f32 %v477_v31, %v425_v28  ;;  %v471_v36 = vpop.f32.mrb[7].mxu0 }
 0x4d5   :  { %v484_v43 = vadd.f32 %v476_v40, %v424_v39  ;;  %v486_v44 = vadd.f32 %v478_v42, %v426_v41  ;;  %v583_v36 = vld [vmem:[#allocation4 + $0x8] sm:$0x22] }
 0x4d6   :  { %v1421_v37 = vmul.f32 -1.442695, %v483_v34  ;;  %v1422_v38 = vmul.f32 -1.442695, %v485_v35  ;;  %v582_v35 = vld [vmem:[#allocation4] sm:$0x22] }
 0x4d7   :  { %v1423_v55 = vmul.f32 -1.442695, %v484_v43  ;;  %v1424_v56 = vmul.f32 -1.442695, %v486_v44 }
 0x4d8   :  { %1541 = vpow2.f32 %v1421_v37  ;;  %v584_v37 = vunpack.c.l.bf16 %v582_v35 }
 0x4d9   :  { %1543 = vpow2.f32 %v1422_v38  ;;  %v586_v38 = vunpack.c.l.bf16 %v583_v36 }
 0x4da   :  { %1545 = vtanh.f32 %v484_v43 }
 0x4db   :  { %1547 = vtanh.f32 %v486_v44 }
 0x4e2   :  { %v1542_v45 = vpop.eup %1541 }
 0x4e3   :  { %v1544_v46 = vpop.eup %1543  ;;  %v493_v47 = vadd.f32 1.0, %v1542_v45 }
 0x4e4   :  { %v494_v48 = vadd.f32 1.0, %v1544_v46  ;;  %v1546_v49 = vpop.eup %1545 }
 0x4e5   :  { %1549 = vrcp.f32 %v493_v47  ;;  %v1548_v50 = vpop.eup %1547 }
 0x4e6   :  { %1551 = vrcp.f32 %v494_v48 }
 0x4e7   :  { %1553 = vpow2.f32 %v1423_v55 }
 0x4e8   :  { %1555 = vpow2.f32 %v1424_v56 }
 0x4ef   :  { %v1550_v51 = vpop.eup %1549 }
 0x4f0   :  { %v1552_v52 = vpop.eup %1551  ;;  %v525_v53 = vmul.f32 %v1550_v51, %v1546_v49  ;;  %v523_v4 = vmul.f32 %v1550_v51, %v518_v59  ;;  %v585_v49 = vunpack.c.h.bf16 %v582_v35  ;;  %v587_v51 = vunpack.c.h.bf16 %v583_v36 }
 0x4f1   :  { %v526_v54 = vmul.f32 %v1552_v52, %v1548_v50  ;;  %v1554_v57 = vpop.eup %1553  ;;  %v524_v11 = vmul.f32 %v1552_v52, %v520_v60 }
 0x4f2   :  { %529 = vrot.lane.b32.xlu1 %v525_v53, %s1687_s28  ;;  %v1556_v58 = vpop.eup %1555  ;;  %v507_v61 = vadd.f32 1.0, %v1554_v57 }
 0x4f3   :  { %531 = vrot.lane.b32.xlu0 %v526_v54, %s1687_s28  ;;  %v508_v63 = vadd.f32 1.0, %v1556_v58 }
 0x4f4   :  { %1557 = vrcp.f32 %v507_v61 }
 0x4f5   :  { %1559 = vrcp.f32 %v508_v63 }
 0x4fe   :  { %v1558_v20 = vpop.eup %1557 }
 0x4ff   :  { %v1560_v21 = vpop.eup %1559 }
 0x564   :  { %v530_v8 = vpop.permute.xlu1 %529 }
 0x565   :  { %v535_v14 = vadd.f32 %v530_v8, %v523_v4  ;;  %v532_v16 = vpop.permute.xlu0 %531 }
 0x566   :  { %v536_v17 = vadd.f32 %v532_v16, %v524_v11 }
 0x567   :  { %1561 = vtanh.f32 %v535_v14 }
 0x568   :  { %1563 = vtanh.f32 %v536_v17  ;;  %v543_v18 = vrot.slane %v536_v17, 7 }
 0x56a   :  { %v545_v19 = vsel %vm544_vm5, %v543_v18, %v535_v14 }
 0x56b   :  { %546 = vrot.lane.b32.xlu1 %v545_v19, %s1687_s28 }
 0x571   :  { %v1562_v22 = vpop.eup %1561 }
 0x572   :  { %v1564_v23 = vpop.eup %1563  ;;  %v1832_v24 = vmul.f32 %v1562_v22, %v1558_v20 }
 0x573   :  { %v1834_v25 = vmul.f32 %v1564_v23, %v1560_v21 }
 0x575   :  { %v553_v26 = vrot.slane %v1834_v25, 7 }
 0x577   :  { %v554_v27 = vsel %vm544_vm5, %v553_v26, %v1832_v24  ;;  %vm894_vm5 = vcmask 518146  }
 0x578   :  { %555 = vrot.lane.b32.xlu0 %v554_v27, %s1687_s28 }
 0x5dd   :  { %v547_v28 = vpop.permute.xlu1 %546 }
 0x5de   :  { %550 = vst.msk [vmem:[#allocation3 - $0x2] sm:$0xc] %vm549_vm6, %v547_v28 }
 0x5e5   :  { %v674_v29 = vld [vmem:[#allocation3] sm:$0x3] }
 0x5e6   :  { %v676_v30 = vrot.slane %v674_v29, 5  ;;  %v677_v31 = vrot.slane %v674_v29, 6 }
 0x5e8   :  { %678 = vrot.lane.b32.xlu1 %v676_v30, %s1687_s28  ;;  %680 = vrot.lane.b32.xlu0 %v677_v31, %s1687_s28 }
 0x5ea   :  { %v556_v32 = vpop.permute.xlu0 %555 }
 0x5eb   :  { %558 = vst.msk [vmem:[#allocation2 - $0x2] sm:$0xc] %vm549_vm6, %v556_v32  ;;  %vm895_vm6 = vsmask.f32 2304 }
 0x5f2   :  { %v588_v33 = vld [vmem:[#allocation2] sm:$0x3] }
 0x5f3   :  { %v589_v34 = vpack.c.bf16 %v588_v33, %v588_v33 }
 0x5f5   :  { %1427 = vmatmul.mubr.msk.bf16.vlgmr.msra.gmra.mrb[4].mxu1 %vm113_vm1, %v589_v34 }
 0x5f6   :  { %915 = vmatpush1.bf16.msra.mxu1 %v1711_v1  ;;  %946 = vmatprep.mubr.bf16.mxu1 %v1685_v2 }
 0x5f7   :  { %916 = vmatprep.subr.bf16.mxu1 %v1719_v3 }
 0x5fa   :  { %917 = vmatpush1.bf16.msra.mxu1 %v1728_v5 }
 0x5fb   :  { %918 = vmatprep.subr.bf16.mxu1 %v1735_v6 }
 0x5fe   :  { %919 = vmatpush1.bf16.msra.mxu1 %v1748_v9 }
 0x5ff   :  { %920 = vmatprep.subr.bf16.mxu1 %v1755_v10 }
 0x602   :  { %921 = vmatpush1.bf16.msra.mxu1 %v1762_v13 }
 0x603   :  { %1235 = vmatprep.subr.bf16.mxu1 %v1706_v0 }
 0x65a   :  { %v679_v17 = vpop.permute.xlu1 %678  ;;  %v681_v18 = vpop.permute.xlu0 %680 }
 0x6c8   :  { %v627_v39 = vpop.f32.mrb[4].mxu1 }
 0x6c9   :  { %v636_v40 = vrot.slane %v627_v39, 5  ;;  %v638_v41 = vrot.slane %v627_v39, 6  ;;  %v629_v42 = vpop.f32.mrb[5].mxu1 }
 0x6ca   :  { %v631_v43 = vpop.f32.mrb[6].mxu1  ;;  %v637_v50 = vrot.slane %v629_v42, 5  ;;  %v639_v0 = vrot.slane %v629_v42, 6 }
 0x6cb   :  { %v644_v44 = vadd.f32 %v636_v40, %v584_v37  ;;  %v646_v45 = vadd.f32 %v638_v41, %v586_v38  ;;  %v632_v46 = vpop.f32.mrb[7].mxu1 }
 0x6cc   :  { %v645_v52 = vadd.f32 %v637_v50, %v585_v49  ;;  %v647_v53 = vadd.f32 %v639_v0, %v587_v51  ;;  %v742_v46 = vld [vmem:[#allocation4] sm:$0x44] }
 0x6cd   :  { %v1428_v47 = vmul.f32 -1.442695, %v644_v44  ;;  %v1429_v48 = vmul.f32 -1.442695, %v646_v45 }
 0x6ce   :  { %v1430_v8 = vmul.f32 -1.442695, %v645_v52  ;;  %v1431_v11 = vmul.f32 -1.442695, %v647_v53 }
 0x6cf   :  { %1565 = vpow2.f32 %v1428_v47  ;;  %v743_v47 = vld [vmem:[#allocation4 + $0x8] sm:$0x44] }
 0x6d0   :  { %1567 = vpow2.f32 %v1429_v48  ;;  %v744_v48 = vunpack.c.l.bf16 %v742_v46  ;;  %v746_v49 = vunpack.c.l.bf16 %v743_v47 }
 0x6d1   :  { %1569 = vtanh.f32 %v645_v52 }
 0x6d2   :  { %1571 = vtanh.f32 %v647_v53 }
 0x6d9   :  { %v1566_v54 = vpop.eup %1565 }
 0x6da   :  { %v1568_v55 = vpop.eup %1567  ;;  %v654_v56 = vadd.f32 1.0, %v1566_v54 }
 0x6db   :  { %v655_v57 = vadd.f32 1.0, %v1568_v55  ;;  %v1570_v58 = vpop.eup %1569 }
 0x6dc   :  { %1573 = vrcp.f32 %v654_v56  ;;  %v1572_v59 = vpop.eup %1571 }
 0x6dd   :  { %1575 = vrcp.f32 %v655_v57 }
 0x6de   :  { %1577 = vpow2.f32 %v1430_v8 }
 0x6df   :  { %1579 = vpow2.f32 %v1431_v11 }
 0x6e6   :  { %v1574_v60 = vpop.eup %1573 }
 0x6e7   :  { %v1576_v61 = vpop.eup %1575  ;;  %v686_v63 = vmul.f32 %v1574_v60, %v1570_v58  ;;  %v684_v21 = vmul.f32 %v1574_v60, %v679_v17 }
 0x6e8   :  { %v687_v4 = vmul.f32 %v1576_v61, %v1572_v59  ;;  %v1578_v14 = vpop.eup %1577  ;;  %v685_v23 = vmul.f32 %v1576_v61, %v681_v18  ;;  %v745_v59 = vunpack.c.h.bf16 %v742_v46  ;;  %v747_v61 = vunpack.c.h.bf16 %v743_v47 }
 0x6e9   :  { %690 = vrot.lane.b32.xlu1 %v686_v63, %s1687_s28  ;;  %v1580_v16 = vpop.eup %1579  ;;  %v668_v19 = vadd.f32 1.0, %v1578_v14 }
 0x6ea   :  { %692 = vrot.lane.b32.xlu0 %v687_v4, %s1687_s28  ;;  %v669_v20 = vadd.f32 1.0, %v1580_v16 }
 0x6eb   :  { %1581 = vrcp.f32 %v668_v19 }
 0x6ec   :  { %1583 = vrcp.f32 %v669_v20 }
 0x6f5   :  { %v1582_v31 = vpop.eup %1581 }
 0x6f6   :  { %v1584_v32 = vpop.eup %1583 }
 0x75b   :  { %v691_v22 = vpop.permute.xlu1 %690 }
 0x75c   :  { %v696_v26 = vadd.f32 %v691_v22, %v684_v21  ;;  %v693_v27 = vpop.permute.xlu0 %692 }
 0x75d   :  { %v697_v28 = vadd.f32 %v693_v27, %v685_v23 }
 0x75e   :  { %1585 = vtanh.f32 %v696_v26 }
 0x75f   :  { %1587 = vtanh.f32 %v697_v28  ;;  %v704_v29 = vrot.slane %v697_v28, 7 }
 0x761   :  { %v706_v30 = vsel %vm705_vm7, %v704_v29, %v696_v26 }
 0x762   :  { %707 = vrot.lane.b32.xlu1 %v706_v30, %s1687_s28 }
 0x768   :  { %v1586_v33 = vpop.eup %1585 }
 0x769   :  { %v1588_v34 = vpop.eup %1587  ;;  %v1854_v35 = vmul.f32 %v1586_v33, %v1582_v31 }
 0x76a   :  { %v1856_v36 = vmul.f32 %v1588_v34, %v1584_v32 }
 0x76c   :  { %v714_v37 = vrot.slane %v1856_v36, 7 }
 0x76e   :  { %v715_v38 = vsel %vm705_vm7, %v714_v37, %v1854_v35  ;;  %vm1997_vm7 = vmand %vm894_vm5, %vm895_vm6 }
 0x76f   :  { %716 = vrot.lane.b32.xlu0 %v715_v38, %s1687_s28 }
 0x7d4   :  { %v708_v39 = vpop.permute.xlu1 %707 }
 0x7d5   :  { %711 = vst.msk [vmem:[#allocation3 - $0x3] sm:$0x18] %vm710_vm8, %v708_v39 }
 0x7dc   :  { %v834_v40 = vld [vmem:[#allocation3] sm:$0x3] }
 0x7dd   :  { %v836_v41 = vrot.slane %v834_v40, 4  ;;  %v837_v42 = vrot.slane %v834_v40, 5 }
 0x7df   :  { %838 = vrot.lane.b32.xlu1 %v836_v41, %s1687_s28  ;;  %840 = vrot.lane.b32.xlu0 %v837_v42, %s1687_s28 }
 0x7e1   :  { %v717_v43 = vpop.permute.xlu0 %716 }
 0x7e2   :  { %719 = vst.msk [vmem:[#allocation2 - $0x3] sm:$0x18] %vm710_vm8, %v717_v43  ;;  %vm1215_vm8 = vcmask 519171  }
 0x7e9   :  { %v748_v44 = vld [vmem:[#allocation2] sm:$0x3] }
 0x7ea   :  { %v749_v45 = vpack.c.bf16 %v748_v44, %v748_v44 }
 0x7ec   :  { %1434 = vmatmul.mubr.msk.bf16.vlgmr.msra.gmra.mrb[8].mxu0 %vm113_vm1, %v749_v45 }
 0x7ed   :  { %1075 = vmatpush1.bf16.msra.mxu0 %v1711_v1  ;;  %1106 = vmatprep.mubr.bf16.mxu0 %v1685_v2 }
 0x7ee   :  { %1076 = vmatprep.subr.bf16.mxu0 %v1719_v3 }
 0x7f1   :  { %1077 = vmatpush1.bf16.msra.mxu0 %v1728_v5 }
 0x7f2   :  { %1078 = vmatprep.subr.bf16.mxu0 %v1735_v6 }
 0x7f5   :  { %1079 = vmatpush1.bf16.msra.mxu0 %v1748_v9 }
 0x7f6   :  { %1080 = vmatprep.subr.bf16.mxu0 %v1755_v10 }
 0x7f9   :  { %1081 = vmatpush1.bf16.msra.mxu0 %v1762_v13 }
 0x851   :  { %v839_v30 = vpop.permute.xlu1 %838  ;;  %v841_v31 = vpop.permute.xlu0 %840 }
 0x8bf   :  { %v787_v50 = vpop.f32.mrb[8].mxu0 }
 0x8c0   :  { %v796_v51 = vrot.slane %v787_v50, 4  ;;  %v798_v0 = vrot.slane %v787_v50, 5  ;;  %v789_v52 = vpop.f32.mrb[9].mxu0 }
 0x8c1   :  { %v791_v53 = vpop.f32.mrb[10].mxu0  ;;  %v797_v60 = vrot.slane %v789_v52, 4  ;;  %v799_v63 = vrot.slane %v789_v52, 5 }
 0x8c2   :  { %v804_v54 = vadd.f32 %v796_v51, %v744_v48  ;;  %v806_v55 = vadd.f32 %v798_v0, %v746_v49  ;;  %v792_v56 = vpop.f32.mrb[11].mxu0 }
 0x8c3   :  { %v805_v4 = vadd.f32 %v797_v60, %v745_v59  ;;  %v807_v8 = vadd.f32 %v799_v63, %v747_v61  ;;  %v904_v59 = vld [vmem:[#allocation4 + $0x8] sm:$0x44] }
 0x8c4   :  { %v1435_v57 = vmul.f32 -1.442695, %v804_v54  ;;  %v1436_v58 = vmul.f32 -1.442695, %v806_v55  ;;  %v907_v61 = vunpack.c.l.bf16 %v904_v59 }
 0x8c5   :  { %v1437_v26 = vmul.f32 -1.442695, %v805_v4  ;;  %v1438_v27 = vmul.f32 -1.442695, %v807_v8 }
 0x8c6   :  { %1589 = vpow2.f32 %v1435_v57 }
 0x8c7   :  { %1591 = vpow2.f32 %v1436_v58  ;;  %v903_v58 = vld [vmem:[#allocation4] sm:$0x44] }
 0x8c8   :  { %1593 = vtanh.f32 %v805_v4  ;;  %v905_v60 = vunpack.c.l.bf16 %v903_v58 }
 0x8c9   :  { %1595 = vtanh.f32 %v807_v8 }
 0x8d0   :  { %v1590_v11 = vpop.eup %1589 }
 0x8d1   :  { %v1592_v14 = vpop.eup %1591  ;;  %v814_v16 = vadd.f32 1.0, %v1590_v11 }
 0x8d2   :  { %v815_v17 = vadd.f32 1.0, %v1592_v14  ;;  %v1594_v18 = vpop.eup %1593 }
 0x8d3   :  { %1597 = vrcp.f32 %v814_v16  ;;  %v1596_v19 = vpop.eup %1595  ;;  %v908_v16 = vunpack.c.h.bf16 %v904_v59 }
 0x8d4   :  { %1599 = vrcp.f32 %v815_v17 }
 0x8d5   :  { %1601 = vpow2.f32 %v1437_v26 }
 0x8d6   :  { %1603 = vpow2.f32 %v1438_v27 }
 0x8dd   :  { %v1598_v20 = vpop.eup %1597 }
 0x8de   :  { %v1600_v21 = vpop.eup %1599  ;;  %v846_v22 = vmul.f32 %v1598_v20, %v1594_v18  ;;  %v844_v34 = vmul.f32 %v1598_v20, %v839_v30 }
 0x8df   :  { %v847_v23 = vmul.f32 %v1600_v21, %v1596_v19  ;;  %v1602_v28 = vpop.eup %1601  ;;  %v845_v38 = vmul.f32 %v1600_v21, %v841_v31 }
 0x8e0   :  { %850 = vrot.lane.b32.xlu1 %v846_v22, %s1687_s28  ;;  %v1604_v29 = vpop.eup %1603  ;;  %v828_v32 = vadd.f32 1.0, %v1602_v28 }
 0x8e1   :  { %852 = vrot.lane.b32.xlu0 %v847_v23, %s1687_s28  ;;  %v829_v33 = vadd.f32 1.0, %v1604_v29 }
 0x8e2   :  { %1605 = vrcp.f32 %v828_v32 }
 0x8e3   :  { %1607 = vrcp.f32 %v829_v33 }
 0x8ec   :  { %v1606_v44 = vpop.eup %1605 }
 0x8ed   :  { %v1608_v45 = vpop.eup %1607 }
 0x952   :  { %v851_v37 = vpop.permute.xlu1 %850 }
 0x953   :  { %v856_v39 = vadd.f32 %v851_v37, %v844_v34  ;;  %v853_v40 = vpop.permute.xlu0 %852 }
 0x954   :  { %v857_v41 = vadd.f32 %v853_v40, %v845_v38 }
 0x955   :  { %1609 = vtanh.f32 %v856_v39 }
 0x956   :  { %1611 = vtanh.f32 %v857_v41  ;;  %v864_v42 = vrot.slane %v857_v41, 7 }
 0x958   :  { %v866_v43 = vsel %vm865_vm9, %v864_v42, %v856_v39 }
 0x959   :  { %867 = vrot.lane.b32.xlu1 %v866_v43, %s1687_s28 }
 0x95f   :  { %v1610_v46 = vpop.eup %1609 }
 0x960   :  { %v1612_v47 = vpop.eup %1611  ;;  %v1875_v48 = vmul.f32 %v1610_v46, %v1606_v44 }
 0x961   :  { %v1877_v49 = vmul.f32 %v1612_v47, %v1608_v45 }
 0x963   :  { %v874_v50 = vrot.slane %v1877_v49, 7 }
 0x965   :  { %v875_v51 = vsel %vm865_vm9, %v874_v50, %v1875_v48  ;;  %vm1216_vm9 = vsmask.f32 3328 }
 0x966   :  { %876 = vrot.lane.b32.xlu0 %v875_v51, %s1687_s28 }
 0x9cb   :  { %v868_v0 = vpop.permute.xlu1 %867 }
 0x9cc   :  { %871 = vst.msk [vmem:[#allocation3 - $0x4] sm:$0x30] %vm870_vm10, %v868_v0 }
 0x9d3   :  { %v995_v52 = vld [vmem:[#allocation3] sm:$0x3] }
 0x9d4   :  { %v997_v53 = vrot.slane %v995_v52, 3  ;;  %v998_v54 = vrot.slane %v995_v52, 4 }
 0x9d6   :  { %999 = vrot.lane.b32.xlu1 %v997_v53, %s1687_s28  ;;  %1001 = vrot.lane.b32.xlu0 %v998_v54, %s1687_s28 }
 0x9d8   :  { %v877_v55 = vpop.permute.xlu0 %876 }
 0x9d9   :  { %879 = vst.msk [vmem:[#allocation2 - $0x4] sm:$0x30] %vm870_vm10, %v877_v55  ;;  %vm2018_vm10 = vmand %vm1215_vm8, %vm1216_vm9 }
 0x9e0   :  { %v909_v56 = vld [vmem:[#allocation2] sm:$0x3] }
 0x9e1   :  { %v910_v57 = vpack.c.bf16 %v909_v56, %v909_v56 }
 0x9e3   :  { %1441 = vmatmul.mubr.msk.bf16.vlgmr.msra.gmra.mrb[8].mxu1 %vm113_vm1, %v910_v57 }
 0x9e4   :  { %1236 = vmatpush1.bf16.msra.mxu1 %v1711_v1  ;;  %1267 = vmatprep.mubr.bf16.mxu1 %v1685_v2 }
 0x9e5   :  { %1237 = vmatprep.subr.bf16.mxu1 %v1719_v3 }
 0x9e8   :  { %1238 = vmatpush1.bf16.msra.mxu1 %v1728_v5 }
 0x9e9   :  { %1239 = vmatprep.subr.bf16.mxu1 %v1735_v6 }
 0x9ec   :  { %1240 = vmatpush1.bf16.msra.mxu1 %v1748_v9  ;;  %v906_v9 = vunpack.c.h.bf16 %v903_v58 }
 0x9ed   :  { %1241 = vmatprep.subr.bf16.mxu1 %v1755_v10 }
 0x9f0   :  { %1242 = vmatpush1.bf16.msra.mxu1 %v1762_v13 }
 0xa48   :  { %v1000_v37 = vpop.permute.xlu1 %999  ;;  %v1002_v38 = vpop.permute.xlu0 %1001 }
 0xab6   :  { %v948_v63 = vpop.f32.mrb[8].mxu1 }
 0xab7   :  { %v957_v1 = vrot.slane %v948_v63, 3  ;;  %v959_v4 = vrot.slane %v948_v63, 4  ;;  %v950_v2 = vpop.f32.mrb[9].mxu1 }
 0xab8   :  { %v952_v8 = vpop.f32.mrb[10].mxu1  ;;  %v958_v10 = vrot.slane %v950_v2, 3  ;;  %v960_v13 = vrot.slane %v950_v2, 4  ;;  %v1063_v2 = vld [vmem:[#allocation4] sm:$0x88] }
 0xab9   :  { %v965_v3 = vadd.f32 %v957_v1, %v905_v60  ;;  %v967_v11 = vadd.f32 %v959_v4, %v907_v61  ;;  %v953_v5 = vpop.f32.mrb[11].mxu1  ;;  %v1064_v8 = vld [vmem:[#allocation4 + $0x8] sm:$0x88] }
 0xaba   :  { %v966_v17 = vadd.f32 %v958_v10, %v906_v9  ;;  %v968_v18 = vadd.f32 %v960_v13, %v908_v16 }
 0xabb   :  { %v1442_v14 = vmul.f32 -1.442695, %v965_v3  ;;  %v1443_v6 = vmul.f32 -1.442695, %v967_v11  ;;  %v1065_v3 = vunpack.c.l.bf16 %v1063_v2  ;;  %v1067_v11 = vunpack.c.l.bf16 %v1064_v8 }
 0xabc   :  { %v1444_v31 = vmul.f32 -1.442695, %v966_v17  ;;  %v1445_v32 = vmul.f32 -1.442695, %v968_v18 }
 0xabd   :  { %1613 = vpow2.f32 %v1442_v14 }
 0xabe   :  { %1615 = vpow2.f32 %v1443_v6 }
 0xabf   :  { %1617 = vtanh.f32 %v966_v17 }
 0xac0   :  { %1619 = vtanh.f32 %v968_v18 }
 0xac7   :  { %v1614_v19 = vpop.eup %1613 }
 0xac8   :  { %v1616_v20 = vpop.eup %1615  ;;  %v975_v21 = vadd.f32 1.0, %v1614_v19 }
 0xac9   :  { %v976_v22 = vadd.f32 1.0, %v1616_v20  ;;  %v1618_v23 = vpop.eup %1617  ;;  %v1066_v20 = vunpack.c.h.bf16 %v1063_v2 }
 0xaca   :  { %1621 = vrcp.f32 %v975_v21  ;;  %v1620_v26 = vpop.eup %1619 }
 0xacb   :  { %1623 = vrcp.f32 %v976_v22  ;;  %v1068_v22 = vunpack.c.h.bf16 %v1064_v8 }
 0xacc   :  { %1625 = vpow2.f32 %v1444_v31 }
 0xacd   :  { %1627 = vpow2.f32 %v1445_v32 }
 0xad4   :  { %v1622_v27 = vpop.eup %1621 }
 0xad5   :  { %v1624_v28 = vpop.eup %1623  ;;  %v1007_v29 = vmul.f32 %v1622_v27, %v1618_v23  ;;  %v1005_v41 = vmul.f32 %v1622_v27, %v1000_v37 }
 0xad6   :  { %v1008_v30 = vmul.f32 %v1624_v28, %v1620_v26  ;;  %v1626_v33 = vpop.eup %1625  ;;  %v1006_v43 = vmul.f32 %v1624_v28, %v1002_v38 }
 0xad7   :  { %1011 = vrot.lane.b32.xlu1 %v1007_v29, %s1687_s28  ;;  %v1628_v34 = vpop.eup %1627  ;;  %v989_v39 = vadd.f32 1.0, %v1626_v33 }
 0xad8   :  { %1013 = vrot.lane.b32.xlu0 %v1008_v30, %s1687_s28  ;;  %v990_v40 = vadd.f32 1.0, %v1628_v34 }
 0xad9   :  { %1629 = vrcp.f32 %v989_v39 }
 0xada   :  { %1631 = vrcp.f32 %v990_v40 }
 0xae3   :  { %v1630_v51 = vpop.eup %1629 }
 0xae4   :  { %v1632_v0 = vpop.eup %1631 }
 0xb49   :  { %v1012_v42 = vpop.permute.xlu1 %1011 }
 0xb4a   :  { %v1017_v44 = vadd.f32 %v1012_v42, %v1005_v41  ;;  %v1014_v45 = vpop.permute.xlu0 %1013 }
 0xb4b   :  { %v1018_v46 = vadd.f32 %v1014_v45, %v1006_v43 }
 0xb4c   :  { %1633 = vtanh.f32 %v1017_v44 }
 0xb4d   :  { %1635 = vtanh.f32 %v1018_v46  ;;  %v1025_v47 = vrot.slane %v1018_v46, 7 }
 0xb4f   :  { %v1027_v50 = vsel %vm1026_vm11, %v1025_v47, %v1017_v44 }
 0xb50   :  { %1028 = vrot.lane.b32.xlu1 %v1027_v50, %s1687_s28 }
 0xb56   :  { %v1634_v52 = vpop.eup %1633 }
 0xb57   :  { %v1636_v53 = vpop.eup %1635  ;;  %v1896_v54 = vmul.f32 %v1634_v52, %v1630_v51 }
 0xb58   :  { %v1898_v55 = vmul.f32 %v1636_v53, %v1632_v0 }
 0xb5a   :  { %v1035_v56 = vrot.slane %v1898_v55, 7 }
 0xb5c   :  { %v1036_v57 = vsel %vm1026_vm11, %v1035_v56, %v1896_v54  ;;  %vm413_vm11 = vsmask.f32 7938 }
 0xb5d   :  { %1037 = vrot.lane.b32.xlu0 %v1036_v57, %s1687_s28 }
 0xbc2   :  { %v1029_v58 = vpop.permute.xlu1 %1028 }
 0xbc3   :  { %1032 = vst.msk [vmem:[#allocation3 - $0x5] sm:$0x60] %vm1031_vm12, %v1029_v58 }
 0xbca   :  { %v1155_v59 = vld [vmem:[#allocation3] sm:$0x3] }
 0xbcb   :  { %v1157_v60 = vrot.slane %v1155_v59, 2  ;;  %v1158_v61 = vrot.slane %v1155_v59, 3 }
 0xbcd   :  { %1159 = vrot.lane.b32.xlu1 %v1157_v60, %s1687_s28  ;;  %1161 = vrot.lane.b32.xlu0 %v1158_v61, %s1687_s28 }
 0xbcf   :  { %v1038_v63 = vpop.permute.xlu0 %1037 }
 0xbd0   :  { %1040 = vst.msk [vmem:[#allocation2 - $0x5] sm:$0x60] %vm1031_vm12, %v1038_v63  ;;  %vm414_vm12 = vmand %vm255_vm15, %vm413_vm11 }
 0xbd7   :  { %v1069_v1 = vld [vmem:[#allocation2] sm:$0x3] }
 0xbd8   :  { %v1070_v4 = vpack.c.bf16 %v1069_v1, %v1069_v1 }
 0xbda   :  { %1448 = vmatmul.mubr.msk.bf16.vlgmr.msra.gmra.mrb[12].mxu0 %vm113_vm1, %v1070_v4 }
 0xc3f   :  { %v1160_v44 = vpop.permute.xlu1 %1159  ;;  %v1162_v45 = vpop.permute.xlu0 %1161 }
 0xcad   :  { %v1108_v5 = vpop.f32.mrb[12].mxu0 }
 0xcae   :  { %v1117_v14 = vrot.slane %v1108_v5, 2  ;;  %v1119_v6 = vrot.slane %v1108_v5, 3  ;;  %v1110_v9 = vpop.f32.mrb[13].mxu0 }
 0xcaf   :  { %v1112_v10 = vpop.f32.mrb[14].mxu0  ;;  %v1118_v21 = vrot.slane %v1110_v9, 2  ;;  %v1120_v23 = vrot.slane %v1110_v9, 3 }
 0xcb0   :  { %v1125_v16 = vadd.f32 %v1117_v14, %v1065_v3  ;;  %v1127_v13 = vadd.f32 %v1119_v6, %v1067_v11  ;;  %v1113_v17 = vpop.f32.mrb[15].mxu0 }
 0xcb1   :  { %v1126_v26 = vadd.f32 %v1118_v21, %v1066_v20  ;;  %v1128_v27 = vadd.f32 %v1120_v23, %v1068_v22 }
 0xcb2   :  { %v1449_v18 = vmul.f32 -1.442695, %v1125_v16  ;;  %v1450_v19 = vmul.f32 -1.442695, %v1127_v13  ;;  %v1224_v16 = vld [vmem:[#allocation4] sm:$0x88] }
 0xcb3   :  { %v1451_v40 = vmul.f32 -1.442695, %v1126_v26  ;;  %v1452_v41 = vmul.f32 -1.442695, %v1128_v27  ;;  %v1225_v13 = vld [vmem:[#allocation4 + $0x8] sm:$0x88]  ;;  %v1226_v17 = vunpack.c.l.bf16 %v1224_v16 }
 0xcb4   :  { %1637 = vpow2.f32 %v1449_v18  ;;  %v1228_v18 = vunpack.c.l.bf16 %v1225_v13 }
 0xcb5   :  { %1639 = vpow2.f32 %v1450_v19 }
 0xcb6   :  { %1641 = vtanh.f32 %v1126_v26 }
 0xcb7   :  { %1643 = vtanh.f32 %v1128_v27 }
 0xcbe   :  { %v1638_v28 = vpop.eup %1637 }
 0xcbf   :  { %v1640_v29 = vpop.eup %1639  ;;  %v1135_v30 = vadd.f32 1.0, %v1638_v28 }
 0xcc0   :  { %v1136_v31 = vadd.f32 1.0, %v1640_v29  ;;  %v1642_v32 = vpop.eup %1641 }
 0xcc1   :  { %1645 = vrcp.f32 %v1135_v30  ;;  %v1644_v33 = vpop.eup %1643 }
 0xcc2   :  { %1647 = vrcp.f32 %v1136_v31  ;;  %v1227_v31 = vunpack.c.h.bf16 %v1224_v16 }
 0xcc3   :  { %1649 = vpow2.f32 %v1451_v40 }
 0xcc4   :  { %1651 = vpow2.f32 %v1452_v41 }
 0xccb   :  { %v1646_v34 = vpop.eup %1645 }
 0xccc   :  { %v1648_v37 = vpop.eup %1647  ;;  %v1167_v38 = vmul.f32 %v1646_v34, %v1642_v32  ;;  %v1165_v50 = vmul.f32 %v1646_v34, %v1160_v44 }
 0xccd   :  { %v1168_v39 = vmul.f32 %v1648_v37, %v1644_v33  ;;  %v1650_v42 = vpop.eup %1649  ;;  %v1166_v0 = vmul.f32 %v1648_v37, %v1162_v45  ;;  %v1229_v33 = vunpack.c.h.bf16 %v1225_v13 }
 0xcce   :  { %1171 = vrot.lane.b32.xlu1 %v1167_v38, %s1687_s28  ;;  %v1652_v43 = vpop.eup %1651  ;;  %v1149_v46 = vadd.f32 1.0, %v1650_v42 }
 0xccf   :  { %1173 = vrot.lane.b32.xlu0 %v1168_v39, %s1687_s28  ;;  %v1150_v47 = vadd.f32 1.0, %v1652_v43 }
 0xcd0   :  { %1653 = vrcp.f32 %v1149_v46 }
 0xcd1   :  { %1655 = vrcp.f32 %v1150_v47 }
 0xcda   :  { %v1654_v59 = vpop.eup %1653 }
 0xcdb   :  { %v1656_v60 = vpop.eup %1655 }
 0xd40   :  { %v1172_v51 = vpop.permute.xlu1 %1171 }
 0xd41   :  { %v1177_v52 = vadd.f32 %v1172_v51, %v1165_v50  ;;  %v1174_v53 = vpop.permute.xlu0 %1173  ;;  %v1462_v51 = vpack.c.bf16 %v1788_v7, %v1788_v7  ;;  %v1470_v7 = vpack.c.bf16 %v1875_v48, %v1875_v48  ;;  %v1464_v48 = vpack.c.bf16 %v1812_v15, %v1812_v15 }
 0xd42   :  { %v1178_v56 = vadd.f32 %v1174_v53, %v1166_v0  ;;  %v1463_v0 = vpack.c.bf16 %v1786_v62, %v1786_v62  ;;  %v1467_v53 = vpack.c.bf16 %v1834_v25, %v1834_v25  ;;  %v1471_v62 = vpack.c.bf16 %v1877_v49, %v1877_v49 }
 0xd43   :  { %1657 = vtanh.f32 %v1177_v52  ;;  %v1465_v49 = vpack.c.bf16 %v1810_v12, %v1810_v12  ;;  %v1472_v15 = vpack.c.bf16 %v1896_v54, %v1896_v54  ;;  %v1473_v12 = vpack.c.bf16 %v1898_v55, %v1898_v55 }
 0xd44   :  { %1659 = vtanh.f32 %v1178_v56  ;;  %v1185_v57 = vrot.slane %v1178_v56, 7  ;;  %v1468_v56 = vpack.c.bf16 %v1854_v35, %v1854_v35 }
 0xd46   :  { %v1187_v58 = vsel %vm1186_vm13, %v1185_v57, %v1177_v52  ;;  %v1466_v52 = vpack.c.bf16 %v1832_v24, %v1832_v24  ;;  %v1469_v57 = vpack.c.bf16 %v1856_v36, %v1856_v36 }
 0xd47   :  { %1188 = vrot.lane.b32.xlu1 %v1187_v58, %s1687_s28 }
 0xd4d   :  { %v1658_v61 = vpop.eup %1657 }
 0xd4e   :  { %v1660_v63 = vpop.eup %1659  ;;  %v1909_v1 = vmul.f32 %v1658_v61, %v1654_v59 }
 0xd4f   :  { %v1911_v4 = vmul.f32 %v1660_v63, %v1656_v60 }
 0xd50   :  { %v1474_v24 = vpack.c.bf16 %v1909_v1, %v1909_v1 }
 0xd51   :  { %v1195_v2 = vrot.slane %v1911_v4, 7  ;;  %v1475_v25 = vpack.c.bf16 %v1911_v4, %v1911_v4 }
 0xd53   :  { %v1196_v8 = vsel %vm1186_vm13, %v1195_v2, %v1909_v1  ;;  %vm734_vm13 = vsmask.f32 7942 }
 0xd54   :  { %1197 = vrot.lane.b32.xlu0 %v1196_v8, %s1687_s28 }
 0xdb9   :  { %v1189_v3 = vpop.permute.xlu1 %1188 }
 0xdba   :  { %1192 = vst.msk [vmem:[#allocation3 - $0x6] sm:$0xc0] %vm1191_vm14, %v1189_v3 }
 0xdc1   :  { %v1316_v11 = vld [vmem:[#allocation3] sm:$0x3] }
 0xdc2   :  { %v1319_v5 = vrot.slane %v1316_v11, 2  ;;  %v1318_v14 = vrot.slane %v1316_v11, 1 }
 0xdc4   :  { %1322 = vrot.lane.b32.xlu1 %v1319_v5, %s1687_s28  ;;  %1320 = vrot.lane.b32.xlu0 %v1318_v14, %s1687_s28  ;;  %v258_v5 = vld [vmem:[%s2103_s2] sm:$0x1]  ;;  %v261_v14 = vld [vmem:[%s2103_s2 + $0x4] sm:$0x1] }
 0xdc6   :  { %v1198_v6 = vpop.permute.xlu0 %1197 }
 0xdc7   :  { %1200 = vst.msk [vmem:[#allocation2 - $0x6] sm:$0xc0] %vm1191_vm14, %v1198_v6  ;;  %vm735_vm14 = vmand %vm573_vm2, %vm734_vm13  ;;  %vm1353_vm2 = vcmask 523271  }
 0xdce   :  { %v1230_v9 = vld [vmem:[#allocation2] sm:$0x3] }
 0xdcf   :  { %v1231_v10 = vpack.c.bf16 %v1230_v9, %v1230_v9 }
 0xdd1   :  { %1455 = vmatmul.mubr.msk.bf16.vlgmr.msra.gmra.mrb[12].mxu1 %vm113_vm1, %v1231_v10  ;;  %vm1964_vm1 = vmand %vm255_vm15, %vm256_vm0  ;;  %vm1055_vm0 = vsmask.f32 7946 }
 0xe36   :  { %v1321_v60 = vpop.permute.xlu0 %1320  ;;  %v1323_v61 = vpop.permute.xlu1 %1322 }
 0xea4   :  { %v1269_v19 = vpop.f32.mrb[12].mxu1 }
 0xea5   :  { %v1278_v20 = vrot.slane %v1269_v19, 1  ;;  %v1280_v21 = vrot.slane %v1269_v19, 2  ;;  %v1271_v22 = vpop.f32.mrb[13].mxu1 }
 0xea6   :  { %v1273_v23 = vpop.f32.mrb[14].mxu1  ;;  %v1279_v32 = vrot.slane %v1271_v22, 1  ;;  %v1281_v34 = vrot.slane %v1271_v22, 2 }
 0xea7   :  { %v1286_v26 = vadd.f32 %v1278_v20, %v1226_v17  ;;  %v1288_v27 = vadd.f32 %v1280_v21, %v1228_v18  ;;  %v1274_v28 = vpop.f32.mrb[15].mxu1  ;;  %v576_v17 = vld [vmem:[%s2103_s2] sm:$0x2]  ;;  %v579_v18 = vld [vmem:[%s2103_s2 + $0x4] sm:$0x2] }
 0xea8   :  { %v1287_v37 = vadd.f32 %v1279_v32, %v1227_v31  ;;  %v1289_v38 = vadd.f32 %v1281_v34, %v1229_v33  ;;  %v900_v28 = vld [vmem:[%s2103_s2 + $0x4] sm:$0x4] }
 0xea9   :  { %v1456_v29 = vmul.f32 -1.442695, %v1286_v26  ;;  %v1457_v30 = vmul.f32 -1.442695, %v1288_v27  ;;  %v897_v26 = vld [vmem:[%s2103_s2] sm:$0x4] }
 0xeaa   :  { %v1458_v58 = vmul.f32 -1.442695, %v1287_v37  ;;  %v1459_v59 = vmul.f32 -1.442695, %v1289_v38 }
 0xeab   :  { %1661 = vpow2.f32 %v1456_v29 }
 0xeac   :  { %1663 = vpow2.f32 %v1457_v30 }
 0xead   :  { %1665 = vtanh.f32 %v1287_v37 }
 0xeae   :  { %1667 = vtanh.f32 %v1289_v38 }
 0xeb5   :  { %v1662_v39 = vpop.eup %1661 }
 0xeb6   :  { %v1664_v40 = vpop.eup %1663  ;;  %v1296_v41 = vadd.f32 1.0, %v1662_v39  ;;  %v1218_v39 = vld [vmem:[%s2103_s2] sm:$0x8] }
 0xeb7   :  { %v1297_v42 = vadd.f32 1.0, %v1664_v40  ;;  %v1666_v43 = vpop.eup %1665 }
 0xeb8   :  { %1669 = vrcp.f32 %v1296_v41  ;;  %v1668_v44 = vpop.eup %1667  ;;  %v1221_v41 = vld [vmem:[%s2103_s2 + $0x4] sm:$0x8] }
 0xeb9   :  { %1671 = vrcp.f32 %v1297_v42 }
 0xeba   :  { %1673 = vpow2.f32 %v1458_v58 }
 0xebb   :  { %1675 = vpow2.f32 %v1459_v59 }
 0xec2   :  { %v1670_v45 = vpop.eup %1669 }
 0xec3   :  { %v1672_v46 = vpop.eup %1671  ;;  %v1328_v47 = vmul.f32 %v1670_v45, %v1666_v43  ;;  %v1326_v4 = vmul.f32 %v1670_v45, %v1321_v60 }
 0xec4   :  { %v1329_v50 = vmul.f32 %v1672_v46, %v1668_v44  ;;  %v1674_v35 = vpop.eup %1673  ;;  %v1327_v54 = vmul.f32 %v1672_v46, %v1323_v61 }
 0xec5   :  { %1332 = vrot.lane.b32.xlu0 %v1328_v47, %s1687_s28  ;;  %v1676_v36 = vpop.eup %1675  ;;  %v1310_v63 = vadd.f32 1.0, %v1674_v35 }
 0xec6   :  { %1334 = vrot.lane.b32.xlu1 %v1329_v50, %s1687_s28  ;;  %v1311_v1 = vadd.f32 1.0, %v1676_v36 }
 0xec7   :  { %1677 = vrcp.f32 %v1310_v63 }
 0xec8   :  { %1679 = vrcp.f32 %v1311_v1 }
 0xec9   :  { %249 = vrot.lane.b32.xlu0 %v1462_v51, %s1687_s28 }
 0xeca   :  { %251 = vrot.lane.b32.xlu1 %v1463_v0, %s1687_s28 }
 0xecd   :  { %567 = vrot.lane.b32.xlu0 %v1466_v52, %s1687_s28 }
 0xece   :  { %569 = vrot.lane.b32.xlu1 %v1467_v53, %s1687_s28 }
 0xed1   :  { %888 = vrot.lane.b32.xlu0 %v1470_v7, %s1687_s28  ;;  %v1678_v27 = vpop.eup %1677 }
 0xed2   :  { %890 = vrot.lane.b32.xlu1 %v1471_v62, %s1687_s28  ;;  %v1680_v29 = vpop.eup %1679 }
 0xed5   :  { %1209 = vrot.lane.b32.xlu0 %v1474_v24, %s1687_s28 }
 0xed6   :  { %1211 = vrot.lane.b32.xlu1 %v1475_v25, %s1687_s28 }
 0xed9   :  { %407 = vrot.lane.b32.xlu0 %v1464_v48, %s1687_s28 }
 0xeda   :  { %409 = vrot.lane.b32.xlu1 %v1465_v49, %s1687_s28 }
 0xedd   :  { %728 = vrot.lane.b32.xlu0 %v1468_v56, %s1687_s28 }
 0xede   :  { %730 = vrot.lane.b32.xlu1 %v1469_v57, %s1687_s28 }
 0xee1   :  { %1049 = vrot.lane.b32.xlu0 %v1472_v15, %s1687_s28 }
 0xee2   :  { %1051 = vrot.lane.b32.xlu1 %v1473_v12, %s1687_s28 }
 0xf37   :  { %v1333_v2 = vpop.permute.xlu0 %1332 }
 0xf38   :  { %v1335_v55 = vpop.permute.xlu1 %1334  ;;  %v1338_v8 = vadd.f32 %v1333_v2, %v1326_v4 }
 0xf39   :  { %v1339_v3 = vadd.f32 %v1335_v55, %v1327_v54 }
 0xf3a   :  { %1681 = vtanh.f32 %v1338_v8  ;;  %1347 = vrot.lane.b32.xlu0 %v1338_v8, %s1687_s28 }
 0xf3b   :  { %1683 = vtanh.f32 %v1339_v3  ;;  %v1346_v6 = vrot.slane %v1339_v3, 7  ;;  %v250_v9 = vpop.permute.xlu0 %249 }
 0xf3c   :  { %v252_v10 = vpop.permute.xlu1 %251  ;;  %v259_v16 = vsel %vm1964_vm1, %v250_v9, %v258_v5 }
 0xf3d   :  { %v262_v13 = vsel %vm1964_vm1, %v252_v10, %v261_v14  ;;  %260 = vst [vmem:[%s2103_s2] sm:$0x1] %v259_v16  ;;  %1349 = vrot.lane.b32.xlu1 %v1346_v6, %s1687_s28  ;;  %vm1056_vm1 = vmand %vm894_vm5, %vm1055_vm0 }
 0xf3e   :  { %263 = vst [vmem:[%s2103_s2 + $0x4] sm:$0x1] %v262_v13 }
 0xf3f   :  { %v568_v19 = vpop.permute.xlu0 %567 }
 0xf40   :  { %v570_v20 = vpop.permute.xlu1 %569  ;;  %v577_v21 = vsel %vm575_vm4, %v568_v19, %v576_v17 }
 0xf41   :  { %v580_v22 = vsel %vm575_vm4, %v570_v20, %v579_v18  ;;  %578 = vst [vmem:[%s2103_s2] sm:$0x2] %v577_v21  ;;  %vm1383_vm4 = vmand %vm1215_vm8, %vm1382_vm3 }
 0xf42   :  { %581 = vst [vmem:[%s2103_s2 + $0x4] sm:$0x2] %v580_v22 }
 0xf43   :  { %v889_v30 = vpop.permute.xlu0 %888 }
 0xf44   :  { %v1682_v31 = vpop.eup %1681  ;;  %v891_v32 = vpop.permute.xlu1 %890  ;;  %v898_v33 = vsel %vm1997_vm7, %v889_v30, %v897_v26  ;;  %v415_v51 = vld [vmem:[%s2103_s2] sm:$0x1] }
 0xf45   :  { %v1684_v34 = vpop.eup %1683  ;;  %v901_v37 = vsel %vm1997_vm7, %v891_v32, %v900_v28  ;;  %899 = vst [vmem:[%s2103_s2] sm:$0x4] %v898_v33  ;;  %v1342_v40 = vmul.f32 %v1682_v31, %v1678_v27  ;;  %v418_v52 = vld [vmem:[%s2103_s2 + $0x4] sm:$0x1] }
 0xf46   :  { %902 = vst [vmem:[%s2103_s2 + $0x4] sm:$0x4] %v901_v37  ;;  %v1343_v42 = vmul.f32 %v1684_v34, %v1680_v29 }
 0xf47   :  { %v1210_v43 = vpop.permute.xlu0 %1209  ;;  %v1476_v44 = vpack.c.bf16 %v1342_v40, %v1342_v40 }
 0xf48   :  { %v1212_v45 = vpop.permute.xlu1 %1211  ;;  %v1219_v46 = vsel %vm2018_vm10, %v1210_v43, %v1218_v39  ;;  %v1477_v47 = vpack.c.bf16 %v1343_v42, %v1343_v42  ;;  %v1359_v62 = vrot.slane %v1343_v42, 7  ;;  %v736_v25 = vld [vmem:[%s2103_s2] sm:$0x2] }
 0xf49   :  { %v1222_v50 = vsel %vm2018_vm10, %v1212_v45, %v1221_v41  ;;  %1220 = vst [vmem:[%s2103_s2] sm:$0x8] %v1219_v46  ;;  %1376 = vrot.lane.b32.xlu0 %v1476_v44, %s1687_s28  ;;  %v739_v49 = vld [vmem:[%s2103_s2 + $0x4] sm:$0x2] }
 0xf4a   :  { %1223 = vst [vmem:[%s2103_s2 + $0x4] sm:$0x8] %v1222_v50  ;;  %1378 = vrot.lane.b32.xlu1 %v1477_v47, %s1687_s28 }
 0xf4b   :  { %v408_v0 = vpop.permute.xlu0 %407 }
 0xf4c   :  { %v410_v53 = vpop.permute.xlu1 %409  ;;  %v416_v7 = vsel %vm414_vm12, %v408_v0, %v415_v51  ;;  %v1057_v12 = vld [vmem:[%s2103_s2] sm:$0x4] }
 0xf4d   :  { %v419_v24 = vsel %vm414_vm12, %v410_v53, %v418_v52  ;;  %417 = vst [vmem:[%s2103_s2] sm:$0x1] %v416_v7  ;;  %1360 = vrot.lane.b32.xlu0 %v1342_v40, %s1687_s28  ;;  %v1060_v59 = vld [vmem:[%s2103_s2 + $0x4] sm:$0x4] }
 0xf4e   :  { %420 = vst [vmem:[%s2103_s2 + $0x4] sm:$0x1] %v419_v24  ;;  %1362 = vrot.lane.b32.xlu1 %v1359_v62, %s1687_s28 }
 0xf4f   :  { %v729_v48 = vpop.permute.xlu0 %728 }
 0xf50   :  { %v731_v56 = vpop.permute.xlu1 %730  ;;  %v737_v57 = vsel %vm735_vm14, %v729_v48, %v736_v25  ;;  %v1384_v1 = vld [vmem:[%s2103_s2] sm:$0x8] }
 0xf51   :  { %v740_v15 = vsel %vm735_vm14, %v731_v56, %v739_v49  ;;  %738 = vst [vmem:[%s2103_s2] sm:$0x2] %v737_v57  ;;  %v1387_v54 = vld [vmem:[%s2103_s2 + $0x4] sm:$0x8] }
 0xf52   :  { %741 = vst [vmem:[%s2103_s2 + $0x4] sm:$0x2] %v740_v15 }
 0xf53   :  { %v1050_v58 = vpop.permute.xlu0 %1049 }
 0xf54   :  { %v1052_v35 = vpop.permute.xlu1 %1051  ;;  %v1058_v36 = vsel %vm1056_vm1, %v1050_v58, %v1057_v12 }
 0xf55   :  { %v1061_v60 = vsel %vm1056_vm1, %v1052_v35, %v1060_v59  ;;  %1059 = vst [vmem:[%s2103_s2] sm:$0x4] %v1058_v36 }
 0xf56   :  { %1062 = vst [vmem:[%s2103_s2 + $0x4] sm:$0x4] %v1061_v60 }
 0xfac   :  { %v1348_v61 = vpop.permute.xlu0 %1347 }
 0xfad   :  { %1354 = vst.msk [vmem:[#allocation3 - $0x7] sm:$0x80] %vm1353_vm2, %v1348_v61 }
 0xfaf   :  { %v1350_v63 = vpop.permute.xlu1 %1349 }
 0xfb0   :  { %1356 = vst.msk [vmem:[#allocation3 + $0x1] sm:$0x1] %vm255_vm15, %v1350_v63 }
 0xfbb   :  { %v1377_v4 = vpop.permute.xlu0 %1376 }
 0xfbc   :  { %v1379_v2 = vpop.permute.xlu1 %1378  ;;  %v1385_v55 = vsel %vm1383_vm4, %v1377_v4, %v1384_v1 }
 0xfbd   :  { %v1388_v8 = vsel %vm1383_vm4, %v1379_v2, %v1387_v54  ;;  %1386 = vst [vmem:[%s2103_s2] sm:$0x8] %v1385_v55 }
 0xfbe   :  { %1389 = vst [vmem:[%s2103_s2 + $0x4] sm:$0x8] %v1388_v8 }
 0xfbf   :  { %v1361_v3 = vpop.permute.xlu0 %1360 }
 0xfc0   :  { %v1363_v11 = vpop.permute.xlu1 %1362  ;;  %1366 = vst.msk [vmem:[#allocation2 - $0x7] sm:$0x80] %vm1353_vm2, %v1361_v3 }
 0xfc1   :  { %1367 = vst.msk [vmem:[#allocation2 + $0x1] sm:$0x1] %vm255_vm15, %v1363_v11 }

</bundles_post_ra>
